<compile_context>
chip_gen: v7x
topology: tpu7x:2x2x1
jax: 0.10.0
libtpu: 0.0.40
codegen_flags: <defaults>
</compile_context>

<pallas_src>
import functools

import jax
import jax.numpy as jnp
from jax.experimental import pallas as pl
from jax.experimental.pallas import tpu as pltpu

BN_EPS = 1e-5


def _round_up(x, m):
    return (x + m - 1) // m * m


def _fold_bn(ssum, ssq, count, gamma, beta):
    """Fold batch statistics + affine into per-channel (scale, shift) columns."""
    mean = ssum / count                               # (Cout, 1)
    # TODO(synk): switch to a shifted / Welford-style accumulation if N*H*W
    # gets large enough for E[x^2] - mean^2 to cancel catastrophically.
    var = jnp.maximum(ssq / count - mean * mean, 0.0)
    scale = gamma.reshape(-1, 1) * jax.lax.rsqrt(var + BN_EPS)
    shift = beta.reshape(-1, 1) - mean * scale
    return scale, shift                               # (Cout, 1) each


# ---------------------------------------------------------------------------
# resLevel forward
# ---------------------------------------------------------------------------
@functools.partial(jax.jit, static_argnames=("fsize",))
def res_level_forward(x_nchw, params, fsize):
    N, C, H, W = x_nchw.shape
    K = fsize
    assert K % 2 == 1, "resLevel assumes an odd Fsize (SAME padding)"
    P = (K - 1) // 2
    C1 = C + 3

    Hp, Wp = H + 2 * P, W + 2 * P          # zero-padded spatial extent
    Lraw = Hp * Wp                         # flattened padded image length
    L = _round_up(Lraw, 128)               # lane-dense slab length
    # TODO(synk): row-tile the image (grid over H tiles + halo) once
    # L * max(C, C1) * 4B stops being a comfortably small VMEM footprint.

    f32 = jnp.float32
    x = x_nchw.astype(f32)

    # ---- lane-dense flattened slabs: (N, C, L), zero outside the image ----
    x_pad = jnp.pad(x, ((0, 0), (0, 0), (P, P), (P, P)))
    x_flat = jnp.pad(x_pad.reshape(N, C, Lraw),
                     ((0, 0), (0, 0), (0, L - Lraw)))

    # ---- interior-pixel mask (shared across the batch): (1, L) ------------
    ph = jnp.arange(Hp).reshape(Hp, 1)
    pw = jnp.arange(Wp).reshape(1, Wp)
    interior = (ph >= P) & (ph < P + H) & (pw >= P) & (pw < P + W)
    mask = jnp.pad(interior.astype(f32).reshape(1, Lraw),
                   ((0, 0), (0, L - Lraw)))

    # ---- weights as (K*K, Cin, Cout, 1): a [tap, ci] slice is a (Cout, 1)
    # column that broadcasts over lanes.  Conv biases b1/b2 are intentionally
    # dropped: they cancel exactly under BatchNorm's batch-mean subtraction.
    w1 = jnp.transpose(params["w1"].astype(f32), (2, 3, 1, 0)).reshape(
        K * K, C, C1, 1)
    w2 = jnp.transpose(params["w2"].astype(f32), (2, 3, 1, 0)).reshape(
        K * K, C1, C, 1)

    # ------------------------------------------------------------------ #
    # In-kernel helpers (closures over the static geometry).
    # ------------------------------------------------------------------ #
    def conv_vpu(xin, w_ref, cin, cout):
        """KxK SAME conv on the flattened zero-padded image, all on the VPU.

        xin: (cin, L), zero at padding positions.  Result is valid at interior
        positions only (junk at the padding ring; callers mask it out).
        """
        acc = jnp.zeros((cout, L), jnp.float32)
        for kh in range(K):
            for kw in range(K):
                d = (kh - P) * Wp + (kw - P)          # flat tap offset
                tap = kh * K + kw
                # rolled[:, p] == xin[:, p + d] for every interior p
                # (interior p + d always stays inside [0, Lraw)).
                xr = xin if d == 0 else pltpu.roll(xin, shift=(-d) % L, axis=1)
                for ci in range(cin):
                    acc = acc + w_ref[tap, ci, :, :] * xr[ci:ci + 1, :]
        return acc

    def fused_y2(xin, m, w1_ref, w2_ref, sc1, sh1):
        """conv1 -> folded BN1 + ReLU -> masked X1 (VMEM only) -> conv2."""
        y1 = conv_vpu(xin, w1_ref, C, C1)                      # (C1, L)
        x1 = jnp.maximum(y1 * sc1 + sh1, 0.0) * m              # zero off-image
        return conv_vpu(x1, w2_ref, C1, C)                     # (C, L)

    # ------------------------------------------------------------------ #
    # Kernels
    # ------------------------------------------------------------------ #
    def stats1_kernel(x_ref, m_ref, w1_ref, s_ref, q_ref):
        xin = x_ref[0]                                         # (C, L)
        m = m_ref[...]                                         # (1, L)
        y1 = conv_vpu(xin, w1_ref, C, C1)
        ym = y1 * m
        s_ref[0] = jnp.sum(ym, axis=1, keepdims=True)
        q_ref[0] = jnp.sum(ym * y1, axis=1, keepdims=True)

    def stats2_kernel(x_ref, m_ref, w1_ref, w2_ref, sc1_ref, sh1_ref,
                      s_ref, q_ref):
        xin = x_ref[0]
        m = m_ref[...]
        y2 = fused_y2(xin, m, w1_ref, w2_ref, sc1_ref[...], sh1_ref[...])
        ym = y2 * m
        s_ref[0] = jnp.sum(ym, axis=1, keepdims=True)
        q_ref[0] = jnp.sum(ym * y2, axis=1, keepdims=True)

    def final_kernel(x_ref, m_ref, w1_ref, w2_ref, sc1_ref, sh1_ref,
                     sc2_ref, sh2_ref, o_ref):
        xin = x_ref[0]
        m = m_ref[...]
        y2 = fused_y2(xin, m, w1_ref, w2_ref, sc1_ref[...], sh1_ref[...])
        y2 = jnp.maximum(y2 * sc2_ref[...] + sh2_ref[...], 0.0)
        o_ref[0] = y2 * m + xin          # + residual; zero outside the image

    # ------------------------------------------------------------------ #
    # pallas_call plumbing
    # ------------------------------------------------------------------ #
    grid = (N,)
    x_spec = pl.BlockSpec((1, C, L), lambda n: (n, 0, 0))
    m_spec = pl.BlockSpec((1, L), lambda n: (0, 0))
    w1_spec = pl.BlockSpec((K * K, C, C1, 1), lambda n: (0, 0, 0, 0))
    w2_spec = pl.BlockSpec((K * K, C1, C, 1), lambda n: (0, 0, 0, 0))
    v1_spec = pl.BlockSpec((C1, 1), lambda n: (0, 0))
    v2_spec = pl.BlockSpec((C, 1), lambda n: (0, 0))
    s1_spec = pl.BlockSpec((1, C1, 1), lambda n: (n, 0, 0))
    s2_spec = pl.BlockSpec((1, C, 1), lambda n: (n, 0, 0))
    out_spec = pl.BlockSpec((1, C, L), lambda n: (n, 0, 0))

    cparams = pltpu.CompilerParams(dimension_semantics=("parallel",))
    count = jnp.float32(N * H * W)

    # ---- pass A: BN1 batch statistics -------------------------------------
    s1, q1 = pl.pallas_call(
        stats1_kernel,
        grid=grid,
        in_specs=[x_spec, m_spec, w1_spec],
        out_specs=(s1_spec, s1_spec),
        out_shape=(jax.ShapeDtypeStruct((N, C1, 1), f32),
                   jax.ShapeDtypeStruct((N, C1, 1), f32)),
        compiler_params=cparams,
    )(x_flat, mask, w1)
    scale1, shift1 = _fold_bn(jnp.sum(s1, axis=0), jnp.sum(q1, axis=0), count,
                              params["g1"].astype(f32),
                              params["be1"].astype(f32))

    # ---- pass B: BN2 batch statistics (X1 recomputed, stays in VMEM) ------
    s2, q2 = pl.pallas_call(
        stats2_kernel,
        grid=grid,
        in_specs=[x_spec, m_spec, w1_spec, w2_spec, v1_spec, v1_spec],
        out_specs=(s2_spec, s2_spec),
        out_shape=(jax.ShapeDtypeStruct((N, C, 1), f32),
                   jax.ShapeDtypeStruct((N, C, 1), f32)),
        compiler_params=cparams,
    )(x_flat, mask, w1, w2, scale1, shift1)
    scale2, shift2 = _fold_bn(jnp.sum(s2, axis=0), jnp.sum(q2, axis=0), count,
                              params["g2"].astype(f32),
                              params["be2"].astype(f32))

    # ---- pass C: fused conv1+BN1+ReLU+conv2+BN2+ReLU+residual --------------
    out_flat = pl.pallas_call(
        final_kernel,
        grid=grid,
        in_specs=[x_spec, m_spec, w1_spec, w2_spec, v1_spec, v1_spec,
                  v2_spec, v2_spec],
        out_specs=out_spec,
        out_shape=jax.ShapeDtypeStruct((N, C, L), f32),
        compiler_params=cparams,
    )(x_flat, mask, w1, w2, scale1, shift1, scale2, shift2)

    # un-flatten: drop lane padding + the zero ring -> NCHW
    out = out_flat[:, :, :Lraw].reshape(N, C, Hp, Wp)[:, :, P:P + H, P:P + W]
    return out


# ---------------------------------------------------------------------------
# Pure-JAX reference (includes the conv biases, which the kernel drops because
# they cancel exactly under batch normalization).
# ---------------------------------------------------------------------------
def res_level_reference(x, params):
    def block(h, w, b, g, be):
        y = jax.lax.conv_general_dilated(
            h, w, window_strides=(1, 1), padding="SAME",
            dimension_numbers=("NCHW", "OIHW", "NCHW"))
        y = y + b[None, :, None, None]
        mean = jnp.mean(y, axis=(0, 2, 3), keepdims=True)
        var = jnp.mean(jnp.square(y - mean), axis=(0, 2, 3), keepdims=True)
        y = (y - mean) * jax.lax.rsqrt(var + BN_EPS)
        y = g[None, :, None, None] * y + be[None, :, None, None]
        return jnp.maximum(y, 0.0)

    x1 = block(x, params["w1"], params["b1"], params["g1"], params["be1"])
    x2 = block(x1, params["w2"], params["b2"], params["g2"], params["be2"])
    return x + x2


# ---------------------------------------------------------------------------
if __name__ == "__main__":
    N, C, H, W = 2, 4, 16, 16
    FSIZE = 3
    C1 = C + 3

    key = jax.random.PRNGKey(0)
    k_x, k_w1, k_b1, k_w2, k_b2 = jax.random.split(key, 5)

    x = jax.random.normal(k_x, (N, C, H, W), dtype=jnp.float32)

    params = {
        # Conv2d(C -> C+3, K, pad=(K-1)//2)
        "w1": 0.1 * jax.random.normal(k_w1, (C1, C, FSIZE, FSIZE), jnp.float32),
        "b1": 0.1 * jax.random.normal(k_b1, (C1,), jnp.float32),
        # MyBN(C+3): BatchNorm2d affine defaults (weight=1, bias=0)
        "g1": jnp.ones((C1,), jnp.float32),
        "be1": jnp.zeros((C1,), jnp.float32),
        # Conv2d(C+3 -> C, K, pad=(K-1)//2)
        "w2": 0.1 * jax.random.normal(k_w2, (C, C1, FSIZE, FSIZE), jnp.float32),
        "b2": 0.1 * jax.random.normal(k_b2, (C,), jnp.float32),
        # MyBN(C)
        "g2": jnp.ones((C,), jnp.float32),
        "be2": jnp.zeros((C,), jnp.float32),
    }

    out = jax.block_until_ready(res_level_forward(x, params, FSIZE))
    ref = jax.block_until_ready(res_level_reference(x, params))

    assert out.shape == (N, C, H, W), out.shape
    err = float(jnp.max(jnp.abs(out - ref)))
    assert err < 5e-4, err

    print("KERNEL_OK")
</pallas_src>

<mosaic_0001>
module attributes {stable_mosaic.version = 11 : i64} {
  func.func @stats1_kernel(%arg0: i32, %arg1: memref<1x4x384xf32, #tpu.memory_space<vmem>>, %arg2: memref<1x384xf32, #tpu.memory_space<vmem>>, %arg3: memref<9x4x7x1xf32, #tpu.memory_space<vmem>>, %arg4: memref<1x7x1xf32, #tpu.memory_space<vmem>>, %arg5: memref<1x7x1xf32, #tpu.memory_space<vmem>>) attributes {dimension_semantics = [#tpu.dimension_semantics<parallel>], iteration_bounds = array<i64: 2>, scalar_prefetch = 0 : i64, scratch_operands = 0 : i64, tpu.core_type = #tpu.core_type<tc>, window_params = [{transform_indices = @transform_0, window_bounds = array<i64: 1, 4, 384>}, {pipeline_mode = #tpu.pipeline_mode<synchronous>, transform_indices = @transform_1, window_bounds = array<i64: 1, 384>}, {pipeline_mode = #tpu.pipeline_mode<synchronous>, transform_indices = @transform_2, window_bounds = array<i64: 9, 4, 7, 1>}, {transform_indices = @transform_3, window_bounds = array<i64: 1, 7, 1>}, {transform_indices = @transform_4, window_bounds = array<i64: 1, 7, 1>}]} {
    %c0 = arith.constant 0 : index
    %c0_0 = arith.constant 0 : index
    %c0_1 = arith.constant 0 : index
    %0 = vector.load %arg1[%c0, %c0_0, %c0_1] : memref<1x4x384xf32, #tpu.memory_space<vmem>>, vector<1x4x384xf32>
    %1 = vector.shape_cast %0 : vector<1x4x384xf32> to vector<4x384xf32>
    %c0_2 = arith.constant 0 : index
    %c0_3 = arith.constant 0 : index
    %2 = vector.load %arg2[%c0_2, %c0_3] : memref<1x384xf32, #tpu.memory_space<vmem>>, vector<1x384xf32>
    %cst = arith.constant 0.000000e+00 : f32
    %3 = vector.broadcast %cst : f32 to vector<7x384xf32>
    %c19_i32 = arith.constant 19 : i32
    %4 = tpu.dynamic_rotate %1 by %c19_i32 dim 1 : vector<4x384xf32>, i32 -> vector<4x384xf32>
    %c0_4 = arith.constant 0 : index
    %c0_5 = arith.constant 0 : index
    %c0_6 = arith.constant 0 : index
    %c0_7 = arith.constant 0 : index
    %5 = vector.load %arg3[%c0_4, %c0_5, %c0_6, %c0_7] : memref<9x4x7x1xf32, #tpu.memory_space<vmem>>, vector<1x1x7x1xf32>
    %6 = vector.shape_cast %5 : vector<1x1x7x1xf32> to vector<7x1xf32>
    %7 = vector.extract_strided_slice %4 {offsets = [0, 0], sizes = [1, 384], strides = [1, 1]} : vector<4x384xf32> to vector<1x384xf32>
    %8 = vector.broadcast %6 : vector<7x1xf32> to vector<7x384xf32>
    %9 = vector.broadcast %7 : vector<1x384xf32> to vector<7x384xf32>
    %10 = arith.mulf %8, %9 : vector<7x384xf32>
    %11 = arith.addf %3, %10 : vector<7x384xf32>
    %c0_8 = arith.constant 0 : index
    %c1 = arith.constant 1 : index
    %c0_9 = arith.constant 0 : index
    %c0_10 = arith.constant 0 : index
    %12 = vector.load %arg3[%c0_8, %c1, %c0_9, %c0_10] : memref<9x4x7x1xf32, #tpu.memory_space<vmem>>, vector<1x1x7x1xf32>
    %13 = vector.shape_cast %12 : vector<1x1x7x1xf32> to vector<7x1xf32>
    %14 = vector.extract_strided_slice %4 {offsets = [1, 0], sizes = [1, 384], strides = [1, 1]} : vector<4x384xf32> to vector<1x384xf32>
    %15 = vector.broadcast %13 : vector<7x1xf32> to vector<7x384xf32>
    %16 = vector.broadcast %14 : vector<1x384xf32> to vector<7x384xf32>
    %17 = arith.mulf %15, %16 : vector<7x384xf32>
    %18 = arith.addf %11, %17 : vector<7x384xf32>
    %c0_11 = arith.constant 0 : index
    %c2 = arith.constant 2 : index
    %c0_12 = arith.constant 0 : index
    %c0_13 = arith.constant 0 : index
    %19 = vector.load %arg3[%c0_11, %c2, %c0_12, %c0_13] : memref<9x4x7x1xf32, #tpu.memory_space<vmem>>, vector<1x1x7x1xf32>
    %20 = vector.shape_cast %19 : vector<1x1x7x1xf32> to vector<7x1xf32>
    %21 = vector.extract_strided_slice %4 {offsets = [2, 0], sizes = [1, 384], strides = [1, 1]} : vector<4x384xf32> to vector<1x384xf32>
    %22 = vector.broadcast %20 : vector<7x1xf32> to vector<7x384xf32>
    %23 = vector.broadcast %21 : vector<1x384xf32> to vector<7x384xf32>
    %24 = arith.mulf %22, %23 : vector<7x384xf32>
    %25 = arith.addf %18, %24 : vector<7x384xf32>
    %c0_14 = arith.constant 0 : index
    %c3 = arith.constant 3 : index
    %c0_15 = arith.constant 0 : index
    %c0_16 = arith.constant 0 : index
    %26 = vector.load %arg3[%c0_14, %c3, %c0_15, %c0_16] : memref<9x4x7x1xf32, #tpu.memory_space<vmem>>, vector<1x1x7x1xf32>
    %27 = vector.shape_cast %26 : vector<1x1x7x1xf32> to vector<7x1xf32>
    %28 = vector.extract_strided_slice %4 {offsets = [3, 0], sizes = [1, 384], strides = [1, 1]} : vector<4x384xf32> to vector<1x384xf32>
    %29 = vector.broadcast %27 : vector<7x1xf32> to vector<7x384xf32>
    %30 = vector.broadcast %28 : vector<1x384xf32> to vector<7x384xf32>
    %31 = arith.mulf %29, %30 : vector<7x384xf32>
    %32 = arith.addf %25, %31 : vector<7x384xf32>
    %c18_i32 = arith.constant 18 : i32
    %33 = tpu.dynamic_rotate %1 by %c18_i32 dim 1 : vector<4x384xf32>, i32 -> vector<4x384xf32>
    %c1_17 = arith.constant 1 : index
    %c0_18 = arith.constant 0 : index
    %c0_19 = arith.constant 0 : index
    %c0_20 = arith.constant 0 : index
    %34 = vector.load %arg3[%c1_17, %c0_18, %c0_19, %c0_20] : memref<9x4x7x1xf32, #tpu.memory_space<vmem>>, vector<1x1x7x1xf32>
    %35 = vector.shape_cast %34 : vector<1x1x7x1xf32> to vector<7x1xf32>
    %36 = vector.extract_strided_slice %33 {offsets = [0, 0], sizes = [1, 384], strides = [1, 1]} : vector<4x384xf32> to vector<1x384xf32>
    %37 = vector.broadcast %35 : vector<7x1xf32> to vector<7x384xf32>
    %38 = vector.broadcast %36 : vector<1x384xf32> to vector<7x384xf32>
    %39 = arith.mulf %37, %38 : vector<7x384xf32>
    %40 = arith.addf %32, %39 : vector<7x384xf32>
    %c1_21 = arith.constant 1 : index
    %c1_22 = arith.constant 1 : index
    %c0_23 = arith.constant 0 : index
    %c0_24 = arith.constant 0 : index
    %41 = vector.load %arg3[%c1_21, %c1_22, %c0_23, %c0_24] : memref<9x4x7x1xf32, #tpu.memory_space<vmem>>, vector<1x1x7x1xf32>
    %42 = vector.shape_cast %41 : vector<1x1x7x1xf32> to vector<7x1xf32>
    %43 = vector.extract_strided_slice %33 {offsets = [1, 0], sizes = [1, 384], strides = [1, 1]} : vector<4x384xf32> to vector<1x384xf32>
    %44 = vector.broadcast %42 : vector<7x1xf32> to vector<7x384xf32>
    %45 = vector.broadcast %43 : vector<1x384xf32> to vector<7x384xf32>
    %46 = arith.mulf %44, %45 : vector<7x384xf32>
    %47 = arith.addf %40, %46 : vector<7x384xf32>
    %c1_25 = arith.constant 1 : index
    %c2_26 = arith.constant 2 : index
    %c0_27 = arith.constant 0 : index
    %c0_28 = arith.constant 0 : index
    %48 = vector.load %arg3[%c1_25, %c2_26, %c0_27, %c0_28] : memref<9x4x7x1xf32, #tpu.memory_space<vmem>>, vector<1x1x7x1xf32>
    %49 = vector.shape_cast %48 : vector<1x1x7x1xf32> to vector<7x1xf32>
    %50 = vector.extract_strided_slice %33 {offsets = [2, 0], sizes = [1, 384], strides = [1, 1]} : vector<4x384xf32> to vector<1x384xf32>
    %51 = vector.broadcast %49 : vector<7x1xf32> to vector<7x384xf32>
    %52 = vector.broadcast %50 : vector<1x384xf32> to vector<7x384xf32>
    %53 = arith.mulf %51, %52 : vector<7x384xf32>
    %54 = arith.addf %47, %53 : vector<7x384xf32>
    %c1_29 = arith.constant 1 : index
    %c3_30 = arith.constant 3 : index
    %c0_31 = arith.constant 0 : index
    %c0_32 = arith.constant 0 : index
    %55 = vector.load %arg3[%c1_29, %c3_30, %c0_31, %c0_32] : memref<9x4x7x1xf32, #tpu.memory_space<vmem>>, vector<1x1x7x1xf32>
    %56 = vector.shape_cast %55 : vector<1x1x7x1xf32> to vector<7x1xf32>
    %57 = vector.extract_strided_slice %33 {offsets = [3, 0], sizes = [1, 384], strides = [1, 1]} : vector<4x384xf32> to vector<1x384xf32>
    %58 = vector.broadcast %56 : vector<7x1xf32> to vector<7x384xf32>
    %59 = vector.broadcast %57 : vector<1x384xf32> to vector<7x384xf32>
    %60 = arith.mulf %58, %59 : vector<7x384xf32>
    %61 = arith.addf %54, %60 : vector<7x384xf32>
    %c17_i32 = arith.constant 17 : i32
    %62 = tpu.dynamic_rotate %1 by %c17_i32 dim 1 : vector<4x384xf32>, i32 -> vector<4x384xf32>
    %c2_33 = arith.constant 2 : index
    %c0_34 = arith.constant 0 : index
    %c0_35 = arith.constant 0 : index
    %c0_36 = arith.constant 0 : index
    %63 = vector.load %arg3[%c2_33, %c0_34, %c0_35, %c0_36] : memref<9x4x7x1xf32, #tpu.memory_space<vmem>>, vector<1x1x7x1xf32>
    %64 = vector.shape_cast %63 : vector<1x1x7x1xf32> to vector<7x1xf32>
    %65 = vector.extract_strided_slice %62 {offsets = [0, 0], sizes = [1, 384], strides = [1, 1]} : vector<4x384xf32> to vector<1x384xf32>
    %66 = vector.broadcast %64 : vector<7x1xf32> to vector<7x384xf32>
    %67 = vector.broadcast %65 : vector<1x384xf32> to vector<7x384xf32>
    %68 = arith.mulf %66, %67 : vector<7x384xf32>
    %69 = arith.addf %61, %68 : vector<7x384xf32>
    %c2_37 = arith.constant 2 : index
    %c1_38 = arith.constant 1 : index
    %c0_39 = arith.constant 0 : index
    %c0_40 = arith.constant 0 : index
    %70 = vector.load %arg3[%c2_37, %c1_38, %c0_39, %c0_40] : memref<9x4x7x1xf32, #tpu.memory_space<vmem>>, vector<1x1x7x1xf32>
    %71 = vector.shape_cast %70 : vector<1x1x7x1xf32> to vector<7x1xf32>
    %72 = vector.extract_strided_slice %62 {offsets = [1, 0], sizes = [1, 384], strides = [1, 1]} : vector<4x384xf32> to vector<1x384xf32>
    %73 = vector.broadcast %71 : vector<7x1xf32> to vector<7x384xf32>
    %74 = vector.broadcast %72 : vector<1x384xf32> to vector<7x384xf32>
    %75 = arith.mulf %73, %74 : vector<7x384xf32>
    %76 = arith.addf %69, %75 : vector<7x384xf32>
    %c2_41 = arith.constant 2 : index
    %c2_42 = arith.constant 2 : index
    %c0_43 = arith.constant 0 : index
    %c0_44 = arith.constant 0 : index
    %77 = vector.load %arg3[%c2_41, %c2_42, %c0_43, %c0_44] : memref<9x4x7x1xf32, #tpu.memory_space<vmem>>, vector<1x1x7x1xf32>
    %78 = vector.shape_cast %77 : vector<1x1x7x1xf32> to vector<7x1xf32>
    %79 = vector.extract_strided_slice %62 {offsets = [2, 0], sizes = [1, 384], strides = [1, 1]} : vector<4x384xf32> to vector<1x384xf32>
    %80 = vector.broadcast %78 : vector<7x1xf32> to vector<7x384xf32>
    %81 = vector.broadcast %79 : vector<1x384xf32> to vector<7x384xf32>
    %82 = arith.mulf %80, %81 : vector<7x384xf32>
    %83 = arith.addf %76, %82 : vector<7x384xf32>
    %c2_45 = arith.constant 2 : index
    %c3_46 = arith.constant 3 : index
    %c0_47 = arith.constant 0 : index
    %c0_48 = arith.constant 0 : index
    %84 = vector.load %arg3[%c2_45, %c3_46, %c0_47, %c0_48] : memref<9x4x7x1xf32, #tpu.memory_space<vmem>>, vector<1x1x7x1xf32>
    %85 = vector.shape_cast %84 : vector<1x1x7x1xf32> to vector<7x1xf32>
    %86 = vector.extract_strided_slice %62 {offsets = [3, 0], sizes = [1, 384], strides = [1, 1]} : vector<4x384xf32> to vector<1x384xf32>
    %87 = vector.broadcast %85 : vector<7x1xf32> to vector<7x384xf32>
    %88 = vector.broadcast %86 : vector<1x384xf32> to vector<7x384xf32>
    %89 = arith.mulf %87, %88 : vector<7x384xf32>
    %90 = arith.addf %83, %89 : vector<7x384xf32>
    %c1_i32 = arith.constant 1 : i32
    %91 = tpu.dynamic_rotate %1 by %c1_i32 dim 1 : vector<4x384xf32>, i32 -> vector<4x384xf32>
    %c3_49 = arith.constant 3 : index
    %c0_50 = arith.constant 0 : index
    %c0_51 = arith.constant 0 : index
    %c0_52 = arith.constant 0 : index
    %92 = vector.load %arg3[%c3_49, %c0_50, %c0_51, %c0_52] : memref<9x4x7x1xf32, #tpu.memory_space<vmem>>, vector<1x1x7x1xf32>
    %93 = vector.shape_cast %92 : vector<1x1x7x1xf32> to vector<7x1xf32>
    %94 = vector.extract_strided_slice %91 {offsets = [0, 0], sizes = [1, 384], strides = [1, 1]} : vector<4x384xf32> to vector<1x384xf32>
    %95 = vector.broadcast %93 : vector<7x1xf32> to vector<7x384xf32>
    %96 = vector.broadcast %94 : vector<1x384xf32> to vector<7x384xf32>
    %97 = arith.mulf %95, %96 : vector<7x384xf32>
    %98 = arith.addf %90, %97 : vector<7x384xf32>
    %c3_53 = arith.constant 3 : index
    %c1_54 = arith.constant 1 : index
    %c0_55 = arith.constant 0 : index
    %c0_56 = arith.constant 0 : index
    %99 = vector.load %arg3[%c3_53, %c1_54, %c0_55, %c0_56] : memref<9x4x7x1xf32, #tpu.memory_space<vmem>>, vector<1x1x7x1xf32>
    %100 = vector.shape_cast %99 : vector<1x1x7x1xf32> to vector<7x1xf32>
    %101 = vector.extract_strided_slice %91 {offsets = [1, 0], sizes = [1, 384], strides = [1, 1]} : vector<4x384xf32> to vector<1x384xf32>
    %102 = vector.broadcast %100 : vector<7x1xf32> to vector<7x384xf32>
    %103 = vector.broadcast %101 : vector<1x384xf32> to vector<7x384xf32>
    %104 = arith.mulf %102, %103 : vector<7x384xf32>
    %105 = arith.addf %98, %104 : vector<7x384xf32>
    %c3_57 = arith.constant 3 : index
    %c2_58 = arith.constant 2 : index
    %c0_59 = arith.constant 0 : index
    %c0_60 = arith.constant 0 : index
    %106 = vector.load %arg3[%c3_57, %c2_58, %c0_59, %c0_60] : memref<9x4x7x1xf32, #tpu.memory_space<vmem>>, vector<1x1x7x1xf32>
    %107 = vector.shape_cast %106 : vector<1x1x7x1xf32> to vector<7x1xf32>
    %108 = vector.extract_strided_slice %91 {offsets = [2, 0], sizes = [1, 384], strides = [1, 1]} : vector<4x384xf32> to vector<1x384xf32>
    %109 = vector.broadcast %107 : vector<7x1xf32> to vector<7x384xf32>
    %110 = vector.broadcast %108 : vector<1x384xf32> to vector<7x384xf32>
    %111 = arith.mulf %109, %110 : vector<7x384xf32>
    %112 = arith.addf %105, %111 : vector<7x384xf32>
    %c3_61 = arith.constant 3 : index
    %c3_62 = arith.constant 3 : index
    %c0_63 = arith.constant 0 : index
    %c0_64 = arith.constant 0 : index
    %113 = vector.load %arg3[%c3_61, %c3_62, %c0_63, %c0_64] : memref<9x4x7x1xf32, #tpu.memory_space<vmem>>, vector<1x1x7x1xf32>
    %114 = vector.shape_cast %113 : vector<1x1x7x1xf32> to vector<7x1xf32>
    %115 = vector.extract_strided_slice %91 {offsets = [3, 0], sizes = [1, 384], strides = [1, 1]} : vector<4x384xf32> to vector<1x384xf32>
    %116 = vector.broadcast %114 : vector<7x1xf32> to vector<7x384xf32>
    %117 = vector.broadcast %115 : vector<1x384xf32> to vector<7x384xf32>
    %118 = arith.mulf %116, %117 : vector<7x384xf32>
    %119 = arith.addf %112, %118 : vector<7x384xf32>
    %c4 = arith.constant 4 : index
    %c0_65 = arith.constant 0 : index
    %c0_66 = arith.constant 0 : index
    %c0_67 = arith.constant 0 : index
    %120 = vector.load %arg3[%c4, %c0_65, %c0_66, %c0_67] : memref<9x4x7x1xf32, #tpu.memory_space<vmem>>, vector<1x1x7x1xf32>
    %121 = vector.shape_cast %120 : vector<1x1x7x1xf32> to vector<7x1xf32>
    %122 = vector.extract_strided_slice %1 {offsets = [0, 0], sizes = [1, 384], strides = [1, 1]} : vector<4x384xf32> to vector<1x384xf32>
    %123 = vector.broadcast %121 : vector<7x1xf32> to vector<7x384xf32>
    %124 = vector.broadcast %122 : vector<1x384xf32> to vector<7x384xf32>
    %125 = arith.mulf %123, %124 : vector<7x384xf32>
    %126 = arith.addf %119, %125 : vector<7x384xf32>
    %c4_68 = arith.constant 4 : index
    %c1_69 = arith.constant 1 : index
    %c0_70 = arith.constant 0 : index
    %c0_71 = arith.constant 0 : index
    %127 = vector.load %arg3[%c4_68, %c1_69, %c0_70, %c0_71] : memref<9x4x7x1xf32, #tpu.memory_space<vmem>>, vector<1x1x7x1xf32>
    %128 = vector.shape_cast %127 : vector<1x1x7x1xf32> to vector<7x1xf32>
    %129 = vector.extract_strided_slice %1 {offsets = [1, 0], sizes = [1, 384], strides = [1, 1]} : vector<4x384xf32> to vector<1x384xf32>
    %130 = vector.broadcast %128 : vector<7x1xf32> to vector<7x384xf32>
    %131 = vector.broadcast %129 : vector<1x384xf32> to vector<7x384xf32>
    %132 = arith.mulf %130, %131 : vector<7x384xf32>
    %133 = arith.addf %126, %132 : vector<7x384xf32>
    %c4_72 = arith.constant 4 : index
    %c2_73 = arith.constant 2 : index
    %c0_74 = arith.constant 0 : index
    %c0_75 = arith.constant 0 : index
    %134 = vector.load %arg3[%c4_72, %c2_73, %c0_74, %c0_75] : memref<9x4x7x1xf32, #tpu.memory_space<vmem>>, vector<1x1x7x1xf32>
    %135 = vector.shape_cast %134 : vector<1x1x7x1xf32> to vector<7x1xf32>
    %136 = vector.extract_strided_slice %1 {offsets = [2, 0], sizes = [1, 384], strides = [1, 1]} : vector<4x384xf32> to vector<1x384xf32>
    %137 = vector.broadcast %135 : vector<7x1xf32> to vector<7x384xf32>
    %138 = vector.broadcast %136 : vector<1x384xf32> to vector<7x384xf32>
    %139 = arith.mulf %137, %138 : vector<7x384xf32>
    %140 = arith.addf %133, %139 : vector<7x384xf32>
    %c4_76 = arith.constant 4 : index
    %c3_77 = arith.constant 3 : index
    %c0_78 = arith.constant 0 : index
    %c0_79 = arith.constant 0 : index
    %141 = vector.load %arg3[%c4_76, %c3_77, %c0_78, %c0_79] : memref<9x4x7x1xf32, #tpu.memory_space<vmem>>, vector<1x1x7x1xf32>
    %142 = vector.shape_cast %141 : vector<1x1x7x1xf32> to vector<7x1xf32>
    %143 = vector.extract_strided_slice %1 {offsets = [3, 0], sizes = [1, 384], strides = [1, 1]} : vector<4x384xf32> to vector<1x384xf32>
    %144 = vector.broadcast %142 : vector<7x1xf32> to vector<7x384xf32>
    %145 = vector.broadcast %143 : vector<1x384xf32> to vector<7x384xf32>
    %146 = arith.mulf %144, %145 : vector<7x384xf32>
    %147 = arith.addf %140, %146 : vector<7x384xf32>
    %c383_i32 = arith.constant 383 : i32
    %148 = tpu.dynamic_rotate %1 by %c383_i32 dim 1 : vector<4x384xf32>, i32 -> vector<4x384xf32>
    %c5 = arith.constant 5 : index
    %c0_80 = arith.constant 0 : index
    %c0_81 = arith.constant 0 : index
    %c0_82 = arith.constant 0 : index
    %149 = vector.load %arg3[%c5, %c0_80, %c0_81, %c0_82] : memref<9x4x7x1xf32, #tpu.memory_space<vmem>>, vector<1x1x7x1xf32>
    %150 = vector.shape_cast %149 : vector<1x1x7x1xf32> to vector<7x1xf32>
    %151 = vector.extract_strided_slice %148 {offsets = [0, 0], sizes = [1, 384], strides = [1, 1]} : vector<4x384xf32> to vector<1x384xf32>
    %152 = vector.broadcast %150 : vector<7x1xf32> to vector<7x384xf32>
    %153 = vector.broadcast %151 : vector<1x384xf32> to vector<7x384xf32>
    %154 = arith.mulf %152, %153 : vector<7x384xf32>
    %155 = arith.addf %147, %154 : vector<7x384xf32>
    %c5_83 = arith.constant 5 : index
    %c1_84 = arith.constant 1 : index
    %c0_85 = arith.constant 0 : index
    %c0_86 = arith.constant 0 : index
    %156 = vector.load %arg3[%c5_83, %c1_84, %c0_85, %c0_86] : memref<9x4x7x1xf32, #tpu.memory_space<vmem>>, vector<1x1x7x1xf32>
    %157 = vector.shape_cast %156 : vector<1x1x7x1xf32> to vector<7x1xf32>
    %158 = vector.extract_strided_slice %148 {offsets = [1, 0], sizes = [1, 384], strides = [1, 1]} : vector<4x384xf32> to vector<1x384xf32>
    %159 = vector.broadcast %157 : vector<7x1xf32> to vector<7x384xf32>
    %160 = vector.broadcast %158 : vector<1x384xf32> to vector<7x384xf32>
    %161 = arith.mulf %159, %160 : vector<7x384xf32>
    %162 = arith.addf %155, %161 : vector<7x384xf32>
    %c5_87 = arith.constant 5 : index
    %c2_88 = arith.constant 2 : index
    %c0_89 = arith.constant 0 : index
    %c0_90 = arith.constant 0 : index
    %163 = vector.load %arg3[%c5_87, %c2_88, %c0_89, %c0_90] : memref<9x4x7x1xf32, #tpu.memory_space<vmem>>, vector<1x1x7x1xf32>
    %164 = vector.shape_cast %163 : vector<1x1x7x1xf32> to vector<7x1xf32>
    %165 = vector.extract_strided_slice %148 {offsets = [2, 0], sizes = [1, 384], strides = [1, 1]} : vector<4x384xf32> to vector<1x384xf32>
    %166 = vector.broadcast %164 : vector<7x1xf32> to vector<7x384xf32>
    %167 = vector.broadcast %165 : vector<1x384xf32> to vector<7x384xf32>
    %168 = arith.mulf %166, %167 : vector<7x384xf32>
    %169 = arith.addf %162, %168 : vector<7x384xf32>
    %c5_91 = arith.constant 5 : index
    %c3_92 = arith.constant 3 : index
    %c0_93 = arith.constant 0 : index
    %c0_94 = arith.constant 0 : index
    %170 = vector.load %arg3[%c5_91, %c3_92, %c0_93, %c0_94] : memref<9x4x7x1xf32, #tpu.memory_space<vmem>>, vector<1x1x7x1xf32>
    %171 = vector.shape_cast %170 : vector<1x1x7x1xf32> to vector<7x1xf32>
    %172 = vector.extract_strided_slice %148 {offsets = [3, 0], sizes = [1, 384], strides = [1, 1]} : vector<4x384xf32> to vector<1x384xf32>
    %173 = vector.broadcast %171 : vector<7x1xf32> to vector<7x384xf32>
    %174 = vector.broadcast %172 : vector<1x384xf32> to vector<7x384xf32>
    %175 = arith.mulf %173, %174 : vector<7x384xf32>
    %176 = arith.addf %169, %175 : vector<7x384xf32>
    %c367_i32 = arith.constant 367 : i32
    %177 = tpu.dynamic_rotate %1 by %c367_i32 dim 1 : vector<4x384xf32>, i32 -> vector<4x384xf32>
    %c6 = arith.constant 6 : index
    %c0_95 = arith.constant 0 : index
    %c0_96 = arith.constant 0 : index
    %c0_97 = arith.constant 0 : index
    %178 = vector.load %arg3[%c6, %c0_95, %c0_96, %c0_97] : memref<9x4x7x1xf32, #tpu.memory_space<vmem>>, vector<1x1x7x1xf32>
    %179 = vector.shape_cast %178 : vector<1x1x7x1xf32> to vector<7x1xf32>
    %180 = vector.extract_strided_slice %177 {offsets = [0, 0], sizes = [1, 384], strides = [1, 1]} : vector<4x384xf32> to vector<1x384xf32>
    %181 = vector.broadcast %179 : vector<7x1xf32> to vector<7x384xf32>
    %182 = vector.broadcast %180 : vector<1x384xf32> to vector<7x384xf32>
    %183 = arith.mulf %181, %182 : vector<7x384xf32>
    %184 = arith.addf %176, %183 : vector<7x384xf32>
    %c6_98 = arith.constant 6 : index
    %c1_99 = arith.constant 1 : index
    %c0_100 = arith.constant 0 : index
    %c0_101 = arith.constant 0 : index
    %185 = vector.load %arg3[%c6_98, %c1_99, %c0_100, %c0_101] : memref<9x4x7x1xf32, #tpu.memory_space<vmem>>, vector<1x1x7x1xf32>
    %186 = vector.shape_cast %185 : vector<1x1x7x1xf32> to vector<7x1xf32>
    %187 = vector.extract_strided_slice %177 {offsets = [1, 0], sizes = [1, 384], strides = [1, 1]} : vector<4x384xf32> to vector<1x384xf32>
    %188 = vector.broadcast %186 : vector<7x1xf32> to vector<7x384xf32>
    %189 = vector.broadcast %187 : vector<1x384xf32> to vector<7x384xf32>
    %190 = arith.mulf %188, %189 : vector<7x384xf32>
    %191 = arith.addf %184, %190 : vector<7x384xf32>
    %c6_102 = arith.constant 6 : index
    %c2_103 = arith.constant 2 : index
    %c0_104 = arith.constant 0 : index
    %c0_105 = arith.constant 0 : index
    %192 = vector.load %arg3[%c6_102, %c2_103, %c0_104, %c0_105] : memref<9x4x7x1xf32, #tpu.memory_space<vmem>>, vector<1x1x7x1xf32>
    %193 = vector.shape_cast %192 : vector<1x1x7x1xf32> to vector<7x1xf32>
    %194 = vector.extract_strided_slice %177 {offsets = [2, 0], sizes = [1, 384], strides = [1, 1]} : vector<4x384xf32> to vector<1x384xf32>
    %195 = vector.broadcast %193 : vector<7x1xf32> to vector<7x384xf32>
    %196 = vector.broadcast %194 : vector<1x384xf32> to vector<7x384xf32>
    %197 = arith.mulf %195, %196 : vector<7x384xf32>
    %198 = arith.addf %191, %197 : vector<7x384xf32>
    %c6_106 = arith.constant 6 : index
    %c3_107 = arith.constant 3 : index
    %c0_108 = arith.constant 0 : index
    %c0_109 = arith.constant 0 : index
    %199 = vector.load %arg3[%c6_106, %c3_107, %c0_108, %c0_109] : memref<9x4x7x1xf32, #tpu.memory_space<vmem>>, vector<1x1x7x1xf32>
    %200 = vector.shape_cast %199 : vector<1x1x7x1xf32> to vector<7x1xf32>
    %201 = vector.extract_strided_slice %177 {offsets = [3, 0], sizes = [1, 384], strides = [1, 1]} : vector<4x384xf32> to vector<1x384xf32>
    %202 = vector.broadcast %200 : vector<7x1xf32> to vector<7x384xf32>
    %203 = vector.broadcast %201 : vector<1x384xf32> to vector<7x384xf32>
    %204 = arith.mulf %202, %203 : vector<7x384xf32>
    %205 = arith.addf %198, %204 : vector<7x384xf32>
    %c366_i32 = arith.constant 366 : i32
    %206 = tpu.dynamic_rotate %1 by %c366_i32 dim 1 : vector<4x384xf32>, i32 -> vector<4x384xf32>
    %c7 = arith.constant 7 : index
    %c0_110 = arith.constant 0 : index
    %c0_111 = arith.constant 0 : index
    %c0_112 = arith.constant 0 : index
    %207 = vector.load %arg3[%c7, %c0_110, %c0_111, %c0_112] : memref<9x4x7x1xf32, #tpu.memory_space<vmem>>, vector<1x1x7x1xf32>
    %208 = vector.shape_cast %207 : vector<1x1x7x1xf32> to vector<7x1xf32>
    %209 = vector.extract_strided_slice %206 {offsets = [0, 0], sizes = [1, 384], strides = [1, 1]} : vector<4x384xf32> to vector<1x384xf32>
    %210 = vector.broadcast %208 : vector<7x1xf32> to vector<7x384xf32>
    %211 = vector.broadcast %209 : vector<1x384xf32> to vector<7x384xf32>
    %212 = arith.mulf %210, %211 : vector<7x384xf32>
    %213 = arith.addf %205, %212 : vector<7x384xf32>
    %c7_113 = arith.constant 7 : index
    %c1_114 = arith.constant 1 : index
    %c0_115 = arith.constant 0 : index
    %c0_116 = arith.constant 0 : index
    %214 = vector.load %arg3[%c7_113, %c1_114, %c0_115, %c0_116] : memref<9x4x7x1xf32, #tpu.memory_space<vmem>>, vector<1x1x7x1xf32>
    %215 = vector.shape_cast %214 : vector<1x1x7x1xf32> to vector<7x1xf32>
    %216 = vector.extract_strided_slice %206 {offsets = [1, 0], sizes = [1, 384], strides = [1, 1]} : vector<4x384xf32> to vector<1x384xf32>
    %217 = vector.broadcast %215 : vector<7x1xf32> to vector<7x384xf32>
    %218 = vector.broadcast %216 : vector<1x384xf32> to vector<7x384xf32>
    %219 = arith.mulf %217, %218 : vector<7x384xf32>
    %220 = arith.addf %213, %219 : vector<7x384xf32>
    %c7_117 = arith.constant 7 : index
    %c2_118 = arith.constant 2 : index
    %c0_119 = arith.constant 0 : index
    %c0_120 = arith.constant 0 : index
    %221 = vector.load %arg3[%c7_117, %c2_118, %c0_119, %c0_120] : memref<9x4x7x1xf32, #tpu.memory_space<vmem>>, vector<1x1x7x1xf32>
    %222 = vector.shape_cast %221 : vector<1x1x7x1xf32> to vector<7x1xf32>
    %223 = vector.extract_strided_slice %206 {offsets = [2, 0], sizes = [1, 384], strides = [1, 1]} : vector<4x384xf32> to vector<1x384xf32>
    %224 = vector.broadcast %222 : vector<7x1xf32> to vector<7x384xf32>
    %225 = vector.broadcast %223 : vector<1x384xf32> to vector<7x384xf32>
    %226 = arith.mulf %224, %225 : vector<7x384xf32>
    %227 = arith.addf %220, %226 : vector<7x384xf32>
    %c7_121 = arith.constant 7 : index
    %c3_122 = arith.constant 3 : index
    %c0_123 = arith.constant 0 : index
    %c0_124 = arith.constant 0 : index
    %228 = vector.load %arg3[%c7_121, %c3_122, %c0_123, %c0_124] : memref<9x4x7x1xf32, #tpu.memory_space<vmem>>, vector<1x1x7x1xf32>
    %229 = vector.shape_cast %228 : vector<1x1x7x1xf32> to vector<7x1xf32>
    %230 = vector.extract_strided_slice %206 {offsets = [3, 0], sizes = [1, 384], strides = [1, 1]} : vector<4x384xf32> to vector<1x384xf32>
    %231 = vector.broadcast %229 : vector<7x1xf32> to vector<7x384xf32>
    %232 = vector.broadcast %230 : vector<1x384xf32> to vector<7x384xf32>
    %233 = arith.mulf %231, %232 : vector<7x384xf32>
    %234 = arith.addf %227, %233 : vector<7x384xf32>
    %c365_i32 = arith.constant 365 : i32
    %235 = tpu.dynamic_rotate %1 by %c365_i32 dim 1 : vector<4x384xf32>, i32 -> vector<4x384xf32>
    %c8 = arith.constant 8 : index
    %c0_125 = arith.constant 0 : index
    %c0_126 = arith.constant 0 : index
    %c0_127 = arith.constant 0 : index
    %236 = vector.load %arg3[%c8, %c0_125, %c0_126, %c0_127] : memref<9x4x7x1xf32, #tpu.memory_space<vmem>>, vector<1x1x7x1xf32>
    %237 = vector.shape_cast %236 : vector<1x1x7x1xf32> to vector<7x1xf32>
    %238 = vector.extract_strided_slice %235 {offsets = [0, 0], sizes = [1, 384], strides = [1, 1]} : vector<4x384xf32> to vector<1x384xf32>
    %239 = vector.broadcast %237 : vector<7x1xf32> to vector<7x384xf32>
    %240 = vector.broadcast %238 : vector<1x384xf32> to vector<7x384xf32>
    %241 = arith.mulf %239, %240 : vector<7x384xf32>
    %242 = arith.addf %234, %241 : vector<7x384xf32>
    %c8_128 = arith.constant 8 : index
    %c1_129 = arith.constant 1 : index
    %c0_130 = arith.constant 0 : index
    %c0_131 = arith.constant 0 : index
    %243 = vector.load %arg3[%c8_128, %c1_129, %c0_130, %c0_131] : memref<9x4x7x1xf32, #tpu.memory_space<vmem>>, vector<1x1x7x1xf32>
    %244 = vector.shape_cast %243 : vector<1x1x7x1xf32> to vector<7x1xf32>
    %245 = vector.extract_strided_slice %235 {offsets = [1, 0], sizes = [1, 384], strides = [1, 1]} : vector<4x384xf32> to vector<1x384xf32>
    %246 = vector.broadcast %244 : vector<7x1xf32> to vector<7x384xf32>
    %247 = vector.broadcast %245 : vector<1x384xf32> to vector<7x384xf32>
    %248 = arith.mulf %246, %247 : vector<7x384xf32>
    %249 = arith.addf %242, %248 : vector<7x384xf32>
    %c8_132 = arith.constant 8 : index
    %c2_133 = arith.constant 2 : index
    %c0_134 = arith.constant 0 : index
    %c0_135 = arith.constant 0 : index
    %250 = vector.load %arg3[%c8_132, %c2_133, %c0_134, %c0_135] : memref<9x4x7x1xf32, #tpu.memory_space<vmem>>, vector<1x1x7x1xf32>
    %251 = vector.shape_cast %250 : vector<1x1x7x1xf32> to vector<7x1xf32>
    %252 = vector.extract_strided_slice %235 {offsets = [2, 0], sizes = [1, 384], strides = [1, 1]} : vector<4x384xf32> to vector<1x384xf32>
    %253 = vector.broadcast %251 : vector<7x1xf32> to vector<7x384xf32>
    %254 = vector.broadcast %252 : vector<1x384xf32> to vector<7x384xf32>
    %255 = arith.mulf %253, %254 : vector<7x384xf32>
    %256 = arith.addf %249, %255 : vector<7x384xf32>
    %c8_136 = arith.constant 8 : index
    %c3_137 = arith.constant 3 : index
    %c0_138 = arith.constant 0 : index
    %c0_139 = arith.constant 0 : index
    %257 = vector.load %arg3[%c8_136, %c3_137, %c0_138, %c0_139] : memref<9x4x7x1xf32, #tpu.memory_space<vmem>>, vector<1x1x7x1xf32>
    %258 = vector.shape_cast %257 : vector<1x1x7x1xf32> to vector<7x1xf32>
    %259 = vector.extract_strided_slice %235 {offsets = [3, 0], sizes = [1, 384], strides = [1, 1]} : vector<4x384xf32> to vector<1x384xf32>
    %260 = vector.broadcast %258 : vector<7x1xf32> to vector<7x384xf32>
    %261 = vector.broadcast %259 : vector<1x384xf32> to vector<7x384xf32>
    %262 = arith.mulf %260, %261 : vector<7x384xf32>
    %263 = arith.addf %256, %262 : vector<7x384xf32>
    %264 = vector.broadcast %2 : vector<1x384xf32> to vector<7x384xf32>
    %265 = arith.mulf %263, %264 : vector<7x384xf32>
    %cst_140 = arith.constant dense<0.000000e+00> : vector<7xf32>
    %266 = vector.multi_reduction <add>, %265, %cst_140 [1] : vector<7x384xf32> to vector<7xf32>
    %267 = vector.shape_cast %266 : vector<7xf32> to vector<7x1xf32>
    %c0_141 = arith.constant 0 : index
    %c0_142 = arith.constant 0 : index
    %c0_143 = arith.constant 0 : index
    %268 = vector.load %arg4[%c0_141, %c0_142, %c0_143] : memref<1x7x1xf32, #tpu.memory_space<vmem>>, vector<1x7x1xf32>
    %269 = vector.shape_cast %268 : vector<1x7x1xf32> to vector<7x1xf32>
    %270 = vector.shape_cast %267 : vector<7x1xf32> to vector<1x7x1xf32>
    tpu.vector_store %arg4[%c0_141, %c0_142, %c0_143], %270 {strides = array<i32>} : memref<1x7x1xf32, #tpu.memory_space<vmem>>, vector<1x7x1xf32>,
    %271 = arith.mulf %265, %263 : vector<7x384xf32>
    %cst_144 = arith.constant dense<0.000000e+00> : vector<7xf32>
    %272 = vector.multi_reduction <add>, %271, %cst_144 [1] : vector<7x384xf32> to vector<7xf32>
    %273 = vector.shape_cast %272 : vector<7xf32> to vector<7x1xf32>
    %c0_145 = arith.constant 0 : index
    %c0_146 = arith.constant 0 : index
    %c0_147 = arith.constant 0 : index
    %274 = vector.load %arg5[%c0_145, %c0_146, %c0_147] : memref<1x7x1xf32, #tpu.memory_space<vmem>>, vector<1x7x1xf32>
    %275 = vector.shape_cast %274 : vector<1x7x1xf32> to vector<7x1xf32>
    %276 = vector.shape_cast %273 : vector<7x1xf32> to vector<1x7x1xf32>
    tpu.vector_store %arg5[%c0_145, %c0_146, %c0_147], %276 {strides = array<i32>} : memref<1x7x1xf32, #tpu.memory_space<vmem>>, vector<1x7x1xf32>,
    return
  }
  func.func @transform_0(%arg0: i32) -> (i32, i32, i32) {
    %c0_i32 = arith.constant 0 : i32
    %c0_i32_0 = arith.constant 0 : i32
    %c0_i32_1 = arith.constant 0 : i32
    return %arg0, %c0_i32, %c0_i32_0 : i32, i32, i32
  }
  func.func @transform_1(%arg0: i32) -> (i32, i32) {
    %c0_i32 = arith.constant 0 : i32
    %c0_i32_0 = arith.constant 0 : i32
    %c0_i32_1 = arith.constant 0 : i32
    return %c0_i32, %c0_i32_0 : i32, i32
  }
  func.func @transform_2(%arg0: i32) -> (i32, i32, i32, i32) {
    %c0_i32 = arith.constant 0 : i32
    %c0_i32_0 = arith.constant 0 : i32
    %c0_i32_1 = arith.constant 0 : i32
    %c0_i32_2 = arith.constant 0 : i32
    %c0_i32_3 = arith.constant 0 : i32
    return %c0_i32, %c0_i32_0, %c0_i32_1, %c0_i32_2 : i32, i32, i32, i32
  }
  func.func @transform_3(%arg0: i32) -> (i32, i32, i32) {
    %c0_i32 = arith.constant 0 : i32
    %c0_i32_0 = arith.constant 0 : i32
    %c0_i32_1 = arith.constant 0 : i32
    return %arg0, %c0_i32, %c0_i32_0 : i32, i32, i32
  }
  func.func @transform_4(%arg0: i32) -> (i32, i32, i32) {
    %c0_i32 = arith.constant 0 : i32
    %c0_i32_0 = arith.constant 0 : i32
    %c0_i32_1 = arith.constant 0 : i32
    return %arg0, %c0_i32, %c0_i32_0 : i32, i32, i32
  }
}

module attributes {stable_mosaic.version = 11 : i64} {
  func.func @final_kernel(%arg0: i32, %arg1: memref<1x4x384xf32, #tpu.memory_space<vmem>>, %arg2: memref<1x384xf32, #tpu.memory_space<vmem>>, %arg3: memref<9x4x7x1xf32, #tpu.memory_space<vmem>>, %arg4: memref<9x7x4x1xf32, #tpu.memory_space<vmem>>, %arg5: memref<7x1xf32, #tpu.memory_space<vmem>>, %arg6: memref<7x1xf32, #tpu.memory_space<vmem>>, %arg7: memref<4x1xf32, #tpu.memory_space<vmem>>, %arg8: memref<4x1xf32, #tpu.memory_space<vmem>>, %arg9: memref<1x4x384xf32, #tpu.memory_space<vmem>>) attributes {dimension_semantics = [#tpu.dimension_semantics<parallel>], iteration_bounds = array<i64: 2>, scalar_prefetch = 0 : i64, scratch_operands = 0 : i64, tpu.core_type = #tpu.core_type<tc>, window_params = [{transform_indices = @transform_0, window_bounds = array<i64: 1, 4, 384>}, {pipeline_mode = #tpu.pipeline_mode<synchronous>, transform_indices = @transform_1, window_bounds = array<i64: 1, 384>}, {pipeline_mode = #tpu.pipeline_mode<synchronous>, transform_indices = @transform_2, window_bounds = array<i64: 9, 4, 7, 1>}, {pipeline_mode = #tpu.pipeline_mode<synchronous>, transform_indices = @transform_3, window_bounds = array<i64: 9, 7, 4, 1>}, {pipeline_mode = #tpu.pipeline_mode<synchronous>, transform_indices = @transform_4, window_bounds = array<i64: 7, 1>}, {pipeline_mode = #tpu.pipeline_mode<synchronous>, transform_indices = @transform_5, window_bounds = array<i64: 7, 1>}, {pipeline_mode = #tpu.pipeline_mode<synchronous>, transform_indices = @transform_6, window_bounds = array<i64: 4, 1>}, {pipeline_mode = #tpu.pipeline_mode<synchronous>, transform_indices = @transform_7, window_bounds = array<i64: 4, 1>}, {transform_indices = @transform_8, window_bounds = array<i64: 1, 4, 384>}]} {
    %c0 = arith.constant 0 : index
    %c0_0 = arith.constant 0 : index
    %c0_1 = arith.constant 0 : index
    %0 = vector.load %arg1[%c0, %c0_0, %c0_1] : memref<1x4x384xf32, #tpu.memory_space<vmem>>, vector<1x4x384xf32>
    %1 = vector.shape_cast %0 : vector<1x4x384xf32> to vector<4x384xf32>
    %c0_2 = arith.constant 0 : index
    %c0_3 = arith.constant 0 : index
    %2 = vector.load %arg2[%c0_2, %c0_3] : memref<1x384xf32, #tpu.memory_space<vmem>>, vector<1x384xf32>
    %c0_4 = arith.constant 0 : index
    %c0_5 = arith.constant 0 : index
    %3 = vector.load %arg5[%c0_4, %c0_5] : memref<7x1xf32, #tpu.memory_space<vmem>>, vector<7x1xf32>
    %c0_6 = arith.constant 0 : index
    %c0_7 = arith.constant 0 : index
    %4 = vector.load %arg6[%c0_6, %c0_7] : memref<7x1xf32, #tpu.memory_space<vmem>>, vector<7x1xf32>
    %cst = arith.constant 0.000000e+00 : f32
    %5 = vector.broadcast %cst : f32 to vector<7x384xf32>
    %c19_i32 = arith.constant 19 : i32
    %6 = tpu.dynamic_rotate %1 by %c19_i32 dim 1 : vector<4x384xf32>, i32 -> vector<4x384xf32>
    %c0_8 = arith.constant 0 : index
    %c0_9 = arith.constant 0 : index
    %c0_10 = arith.constant 0 : index
    %c0_11 = arith.constant 0 : index
    %7 = vector.load %arg3[%c0_8, %c0_9, %c0_10, %c0_11] : memref<9x4x7x1xf32, #tpu.memory_space<vmem>>, vector<1x1x7x1xf32>
    %8 = vector.shape_cast %7 : vector<1x1x7x1xf32> to vector<7x1xf32>
    %9 = vector.extract_strided_slice %6 {offsets = [0, 0], sizes = [1, 384], strides = [1, 1]} : vector<4x384xf32> to vector<1x384xf32>
    %10 = vector.broadcast %8 : vector<7x1xf32> to vector<7x384xf32>
    %11 = vector.broadcast %9 : vector<1x384xf32> to vector<7x384xf32>
    %12 = arith.mulf %10, %11 : vector<7x384xf32>
    %13 = arith.addf %5, %12 : vector<7x384xf32>
    %c0_12 = arith.constant 0 : index
    %c1 = arith.constant 1 : index
    %c0_13 = arith.constant 0 : index
    %c0_14 = arith.constant 0 : index
    %14 = vector.load %arg3[%c0_12, %c1, %c0_13, %c0_14] : memref<9x4x7x1xf32, #tpu.memory_space<vmem>>, vector<1x1x7x1xf32>
    %15 = vector.shape_cast %14 : vector<1x1x7x1xf32> to vector<7x1xf32>
    %16 = vector.extract_strided_slice %6 {offsets = [1, 0], sizes = [1, 384], strides = [1, 1]} : vector<4x384xf32> to vector<1x384xf32>
    %17 = vector.broadcast %15 : vector<7x1xf32> to vector<7x384xf32>
    %18 = vector.broadcast %16 : vector<1x384xf32> to vector<7x384xf32>
    %19 = arith.mulf %17, %18 : vector<7x384xf32>
    %20 = arith.addf %13, %19 : vector<7x384xf32>
    %c0_15 = arith.constant 0 : index
    %c2 = arith.constant 2 : index
    %c0_16 = arith.constant 0 : index
    %c0_17 = arith.constant 0 : index
    %21 = vector.load %arg3[%c0_15, %c2, %c0_16, %c0_17] : memref<9x4x7x1xf32, #tpu.memory_space<vmem>>, vector<1x1x7x1xf32>
    %22 = vector.shape_cast %21 : vector<1x1x7x1xf32> to vector<7x1xf32>
    %23 = vector.extract_strided_slice %6 {offsets = [2, 0], sizes = [1, 384], strides = [1, 1]} : vector<4x384xf32> to vector<1x384xf32>
    %24 = vector.broadcast %22 : vector<7x1xf32> to vector<7x384xf32>
    %25 = vector.broadcast %23 : vector<1x384xf32> to vector<7x384xf32>
    %26 = arith.mulf %24, %25 : vector<7x384xf32>
    %27 = arith.addf %20, %26 : vector<7x384xf32>
    %c0_18 = arith.constant 0 : index
    %c3 = arith.constant 3 : index
    %c0_19 = arith.constant 0 : index
    %c0_20 = arith.constant 0 : index
    %28 = vector.load %arg3[%c0_18, %c3, %c0_19, %c0_20] : memref<9x4x7x1xf32, #tpu.memory_space<vmem>>, vector<1x1x7x1xf32>
    %29 = vector.shape_cast %28 : vector<1x1x7x1xf32> to vector<7x1xf32>
    %30 = vector.extract_strided_slice %6 {offsets = [3, 0], sizes = [1, 384], strides = [1, 1]} : vector<4x384xf32> to vector<1x384xf32>
    %31 = vector.broadcast %29 : vector<7x1xf32> to vector<7x384xf32>
    %32 = vector.broadcast %30 : vector<1x384xf32> to vector<7x384xf32>
    %33 = arith.mulf %31, %32 : vector<7x384xf32>
    %34 = arith.addf %27, %33 : vector<7x384xf32>
    %c18_i32 = arith.constant 18 : i32
    %35 = tpu.dynamic_rotate %1 by %c18_i32 dim 1 : vector<4x384xf32>, i32 -> vector<4x384xf32>
    %c1_21 = arith.constant 1 : index
    %c0_22 = arith.constant 0 : index
    %c0_23 = arith.constant 0 : index
    %c0_24 = arith.constant 0 : index
    %36 = vector.load %arg3[%c1_21, %c0_22, %c0_23, %c0_24] : memref<9x4x7x1xf32, #tpu.memory_space<vmem>>, vector<1x1x7x1xf32>
    %37 = vector.shape_cast %36 : vector<1x1x7x1xf32> to vector<7x1xf32>
    %38 = vector.extract_strided_slice %35 {offsets = [0, 0], sizes = [1, 384], strides = [1, 1]} : vector<4x384xf32> to vector<1x384xf32>
    %39 = vector.broadcast %37 : vector<7x1xf32> to vector<7x384xf32>
    %40 = vector.broadcast %38 : vector<1x384xf32> to vector<7x384xf32>
    %41 = arith.mulf %39, %40 : vector<7x384xf32>
    %42 = arith.addf %34, %41 : vector<7x384xf32>
    %c1_25 = arith.constant 1 : index
    %c1_26 = arith.constant 1 : index
    %c0_27 = arith.constant 0 : index
    %c0_28 = arith.constant 0 : index
    %43 = vector.load %arg3[%c1_25, %c1_26, %c0_27, %c0_28] : memref<9x4x7x1xf32, #tpu.memory_space<vmem>>, vector<1x1x7x1xf32>
    %44 = vector.shape_cast %43 : vector<1x1x7x1xf32> to vector<7x1xf32>
    %45 = vector.extract_strided_slice %35 {offsets = [1, 0], sizes = [1, 384], strides = [1, 1]} : vector<4x384xf32> to vector<1x384xf32>
    %46 = vector.broadcast %44 : vector<7x1xf32> to vector<7x384xf32>
    %47 = vector.broadcast %45 : vector<1x384xf32> to vector<7x384xf32>
    %48 = arith.mulf %46, %47 : vector<7x384xf32>
    %49 = arith.addf %42, %48 : vector<7x384xf32>
    %c1_29 = arith.constant 1 : index
    %c2_30 = arith.constant 2 : index
    %c0_31 = arith.constant 0 : index
    %c0_32 = arith.constant 0 : index
    %50 = vector.load %arg3[%c1_29, %c2_30, %c0_31, %c0_32] : memref<9x4x7x1xf32, #tpu.memory_space<vmem>>, vector<1x1x7x1xf32>
    %51 = vector.shape_cast %50 : vector<1x1x7x1xf32> to vector<7x1xf32>
    %52 = vector.extract_strided_slice %35 {offsets = [2, 0], sizes = [1, 384], strides = [1, 1]} : vector<4x384xf32> to vector<1x384xf32>
    %53 = vector.broadcast %51 : vector<7x1xf32> to vector<7x384xf32>
    %54 = vector.broadcast %52 : vector<1x384xf32> to vector<7x384xf32>
    %55 = arith.mulf %53, %54 : vector<7x384xf32>
    %56 = arith.addf %49, %55 : vector<7x384xf32>
    %c1_33 = arith.constant 1 : index
    %c3_34 = arith.constant 3 : index
    %c0_35 = arith.constant 0 : index
    %c0_36 = arith.constant 0 : index
    %57 = vector.load %arg3[%c1_33, %c3_34, %c0_35, %c0_36] : memref<9x4x7x1xf32, #tpu.memory_space<vmem>>, vector<1x1x7x1xf32>
    %58 = vector.shape_cast %57 : vector<1x1x7x1xf32> to vector<7x1xf32>
    %59 = vector.extract_strided_slice %35 {offsets = [3, 0], sizes = [1, 384], strides = [1, 1]} : vector<4x384xf32> to vector<1x384xf32>
    %60 = vector.broadcast %58 : vector<7x1xf32> to vector<7x384xf32>
    %61 = vector.broadcast %59 : vector<1x384xf32> to vector<7x384xf32>
    %62 = arith.mulf %60, %61 : vector<7x384xf32>
    %63 = arith.addf %56, %62 : vector<7x384xf32>
    %c17_i32 = arith.constant 17 : i32
    %64 = tpu.dynamic_rotate %1 by %c17_i32 dim 1 : vector<4x384xf32>, i32 -> vector<4x384xf32>
    %c2_37 = arith.constant 2 : index
    %c0_38 = arith.constant 0 : index
    %c0_39 = arith.constant 0 : index
    %c0_40 = arith.constant 0 : index
    %65 = vector.load %arg3[%c2_37, %c0_38, %c0_39, %c0_40] : memref<9x4x7x1xf32, #tpu.memory_space<vmem>>, vector<1x1x7x1xf32>
    %66 = vector.shape_cast %65 : vector<1x1x7x1xf32> to vector<7x1xf32>
    %67 = vector.extract_strided_slice %64 {offsets = [0, 0], sizes = [1, 384], strides = [1, 1]} : vector<4x384xf32> to vector<1x384xf32>
    %68 = vector.broadcast %66 : vector<7x1xf32> to vector<7x384xf32>
    %69 = vector.broadcast %67 : vector<1x384xf32> to vector<7x384xf32>
    %70 = arith.mulf %68, %69 : vector<7x384xf32>
    %71 = arith.addf %63, %70 : vector<7x384xf32>
    %c2_41 = arith.constant 2 : index
    %c1_42 = arith.constant 1 : index
    %c0_43 = arith.constant 0 : index
    %c0_44 = arith.constant 0 : index
    %72 = vector.load %arg3[%c2_41, %c1_42, %c0_43, %c0_44] : memref<9x4x7x1xf32, #tpu.memory_space<vmem>>, vector<1x1x7x1xf32>
    %73 = vector.shape_cast %72 : vector<1x1x7x1xf32> to vector<7x1xf32>
    %74 = vector.extract_strided_slice %64 {offsets = [1, 0], sizes = [1, 384], strides = [1, 1]} : vector<4x384xf32> to vector<1x384xf32>
    %75 = vector.broadcast %73 : vector<7x1xf32> to vector<7x384xf32>
    %76 = vector.broadcast %74 : vector<1x384xf32> to vector<7x384xf32>
    %77 = arith.mulf %75, %76 : vector<7x384xf32>
    %78 = arith.addf %71, %77 : vector<7x384xf32>
    %c2_45 = arith.constant 2 : index
    %c2_46 = arith.constant 2 : index
    %c0_47 = arith.constant 0 : index
    %c0_48 = arith.constant 0 : index
    %79 = vector.load %arg3[%c2_45, %c2_46, %c0_47, %c0_48] : memref<9x4x7x1xf32, #tpu.memory_space<vmem>>, vector<1x1x7x1xf32>
    %80 = vector.shape_cast %79 : vector<1x1x7x1xf32> to vector<7x1xf32>
    %81 = vector.extract_strided_slice %64 {offsets = [2, 0], sizes = [1, 384], strides = [1, 1]} : vector<4x384xf32> to vector<1x384xf32>
    %82 = vector.broadcast %80 : vector<7x1xf32> to vector<7x384xf32>
    %83 = vector.broadcast %81 : vector<1x384xf32> to vector<7x384xf32>
    %84 = arith.mulf %82, %83 : vector<7x384xf32>
    %85 = arith.addf %78, %84 : vector<7x384xf32>
    %c2_49 = arith.constant 2 : index
    %c3_50 = arith.constant 3 : index
    %c0_51 = arith.constant 0 : index
    %c0_52 = arith.constant 0 : index
    %86 = vector.load %arg3[%c2_49, %c3_50, %c0_51, %c0_52] : memref<9x4x7x1xf32, #tpu.memory_space<vmem>>, vector<1x1x7x1xf32>
    %87 = vector.shape_cast %86 : vector<1x1x7x1xf32> to vector<7x1xf32>
    %88 = vector.extract_strided_slice %64 {offsets = [3, 0], sizes = [1, 384], strides = [1, 1]} : vector<4x384xf32> to vector<1x384xf32>
    %89 = vector.broadcast %87 : vector<7x1xf32> to vector<7x384xf32>
    %90 = vector.broadcast %88 : vector<1x384xf32> to vector<7x384xf32>
    %91 = arith.mulf %89, %90 : vector<7x384xf32>
    %92 = arith.addf %85, %91 : vector<7x384xf32>
    %c1_i32 = arith.constant 1 : i32
    %93 = tpu.dynamic_rotate %1 by %c1_i32 dim 1 : vector<4x384xf32>, i32 -> vector<4x384xf32>
    %c3_53 = arith.constant 3 : index
    %c0_54 = arith.constant 0 : index
    %c0_55 = arith.constant 0 : index
    %c0_56 = arith.constant 0 : index
    %94 = vector.load %arg3[%c3_53, %c0_54, %c0_55, %c0_56] : memref<9x4x7x1xf32, #tpu.memory_space<vmem>>, vector<1x1x7x1xf32>
    %95 = vector.shape_cast %94 : vector<1x1x7x1xf32> to vector<7x1xf32>
    %96 = vector.extract_strided_slice %93 {offsets = [0, 0], sizes = [1, 384], strides = [1, 1]} : vector<4x384xf32> to vector<1x384xf32>
    %97 = vector.broadcast %95 : vector<7x1xf32> to vector<7x384xf32>
    %98 = vector.broadcast %96 : vector<1x384xf32> to vector<7x384xf32>
    %99 = arith.mulf %97, %98 : vector<7x384xf32>
    %100 = arith.addf %92, %99 : vector<7x384xf32>
    %c3_57 = arith.constant 3 : index
    %c1_58 = arith.constant 1 : index
    %c0_59 = arith.constant 0 : index
    %c0_60 = arith.constant 0 : index
    %101 = vector.load %arg3[%c3_57, %c1_58, %c0_59, %c0_60] : memref<9x4x7x1xf32, #tpu.memory_space<vmem>>, vector<1x1x7x1xf32>
    %102 = vector.shape_cast %101 : vector<1x1x7x1xf32> to vector<7x1xf32>
    %103 = vector.extract_strided_slice %93 {offsets = [1, 0], sizes = [1, 384], strides = [1, 1]} : vector<4x384xf32> to vector<1x384xf32>
    %104 = vector.broadcast %102 : vector<7x1xf32> to vector<7x384xf32>
    %105 = vector.broadcast %103 : vector<1x384xf32> to vector<7x384xf32>
    %106 = arith.mulf %104, %105 : vector<7x384xf32>
    %107 = arith.addf %100, %106 : vector<7x384xf32>
    %c3_61 = arith.constant 3 : index
    %c2_62 = arith.constant 2 : index
    %c0_63 = arith.constant 0 : index
    %c0_64 = arith.constant 0 : index
    %108 = vector.load %arg3[%c3_61, %c2_62, %c0_63, %c0_64] : memref<9x4x7x1xf32, #tpu.memory_space<vmem>>, vector<1x1x7x1xf32>
    %109 = vector.shape_cast %108 : vector<1x1x7x1xf32> to vector<7x1xf32>
    %110 = vector.extract_strided_slice %93 {offsets = [2, 0], sizes = [1, 384], strides = [1, 1]} : vector<4x384xf32> to vector<1x384xf32>
    %111 = vector.broadcast %109 : vector<7x1xf32> to vector<7x384xf32>
    %112 = vector.broadcast %110 : vector<1x384xf32> to vector<7x384xf32>
    %113 = arith.mulf %111, %112 : vector<7x384xf32>
    %114 = arith.addf %107, %113 : vector<7x384xf32>
    %c3_65 = arith.constant 3 : index
    %c3_66 = arith.constant 3 : index
    %c0_67 = arith.constant 0 : index
    %c0_68 = arith.constant 0 : index
    %115 = vector.load %arg3[%c3_65, %c3_66, %c0_67, %c0_68] : memref<9x4x7x1xf32, #tpu.memory_space<vmem>>, vector<1x1x7x1xf32>
    %116 = vector.shape_cast %115 : vector<1x1x7x1xf32> to vector<7x1xf32>
    %117 = vector.extract_strided_slice %93 {offsets = [3, 0], sizes = [1, 384], strides = [1, 1]} : vector<4x384xf32> to vector<1x384xf32>
    %118 = vector.broadcast %116 : vector<7x1xf32> to vector<7x384xf32>
    %119 = vector.broadcast %117 : vector<1x384xf32> to vector<7x384xf32>
    %120 = arith.mulf %118, %119 : vector<7x384xf32>
    %121 = arith.addf %114, %120 : vector<7x384xf32>
    %c4 = arith.constant 4 : index
    %c0_69 = arith.constant 0 : index
    %c0_70 = arith.constant 0 : index
    %c0_71 = arith.constant 0 : index
    %122 = vector.load %arg3[%c4, %c0_69, %c0_70, %c0_71] : memref<9x4x7x1xf32, #tpu.memory_space<vmem>>, vector<1x1x7x1xf32>
    %123 = vector.shape_cast %122 : vector<1x1x7x1xf32> to vector<7x1xf32>
    %124 = vector.extract_strided_slice %1 {offsets = [0, 0], sizes = [1, 384], strides = [1, 1]} : vector<4x384xf32> to vector<1x384xf32>
    %125 = vector.broadcast %123 : vector<7x1xf32> to vector<7x384xf32>
    %126 = vector.broadcast %124 : vector<1x384xf32> to vector<7x384xf32>
    %127 = arith.mulf %125, %126 : vector<7x384xf32>
    %128 = arith.addf %121, %127 : vector<7x384xf32>
    %c4_72 = arith.constant 4 : index
    %c1_73 = arith.constant 1 : index
    %c0_74 = arith.constant 0 : index
    %c0_75 = arith.constant 0 : index
    %129 = vector.load %arg3[%c4_72, %c1_73, %c0_74, %c0_75] : memref<9x4x7x1xf32, #tpu.memory_space<vmem>>, vector<1x1x7x1xf32>
    %130 = vector.shape_cast %129 : vector<1x1x7x1xf32> to vector<7x1xf32>
    %131 = vector.extract_strided_slice %1 {offsets = [1, 0], sizes = [1, 384], strides = [1, 1]} : vector<4x384xf32> to vector<1x384xf32>
    %132 = vector.broadcast %130 : vector<7x1xf32> to vector<7x384xf32>
    %133 = vector.broadcast %131 : vector<1x384xf32> to vector<7x384xf32>
    %134 = arith.mulf %132, %133 : vector<7x384xf32>
    %135 = arith.addf %128, %134 : vector<7x384xf32>
    %c4_76 = arith.constant 4 : index
    %c2_77 = arith.constant 2 : index
    %c0_78 = arith.constant 0 : index
    %c0_79 = arith.constant 0 : index
    %136 = vector.load %arg3[%c4_76, %c2_77, %c0_78, %c0_79] : memref<9x4x7x1xf32, #tpu.memory_space<vmem>>, vector<1x1x7x1xf32>
    %137 = vector.shape_cast %136 : vector<1x1x7x1xf32> to vector<7x1xf32>
    %138 = vector.extract_strided_slice %1 {offsets = [2, 0], sizes = [1, 384], strides = [1, 1]} : vector<4x384xf32> to vector<1x384xf32>
    %139 = vector.broadcast %137 : vector<7x1xf32> to vector<7x384xf32>
    %140 = vector.broadcast %138 : vector<1x384xf32> to vector<7x384xf32>
    %141 = arith.mulf %139, %140 : vector<7x384xf32>
    %142 = arith.addf %135, %141 : vector<7x384xf32>
    %c4_80 = arith.constant 4 : index
    %c3_81 = arith.constant 3 : index
    %c0_82 = arith.constant 0 : index
    %c0_83 = arith.constant 0 : index
    %143 = vector.load %arg3[%c4_80, %c3_81, %c0_82, %c0_83] : memref<9x4x7x1xf32, #tpu.memory_space<vmem>>, vector<1x1x7x1xf32>
    %144 = vector.shape_cast %143 : vector<1x1x7x1xf32> to vector<7x1xf32>
    %145 = vector.extract_strided_slice %1 {offsets = [3, 0], sizes = [1, 384], strides = [1, 1]} : vector<4x384xf32> to vector<1x384xf32>
    %146 = vector.broadcast %144 : vector<7x1xf32> to vector<7x384xf32>
    %147 = vector.broadcast %145 : vector<1x384xf32> to vector<7x384xf32>
    %148 = arith.mulf %146, %147 : vector<7x384xf32>
    %149 = arith.addf %142, %148 : vector<7x384xf32>
    %c383_i32 = arith.constant 383 : i32
    %150 = tpu.dynamic_rotate %1 by %c383_i32 dim 1 : vector<4x384xf32>, i32 -> vector<4x384xf32>
    %c5 = arith.constant 5 : index
    %c0_84 = arith.constant 0 : index
    %c0_85 = arith.constant 0 : index
    %c0_86 = arith.constant 0 : index
    %151 = vector.load %arg3[%c5, %c0_84, %c0_85, %c0_86] : memref<9x4x7x1xf32, #tpu.memory_space<vmem>>, vector<1x1x7x1xf32>
    %152 = vector.shape_cast %151 : vector<1x1x7x1xf32> to vector<7x1xf32>
    %153 = vector.extract_strided_slice %150 {offsets = [0, 0], sizes = [1, 384], strides = [1, 1]} : vector<4x384xf32> to vector<1x384xf32>
    %154 = vector.broadcast %152 : vector<7x1xf32> to vector<7x384xf32>
    %155 = vector.broadcast %153 : vector<1x384xf32> to vector<7x384xf32>
    %156 = arith.mulf %154, %155 : vector<7x384xf32>
    %157 = arith.addf %149, %156 : vector<7x384xf32>
    %c5_87 = arith.constant 5 : index
    %c1_88 = arith.constant 1 : index
    %c0_89 = arith.constant 0 : index
    %c0_90 = arith.constant 0 : index
    %158 = vector.load %arg3[%c5_87, %c1_88, %c0_89, %c0_90] : memref<9x4x7x1xf32, #tpu.memory_space<vmem>>, vector<1x1x7x1xf32>
    %159 = vector.shape_cast %158 : vector<1x1x7x1xf32> to vector<7x1xf32>
    %160 = vector.extract_strided_slice %150 {offsets = [1, 0], sizes = [1, 384], strides = [1, 1]} : vector<4x384xf32> to vector<1x384xf32>
    %161 = vector.broadcast %159 : vector<7x1xf32> to vector<7x384xf32>
    %162 = vector.broadcast %160 : vector<1x384xf32> to vector<7x384xf32>
    %163 = arith.mulf %161, %162 : vector<7x384xf32>
    %164 = arith.addf %157, %163 : vector<7x384xf32>
    %c5_91 = arith.constant 5 : index
    %c2_92 = arith.constant 2 : index
    %c0_93 = arith.constant 0 : index
    %c0_94 = arith.constant 0 : index
    %165 = vector.load %arg3[%c5_91, %c2_92, %c0_93, %c0_94] : memref<9x4x7x1xf32, #tpu.memory_space<vmem>>, vector<1x1x7x1xf32>
    %166 = vector.shape_cast %165 : vector<1x1x7x1xf32> to vector<7x1xf32>
    %167 = vector.extract_strided_slice %150 {offsets = [2, 0], sizes = [1, 384], strides = [1, 1]} : vector<4x384xf32> to vector<1x384xf32>
    %168 = vector.broadcast %166 : vector<7x1xf32> to vector<7x384xf32>
    %169 = vector.broadcast %167 : vector<1x384xf32> to vector<7x384xf32>
    %170 = arith.mulf %168, %169 : vector<7x384xf32>
    %171 = arith.addf %164, %170 : vector<7x384xf32>
    %c5_95 = arith.constant 5 : index
    %c3_96 = arith.constant 3 : index
    %c0_97 = arith.constant 0 : index
    %c0_98 = arith.constant 0 : index
    %172 = vector.load %arg3[%c5_95, %c3_96, %c0_97, %c0_98] : memref<9x4x7x1xf32, #tpu.memory_space<vmem>>, vector<1x1x7x1xf32>
    %173 = vector.shape_cast %172 : vector<1x1x7x1xf32> to vector<7x1xf32>
    %174 = vector.extract_strided_slice %150 {offsets = [3, 0], sizes = [1, 384], strides = [1, 1]} : vector<4x384xf32> to vector<1x384xf32>
    %175 = vector.broadcast %173 : vector<7x1xf32> to vector<7x384xf32>
    %176 = vector.broadcast %174 : vector<1x384xf32> to vector<7x384xf32>
    %177 = arith.mulf %175, %176 : vector<7x384xf32>
    %178 = arith.addf %171, %177 : vector<7x384xf32>
    %c367_i32 = arith.constant 367 : i32
    %179 = tpu.dynamic_rotate %1 by %c367_i32 dim 1 : vector<4x384xf32>, i32 -> vector<4x384xf32>
    %c6 = arith.constant 6 : index
    %c0_99 = arith.constant 0 : index
    %c0_100 = arith.constant 0 : index
    %c0_101 = arith.constant 0 : index
    %180 = vector.load %arg3[%c6, %c0_99, %c0_100, %c0_101] : memref<9x4x7x1xf32, #tpu.memory_space<vmem>>, vector<1x1x7x1xf32>
    %181 = vector.shape_cast %180 : vector<1x1x7x1xf32> to vector<7x1xf32>
    %182 = vector.extract_strided_slice %179 {offsets = [0, 0], sizes = [1, 384], strides = [1, 1]} : vector<4x384xf32> to vector<1x384xf32>
    %183 = vector.broadcast %181 : vector<7x1xf32> to vector<7x384xf32>
    %184 = vector.broadcast %182 : vector<1x384xf32> to vector<7x384xf32>
    %185 = arith.mulf %183, %184 : vector<7x384xf32>
    %186 = arith.addf %178, %185 : vector<7x384xf32>
    %c6_102 = arith.constant 6 : index
    %c1_103 = arith.constant 1 : index
    %c0_104 = arith.constant 0 : index
    %c0_105 = arith.constant 0 : index
    %187 = vector.load %arg3[%c6_102, %c1_103, %c0_104, %c0_105] : memref<9x4x7x1xf32, #tpu.memory_space<vmem>>, vector<1x1x7x1xf32>
    %188 = vector.shape_cast %187 : vector<1x1x7x1xf32> to vector<7x1xf32>
    %189 = vector.extract_strided_slice %179 {offsets = [1, 0], sizes = [1, 384], strides = [1, 1]} : vector<4x384xf32> to vector<1x384xf32>
    %190 = vector.broadcast %188 : vector<7x1xf32> to vector<7x384xf32>
    %191 = vector.broadcast %189 : vector<1x384xf32> to vector<7x384xf32>
    %192 = arith.mulf %190, %191 : vector<7x384xf32>
    %193 = arith.addf %186, %192 : vector<7x384xf32>
    %c6_106 = arith.constant 6 : index
    %c2_107 = arith.constant 2 : index
    %c0_108 = arith.constant 0 : index
    %c0_109 = arith.constant 0 : index
    %194 = vector.load %arg3[%c6_106, %c2_107, %c0_108, %c0_109] : memref<9x4x7x1xf32, #tpu.memory_space<vmem>>, vector<1x1x7x1xf32>
    %195 = vector.shape_cast %194 : vector<1x1x7x1xf32> to vector<7x1xf32>
    %196 = vector.extract_strided_slice %179 {offsets = [2, 0], sizes = [1, 384], strides = [1, 1]} : vector<4x384xf32> to vector<1x384xf32>
    %197 = vector.broadcast %195 : vector<7x1xf32> to vector<7x384xf32>
    %198 = vector.broadcast %196 : vector<1x384xf32> to vector<7x384xf32>
    %199 = arith.mulf %197, %198 : vector<7x384xf32>
    %200 = arith.addf %193, %199 : vector<7x384xf32>
    %c6_110 = arith.constant 6 : index
    %c3_111 = arith.constant 3 : index
    %c0_112 = arith.constant 0 : index
    %c0_113 = arith.constant 0 : index
    %201 = vector.load %arg3[%c6_110, %c3_111, %c0_112, %c0_113] : memref<9x4x7x1xf32, #tpu.memory_space<vmem>>, vector<1x1x7x1xf32>
    %202 = vector.shape_cast %201 : vector<1x1x7x1xf32> to vector<7x1xf32>
    %203 = vector.extract_strided_slice %179 {offsets = [3, 0], sizes = [1, 384], strides = [1, 1]} : vector<4x384xf32> to vector<1x384xf32>
    %204 = vector.broadcast %202 : vector<7x1xf32> to vector<7x384xf32>
    %205 = vector.broadcast %203 : vector<1x384xf32> to vector<7x384xf32>
    %206 = arith.mulf %204, %205 : vector<7x384xf32>
    %207 = arith.addf %200, %206 : vector<7x384xf32>
    %c366_i32 = arith.constant 366 : i32
    %208 = tpu.dynamic_rotate %1 by %c366_i32 dim 1 : vector<4x384xf32>, i32 -> vector<4x384xf32>
    %c7 = arith.constant 7 : index
    %c0_114 = arith.constant 0 : index
    %c0_115 = arith.constant 0 : index
    %c0_116 = arith.constant 0 : index
    %209 = vector.load %arg3[%c7, %c0_114, %c0_115, %c0_116] : memref<9x4x7x1xf32, #tpu.memory_space<vmem>>, vector<1x1x7x1xf32>
    %210 = vector.shape_cast %209 : vector<1x1x7x1xf32> to vector<7x1xf32>
    %211 = vector.extract_strided_slice %208 {offsets = [0, 0], sizes = [1, 384], strides = [1, 1]} : vector<4x384xf32> to vector<1x384xf32>
    %212 = vector.broadcast %210 : vector<7x1xf32> to vector<7x384xf32>
    %213 = vector.broadcast %211 : vector<1x384xf32> to vector<7x384xf32>
    %214 = arith.mulf %212, %213 : vector<7x384xf32>
    %215 = arith.addf %207, %214 : vector<7x384xf32>
    %c7_117 = arith.constant 7 : index
    %c1_118 = arith.constant 1 : index
    %c0_119 = arith.constant 0 : index
    %c0_120 = arith.constant 0 : index
    %216 = vector.load %arg3[%c7_117, %c1_118, %c0_119, %c0_120] : memref<9x4x7x1xf32, #tpu.memory_space<vmem>>, vector<1x1x7x1xf32>
    %217 = vector.shape_cast %216 : vector<1x1x7x1xf32> to vector<7x1xf32>
    %218 = vector.extract_strided_slice %208 {offsets = [1, 0], sizes = [1, 384], strides = [1, 1]} : vector<4x384xf32> to vector<1x384xf32>
    %219 = vector.broadcast %217 : vector<7x1xf32> to vector<7x384xf32>
    %220 = vector.broadcast %218 : vector<1x384xf32> to vector<7x384xf32>
    %221 = arith.mulf %219, %220 : vector<7x384xf32>
    %222 = arith.addf %215, %221 : vector<7x384xf32>
    %c7_121 = arith.constant 7 : index
    %c2_122 = arith.constant 2 : index
    %c0_123 = arith.constant 0 : index
    %c0_124 = arith.constant 0 : index
    %223 = vector.load %arg3[%c7_121, %c2_122, %c0_123, %c0_124] : memref<9x4x7x1xf32, #tpu.memory_space<vmem>>, vector<1x1x7x1xf32>
    %224 = vector.shape_cast %223 : vector<1x1x7x1xf32> to vector<7x1xf32>
    %225 = vector.extract_strided_slice %208 {offsets = [2, 0], sizes = [1, 384], strides = [1, 1]} : vector<4x384xf32> to vector<1x384xf32>
    %226 = vector.broadcast %224 : vector<7x1xf32> to vector<7x384xf32>
    %227 = vector.broadcast %225 : vector<1x384xf32> to vector<7x384xf32>
    %228 = arith.mulf %226, %227 : vector<7x384xf32>
    %229 = arith.addf %222, %228 : vector<7x384xf32>
    %c7_125 = arith.constant 7 : index
    %c3_126 = arith.constant 3 : index
    %c0_127 = arith.constant 0 : index
    %c0_128 = arith.constant 0 : index
    %230 = vector.load %arg3[%c7_125, %c3_126, %c0_127, %c0_128] : memref<9x4x7x1xf32, #tpu.memory_space<vmem>>, vector<1x1x7x1xf32>
    %231 = vector.shape_cast %230 : vector<1x1x7x1xf32> to vector<7x1xf32>
    %232 = vector.extract_strided_slice %208 {offsets = [3, 0], sizes = [1, 384], strides = [1, 1]} : vector<4x384xf32> to vector<1x384xf32>
    %233 = vector.broadcast %231 : vector<7x1xf32> to vector<7x384xf32>
    %234 = vector.broadcast %232 : vector<1x384xf32> to vector<7x384xf32>
    %235 = arith.mulf %233, %234 : vector<7x384xf32>
    %236 = arith.addf %229, %235 : vector<7x384xf32>
    %c365_i32 = arith.constant 365 : i32
    %237 = tpu.dynamic_rotate %1 by %c365_i32 dim 1 : vector<4x384xf32>, i32 -> vector<4x384xf32>
    %c8 = arith.constant 8 : index
    %c0_129 = arith.constant 0 : index
    %c0_130 = arith.constant 0 : index
    %c0_131 = arith.constant 0 : index
    %238 = vector.load %arg3[%c8, %c0_129, %c0_130, %c0_131] : memref<9x4x7x1xf32, #tpu.memory_space<vmem>>, vector<1x1x7x1xf32>
    %239 = vector.shape_cast %238 : vector<1x1x7x1xf32> to vector<7x1xf32>
    %240 = vector.extract_strided_slice %237 {offsets = [0, 0], sizes = [1, 384], strides = [1, 1]} : vector<4x384xf32> to vector<1x384xf32>
    %241 = vector.broadcast %239 : vector<7x1xf32> to vector<7x384xf32>
    %242 = vector.broadcast %240 : vector<1x384xf32> to vector<7x384xf32>
    %243 = arith.mulf %241, %242 : vector<7x384xf32>
    %244 = arith.addf %236, %243 : vector<7x384xf32>
    %c8_132 = arith.constant 8 : index
    %c1_133 = arith.constant 1 : index
    %c0_134 = arith.constant 0 : index
    %c0_135 = arith.constant 0 : index
    %245 = vector.load %arg3[%c8_132, %c1_133, %c0_134, %c0_135] : memref<9x4x7x1xf32, #tpu.memory_space<vmem>>, vector<1x1x7x1xf32>
    %246 = vector.shape_cast %245 : vector<1x1x7x1xf32> to vector<7x1xf32>
    %247 = vector.extract_strided_slice %237 {offsets = [1, 0], sizes = [1, 384], strides = [1, 1]} : vector<4x384xf32> to vector<1x384xf32>
    %248 = vector.broadcast %246 : vector<7x1xf32> to vector<7x384xf32>
    %249 = vector.broadcast %247 : vector<1x384xf32> to vector<7x384xf32>
    %250 = arith.mulf %248, %249 : vector<7x384xf32>
    %251 = arith.addf %244, %250 : vector<7x384xf32>
    %c8_136 = arith.constant 8 : index
    %c2_137 = arith.constant 2 : index
    %c0_138 = arith.constant 0 : index
    %c0_139 = arith.constant 0 : index
    %252 = vector.load %arg3[%c8_136, %c2_137, %c0_138, %c0_139] : memref<9x4x7x1xf32, #tpu.memory_space<vmem>>, vector<1x1x7x1xf32>
    %253 = vector.shape_cast %252 : vector<1x1x7x1xf32> to vector<7x1xf32>
    %254 = vector.extract_strided_slice %237 {offsets = [2, 0], sizes = [1, 384], strides = [1, 1]} : vector<4x384xf32> to vector<1x384xf32>
    %255 = vector.broadcast %253 : vector<7x1xf32> to vector<7x384xf32>
    %256 = vector.broadcast %254 : vector<1x384xf32> to vector<7x384xf32>
    %257 = arith.mulf %255, %256 : vector<7x384xf32>
    %258 = arith.addf %251, %257 : vector<7x384xf32>
    %c8_140 = arith.constant 8 : index
    %c3_141 = arith.constant 3 : index
    %c0_142 = arith.constant 0 : index
    %c0_143 = arith.constant 0 : index
    %259 = vector.load %arg3[%c8_140, %c3_141, %c0_142, %c0_143] : memref<9x4x7x1xf32, #tpu.memory_space<vmem>>, vector<1x1x7x1xf32>
    %260 = vector.shape_cast %259 : vector<1x1x7x1xf32> to vector<7x1xf32>
    %261 = vector.extract_strided_slice %237 {offsets = [3, 0], sizes = [1, 384], strides = [1, 1]} : vector<4x384xf32> to vector<1x384xf32>
    %262 = vector.broadcast %260 : vector<7x1xf32> to vector<7x384xf32>
    %263 = vector.broadcast %261 : vector<1x384xf32> to vector<7x384xf32>
    %264 = arith.mulf %262, %263 : vector<7x384xf32>
    %265 = arith.addf %258, %264 : vector<7x384xf32>
    %266 = vector.broadcast %3 : vector<7x1xf32> to vector<7x384xf32>
    %267 = arith.mulf %265, %266 : vector<7x384xf32>
    %268 = vector.broadcast %4 : vector<7x1xf32> to vector<7x384xf32>
    %269 = arith.addf %267, %268 : vector<7x384xf32>
    %cst_144 = arith.constant 0.000000e+00 : f32
    %270 = vector.broadcast %cst_144 : f32 to vector<7x384xf32>
    %271 = arith.maximumf %269, %270 : vector<7x384xf32>
    %272 = vector.broadcast %2 : vector<1x384xf32> to vector<7x384xf32>
    %273 = arith.mulf %271, %272 : vector<7x384xf32>
    %cst_145 = arith.constant 0.000000e+00 : f32
    %274 = vector.broadcast %cst_145 : f32 to vector<4x384xf32>
    %c19_i32_146 = arith.constant 19 : i32
    %275 = tpu.dynamic_rotate %273 by %c19_i32_146 dim 1 : vector<7x384xf32>, i32 -> vector<7x384xf32>
    %c0_147 = arith.constant 0 : index
    %c0_148 = arith.constant 0 : index
    %c0_149 = arith.constant 0 : index
    %c0_150 = arith.constant 0 : index
    %276 = vector.load %arg4[%c0_147, %c0_148, %c0_149, %c0_150] : memref<9x7x4x1xf32, #tpu.memory_space<vmem>>, vector<1x1x4x1xf32>
    %277 = vector.shape_cast %276 : vector<1x1x4x1xf32> to vector<4x1xf32>
    %278 = vector.extract_strided_slice %275 {offsets = [0, 0], sizes = [1, 384], strides = [1, 1]} : vector<7x384xf32> to vector<1x384xf32>
    %279 = vector.broadcast %277 : vector<4x1xf32> to vector<4x384xf32>
    %280 = vector.broadcast %278 : vector<1x384xf32> to vector<4x384xf32>
    %281 = arith.mulf %279, %280 : vector<4x384xf32>
    %282 = arith.addf %274, %281 : vector<4x384xf32>
    %c0_151 = arith.constant 0 : index
    %c1_152 = arith.constant 1 : index
    %c0_153 = arith.constant 0 : index
    %c0_154 = arith.constant 0 : index
    %283 = vector.load %arg4[%c0_151, %c1_152, %c0_153, %c0_154] : memref<9x7x4x1xf32, #tpu.memory_space<vmem>>, vector<1x1x4x1xf32>
    %284 = vector.shape_cast %283 : vector<1x1x4x1xf32> to vector<4x1xf32>
    %285 = vector.extract_strided_slice %275 {offsets = [1, 0], sizes = [1, 384], strides = [1, 1]} : vector<7x384xf32> to vector<1x384xf32>
    %286 = vector.broadcast %284 : vector<4x1xf32> to vector<4x384xf32>
    %287 = vector.broadcast %285 : vector<1x384xf32> to vector<4x384xf32>
    %288 = arith.mulf %286, %287 : vector<4x384xf32>
    %289 = arith.addf %282, %288 : vector<4x384xf32>
    %c0_155 = arith.constant 0 : index
    %c2_156 = arith.constant 2 : index
    %c0_157 = arith.constant 0 : index
    %c0_158 = arith.constant 0 : index
    %290 = vector.load %arg4[%c0_155, %c2_156, %c0_157, %c0_158] : memref<9x7x4x1xf32, #tpu.memory_space<vmem>>, vector<1x1x4x1xf32>
    %291 = vector.shape_cast %290 : vector<1x1x4x1xf32> to vector<4x1xf32>
    %292 = vector.extract_strided_slice %275 {offsets = [2, 0], sizes = [1, 384], strides = [1, 1]} : vector<7x384xf32> to vector<1x384xf32>
    %293 = vector.broadcast %291 : vector<4x1xf32> to vector<4x384xf32>
    %294 = vector.broadcast %292 : vector<1x384xf32> to vector<4x384xf32>
    %295 = arith.mulf %293, %294 : vector<4x384xf32>
    %296 = arith.addf %289, %295 : vector<4x384xf32>
    %c0_159 = arith.constant 0 : index
    %c3_160 = arith.constant 3 : index
    %c0_161 = arith.constant 0 : index
    %c0_162 = arith.constant 0 : index
    %297 = vector.load %arg4[%c0_159, %c3_160, %c0_161, %c0_162] : memref<9x7x4x1xf32, #tpu.memory_space<vmem>>, vector<1x1x4x1xf32>
    %298 = vector.shape_cast %297 : vector<1x1x4x1xf32> to vector<4x1xf32>
    %299 = vector.extract_strided_slice %275 {offsets = [3, 0], sizes = [1, 384], strides = [1, 1]} : vector<7x384xf32> to vector<1x384xf32>
    %300 = vector.broadcast %298 : vector<4x1xf32> to vector<4x384xf32>
    %301 = vector.broadcast %299 : vector<1x384xf32> to vector<4x384xf32>
    %302 = arith.mulf %300, %301 : vector<4x384xf32>
    %303 = arith.addf %296, %302 : vector<4x384xf32>
    %c0_163 = arith.constant 0 : index
    %c4_164 = arith.constant 4 : index
    %c0_165 = arith.constant 0 : index
    %c0_166 = arith.constant 0 : index
    %304 = vector.load %arg4[%c0_163, %c4_164, %c0_165, %c0_166] : memref<9x7x4x1xf32, #tpu.memory_space<vmem>>, vector<1x1x4x1xf32>
    %305 = vector.shape_cast %304 : vector<1x1x4x1xf32> to vector<4x1xf32>
    %306 = vector.extract_strided_slice %275 {offsets = [4, 0], sizes = [1, 384], strides = [1, 1]} : vector<7x384xf32> to vector<1x384xf32>
    %307 = vector.broadcast %305 : vector<4x1xf32> to vector<4x384xf32>
    %308 = vector.broadcast %306 : vector<1x384xf32> to vector<4x384xf32>
    %309 = arith.mulf %307, %308 : vector<4x384xf32>
    %310 = arith.addf %303, %309 : vector<4x384xf32>
    %c0_167 = arith.constant 0 : index
    %c5_168 = arith.constant 5 : index
    %c0_169 = arith.constant 0 : index
    %c0_170 = arith.constant 0 : index
    %311 = vector.load %arg4[%c0_167, %c5_168, %c0_169, %c0_170] : memref<9x7x4x1xf32, #tpu.memory_space<vmem>>, vector<1x1x4x1xf32>
    %312 = vector.shape_cast %311 : vector<1x1x4x1xf32> to vector<4x1xf32>
    %313 = vector.extract_strided_slice %275 {offsets = [5, 0], sizes = [1, 384], strides = [1, 1]} : vector<7x384xf32> to vector<1x384xf32>
    %314 = vector.broadcast %312 : vector<4x1xf32> to vector<4x384xf32>
    %315 = vector.broadcast %313 : vector<1x384xf32> to vector<4x384xf32>
    %316 = arith.mulf %314, %315 : vector<4x384xf32>
    %317 = arith.addf %310, %316 : vector<4x384xf32>
    %c0_171 = arith.constant 0 : index
    %c6_172 = arith.constant 6 : index
    %c0_173 = arith.constant 0 : index
    %c0_174 = arith.constant 0 : index
    %318 = vector.load %arg4[%c0_171, %c6_172, %c0_173, %c0_174] : memref<9x7x4x1xf32, #tpu.memory_space<vmem>>, vector<1x1x4x1xf32>
    %319 = vector.shape_cast %318 : vector<1x1x4x1xf32> to vector<4x1xf32>
    %320 = vector.extract_strided_slice %275 {offsets = [6, 0], sizes = [1, 384], strides = [1, 1]} : vector<7x384xf32> to vector<1x384xf32>
    %321 = vector.broadcast %319 : vector<4x1xf32> to vector<4x384xf32>
    %322 = vector.broadcast %320 : vector<1x384xf32> to vector<4x384xf32>
    %323 = arith.mulf %321, %322 : vector<4x384xf32>
    %324 = arith.addf %317, %323 : vector<4x384xf32>
    %c18_i32_175 = arith.constant 18 : i32
    %325 = tpu.dynamic_rotate %273 by %c18_i32_175 dim 1 : vector<7x384xf32>, i32 -> vector<7x384xf32>
    %c1_176 = arith.constant 1 : index
    %c0_177 = arith.constant 0 : index
    %c0_178 = arith.constant 0 : index
    %c0_179 = arith.constant 0 : index
    %326 = vector.load %arg4[%c1_176, %c0_177, %c0_178, %c0_179] : memref<9x7x4x1xf32, #tpu.memory_space<vmem>>, vector<1x1x4x1xf32>
    %327 = vector.shape_cast %326 : vector<1x1x4x1xf32> to vector<4x1xf32>
    %328 = vector.extract_strided_slice %325 {offsets = [0, 0], sizes = [1, 384], strides = [1, 1]} : vector<7x384xf32> to vector<1x384xf32>
    %329 = vector.broadcast %327 : vector<4x1xf32> to vector<4x384xf32>
    %330 = vector.broadcast %328 : vector<1x384xf32> to vector<4x384xf32>
    %331 = arith.mulf %329, %330 : vector<4x384xf32>
    %332 = arith.addf %324, %331 : vector<4x384xf32>
    %c1_180 = arith.constant 1 : index
    %c1_181 = arith.constant 1 : index
    %c0_182 = arith.constant 0 : index
    %c0_183 = arith.constant 0 : index
    %333 = vector.load %arg4[%c1_180, %c1_181, %c0_182, %c0_183] : memref<9x7x4x1xf32, #tpu.memory_space<vmem>>, vector<1x1x4x1xf32>
    %334 = vector.shape_cast %333 : vector<1x1x4x1xf32> to vector<4x1xf32>
    %335 = vector.extract_strided_slice %325 {offsets = [1, 0], sizes = [1, 384], strides = [1, 1]} : vector<7x384xf32> to vector<1x384xf32>
    %336 = vector.broadcast %334 : vector<4x1xf32> to vector<4x384xf32>
    %337 = vector.broadcast %335 : vector<1x384xf32> to vector<4x384xf32>
    %338 = arith.mulf %336, %337 : vector<4x384xf32>
    %339 = arith.addf %332, %338 : vector<4x384xf32>
    %c1_184 = arith.constant 1 : index
    %c2_185 = arith.constant 2 : index
    %c0_186 = arith.constant 0 : index
    %c0_187 = arith.constant 0 : index
    %340 = vector.load %arg4[%c1_184, %c2_185, %c0_186, %c0_187] : memref<9x7x4x1xf32, #tpu.memory_space<vmem>>, vector<1x1x4x1xf32>
    %341 = vector.shape_cast %340 : vector<1x1x4x1xf32> to vector<4x1xf32>
    %342 = vector.extract_strided_slice %325 {offsets = [2, 0], sizes = [1, 384], strides = [1, 1]} : vector<7x384xf32> to vector<1x384xf32>
    %343 = vector.broadcast %341 : vector<4x1xf32> to vector<4x384xf32>
    %344 = vector.broadcast %342 : vector<1x384xf32> to vector<4x384xf32>
    %345 = arith.mulf %343, %344 : vector<4x384xf32>
    %346 = arith.addf %339, %345 : vector<4x384xf32>
    %c1_188 = arith.constant 1 : index
    %c3_189 = arith.constant 3 : index
    %c0_190 = arith.constant 0 : index
    %c0_191 = arith.constant 0 : index
    %347 = vector.load %arg4[%c1_188, %c3_189, %c0_190, %c0_191] : memref<9x7x4x1xf32, #tpu.memory_space<vmem>>, vector<1x1x4x1xf32>
    %348 = vector.shape_cast %347 : vector<1x1x4x1xf32> to vector<4x1xf32>
    %349 = vector.extract_strided_slice %325 {offsets = [3, 0], sizes = [1, 384], strides = [1, 1]} : vector<7x384xf32> to vector<1x384xf32>
    %350 = vector.broadcast %348 : vector<4x1xf32> to vector<4x384xf32>
    %351 = vector.broadcast %349 : vector<1x384xf32> to vector<4x384xf32>
    %352 = arith.mulf %350, %351 : vector<4x384xf32>
    %353 = arith.addf %346, %352 : vector<4x384xf32>
    %c1_192 = arith.constant 1 : index
    %c4_193 = arith.constant 4 : index
    %c0_194 = arith.constant 0 : index
    %c0_195 = arith.constant 0 : index
    %354 = vector.load %arg4[%c1_192, %c4_193, %c0_194, %c0_195] : memref<9x7x4x1xf32, #tpu.memory_space<vmem>>, vector<1x1x4x1xf32>
    %355 = vector.shape_cast %354 : vector<1x1x4x1xf32> to vector<4x1xf32>
    %356 = vector.extract_strided_slice %325 {offsets = [4, 0], sizes = [1, 384], strides = [1, 1]} : vector<7x384xf32> to vector<1x384xf32>
    %357 = vector.broadcast %355 : vector<4x1xf32> to vector<4x384xf32>
    %358 = vector.broadcast %356 : vector<1x384xf32> to vector<4x384xf32>
    %359 = arith.mulf %357, %358 : vector<4x384xf32>
    %360 = arith.addf %353, %359 : vector<4x384xf32>
    %c1_196 = arith.constant 1 : index
    %c5_197 = arith.constant 5 : index
    %c0_198 = arith.constant 0 : index
    %c0_199 = arith.constant 0 : index
    %361 = vector.load %arg4[%c1_196, %c5_197, %c0_198, %c0_199] : memref<9x7x4x1xf32, #tpu.memory_space<vmem>>, vector<1x1x4x1xf32>
    %362 = vector.shape_cast %361 : vector<1x1x4x1xf32> to vector<4x1xf32>
    %363 = vector.extract_strided_slice %325 {offsets = [5, 0], sizes = [1, 384], strides = [1, 1]} : vector<7x384xf32> to vector<1x384xf32>
    %364 = vector.broadcast %362 : vector<4x1xf32> to vector<4x384xf32>
    %365 = vector.broadcast %363 : vector<1x384xf32> to vector<4x384xf32>
    %366 = arith.mulf %364, %365 : vector<4x384xf32>
    %367 = arith.addf %360, %366 : vector<4x384xf32>
    %c1_200 = arith.constant 1 : index
    %c6_201 = arith.constant 6 : index
    %c0_202 = arith.constant 0 : index
    %c0_203 = arith.constant 0 : index
    %368 = vector.load %arg4[%c1_200, %c6_201, %c0_202, %c0_203] : memref<9x7x4x1xf32, #tpu.memory_space<vmem>>, vector<1x1x4x1xf32>
    %369 = vector.shape_cast %368 : vector<1x1x4x1xf32> to vector<4x1xf32>
    %370 = vector.extract_strided_slice %325 {offsets = [6, 0], sizes = [1, 384], strides = [1, 1]} : vector<7x384xf32> to vector<1x384xf32>
    %371 = vector.broadcast %369 : vector<4x1xf32> to vector<4x384xf32>
    %372 = vector.broadcast %370 : vector<1x384xf32> to vector<4x384xf32>
    %373 = arith.mulf %371, %372 : vector<4x384xf32>
    %374 = arith.addf %367, %373 : vector<4x384xf32>
    %c17_i32_204 = arith.constant 17 : i32
    %375 = tpu.dynamic_rotate %273 by %c17_i32_204 dim 1 : vector<7x384xf32>, i32 -> vector<7x384xf32>
    %c2_205 = arith.constant 2 : index
    %c0_206 = arith.constant 0 : index
    %c0_207 = arith.constant 0 : index
    %c0_208 = arith.constant 0 : index
    %376 = vector.load %arg4[%c2_205, %c0_206, %c0_207, %c0_208] : memref<9x7x4x1xf32, #tpu.memory_space<vmem>>, vector<1x1x4x1xf32>
    %377 = vector.shape_cast %376 : vector<1x1x4x1xf32> to vector<4x1xf32>
    %378 = vector.extract_strided_slice %375 {offsets = [0, 0], sizes = [1, 384], strides = [1, 1]} : vector<7x384xf32> to vector<1x384xf32>
    %379 = vector.broadcast %377 : vector<4x1xf32> to vector<4x384xf32>
    %380 = vector.broadcast %378 : vector<1x384xf32> to vector<4x384xf32>
    %381 = arith.mulf %379, %380 : vector<4x384xf32>
    %382 = arith.addf %374, %381 : vector<4x384xf32>
    %c2_209 = arith.constant 2 : index
    %c1_210 = arith.constant 1 : index
    %c0_211 = arith.constant 0 : index
    %c0_212 = arith.constant 0 : index
    %383 = vector.load %arg4[%c2_209, %c1_210, %c0_211, %c0_212] : memref<9x7x4x1xf32, #tpu.memory_space<vmem>>, vector<1x1x4x1xf32>
    %384 = vector.shape_cast %383 : vector<1x1x4x1xf32> to vector<4x1xf32>
    %385 = vector.extract_strided_slice %375 {offsets = [1, 0], sizes = [1, 384], strides = [1, 1]} : vector<7x384xf32> to vector<1x384xf32>
    %386 = vector.broadcast %384 : vector<4x1xf32> to vector<4x384xf32>
    %387 = vector.broadcast %385 : vector<1x384xf32> to vector<4x384xf32>
    %388 = arith.mulf %386, %387 : vector<4x384xf32>
    %389 = arith.addf %382, %388 : vector<4x384xf32>
    %c2_213 = arith.constant 2 : index
    %c2_214 = arith.constant 2 : index
    %c0_215 = arith.constant 0 : index
    %c0_216 = arith.constant 0 : index
    %390 = vector.load %arg4[%c2_213, %c2_214, %c0_215, %c0_216] : memref<9x7x4x1xf32, #tpu.memory_space<vmem>>, vector<1x1x4x1xf32>
    %391 = vector.shape_cast %390 : vector<1x1x4x1xf32> to vector<4x1xf32>
    %392 = vector.extract_strided_slice %375 {offsets = [2, 0], sizes = [1, 384], strides = [1, 1]} : vector<7x384xf32> to vector<1x384xf32>
    %393 = vector.broadcast %391 : vector<4x1xf32> to vector<4x384xf32>
    %394 = vector.broadcast %392 : vector<1x384xf32> to vector<4x384xf32>
    %395 = arith.mulf %393, %394 : vector<4x384xf32>
    %396 = arith.addf %389, %395 : vector<4x384xf32>
    %c2_217 = arith.constant 2 : index
    %c3_218 = arith.constant 3 : index
    %c0_219 = arith.constant 0 : index
    %c0_220 = arith.constant 0 : index
    %397 = vector.load %arg4[%c2_217, %c3_218, %c0_219, %c0_220] : memref<9x7x4x1xf32, #tpu.memory_space<vmem>>, vector<1x1x4x1xf32>
    %398 = vector.shape_cast %397 : vector<1x1x4x1xf32> to vector<4x1xf32>
    %399 = vector.extract_strided_slice %375 {offsets = [3, 0], sizes = [1, 384], strides = [1, 1]} : vector<7x384xf32> to vector<1x384xf32>
    %400 = vector.broadcast %398 : vector<4x1xf32> to vector<4x384xf32>
    %401 = vector.broadcast %399 : vector<1x384xf32> to vector<4x384xf32>
    %402 = arith.mulf %400, %401 : vector<4x384xf32>
    %403 = arith.addf %396, %402 : vector<4x384xf32>
    %c2_221 = arith.constant 2 : index
    %c4_222 = arith.constant 4 : index
    %c0_223 = arith.constant 0 : index
    %c0_224 = arith.constant 0 : index
    %404 = vector.load %arg4[%c2_221, %c4_222, %c0_223, %c0_224] : memref<9x7x4x1xf32, #tpu.memory_space<vmem>>, vector<1x1x4x1xf32>
    %405 = vector.shape_cast %404 : vector<1x1x4x1xf32> to vector<4x1xf32>
    %406 = vector.extract_strided_slice %375 {offsets = [4, 0], sizes = [1, 384], strides = [1, 1]} : vector<7x384xf32> to vector<1x384xf32>
    %407 = vector.broadcast %405 : vector<4x1xf32> to vector<4x384xf32>
    %408 = vector.broadcast %406 : vector<1x384xf32> to vector<4x384xf32>
    %409 = arith.mulf %407, %408 : vector<4x384xf32>
    %410 = arith.addf %403, %409 : vector<4x384xf32>
    %c2_225 = arith.constant 2 : index
    %c5_226 = arith.constant 5 : index
    %c0_227 = arith.constant 0 : index
    %c0_228 = arith.constant 0 : index
    %411 = vector.load %arg4[%c2_225, %c5_226, %c0_227, %c0_228] : memref<9x7x4x1xf32, #tpu.memory_space<vmem>>, vector<1x1x4x1xf32>
    %412 = vector.shape_cast %411 : vector<1x1x4x1xf32> to vector<4x1xf32>
    %413 = vector.extract_strided_slice %375 {offsets = [5, 0], sizes = [1, 384], strides = [1, 1]} : vector<7x384xf32> to vector<1x384xf32>
    %414 = vector.broadcast %412 : vector<4x1xf32> to vector<4x384xf32>
    %415 = vector.broadcast %413 : vector<1x384xf32> to vector<4x384xf32>
    %416 = arith.mulf %414, %415 : vector<4x384xf32>
    %417 = arith.addf %410, %416 : vector<4x384xf32>
    %c2_229 = arith.constant 2 : index
    %c6_230 = arith.constant 6 : index
    %c0_231 = arith.constant 0 : index
    %c0_232 = arith.constant 0 : index
    %418 = vector.load %arg4[%c2_229, %c6_230, %c0_231, %c0_232] : memref<9x7x4x1xf32, #tpu.memory_space<vmem>>, vector<1x1x4x1xf32>
    %419 = vector.shape_cast %418 : vector<1x1x4x1xf32> to vector<4x1xf32>
    %420 = vector.extract_strided_slice %375 {offsets = [6, 0], sizes = [1, 384], strides = [1, 1]} : vector<7x384xf32> to vector<1x384xf32>
    %421 = vector.broadcast %419 : vector<4x1xf32> to vector<4x384xf32>
    %422 = vector.broadcast %420 : vector<1x384xf32> to vector<4x384xf32>
    %423 = arith.mulf %421, %422 : vector<4x384xf32>
    %424 = arith.addf %417, %423 : vector<4x384xf32>
    %c1_i32_233 = arith.constant 1 : i32
    %425 = tpu.dynamic_rotate %273 by %c1_i32_233 dim 1 : vector<7x384xf32>, i32 -> vector<7x384xf32>
    %c3_234 = arith.constant 3 : index
    %c0_235 = arith.constant 0 : index
    %c0_236 = arith.constant 0 : index
    %c0_237 = arith.constant 0 : index
    %426 = vector.load %arg4[%c3_234, %c0_235, %c0_236, %c0_237] : memref<9x7x4x1xf32, #tpu.memory_space<vmem>>, vector<1x1x4x1xf32>
    %427 = vector.shape_cast %426 : vector<1x1x4x1xf32> to vector<4x1xf32>
    %428 = vector.extract_strided_slice %425 {offsets = [0, 0], sizes = [1, 384], strides = [1, 1]} : vector<7x384xf32> to vector<1x384xf32>
    %429 = vector.broadcast %427 : vector<4x1xf32> to vector<4x384xf32>
    %430 = vector.broadcast %428 : vector<1x384xf32> to vector<4x384xf32>
    %431 = arith.mulf %429, %430 : vector<4x384xf32>
    %432 = arith.addf %424, %431 : vector<4x384xf32>
    %c3_238 = arith.constant 3 : index
    %c1_239 = arith.constant 1 : index
    %c0_240 = arith.constant 0 : index
    %c0_241 = arith.constant 0 : index
    %433 = vector.load %arg4[%c3_238, %c1_239, %c0_240, %c0_241] : memref<9x7x4x1xf32, #tpu.memory_space<vmem>>, vector<1x1x4x1xf32>
    %434 = vector.shape_cast %433 : vector<1x1x4x1xf32> to vector<4x1xf32>
    %435 = vector.extract_strided_slice %425 {offsets = [1, 0], sizes = [1, 384], strides = [1, 1]} : vector<7x384xf32> to vector<1x384xf32>
    %436 = vector.broadcast %434 : vector<4x1xf32> to vector<4x384xf32>
    %437 = vector.broadcast %435 : vector<1x384xf32> to vector<4x384xf32>
    %438 = arith.mulf %436, %437 : vector<4x384xf32>
    %439 = arith.addf %432, %438 : vector<4x384xf32>
    %c3_242 = arith.constant 3 : index
    %c2_243 = arith.constant 2 : index
    %c0_244 = arith.constant 0 : index
    %c0_245 = arith.constant 0 : index
    %440 = vector.load %arg4[%c3_242, %c2_243, %c0_244, %c0_245] : memref<9x7x4x1xf32, #tpu.memory_space<vmem>>, vector<1x1x4x1xf32>
    %441 = vector.shape_cast %440 : vector<1x1x4x1xf32> to vector<4x1xf32>
    %442 = vector.extract_strided_slice %425 {offsets = [2, 0], sizes = [1, 384], strides = [1, 1]} : vector<7x384xf32> to vector<1x384xf32>
    %443 = vector.broadcast %441 : vector<4x1xf32> to vector<4x384xf32>
    %444 = vector.broadcast %442 : vector<1x384xf32> to vector<4x384xf32>
    %445 = arith.mulf %443, %444 : vector<4x384xf32>
    %446 = arith.addf %439, %445 : vector<4x384xf32>
    %c3_246 = arith.constant 3 : index
    %c3_247 = arith.constant 3 : index
    %c0_248 = arith.constant 0 : index
    %c0_249 = arith.constant 0 : index
    %447 = vector.load %arg4[%c3_246, %c3_247, %c0_248, %c0_249] : memref<9x7x4x1xf32, #tpu.memory_space<vmem>>, vector<1x1x4x1xf32>
    %448 = vector.shape_cast %447 : vector<1x1x4x1xf32> to vector<4x1xf32>
    %449 = vector.extract_strided_slice %425 {offsets = [3, 0], sizes = [1, 384], strides = [1, 1]} : vector<7x384xf32> to vector<1x384xf32>
    %450 = vector.broadcast %448 : vector<4x1xf32> to vector<4x384xf32>
    %451 = vector.broadcast %449 : vector<1x384xf32> to vector<4x384xf32>
    %452 = arith.mulf %450, %451 : vector<4x384xf32>
    %453 = arith.addf %446, %452 : vector<4x384xf32>
    %c3_250 = arith.constant 3 : index
    %c4_251 = arith.constant 4 : index
    %c0_252 = arith.constant 0 : index
    %c0_253 = arith.constant 0 : index
    %454 = vector.load %arg4[%c3_250, %c4_251, %c0_252, %c0_253] : memref<9x7x4x1xf32, #tpu.memory_space<vmem>>, vector<1x1x4x1xf32>
    %455 = vector.shape_cast %454 : vector<1x1x4x1xf32> to vector<4x1xf32>
    %456 = vector.extract_strided_slice %425 {offsets = [4, 0], sizes = [1, 384], strides = [1, 1]} : vector<7x384xf32> to vector<1x384xf32>
    %457 = vector.broadcast %455 : vector<4x1xf32> to vector<4x384xf32>
    %458 = vector.broadcast %456 : vector<1x384xf32> to vector<4x384xf32>
    %459 = arith.mulf %457, %458 : vector<4x384xf32>
    %460 = arith.addf %453, %459 : vector<4x384xf32>
    %c3_254 = arith.constant 3 : index
    %c5_255 = arith.constant 5 : index
    %c0_256 = arith.constant 0 : index
    %c0_257 = arith.constant 0 : index
    %461 = vector.load %arg4[%c3_254, %c5_255, %c0_256, %c0_257] : memref<9x7x4x1xf32, #tpu.memory_space<vmem>>, vector<1x1x4x1xf32>
    %462 = vector.shape_cast %461 : vector<1x1x4x1xf32> to vector<4x1xf32>
    %463 = vector.extract_strided_slice %425 {offsets = [5, 0], sizes = [1, 384], strides = [1, 1]} : vector<7x384xf32> to vector<1x384xf32>
    %464 = vector.broadcast %462 : vector<4x1xf32> to vector<4x384xf32>
    %465 = vector.broadcast %463 : vector<1x384xf32> to vector<4x384xf32>
    %466 = arith.mulf %464, %465 : vector<4x384xf32>
    %467 = arith.addf %460, %466 : vector<4x384xf32>
    %c3_258 = arith.constant 3 : index
    %c6_259 = arith.constant 6 : index
    %c0_260 = arith.constant 0 : index
    %c0_261 = arith.constant 0 : index
    %468 = vector.load %arg4[%c3_258, %c6_259, %c0_260, %c0_261] : memref<9x7x4x1xf32, #tpu.memory_space<vmem>>, vector<1x1x4x1xf32>
    %469 = vector.shape_cast %468 : vector<1x1x4x1xf32> to vector<4x1xf32>
    %470 = vector.extract_strided_slice %425 {offsets = [6, 0], sizes = [1, 384], strides = [1, 1]} : vector<7x384xf32> to vector<1x384xf32>
    %471 = vector.broadcast %469 : vector<4x1xf32> to vector<4x384xf32>
    %472 = vector.broadcast %470 : vector<1x384xf32> to vector<4x384xf32>
    %473 = arith.mulf %471, %472 : vector<4x384xf32>
    %474 = arith.addf %467, %473 : vector<4x384xf32>
    %c4_262 = arith.constant 4 : index
    %c0_263 = arith.constant 0 : index
    %c0_264 = arith.constant 0 : index
    %c0_265 = arith.constant 0 : index
    %475 = vector.load %arg4[%c4_262, %c0_263, %c0_264, %c0_265] : memref<9x7x4x1xf32, #tpu.memory_space<vmem>>, vector<1x1x4x1xf32>
    %476 = vector.shape_cast %475 : vector<1x1x4x1xf32> to vector<4x1xf32>
    %477 = vector.extract_strided_slice %273 {offsets = [0, 0], sizes = [1, 384], strides = [1, 1]} : vector<7x384xf32> to vector<1x384xf32>
    %478 = vector.broadcast %476 : vector<4x1xf32> to vector<4x384xf32>
    %479 = vector.broadcast %477 : vector<1x384xf32> to vector<4x384xf32>
    %480 = arith.mulf %478, %479 : vector<4x384xf32>
    %481 = arith.addf %474, %480 : vector<4x384xf32>
    %c4_266 = arith.constant 4 : index
    %c1_267 = arith.constant 1 : index
    %c0_268 = arith.constant 0 : index
    %c0_269 = arith.constant 0 : index
    %482 = vector.load %arg4[%c4_266, %c1_267, %c0_268, %c0_269] : memref<9x7x4x1xf32, #tpu.memory_space<vmem>>, vector<1x1x4x1xf32>
    %483 = vector.shape_cast %482 : vector<1x1x4x1xf32> to vector<4x1xf32>
    %484 = vector.extract_strided_slice %273 {offsets = [1, 0], sizes = [1, 384], strides = [1, 1]} : vector<7x384xf32> to vector<1x384xf32>
    %485 = vector.broadcast %483 : vector<4x1xf32> to vector<4x384xf32>
    %486 = vector.broadcast %484 : vector<1x384xf32> to vector<4x384xf32>
    %487 = arith.mulf %485, %486 : vector<4x384xf32>
    %488 = arith.addf %481, %487 : vector<4x384xf32>
    %c4_270 = arith.constant 4 : index
    %c2_271 = arith.constant 2 : index
    %c0_272 = arith.constant 0 : index
    %c0_273 = arith.constant 0 : index
    %489 = vector.load %arg4[%c4_270, %c2_271, %c0_272, %c0_273] : memref<9x7x4x1xf32, #tpu.memory_space<vmem>>, vector<1x1x4x1xf32>
    %490 = vector.shape_cast %489 : vector<1x1x4x1xf32> to vector<4x1xf32>
    %491 = vector.extract_strided_slice %273 {offsets = [2, 0], sizes = [1, 384], strides = [1, 1]} : vector<7x384xf32> to vector<1x384xf32>
    %492 = vector.broadcast %490 : vector<4x1xf32> to vector<4x384xf32>
    %493 = vector.broadcast %491 : vector<1x384xf32> to vector<4x384xf32>
    %494 = arith.mulf %492, %493 : vector<4x384xf32>
    %495 = arith.addf %488, %494 : vector<4x384xf32>
    %c4_274 = arith.constant 4 : index
    %c3_275 = arith.constant 3 : index
    %c0_276 = arith.constant 0 : index
    %c0_277 = arith.constant 0 : index
    %496 = vector.load %arg4[%c4_274, %c3_275, %c0_276, %c0_277] : memref<9x7x4x1xf32, #tpu.memory_space<vmem>>, vector<1x1x4x1xf32>
    %497 = vector.shape_cast %496 : vector<1x1x4x1xf32> to vector<4x1xf32>
    %498 = vector.extract_strided_slice %273 {offsets = [3, 0], sizes = [1, 384], strides = [1, 1]} : vector<7x384xf32> to vector<1x384xf32>
    %499 = vector.broadcast %497 : vector<4x1xf32> to vector<4x384xf32>
    %500 = vector.broadcast %498 : vector<1x384xf32> to vector<4x384xf32>
    %501 = arith.mulf %499, %500 : vector<4x384xf32>
    %502 = arith.addf %495, %501 : vector<4x384xf32>
    %c4_278 = arith.constant 4 : index
    %c4_279 = arith.constant 4 : index
    %c0_280 = arith.constant 0 : index
    %c0_281 = arith.constant 0 : index
    %503 = vector.load %arg4[%c4_278, %c4_279, %c0_280, %c0_281] : memref<9x7x4x1xf32, #tpu.memory_space<vmem>>, vector<1x1x4x1xf32>
    %504 = vector.shape_cast %503 : vector<1x1x4x1xf32> to vector<4x1xf32>
    %505 = vector.extract_strided_slice %273 {offsets = [4, 0], sizes = [1, 384], strides = [1, 1]} : vector<7x384xf32> to vector<1x384xf32>
    %506 = vector.broadcast %504 : vector<4x1xf32> to vector<4x384xf32>
    %507 = vector.broadcast %505 : vector<1x384xf32> to vector<4x384xf32>
    %508 = arith.mulf %506, %507 : vector<4x384xf32>
    %509 = arith.addf %502, %508 : vector<4x384xf32>
    %c4_282 = arith.constant 4 : index
    %c5_283 = arith.constant 5 : index
    %c0_284 = arith.constant 0 : index
    %c0_285 = arith.constant 0 : index
    %510 = vector.load %arg4[%c4_282, %c5_283, %c0_284, %c0_285] : memref<9x7x4x1xf32, #tpu.memory_space<vmem>>, vector<1x1x4x1xf32>
    %511 = vector.shape_cast %510 : vector<1x1x4x1xf32> to vector<4x1xf32>
    %512 = vector.extract_strided_slice %273 {offsets = [5, 0], sizes = [1, 384], strides = [1, 1]} : vector<7x384xf32> to vector<1x384xf32>
    %513 = vector.broadcast %511 : vector<4x1xf32> to vector<4x384xf32>
    %514 = vector.broadcast %512 : vector<1x384xf32> to vector<4x384xf32>
    %515 = arith.mulf %513, %514 : vector<4x384xf32>
    %516 = arith.addf %509, %515 : vector<4x384xf32>
    %c4_286 = arith.constant 4 : index
    %c6_287 = arith.constant 6 : index
    %c0_288 = arith.constant 0 : index
    %c0_289 = arith.constant 0 : index
    %517 = vector.load %arg4[%c4_286, %c6_287, %c0_288, %c0_289] : memref<9x7x4x1xf32, #tpu.memory_space<vmem>>, vector<1x1x4x1xf32>
    %518 = vector.shape_cast %517 : vector<1x1x4x1xf32> to vector<4x1xf32>
    %519 = vector.extract_strided_slice %273 {offsets = [6, 0], sizes = [1, 384], strides = [1, 1]} : vector<7x384xf32> to vector<1x384xf32>
    %520 = vector.broadcast %518 : vector<4x1xf32> to vector<4x384xf32>
    %521 = vector.broadcast %519 : vector<1x384xf32> to vector<4x384xf32>
    %522 = arith.mulf %520, %521 : vector<4x384xf32>
    %523 = arith.addf %516, %522 : vector<4x384xf32>
    %c383_i32_290 = arith.constant 383 : i32
    %524 = tpu.dynamic_rotate %273 by %c383_i32_290 dim 1 : vector<7x384xf32>, i32 -> vector<7x384xf32>
    %c5_291 = arith.constant 5 : index
    %c0_292 = arith.constant 0 : index
    %c0_293 = arith.constant 0 : index
    %c0_294 = arith.constant 0 : index
    %525 = vector.load %arg4[%c5_291, %c0_292, %c0_293, %c0_294] : memref<9x7x4x1xf32, #tpu.memory_space<vmem>>, vector<1x1x4x1xf32>
    %526 = vector.shape_cast %525 : vector<1x1x4x1xf32> to vector<4x1xf32>
    %527 = vector.extract_strided_slice %524 {offsets = [0, 0], sizes = [1, 384], strides = [1, 1]} : vector<7x384xf32> to vector<1x384xf32>
    %528 = vector.broadcast %526 : vector<4x1xf32> to vector<4x384xf32>
    %529 = vector.broadcast %527 : vector<1x384xf32> to vector<4x384xf32>
    %530 = arith.mulf %528, %529 : vector<4x384xf32>
    %531 = arith.addf %523, %530 : vector<4x384xf32>
    %c5_295 = arith.constant 5 : index
    %c1_296 = arith.constant 1 : index
    %c0_297 = arith.constant 0 : index
    %c0_298 = arith.constant 0 : index
    %532 = vector.load %arg4[%c5_295, %c1_296, %c0_297, %c0_298] : memref<9x7x4x1xf32, #tpu.memory_space<vmem>>, vector<1x1x4x1xf32>
    %533 = vector.shape_cast %532 : vector<1x1x4x1xf32> to vector<4x1xf32>
    %534 = vector.extract_strided_slice %524 {offsets = [1, 0], sizes = [1, 384], strides = [1, 1]} : vector<7x384xf32> to vector<1x384xf32>
    %535 = vector.broadcast %533 : vector<4x1xf32> to vector<4x384xf32>
    %536 = vector.broadcast %534 : vector<1x384xf32> to vector<4x384xf32>
    %537 = arith.mulf %535, %536 : vector<4x384xf32>
    %538 = arith.addf %531, %537 : vector<4x384xf32>
    %c5_299 = arith.constant 5 : index
    %c2_300 = arith.constant 2 : index
    %c0_301 = arith.constant 0 : index
    %c0_302 = arith.constant 0 : index
    %539 = vector.load %arg4[%c5_299, %c2_300, %c0_301, %c0_302] : memref<9x7x4x1xf32, #tpu.memory_space<vmem>>, vector<1x1x4x1xf32>
    %540 = vector.shape_cast %539 : vector<1x1x4x1xf32> to vector<4x1xf32>
    %541 = vector.extract_strided_slice %524 {offsets = [2, 0], sizes = [1, 384], strides = [1, 1]} : vector<7x384xf32> to vector<1x384xf32>
    %542 = vector.broadcast %540 : vector<4x1xf32> to vector<4x384xf32>
    %543 = vector.broadcast %541 : vector<1x384xf32> to vector<4x384xf32>
    %544 = arith.mulf %542, %543 : vector<4x384xf32>
    %545 = arith.addf %538, %544 : vector<4x384xf32>
    %c5_303 = arith.constant 5 : index
    %c3_304 = arith.constant 3 : index
    %c0_305 = arith.constant 0 : index
    %c0_306 = arith.constant 0 : index
    %546 = vector.load %arg4[%c5_303, %c3_304, %c0_305, %c0_306] : memref<9x7x4x1xf32, #tpu.memory_space<vmem>>, vector<1x1x4x1xf32>
    %547 = vector.shape_cast %546 : vector<1x1x4x1xf32> to vector<4x1xf32>
    %548 = vector.extract_strided_slice %524 {offsets = [3, 0], sizes = [1, 384], strides = [1, 1]} : vector<7x384xf32> to vector<1x384xf32>
    %549 = vector.broadcast %547 : vector<4x1xf32> to vector<4x384xf32>
    %550 = vector.broadcast %548 : vector<1x384xf32> to vector<4x384xf32>
    %551 = arith.mulf %549, %550 : vector<4x384xf32>
    %552 = arith.addf %545, %551 : vector<4x384xf32>
    %c5_307 = arith.constant 5 : index
    %c4_308 = arith.constant 4 : index
    %c0_309 = arith.constant 0 : index
    %c0_310 = arith.constant 0 : index
    %553 = vector.load %arg4[%c5_307, %c4_308, %c0_309, %c0_310] : memref<9x7x4x1xf32, #tpu.memory_space<vmem>>, vector<1x1x4x1xf32>
    %554 = vector.shape_cast %553 : vector<1x1x4x1xf32> to vector<4x1xf32>
    %555 = vector.extract_strided_slice %524 {offsets = [4, 0], sizes = [1, 384], strides = [1, 1]} : vector<7x384xf32> to vector<1x384xf32>
    %556 = vector.broadcast %554 : vector<4x1xf32> to vector<4x384xf32>
    %557 = vector.broadcast %555 : vector<1x384xf32> to vector<4x384xf32>
    %558 = arith.mulf %556, %557 : vector<4x384xf32>
    %559 = arith.addf %552, %558 : vector<4x384xf32>
    %c5_311 = arith.constant 5 : index
    %c5_312 = arith.constant 5 : index
    %c0_313 = arith.constant 0 : index
    %c0_314 = arith.constant 0 : index
    %560 = vector.load %arg4[%c5_311, %c5_312, %c0_313, %c0_314] : memref<9x7x4x1xf32, #tpu.memory_space<vmem>>, vector<1x1x4x1xf32>
    %561 = vector.shape_cast %560 : vector<1x1x4x1xf32> to vector<4x1xf32>
    %562 = vector.extract_strided_slice %524 {offsets = [5, 0], sizes = [1, 384], strides = [1, 1]} : vector<7x384xf32> to vector<1x384xf32>
    %563 = vector.broadcast %561 : vector<4x1xf32> to vector<4x384xf32>
    %564 = vector.broadcast %562 : vector<1x384xf32> to vector<4x384xf32>
    %565 = arith.mulf %563, %564 : vector<4x384xf32>
    %566 = arith.addf %559, %565 : vector<4x384xf32>
    %c5_315 = arith.constant 5 : index
    %c6_316 = arith.constant 6 : index
    %c0_317 = arith.constant 0 : index
    %c0_318 = arith.constant 0 : index
    %567 = vector.load %arg4[%c5_315, %c6_316, %c0_317, %c0_318] : memref<9x7x4x1xf32, #tpu.memory_space<vmem>>, vector<1x1x4x1xf32>
    %568 = vector.shape_cast %567 : vector<1x1x4x1xf32> to vector<4x1xf32>
    %569 = vector.extract_strided_slice %524 {offsets = [6, 0], sizes = [1, 384], strides = [1, 1]} : vector<7x384xf32> to vector<1x384xf32>
    %570 = vector.broadcast %568 : vector<4x1xf32> to vector<4x384xf32>
    %571 = vector.broadcast %569 : vector<1x384xf32> to vector<4x384xf32>
    %572 = arith.mulf %570, %571 : vector<4x384xf32>
    %573 = arith.addf %566, %572 : vector<4x384xf32>
    %c367_i32_319 = arith.constant 367 : i32
    %574 = tpu.dynamic_rotate %273 by %c367_i32_319 dim 1 : vector<7x384xf32>, i32 -> vector<7x384xf32>
    %c6_320 = arith.constant 6 : index
    %c0_321 = arith.constant 0 : index
    %c0_322 = arith.constant 0 : index
    %c0_323 = arith.constant 0 : index
    %575 = vector.load %arg4[%c6_320, %c0_321, %c0_322, %c0_323] : memref<9x7x4x1xf32, #tpu.memory_space<vmem>>, vector<1x1x4x1xf32>
    %576 = vector.shape_cast %575 : vector<1x1x4x1xf32> to vector<4x1xf32>
    %577 = vector.extract_strided_slice %574 {offsets = [0, 0], sizes = [1, 384], strides = [1, 1]} : vector<7x384xf32> to vector<1x384xf32>
    %578 = vector.broadcast %576 : vector<4x1xf32> to vector<4x384xf32>
    %579 = vector.broadcast %577 : vector<1x384xf32> to vector<4x384xf32>
    %580 = arith.mulf %578, %579 : vector<4x384xf32>
    %581 = arith.addf %573, %580 : vector<4x384xf32>
    %c6_324 = arith.constant 6 : index
    %c1_325 = arith.constant 1 : index
    %c0_326 = arith.constant 0 : index
    %c0_327 = arith.constant 0 : index
    %582 = vector.load %arg4[%c6_324, %c1_325, %c0_326, %c0_327] : memref<9x7x4x1xf32, #tpu.memory_space<vmem>>, vector<1x1x4x1xf32>
    %583 = vector.shape_cast %582 : vector<1x1x4x1xf32> to vector<4x1xf32>
    %584 = vector.extract_strided_slice %574 {offsets = [1, 0], sizes = [1, 384], strides = [1, 1]} : vector<7x384xf32> to vector<1x384xf32>
    %585 = vector.broadcast %583 : vector<4x1xf32> to vector<4x384xf32>
    %586 = vector.broadcast %584 : vector<1x384xf32> to vector<4x384xf32>
    %587 = arith.mulf %585, %586 : vector<4x384xf32>
    %588 = arith.addf %581, %587 : vector<4x384xf32>
    %c6_328 = arith.constant 6 : index
    %c2_329 = arith.constant 2 : index
    %c0_330 = arith.constant 0 : index
    %c0_331 = arith.constant 0 : index
    %589 = vector.load %arg4[%c6_328, %c2_329, %c0_330, %c0_331] : memref<9x7x4x1xf32, #tpu.memory_space<vmem>>, vector<1x1x4x1xf32>
    %590 = vector.shape_cast %589 : vector<1x1x4x1xf32> to vector<4x1xf32>
    %591 = vector.extract_strided_slice %574 {offsets = [2, 0], sizes = [1, 384], strides = [1, 1]} : vector<7x384xf32> to vector<1x384xf32>
    %592 = vector.broadcast %590 : vector<4x1xf32> to vector<4x384xf32>
    %593 = vector.broadcast %591 : vector<1x384xf32> to vector<4x384xf32>
    %594 = arith.mulf %592, %593 : vector<4x384xf32>
    %595 = arith.addf %588, %594 : vector<4x384xf32>
    %c6_332 = arith.constant 6 : index
    %c3_333 = arith.constant 3 : index
    %c0_334 = arith.constant 0 : index
    %c0_335 = arith.constant 0 : index
    %596 = vector.load %arg4[%c6_332, %c3_333, %c0_334, %c0_335] : memref<9x7x4x1xf32, #tpu.memory_space<vmem>>, vector<1x1x4x1xf32>
    %597 = vector.shape_cast %596 : vector<1x1x4x1xf32> to vector<4x1xf32>
    %598 = vector.extract_strided_slice %574 {offsets = [3, 0], sizes = [1, 384], strides = [1, 1]} : vector<7x384xf32> to vector<1x384xf32>
    %599 = vector.broadcast %597 : vector<4x1xf32> to vector<4x384xf32>
    %600 = vector.broadcast %598 : vector<1x384xf32> to vector<4x384xf32>
    %601 = arith.mulf %599, %600 : vector<4x384xf32>
    %602 = arith.addf %595, %601 : vector<4x384xf32>
    %c6_336 = arith.constant 6 : index
    %c4_337 = arith.constant 4 : index
    %c0_338 = arith.constant 0 : index
    %c0_339 = arith.constant 0 : index
    %603 = vector.load %arg4[%c6_336, %c4_337, %c0_338, %c0_339] : memref<9x7x4x1xf32, #tpu.memory_space<vmem>>, vector<1x1x4x1xf32>
    %604 = vector.shape_cast %603 : vector<1x1x4x1xf32> to vector<4x1xf32>
    %605 = vector.extract_strided_slice %574 {offsets = [4, 0], sizes = [1, 384], strides = [1, 1]} : vector<7x384xf32> to vector<1x384xf32>
    %606 = vector.broadcast %604 : vector<4x1xf32> to vector<4x384xf32>
    %607 = vector.broadcast %605 : vector<1x384xf32> to vector<4x384xf32>
    %608 = arith.mulf %606, %607 : vector<4x384xf32>
    %609 = arith.addf %602, %608 : vector<4x384xf32>
    %c6_340 = arith.constant 6 : index
    %c5_341 = arith.constant 5 : index
    %c0_342 = arith.constant 0 : index
    %c0_343 = arith.constant 0 : index
    %610 = vector.load %arg4[%c6_340, %c5_341, %c0_342, %c0_343] : memref<9x7x4x1xf32, #tpu.memory_space<vmem>>, vector<1x1x4x1xf32>
    %611 = vector.shape_cast %610 : vector<1x1x4x1xf32> to vector<4x1xf32>
    %612 = vector.extract_strided_slice %574 {offsets = [5, 0], sizes = [1, 384], strides = [1, 1]} : vector<7x384xf32> to vector<1x384xf32>
    %613 = vector.broadcast %611 : vector<4x1xf32> to vector<4x384xf32>
    %614 = vector.broadcast %612 : vector<1x384xf32> to vector<4x384xf32>
    %615 = arith.mulf %613, %614 : vector<4x384xf32>
    %616 = arith.addf %609, %615 : vector<4x384xf32>
    %c6_344 = arith.constant 6 : index
    %c6_345 = arith.constant 6 : index
    %c0_346 = arith.constant 0 : index
    %c0_347 = arith.constant 0 : index
    %617 = vector.load %arg4[%c6_344, %c6_345, %c0_346, %c0_347] : memref<9x7x4x1xf32, #tpu.memory_space<vmem>>, vector<1x1x4x1xf32>
    %618 = vector.shape_cast %617 : vector<1x1x4x1xf32> to vector<4x1xf32>
    %619 = vector.extract_strided_slice %574 {offsets = [6, 0], sizes = [1, 384], strides = [1, 1]} : vector<7x384xf32> to vector<1x384xf32>
    %620 = vector.broadcast %618 : vector<4x1xf32> to vector<4x384xf32>
    %621 = vector.broadcast %619 : vector<1x384xf32> to vector<4x384xf32>
    %622 = arith.mulf %620, %621 : vector<4x384xf32>
    %623 = arith.addf %616, %622 : vector<4x384xf32>
    %c366_i32_348 = arith.constant 366 : i32
    %624 = tpu.dynamic_rotate %273 by %c366_i32_348 dim 1 : vector<7x384xf32>, i32 -> vector<7x384xf32>
    %c7_349 = arith.constant 7 : index
    %c0_350 = arith.constant 0 : index
    %c0_351 = arith.constant 0 : index
    %c0_352 = arith.constant 0 : index
    %625 = vector.load %arg4[%c7_349, %c0_350, %c0_351, %c0_352] : memref<9x7x4x1xf32, #tpu.memory_space<vmem>>, vector<1x1x4x1xf32>
    %626 = vector.shape_cast %625 : vector<1x1x4x1xf32> to vector<4x1xf32>
    %627 = vector.extract_strided_slice %624 {offsets = [0, 0], sizes = [1, 384], strides = [1, 1]} : vector<7x384xf32> to vector<1x384xf32>
    %628 = vector.broadcast %626 : vector<4x1xf32> to vector<4x384xf32>
    %629 = vector.broadcast %627 : vector<1x384xf32> to vector<4x384xf32>
    %630 = arith.mulf %628, %629 : vector<4x384xf32>
    %631 = arith.addf %623, %630 : vector<4x384xf32>
    %c7_353 = arith.constant 7 : index
    %c1_354 = arith.constant 1 : index
    %c0_355 = arith.constant 0 : index
    %c0_356 = arith.constant 0 : index
    %632 = vector.load %arg4[%c7_353, %c1_354, %c0_355, %c0_356] : memref<9x7x4x1xf32, #tpu.memory_space<vmem>>, vector<1x1x4x1xf32>
    %633 = vector.shape_cast %632 : vector<1x1x4x1xf32> to vector<4x1xf32>
    %634 = vector.extract_strided_slice %624 {offsets = [1, 0], sizes = [1, 384], strides = [1, 1]} : vector<7x384xf32> to vector<1x384xf32>
    %635 = vector.broadcast %633 : vector<4x1xf32> to vector<4x384xf32>
    %636 = vector.broadcast %634 : vector<1x384xf32> to vector<4x384xf32>
    %637 = arith.mulf %635, %636 : vector<4x384xf32>
    %638 = arith.addf %631, %637 : vector<4x384xf32>
    %c7_357 = arith.constant 7 : index
    %c2_358 = arith.constant 2 : index
    %c0_359 = arith.constant 0 : index
    %c0_360 = arith.constant 0 : index
    %639 = vector.load %arg4[%c7_357, %c2_358, %c0_359, %c0_360] : memref<9x7x4x1xf32, #tpu.memory_space<vmem>>, vector<1x1x4x1xf32>
    %640 = vector.shape_cast %639 : vector<1x1x4x1xf32> to vector<4x1xf32>
    %641 = vector.extract_strided_slice %624 {offsets = [2, 0], sizes = [1, 384], strides = [1, 1]} : vector<7x384xf32> to vector<1x384xf32>
    %642 = vector.broadcast %640 : vector<4x1xf32> to vector<4x384xf32>
    %643 = vector.broadcast %641 : vector<1x384xf32> to vector<4x384xf32>
    %644 = arith.mulf %642, %643 : vector<4x384xf32>
    %645 = arith.addf %638, %644 : vector<4x384xf32>
    %c7_361 = arith.constant 7 : index
    %c3_362 = arith.constant 3 : index
    %c0_363 = arith.constant 0 : index
    %c0_364 = arith.constant 0 : index
    %646 = vector.load %arg4[%c7_361, %c3_362, %c0_363, %c0_364] : memref<9x7x4x1xf32, #tpu.memory_space<vmem>>, vector<1x1x4x1xf32>
    %647 = vector.shape_cast %646 : vector<1x1x4x1xf32> to vector<4x1xf32>
    %648 = vector.extract_strided_slice %624 {offsets = [3, 0], sizes = [1, 384], strides = [1, 1]} : vector<7x384xf32> to vector<1x384xf32>
    %649 = vector.broadcast %647 : vector<4x1xf32> to vector<4x384xf32>
    %650 = vector.broadcast %648 : vector<1x384xf32> to vector<4x384xf32>
    %651 = arith.mulf %649, %650 : vector<4x384xf32>
    %652 = arith.addf %645, %651 : vector<4x384xf32>
    %c7_365 = arith.constant 7 : index
    %c4_366 = arith.constant 4 : index
    %c0_367 = arith.constant 0 : index
    %c0_368 = arith.constant 0 : index
    %653 = vector.load %arg4[%c7_365, %c4_366, %c0_367, %c0_368] : memref<9x7x4x1xf32, #tpu.memory_space<vmem>>, vector<1x1x4x1xf32>
    %654 = vector.shape_cast %653 : vector<1x1x4x1xf32> to vector<4x1xf32>
    %655 = vector.extract_strided_slice %624 {offsets = [4, 0], sizes = [1, 384], strides = [1, 1]} : vector<7x384xf32> to vector<1x384xf32>
    %656 = vector.broadcast %654 : vector<4x1xf32> to vector<4x384xf32>
    %657 = vector.broadcast %655 : vector<1x384xf32> to vector<4x384xf32>
    %658 = arith.mulf %656, %657 : vector<4x384xf32>
    %659 = arith.addf %652, %658 : vector<4x384xf32>
    %c7_369 = arith.constant 7 : index
    %c5_370 = arith.constant 5 : index
    %c0_371 = arith.constant 0 : index
    %c0_372 = arith.constant 0 : index
    %660 = vector.load %arg4[%c7_369, %c5_370, %c0_371, %c0_372] : memref<9x7x4x1xf32, #tpu.memory_space<vmem>>, vector<1x1x4x1xf32>
    %661 = vector.shape_cast %660 : vector<1x1x4x1xf32> to vector<4x1xf32>
    %662 = vector.extract_strided_slice %624 {offsets = [5, 0], sizes = [1, 384], strides = [1, 1]} : vector<7x384xf32> to vector<1x384xf32>
    %663 = vector.broadcast %661 : vector<4x1xf32> to vector<4x384xf32>
    %664 = vector.broadcast %662 : vector<1x384xf32> to vector<4x384xf32>
    %665 = arith.mulf %663, %664 : vector<4x384xf32>
    %666 = arith.addf %659, %665 : vector<4x384xf32>
    %c7_373 = arith.constant 7 : index
    %c6_374 = arith.constant 6 : index
    %c0_375 = arith.constant 0 : index
    %c0_376 = arith.constant 0 : index
    %667 = vector.load %arg4[%c7_373, %c6_374, %c0_375, %c0_376] : memref<9x7x4x1xf32, #tpu.memory_space<vmem>>, vector<1x1x4x1xf32>
    %668 = vector.shape_cast %667 : vector<1x1x4x1xf32> to vector<4x1xf32>
    %669 = vector.extract_strided_slice %624 {offsets = [6, 0], sizes = [1, 384], strides = [1, 1]} : vector<7x384xf32> to vector<1x384xf32>
    %670 = vector.broadcast %668 : vector<4x1xf32> to vector<4x384xf32>
    %671 = vector.broadcast %669 : vector<1x384xf32> to vector<4x384xf32>
    %672 = arith.mulf %670, %671 : vector<4x384xf32>
    %673 = arith.addf %666, %672 : vector<4x384xf32>
    %c365_i32_377 = arith.constant 365 : i32
    %674 = tpu.dynamic_rotate %273 by %c365_i32_377 dim 1 : vector<7x384xf32>, i32 -> vector<7x384xf32>
    %c8_378 = arith.constant 8 : index
    %c0_379 = arith.constant 0 : index
    %c0_380 = arith.constant 0 : index
    %c0_381 = arith.constant 0 : index
    %675 = vector.load %arg4[%c8_378, %c0_379, %c0_380, %c0_381] : memref<9x7x4x1xf32, #tpu.memory_space<vmem>>, vector<1x1x4x1xf32>
    %676 = vector.shape_cast %675 : vector<1x1x4x1xf32> to vector<4x1xf32>
    %677 = vector.extract_strided_slice %674 {offsets = [0, 0], sizes = [1, 384], strides = [1, 1]} : vector<7x384xf32> to vector<1x384xf32>
    %678 = vector.broadcast %676 : vector<4x1xf32> to vector<4x384xf32>
    %679 = vector.broadcast %677 : vector<1x384xf32> to vector<4x384xf32>
    %680 = arith.mulf %678, %679 : vector<4x384xf32>
    %681 = arith.addf %673, %680 : vector<4x384xf32>
    %c8_382 = arith.constant 8 : index
    %c1_383 = arith.constant 1 : index
    %c0_384 = arith.constant 0 : index
    %c0_385 = arith.constant 0 : index
    %682 = vector.load %arg4[%c8_382, %c1_383, %c0_384, %c0_385] : memref<9x7x4x1xf32, #tpu.memory_space<vmem>>, vector<1x1x4x1xf32>
    %683 = vector.shape_cast %682 : vector<1x1x4x1xf32> to vector<4x1xf32>
    %684 = vector.extract_strided_slice %674 {offsets = [1, 0], sizes = [1, 384], strides = [1, 1]} : vector<7x384xf32> to vector<1x384xf32>
    %685 = vector.broadcast %683 : vector<4x1xf32> to vector<4x384xf32>
    %686 = vector.broadcast %684 : vector<1x384xf32> to vector<4x384xf32>
    %687 = arith.mulf %685, %686 : vector<4x384xf32>
    %688 = arith.addf %681, %687 : vector<4x384xf32>
    %c8_386 = arith.constant 8 : index
    %c2_387 = arith.constant 2 : index
    %c0_388 = arith.constant 0 : index
    %c0_389 = arith.constant 0 : index
    %689 = vector.load %arg4[%c8_386, %c2_387, %c0_388, %c0_389] : memref<9x7x4x1xf32, #tpu.memory_space<vmem>>, vector<1x1x4x1xf32>
    %690 = vector.shape_cast %689 : vector<1x1x4x1xf32> to vector<4x1xf32>
    %691 = vector.extract_strided_slice %674 {offsets = [2, 0], sizes = [1, 384], strides = [1, 1]} : vector<7x384xf32> to vector<1x384xf32>
    %692 = vector.broadcast %690 : vector<4x1xf32> to vector<4x384xf32>
    %693 = vector.broadcast %691 : vector<1x384xf32> to vector<4x384xf32>
    %694 = arith.mulf %692, %693 : vector<4x384xf32>
    %695 = arith.addf %688, %694 : vector<4x384xf32>
    %c8_390 = arith.constant 8 : index
    %c3_391 = arith.constant 3 : index
    %c0_392 = arith.constant 0 : index
    %c0_393 = arith.constant 0 : index
    %696 = vector.load %arg4[%c8_390, %c3_391, %c0_392, %c0_393] : memref<9x7x4x1xf32, #tpu.memory_space<vmem>>, vector<1x1x4x1xf32>
    %697 = vector.shape_cast %696 : vector<1x1x4x1xf32> to vector<4x1xf32>
    %698 = vector.extract_strided_slice %674 {offsets = [3, 0], sizes = [1, 384], strides = [1, 1]} : vector<7x384xf32> to vector<1x384xf32>
    %699 = vector.broadcast %697 : vector<4x1xf32> to vector<4x384xf32>
    %700 = vector.broadcast %698 : vector<1x384xf32> to vector<4x384xf32>
    %701 = arith.mulf %699, %700 : vector<4x384xf32>
    %702 = arith.addf %695, %701 : vector<4x384xf32>
    %c8_394 = arith.constant 8 : index
    %c4_395 = arith.constant 4 : index
    %c0_396 = arith.constant 0 : index
    %c0_397 = arith.constant 0 : index
    %703 = vector.load %arg4[%c8_394, %c4_395, %c0_396, %c0_397] : memref<9x7x4x1xf32, #tpu.memory_space<vmem>>, vector<1x1x4x1xf32>
    %704 = vector.shape_cast %703 : vector<1x1x4x1xf32> to vector<4x1xf32>
    %705 = vector.extract_strided_slice %674 {offsets = [4, 0], sizes = [1, 384], strides = [1, 1]} : vector<7x384xf32> to vector<1x384xf32>
    %706 = vector.broadcast %704 : vector<4x1xf32> to vector<4x384xf32>
    %707 = vector.broadcast %705 : vector<1x384xf32> to vector<4x384xf32>
    %708 = arith.mulf %706, %707 : vector<4x384xf32>
    %709 = arith.addf %702, %708 : vector<4x384xf32>
    %c8_398 = arith.constant 8 : index
    %c5_399 = arith.constant 5 : index
    %c0_400 = arith.constant 0 : index
    %c0_401 = arith.constant 0 : index
    %710 = vector.load %arg4[%c8_398, %c5_399, %c0_400, %c0_401] : memref<9x7x4x1xf32, #tpu.memory_space<vmem>>, vector<1x1x4x1xf32>
    %711 = vector.shape_cast %710 : vector<1x1x4x1xf32> to vector<4x1xf32>
    %712 = vector.extract_strided_slice %674 {offsets = [5, 0], sizes = [1, 384], strides = [1, 1]} : vector<7x384xf32> to vector<1x384xf32>
    %713 = vector.broadcast %711 : vector<4x1xf32> to vector<4x384xf32>
    %714 = vector.broadcast %712 : vector<1x384xf32> to vector<4x384xf32>
    %715 = arith.mulf %713, %714 : vector<4x384xf32>
    %716 = arith.addf %709, %715 : vector<4x384xf32>
    %c8_402 = arith.constant 8 : index
    %c6_403 = arith.constant 6 : index
    %c0_404 = arith.constant 0 : index
    %c0_405 = arith.constant 0 : index
    %717 = vector.load %arg4[%c8_402, %c6_403, %c0_404, %c0_405] : memref<9x7x4x1xf32, #tpu.memory_space<vmem>>, vector<1x1x4x1xf32>
    %718 = vector.shape_cast %717 : vector<1x1x4x1xf32> to vector<4x1xf32>
    %719 = vector.extract_strided_slice %674 {offsets = [6, 0], sizes = [1, 384], strides = [1, 1]} : vector<7x384xf32> to vector<1x384xf32>
    %720 = vector.broadcast %718 : vector<4x1xf32> to vector<4x384xf32>
    %721 = vector.broadcast %719 : vector<1x384xf32> to vector<4x384xf32>
    %722 = arith.mulf %720, %721 : vector<4x384xf32>
    %723 = arith.addf %716, %722 : vector<4x384xf32>
    %c0_406 = arith.constant 0 : index
    %c0_407 = arith.constant 0 : index
    %724 = vector.load %arg7[%c0_406, %c0_407] : memref<4x1xf32, #tpu.memory_space<vmem>>, vector<4x1xf32>
    %725 = vector.broadcast %724 : vector<4x1xf32> to vector<4x384xf32>
    %726 = arith.mulf %723, %725 : vector<4x384xf32>
    %c0_408 = arith.constant 0 : index
    %c0_409 = arith.constant 0 : index
    %727 = vector.load %arg8[%c0_408, %c0_409] : memref<4x1xf32, #tpu.memory_space<vmem>>, vector<4x1xf32>
    %728 = vector.broadcast %727 : vector<4x1xf32> to vector<4x384xf32>
    %729 = arith.addf %726, %728 : vector<4x384xf32>
    %cst_410 = arith.constant 0.000000e+00 : f32
    %730 = vector.broadcast %cst_410 : f32 to vector<4x384xf32>
    %731 = arith.maximumf %729, %730 : vector<4x384xf32>
    %732 = vector.broadcast %2 : vector<1x384xf32> to vector<4x384xf32>
    %733 = arith.mulf %731, %732 : vector<4x384xf32>
    %734 = arith.addf %733, %1 : vector<4x384xf32>
    %c0_411 = arith.constant 0 : index
    %c0_412 = arith.constant 0 : index
    %c0_413 = arith.constant 0 : index
    %735 = vector.load %arg9[%c0_411, %c0_412, %c0_413] : memref<1x4x384xf32, #tpu.memory_space<vmem>>, vector<1x4x384xf32>
    %736 = vector.shape_cast %735 : vector<1x4x384xf32> to vector<4x384xf32>
    %737 = vector.shape_cast %734 : vector<4x384xf32> to vector<1x4x384xf32>
    tpu.vector_store %arg9[%c0_411, %c0_412, %c0_413], %737 {strides = array<i32>} : memref<1x4x384xf32, #tpu.memory_space<vmem>>, vector<1x4x384xf32>,
    return
  }
  func.func @transform_0(%arg0: i32) -> (i32, i32, i32) {
    %c0_i32 = arith.constant 0 : i32
    %c0_i32_0 = arith.constant 0 : i32
    %c0_i32_1 = arith.constant 0 : i32
    return %arg0, %c0_i32, %c0_i32_0 : i32, i32, i32
  }
  func.func @transform_1(%arg0: i32) -> (i32, i32) {
    %c0_i32 = arith.constant 0 : i32
    %c0_i32_0 = arith.constant 0 : i32
    %c0_i32_1 = arith.constant 0 : i32
    return %c0_i32, %c0_i32_0 : i32, i32
  }
  func.func @transform_2(%arg0: i32) -> (i32, i32, i32, i32) {
    %c0_i32 = arith.constant 0 : i32
    %c0_i32_0 = arith.constant 0 : i32
    %c0_i32_1 = arith.constant 0 : i32
    %c0_i32_2 = arith.constant 0 : i32
    %c0_i32_3 = arith.constant 0 : i32
    return %c0_i32, %c0_i32_0, %c0_i32_1, %c0_i32_2 : i32, i32, i32, i32
  }
  func.func @transform_3(%arg0: i32) -> (i32, i32, i32, i32) {
    %c0_i32 = arith.constant 0 : i32
    %c0_i32_0 = arith.constant 0 : i32
    %c0_i32_1 = arith.constant 0 : i32
    %c0_i32_2 = arith.constant 0 : i32
    %c0_i32_3 = arith.constant 0 : i32
    return %c0_i32, %c0_i32_0, %c0_i32_1, %c0_i32_2 : i32, i32, i32, i32
  }
  func.func @transform_4(%arg0: i32) -> (i32, i32) {
    %c0_i32 = arith.constant 0 : i32
    %c0_i32_0 = arith.constant 0 : i32
    %c0_i32_1 = arith.constant 0 : i32
    return %c0_i32, %c0_i32_0 : i32, i32
  }
  func.func @transform_5(%arg0: i32) -> (i32, i32) {
    %c0_i32 = arith.constant 0 : i32
    %c0_i32_0 = arith.constant 0 : i32
    %c0_i32_1 = arith.constant 0 : i32
    return %c0_i32, %c0_i32_0 : i32, i32
  }
  func.func @transform_6(%arg0: i32) -> (i32, i32) {
    %c0_i32 = arith.constant 0 : i32
    %c0_i32_0 = arith.constant 0 : i32
    %c0_i32_1 = arith.constant 0 : i32
    return %c0_i32, %c0_i32_0 : i32, i32
  }
  func.func @transform_7(%arg0: i32) -> (i32, i32) {
    %c0_i32 = arith.constant 0 : i32
    %c0_i32_0 = arith.constant 0 : i32
    %c0_i32_1 = arith.constant 0 : i32
    return %c0_i32, %c0_i32_0 : i32, i32
  }
  func.func @transform_8(%arg0: i32) -> (i32, i32, i32) {
    %c0_i32 = arith.constant 0 : i32
    %c0_i32_0 = arith.constant 0 : i32
    %c0_i32_1 = arith.constant 0 : i32
    return %arg0, %c0_i32, %c0_i32_0 : i32, i32, i32
  }
}

module attributes {stable_mosaic.version = 11 : i64} {
  func.func @stats2_kernel(%arg0: i32, %arg1: memref<1x4x384xf32, #tpu.memory_space<vmem>>, %arg2: memref<1x384xf32, #tpu.memory_space<vmem>>, %arg3: memref<9x4x7x1xf32, #tpu.memory_space<vmem>>, %arg4: memref<9x7x4x1xf32, #tpu.memory_space<vmem>>, %arg5: memref<7x1xf32, #tpu.memory_space<vmem>>, %arg6: memref<7x1xf32, #tpu.memory_space<vmem>>, %arg7: memref<1x4x1xf32, #tpu.memory_space<vmem>>, %arg8: memref<1x4x1xf32, #tpu.memory_space<vmem>>) attributes {dimension_semantics = [#tpu.dimension_semantics<parallel>], iteration_bounds = array<i64: 2>, scalar_prefetch = 0 : i64, scratch_operands = 0 : i64, tpu.core_type = #tpu.core_type<tc>, window_params = [{transform_indices = @transform_0, window_bounds = array<i64: 1, 4, 384>}, {pipeline_mode = #tpu.pipeline_mode<synchronous>, transform_indices = @transform_1, window_bounds = array<i64: 1, 384>}, {pipeline_mode = #tpu.pipeline_mode<synchronous>, transform_indices = @transform_2, window_bounds = array<i64: 9, 4, 7, 1>}, {pipeline_mode = #tpu.pipeline_mode<synchronous>, transform_indices = @transform_3, window_bounds = array<i64: 9, 7, 4, 1>}, {pipeline_mode = #tpu.pipeline_mode<synchronous>, transform_indices = @transform_4, window_bounds = array<i64: 7, 1>}, {pipeline_mode = #tpu.pipeline_mode<synchronous>, transform_indices = @transform_5, window_bounds = array<i64: 7, 1>}, {transform_indices = @transform_6, window_bounds = array<i64: 1, 4, 1>}, {transform_indices = @transform_7, window_bounds = array<i64: 1, 4, 1>}]} {
    %c0 = arith.constant 0 : index
    %c0_0 = arith.constant 0 : index
    %c0_1 = arith.constant 0 : index
    %0 = vector.load %arg1[%c0, %c0_0, %c0_1] : memref<1x4x384xf32, #tpu.memory_space<vmem>>, vector<1x4x384xf32>
    %1 = vector.shape_cast %0 : vector<1x4x384xf32> to vector<4x384xf32>
    %c0_2 = arith.constant 0 : index
    %c0_3 = arith.constant 0 : index
    %2 = vector.load %arg2[%c0_2, %c0_3] : memref<1x384xf32, #tpu.memory_space<vmem>>, vector<1x384xf32>
    %c0_4 = arith.constant 0 : index
    %c0_5 = arith.constant 0 : index
    %3 = vector.load %arg5[%c0_4, %c0_5] : memref<7x1xf32, #tpu.memory_space<vmem>>, vector<7x1xf32>
    %c0_6 = arith.constant 0 : index
    %c0_7 = arith.constant 0 : index
    %4 = vector.load %arg6[%c0_6, %c0_7] : memref<7x1xf32, #tpu.memory_space<vmem>>, vector<7x1xf32>
    %cst = arith.constant 0.000000e+00 : f32
    %5 = vector.broadcast %cst : f32 to vector<7x384xf32>
    %c19_i32 = arith.constant 19 : i32
    %6 = tpu.dynamic_rotate %1 by %c19_i32 dim 1 : vector<4x384xf32>, i32 -> vector<4x384xf32>
    %c0_8 = arith.constant 0 : index
    %c0_9 = arith.constant 0 : index
    %c0_10 = arith.constant 0 : index
    %c0_11 = arith.constant 0 : index
    %7 = vector.load %arg3[%c0_8, %c0_9, %c0_10, %c0_11] : memref<9x4x7x1xf32, #tpu.memory_space<vmem>>, vector<1x1x7x1xf32>
    %8 = vector.shape_cast %7 : vector<1x1x7x1xf32> to vector<7x1xf32>
    %9 = vector.extract_strided_slice %6 {offsets = [0, 0], sizes = [1, 384], strides = [1, 1]} : vector<4x384xf32> to vector<1x384xf32>
    %10 = vector.broadcast %8 : vector<7x1xf32> to vector<7x384xf32>
    %11 = vector.broadcast %9 : vector<1x384xf32> to vector<7x384xf32>
    %12 = arith.mulf %10, %11 : vector<7x384xf32>
    %13 = arith.addf %5, %12 : vector<7x384xf32>
    %c0_12 = arith.constant 0 : index
    %c1 = arith.constant 1 : index
    %c0_13 = arith.constant 0 : index
    %c0_14 = arith.constant 0 : index
    %14 = vector.load %arg3[%c0_12, %c1, %c0_13, %c0_14] : memref<9x4x7x1xf32, #tpu.memory_space<vmem>>, vector<1x1x7x1xf32>
    %15 = vector.shape_cast %14 : vector<1x1x7x1xf32> to vector<7x1xf32>
    %16 = vector.extract_strided_slice %6 {offsets = [1, 0], sizes = [1, 384], strides = [1, 1]} : vector<4x384xf32> to vector<1x384xf32>
    %17 = vector.broadcast %15 : vector<7x1xf32> to vector<7x384xf32>
    %18 = vector.broadcast %16 : vector<1x384xf32> to vector<7x384xf32>
    %19 = arith.mulf %17, %18 : vector<7x384xf32>
    %20 = arith.addf %13, %19 : vector<7x384xf32>
    %c0_15 = arith.constant 0 : index
    %c2 = arith.constant 2 : index
    %c0_16 = arith.constant 0 : index
    %c0_17 = arith.constant 0 : index
    %21 = vector.load %arg3[%c0_15, %c2, %c0_16, %c0_17] : memref<9x4x7x1xf32, #tpu.memory_space<vmem>>, vector<1x1x7x1xf32>
    %22 = vector.shape_cast %21 : vector<1x1x7x1xf32> to vector<7x1xf32>
    %23 = vector.extract_strided_slice %6 {offsets = [2, 0], sizes = [1, 384], strides = [1, 1]} : vector<4x384xf32> to vector<1x384xf32>
    %24 = vector.broadcast %22 : vector<7x1xf32> to vector<7x384xf32>
    %25 = vector.broadcast %23 : vector<1x384xf32> to vector<7x384xf32>
    %26 = arith.mulf %24, %25 : vector<7x384xf32>
    %27 = arith.addf %20, %26 : vector<7x384xf32>
    %c0_18 = arith.constant 0 : index
    %c3 = arith.constant 3 : index
    %c0_19 = arith.constant 0 : index
    %c0_20 = arith.constant 0 : index
    %28 = vector.load %arg3[%c0_18, %c3, %c0_19, %c0_20] : memref<9x4x7x1xf32, #tpu.memory_space<vmem>>, vector<1x1x7x1xf32>
    %29 = vector.shape_cast %28 : vector<1x1x7x1xf32> to vector<7x1xf32>
    %30 = vector.extract_strided_slice %6 {offsets = [3, 0], sizes = [1, 384], strides = [1, 1]} : vector<4x384xf32> to vector<1x384xf32>
    %31 = vector.broadcast %29 : vector<7x1xf32> to vector<7x384xf32>
    %32 = vector.broadcast %30 : vector<1x384xf32> to vector<7x384xf32>
    %33 = arith.mulf %31, %32 : vector<7x384xf32>
    %34 = arith.addf %27, %33 : vector<7x384xf32>
    %c18_i32 = arith.constant 18 : i32
    %35 = tpu.dynamic_rotate %1 by %c18_i32 dim 1 : vector<4x384xf32>, i32 -> vector<4x384xf32>
    %c1_21 = arith.constant 1 : index
    %c0_22 = arith.constant 0 : index
    %c0_23 = arith.constant 0 : index
    %c0_24 = arith.constant 0 : index
    %36 = vector.load %arg3[%c1_21, %c0_22, %c0_23, %c0_24] : memref<9x4x7x1xf32, #tpu.memory_space<vmem>>, vector<1x1x7x1xf32>
    %37 = vector.shape_cast %36 : vector<1x1x7x1xf32> to vector<7x1xf32>
    %38 = vector.extract_strided_slice %35 {offsets = [0, 0], sizes = [1, 384], strides = [1, 1]} : vector<4x384xf32> to vector<1x384xf32>
    %39 = vector.broadcast %37 : vector<7x1xf32> to vector<7x384xf32>
    %40 = vector.broadcast %38 : vector<1x384xf32> to vector<7x384xf32>
    %41 = arith.mulf %39, %40 : vector<7x384xf32>
    %42 = arith.addf %34, %41 : vector<7x384xf32>
    %c1_25 = arith.constant 1 : index
    %c1_26 = arith.constant 1 : index
    %c0_27 = arith.constant 0 : index
    %c0_28 = arith.constant 0 : index
    %43 = vector.load %arg3[%c1_25, %c1_26, %c0_27, %c0_28] : memref<9x4x7x1xf32, #tpu.memory_space<vmem>>, vector<1x1x7x1xf32>
    %44 = vector.shape_cast %43 : vector<1x1x7x1xf32> to vector<7x1xf32>
    %45 = vector.extract_strided_slice %35 {offsets = [1, 0], sizes = [1, 384], strides = [1, 1]} : vector<4x384xf32> to vector<1x384xf32>
    %46 = vector.broadcast %44 : vector<7x1xf32> to vector<7x384xf32>
    %47 = vector.broadcast %45 : vector<1x384xf32> to vector<7x384xf32>
    %48 = arith.mulf %46, %47 : vector<7x384xf32>
    %49 = arith.addf %42, %48 : vector<7x384xf32>
    %c1_29 = arith.constant 1 : index
    %c2_30 = arith.constant 2 : index
    %c0_31 = arith.constant 0 : index
    %c0_32 = arith.constant 0 : index
    %50 = vector.load %arg3[%c1_29, %c2_30, %c0_31, %c0_32] : memref<9x4x7x1xf32, #tpu.memory_space<vmem>>, vector<1x1x7x1xf32>
    %51 = vector.shape_cast %50 : vector<1x1x7x1xf32> to vector<7x1xf32>
    %52 = vector.extract_strided_slice %35 {offsets = [2, 0], sizes = [1, 384], strides = [1, 1]} : vector<4x384xf32> to vector<1x384xf32>
    %53 = vector.broadcast %51 : vector<7x1xf32> to vector<7x384xf32>
    %54 = vector.broadcast %52 : vector<1x384xf32> to vector<7x384xf32>
    %55 = arith.mulf %53, %54 : vector<7x384xf32>
    %56 = arith.addf %49, %55 : vector<7x384xf32>
    %c1_33 = arith.constant 1 : index
    %c3_34 = arith.constant 3 : index
    %c0_35 = arith.constant 0 : index
    %c0_36 = arith.constant 0 : index
    %57 = vector.load %arg3[%c1_33, %c3_34, %c0_35, %c0_36] : memref<9x4x7x1xf32, #tpu.memory_space<vmem>>, vector<1x1x7x1xf32>
    %58 = vector.shape_cast %57 : vector<1x1x7x1xf32> to vector<7x1xf32>
    %59 = vector.extract_strided_slice %35 {offsets = [3, 0], sizes = [1, 384], strides = [1, 1]} : vector<4x384xf32> to vector<1x384xf32>
    %60 = vector.broadcast %58 : vector<7x1xf32> to vector<7x384xf32>
    %61 = vector.broadcast %59 : vector<1x384xf32> to vector<7x384xf32>
    %62 = arith.mulf %60, %61 : vector<7x384xf32>
    %63 = arith.addf %56, %62 : vector<7x384xf32>
    %c17_i32 = arith.constant 17 : i32
    %64 = tpu.dynamic_rotate %1 by %c17_i32 dim 1 : vector<4x384xf32>, i32 -> vector<4x384xf32>
    %c2_37 = arith.constant 2 : index
    %c0_38 = arith.constant 0 : index
    %c0_39 = arith.constant 0 : index
    %c0_40 = arith.constant 0 : index
    %65 = vector.load %arg3[%c2_37, %c0_38, %c0_39, %c0_40] : memref<9x4x7x1xf32, #tpu.memory_space<vmem>>, vector<1x1x7x1xf32>
    %66 = vector.shape_cast %65 : vector<1x1x7x1xf32> to vector<7x1xf32>
    %67 = vector.extract_strided_slice %64 {offsets = [0, 0], sizes = [1, 384], strides = [1, 1]} : vector<4x384xf32> to vector<1x384xf32>
    %68 = vector.broadcast %66 : vector<7x1xf32> to vector<7x384xf32>
    %69 = vector.broadcast %67 : vector<1x384xf32> to vector<7x384xf32>
    %70 = arith.mulf %68, %69 : vector<7x384xf32>
    %71 = arith.addf %63, %70 : vector<7x384xf32>
    %c2_41 = arith.constant 2 : index
    %c1_42 = arith.constant 1 : index
    %c0_43 = arith.constant 0 : index
    %c0_44 = arith.constant 0 : index
    %72 = vector.load %arg3[%c2_41, %c1_42, %c0_43, %c0_44] : memref<9x4x7x1xf32, #tpu.memory_space<vmem>>, vector<1x1x7x1xf32>
    %73 = vector.shape_cast %72 : vector<1x1x7x1xf32> to vector<7x1xf32>
    %74 = vector.extract_strided_slice %64 {offsets = [1, 0], sizes = [1, 384], strides = [1, 1]} : vector<4x384xf32> to vector<1x384xf32>
    %75 = vector.broadcast %73 : vector<7x1xf32> to vector<7x384xf32>
    %76 = vector.broadcast %74 : vector<1x384xf32> to vector<7x384xf32>
    %77 = arith.mulf %75, %76 : vector<7x384xf32>
    %78 = arith.addf %71, %77 : vector<7x384xf32>
    %c2_45 = arith.constant 2 : index
    %c2_46 = arith.constant 2 : index
    %c0_47 = arith.constant 0 : index
    %c0_48 = arith.constant 0 : index
    %79 = vector.load %arg3[%c2_45, %c2_46, %c0_47, %c0_48] : memref<9x4x7x1xf32, #tpu.memory_space<vmem>>, vector<1x1x7x1xf32>
    %80 = vector.shape_cast %79 : vector<1x1x7x1xf32> to vector<7x1xf32>
    %81 = vector.extract_strided_slice %64 {offsets = [2, 0], sizes = [1, 384], strides = [1, 1]} : vector<4x384xf32> to vector<1x384xf32>
    %82 = vector.broadcast %80 : vector<7x1xf32> to vector<7x384xf32>
    %83 = vector.broadcast %81 : vector<1x384xf32> to vector<7x384xf32>
    %84 = arith.mulf %82, %83 : vector<7x384xf32>
    %85 = arith.addf %78, %84 : vector<7x384xf32>
    %c2_49 = arith.constant 2 : index
    %c3_50 = arith.constant 3 : index
    %c0_51 = arith.constant 0 : index
    %c0_52 = arith.constant 0 : index
    %86 = vector.load %arg3[%c2_49, %c3_50, %c0_51, %c0_52] : memref<9x4x7x1xf32, #tpu.memory_space<vmem>>, vector<1x1x7x1xf32>
    %87 = vector.shape_cast %86 : vector<1x1x7x1xf32> to vector<7x1xf32>
    %88 = vector.extract_strided_slice %64 {offsets = [3, 0], sizes = [1, 384], strides = [1, 1]} : vector<4x384xf32> to vector<1x384xf32>
    %89 = vector.broadcast %87 : vector<7x1xf32> to vector<7x384xf32>
    %90 = vector.broadcast %88 : vector<1x384xf32> to vector<7x384xf32>
    %91 = arith.mulf %89, %90 : vector<7x384xf32>
    %92 = arith.addf %85, %91 : vector<7x384xf32>
    %c1_i32 = arith.constant 1 : i32
    %93 = tpu.dynamic_rotate %1 by %c1_i32 dim 1 : vector<4x384xf32>, i32 -> vector<4x384xf32>
    %c3_53 = arith.constant 3 : index
    %c0_54 = arith.constant 0 : index
    %c0_55 = arith.constant 0 : index
    %c0_56 = arith.constant 0 : index
    %94 = vector.load %arg3[%c3_53, %c0_54, %c0_55, %c0_56] : memref<9x4x7x1xf32, #tpu.memory_space<vmem>>, vector<1x1x7x1xf32>
    %95 = vector.shape_cast %94 : vector<1x1x7x1xf32> to vector<7x1xf32>
    %96 = vector.extract_strided_slice %93 {offsets = [0, 0], sizes = [1, 384], strides = [1, 1]} : vector<4x384xf32> to vector<1x384xf32>
    %97 = vector.broadcast %95 : vector<7x1xf32> to vector<7x384xf32>
    %98 = vector.broadcast %96 : vector<1x384xf32> to vector<7x384xf32>
    %99 = arith.mulf %97, %98 : vector<7x384xf32>
    %100 = arith.addf %92, %99 : vector<7x384xf32>
    %c3_57 = arith.constant 3 : index
    %c1_58 = arith.constant 1 : index
    %c0_59 = arith.constant 0 : index
    %c0_60 = arith.constant 0 : index
    %101 = vector.load %arg3[%c3_57, %c1_58, %c0_59, %c0_60] : memref<9x4x7x1xf32, #tpu.memory_space<vmem>>, vector<1x1x7x1xf32>
    %102 = vector.shape_cast %101 : vector<1x1x7x1xf32> to vector<7x1xf32>
    %103 = vector.extract_strided_slice %93 {offsets = [1, 0], sizes = [1, 384], strides = [1, 1]} : vector<4x384xf32> to vector<1x384xf32>
    %104 = vector.broadcast %102 : vector<7x1xf32> to vector<7x384xf32>
    %105 = vector.broadcast %103 : vector<1x384xf32> to vector<7x384xf32>
    %106 = arith.mulf %104, %105 : vector<7x384xf32>
    %107 = arith.addf %100, %106 : vector<7x384xf32>
    %c3_61 = arith.constant 3 : index
    %c2_62 = arith.constant 2 : index
    %c0_63 = arith.constant 0 : index
    %c0_64 = arith.constant 0 : index
    %108 = vector.load %arg3[%c3_61, %c2_62, %c0_63, %c0_64] : memref<9x4x7x1xf32, #tpu.memory_space<vmem>>, vector<1x1x7x1xf32>
    %109 = vector.shape_cast %108 : vector<1x1x7x1xf32> to vector<7x1xf32>
    %110 = vector.extract_strided_slice %93 {offsets = [2, 0], sizes = [1, 384], strides = [1, 1]} : vector<4x384xf32> to vector<1x384xf32>
    %111 = vector.broadcast %109 : vector<7x1xf32> to vector<7x384xf32>
    %112 = vector.broadcast %110 : vector<1x384xf32> to vector<7x384xf32>
    %113 = arith.mulf %111, %112 : vector<7x384xf32>
    %114 = arith.addf %107, %113 : vector<7x384xf32>
    %c3_65 = arith.constant 3 : index
    %c3_66 = arith.constant 3 : index
    %c0_67 = arith.constant 0 : index
    %c0_68 = arith.constant 0 : index
    %115 = vector.load %arg3[%c3_65, %c3_66, %c0_67, %c0_68] : memref<9x4x7x1xf32, #tpu.memory_space<vmem>>, vector<1x1x7x1xf32>
    %116 = vector.shape_cast %115 : vector<1x1x7x1xf32> to vector<7x1xf32>
    %117 = vector.extract_strided_slice %93 {offsets = [3, 0], sizes = [1, 384], strides = [1, 1]} : vector<4x384xf32> to vector<1x384xf32>
    %118 = vector.broadcast %116 : vector<7x1xf32> to vector<7x384xf32>
    %119 = vector.broadcast %117 : vector<1x384xf32> to vector<7x384xf32>
    %120 = arith.mulf %118, %119 : vector<7x384xf32>
    %121 = arith.addf %114, %120 : vector<7x384xf32>
    %c4 = arith.constant 4 : index
    %c0_69 = arith.constant 0 : index
    %c0_70 = arith.constant 0 : index
    %c0_71 = arith.constant 0 : index
    %122 = vector.load %arg3[%c4, %c0_69, %c0_70, %c0_71] : memref<9x4x7x1xf32, #tpu.memory_space<vmem>>, vector<1x1x7x1xf32>
    %123 = vector.shape_cast %122 : vector<1x1x7x1xf32> to vector<7x1xf32>
    %124 = vector.extract_strided_slice %1 {offsets = [0, 0], sizes = [1, 384], strides = [1, 1]} : vector<4x384xf32> to vector<1x384xf32>
    %125 = vector.broadcast %123 : vector<7x1xf32> to vector<7x384xf32>
    %126 = vector.broadcast %124 : vector<1x384xf32> to vector<7x384xf32>
    %127 = arith.mulf %125, %126 : vector<7x384xf32>
    %128 = arith.addf %121, %127 : vector<7x384xf32>
    %c4_72 = arith.constant 4 : index
    %c1_73 = arith.constant 1 : index
    %c0_74 = arith.constant 0 : index
    %c0_75 = arith.constant 0 : index
    %129 = vector.load %arg3[%c4_72, %c1_73, %c0_74, %c0_75] : memref<9x4x7x1xf32, #tpu.memory_space<vmem>>, vector<1x1x7x1xf32>
    %130 = vector.shape_cast %129 : vector<1x1x7x1xf32> to vector<7x1xf32>
    %131 = vector.extract_strided_slice %1 {offsets = [1, 0], sizes = [1, 384], strides = [1, 1]} : vector<4x384xf32> to vector<1x384xf32>
    %132 = vector.broadcast %130 : vector<7x1xf32> to vector<7x384xf32>
    %133 = vector.broadcast %131 : vector<1x384xf32> to vector<7x384xf32>
    %134 = arith.mulf %132, %133 : vector<7x384xf32>
    %135 = arith.addf %128, %134 : vector<7x384xf32>
    %c4_76 = arith.constant 4 : index
    %c2_77 = arith.constant 2 : index
    %c0_78 = arith.constant 0 : index
    %c0_79 = arith.constant 0 : index
    %136 = vector.load %arg3[%c4_76, %c2_77, %c0_78, %c0_79] : memref<9x4x7x1xf32, #tpu.memory_space<vmem>>, vector<1x1x7x1xf32>
    %137 = vector.shape_cast %136 : vector<1x1x7x1xf32> to vector<7x1xf32>
    %138 = vector.extract_strided_slice %1 {offsets = [2, 0], sizes = [1, 384], strides = [1, 1]} : vector<4x384xf32> to vector<1x384xf32>
    %139 = vector.broadcast %137 : vector<7x1xf32> to vector<7x384xf32>
    %140 = vector.broadcast %138 : vector<1x384xf32> to vector<7x384xf32>
    %141 = arith.mulf %139, %140 : vector<7x384xf32>
    %142 = arith.addf %135, %141 : vector<7x384xf32>
    %c4_80 = arith.constant 4 : index
    %c3_81 = arith.constant 3 : index
    %c0_82 = arith.constant 0 : index
    %c0_83 = arith.constant 0 : index
    %143 = vector.load %arg3[%c4_80, %c3_81, %c0_82, %c0_83] : memref<9x4x7x1xf32, #tpu.memory_space<vmem>>, vector<1x1x7x1xf32>
    %144 = vector.shape_cast %143 : vector<1x1x7x1xf32> to vector<7x1xf32>
    %145 = vector.extract_strided_slice %1 {offsets = [3, 0], sizes = [1, 384], strides = [1, 1]} : vector<4x384xf32> to vector<1x384xf32>
    %146 = vector.broadcast %144 : vector<7x1xf32> to vector<7x384xf32>
    %147 = vector.broadcast %145 : vector<1x384xf32> to vector<7x384xf32>
    %148 = arith.mulf %146, %147 : vector<7x384xf32>
    %149 = arith.addf %142, %148 : vector<7x384xf32>
    %c383_i32 = arith.constant 383 : i32
    %150 = tpu.dynamic_rotate %1 by %c383_i32 dim 1 : vector<4x384xf32>, i32 -> vector<4x384xf32>
    %c5 = arith.constant 5 : index
    %c0_84 = arith.constant 0 : index
    %c0_85 = arith.constant 0 : index
    %c0_86 = arith.constant 0 : index
    %151 = vector.load %arg3[%c5, %c0_84, %c0_85, %c0_86] : memref<9x4x7x1xf32, #tpu.memory_space<vmem>>, vector<1x1x7x1xf32>
    %152 = vector.shape_cast %151 : vector<1x1x7x1xf32> to vector<7x1xf32>
    %153 = vector.extract_strided_slice %150 {offsets = [0, 0], sizes = [1, 384], strides = [1, 1]} : vector<4x384xf32> to vector<1x384xf32>
    %154 = vector.broadcast %152 : vector<7x1xf32> to vector<7x384xf32>
    %155 = vector.broadcast %153 : vector<1x384xf32> to vector<7x384xf32>
    %156 = arith.mulf %154, %155 : vector<7x384xf32>
    %157 = arith.addf %149, %156 : vector<7x384xf32>
    %c5_87 = arith.constant 5 : index
    %c1_88 = arith.constant 1 : index
    %c0_89 = arith.constant 0 : index
    %c0_90 = arith.constant 0 : index
    %158 = vector.load %arg3[%c5_87, %c1_88, %c0_89, %c0_90] : memref<9x4x7x1xf32, #tpu.memory_space<vmem>>, vector<1x1x7x1xf32>
    %159 = vector.shape_cast %158 : vector<1x1x7x1xf32> to vector<7x1xf32>
    %160 = vector.extract_strided_slice %150 {offsets = [1, 0], sizes = [1, 384], strides = [1, 1]} : vector<4x384xf32> to vector<1x384xf32>
    %161 = vector.broadcast %159 : vector<7x1xf32> to vector<7x384xf32>
    %162 = vector.broadcast %160 : vector<1x384xf32> to vector<7x384xf32>
    %163 = arith.mulf %161, %162 : vector<7x384xf32>
    %164 = arith.addf %157, %163 : vector<7x384xf32>
    %c5_91 = arith.constant 5 : index
    %c2_92 = arith.constant 2 : index
    %c0_93 = arith.constant 0 : index
    %c0_94 = arith.constant 0 : index
    %165 = vector.load %arg3[%c5_91, %c2_92, %c0_93, %c0_94] : memref<9x4x7x1xf32, #tpu.memory_space<vmem>>, vector<1x1x7x1xf32>
    %166 = vector.shape_cast %165 : vector<1x1x7x1xf32> to vector<7x1xf32>
    %167 = vector.extract_strided_slice %150 {offsets = [2, 0], sizes = [1, 384], strides = [1, 1]} : vector<4x384xf32> to vector<1x384xf32>
    %168 = vector.broadcast %166 : vector<7x1xf32> to vector<7x384xf32>
    %169 = vector.broadcast %167 : vector<1x384xf32> to vector<7x384xf32>
    %170 = arith.mulf %168, %169 : vector<7x384xf32>
    %171 = arith.addf %164, %170 : vector<7x384xf32>
    %c5_95 = arith.constant 5 : index
    %c3_96 = arith.constant 3 : index
    %c0_97 = arith.constant 0 : index
    %c0_98 = arith.constant 0 : index
    %172 = vector.load %arg3[%c5_95, %c3_96, %c0_97, %c0_98] : memref<9x4x7x1xf32, #tpu.memory_space<vmem>>, vector<1x1x7x1xf32>
    %173 = vector.shape_cast %172 : vector<1x1x7x1xf32> to vector<7x1xf32>
    %174 = vector.extract_strided_slice %150 {offsets = [3, 0], sizes = [1, 384], strides = [1, 1]} : vector<4x384xf32> to vector<1x384xf32>
    %175 = vector.broadcast %173 : vector<7x1xf32> to vector<7x384xf32>
    %176 = vector.broadcast %174 : vector<1x384xf32> to vector<7x384xf32>
    %177 = arith.mulf %175, %176 : vector<7x384xf32>
    %178 = arith.addf %171, %177 : vector<7x384xf32>
    %c367_i32 = arith.constant 367 : i32
    %179 = tpu.dynamic_rotate %1 by %c367_i32 dim 1 : vector<4x384xf32>, i32 -> vector<4x384xf32>
    %c6 = arith.constant 6 : index
    %c0_99 = arith.constant 0 : index
    %c0_100 = arith.constant 0 : index
    %c0_101 = arith.constant 0 : index
    %180 = vector.load %arg3[%c6, %c0_99, %c0_100, %c0_101] : memref<9x4x7x1xf32, #tpu.memory_space<vmem>>, vector<1x1x7x1xf32>
    %181 = vector.shape_cast %180 : vector<1x1x7x1xf32> to vector<7x1xf32>
    %182 = vector.extract_strided_slice %179 {offsets = [0, 0], sizes = [1, 384], strides = [1, 1]} : vector<4x384xf32> to vector<1x384xf32>
    %183 = vector.broadcast %181 : vector<7x1xf32> to vector<7x384xf32>
    %184 = vector.broadcast %182 : vector<1x384xf32> to vector<7x384xf32>
    %185 = arith.mulf %183, %184 : vector<7x384xf32>
    %186 = arith.addf %178, %185 : vector<7x384xf32>
    %c6_102 = arith.constant 6 : index
    %c1_103 = arith.constant 1 : index
    %c0_104 = arith.constant 0 : index
    %c0_105 = arith.constant 0 : index
    %187 = vector.load %arg3[%c6_102, %c1_103, %c0_104, %c0_105] : memref<9x4x7x1xf32, #tpu.memory_space<vmem>>, vector<1x1x7x1xf32>
    %188 = vector.shape_cast %187 : vector<1x1x7x1xf32> to vector<7x1xf32>
    %189 = vector.extract_strided_slice %179 {offsets = [1, 0], sizes = [1, 384], strides = [1, 1]} : vector<4x384xf32> to vector<1x384xf32>
    %190 = vector.broadcast %188 : vector<7x1xf32> to vector<7x384xf32>
    %191 = vector.broadcast %189 : vector<1x384xf32> to vector<7x384xf32>
    %192 = arith.mulf %190, %191 : vector<7x384xf32>
    %193 = arith.addf %186, %192 : vector<7x384xf32>
    %c6_106 = arith.constant 6 : index
    %c2_107 = arith.constant 2 : index
    %c0_108 = arith.constant 0 : index
    %c0_109 = arith.constant 0 : index
    %194 = vector.load %arg3[%c6_106, %c2_107, %c0_108, %c0_109] : memref<9x4x7x1xf32, #tpu.memory_space<vmem>>, vector<1x1x7x1xf32>
    %195 = vector.shape_cast %194 : vector<1x1x7x1xf32> to vector<7x1xf32>
    %196 = vector.extract_strided_slice %179 {offsets = [2, 0], sizes = [1, 384], strides = [1, 1]} : vector<4x384xf32> to vector<1x384xf32>
    %197 = vector.broadcast %195 : vector<7x1xf32> to vector<7x384xf32>
    %198 = vector.broadcast %196 : vector<1x384xf32> to vector<7x384xf32>
    %199 = arith.mulf %197, %198 : vector<7x384xf32>
    %200 = arith.addf %193, %199 : vector<7x384xf32>
    %c6_110 = arith.constant 6 : index
    %c3_111 = arith.constant 3 : index
    %c0_112 = arith.constant 0 : index
    %c0_113 = arith.constant 0 : index
    %201 = vector.load %arg3[%c6_110, %c3_111, %c0_112, %c0_113] : memref<9x4x7x1xf32, #tpu.memory_space<vmem>>, vector<1x1x7x1xf32>
    %202 = vector.shape_cast %201 : vector<1x1x7x1xf32> to vector<7x1xf32>
    %203 = vector.extract_strided_slice %179 {offsets = [3, 0], sizes = [1, 384], strides = [1, 1]} : vector<4x384xf32> to vector<1x384xf32>
    %204 = vector.broadcast %202 : vector<7x1xf32> to vector<7x384xf32>
    %205 = vector.broadcast %203 : vector<1x384xf32> to vector<7x384xf32>
    %206 = arith.mulf %204, %205 : vector<7x384xf32>
    %207 = arith.addf %200, %206 : vector<7x384xf32>
    %c366_i32 = arith.constant 366 : i32
    %208 = tpu.dynamic_rotate %1 by %c366_i32 dim 1 : vector<4x384xf32>, i32 -> vector<4x384xf32>
    %c7 = arith.constant 7 : index
    %c0_114 = arith.constant 0 : index
    %c0_115 = arith.constant 0 : index
    %c0_116 = arith.constant 0 : index
    %209 = vector.load %arg3[%c7, %c0_114, %c0_115, %c0_116] : memref<9x4x7x1xf32, #tpu.memory_space<vmem>>, vector<1x1x7x1xf32>
    %210 = vector.shape_cast %209 : vector<1x1x7x1xf32> to vector<7x1xf32>
    %211 = vector.extract_strided_slice %208 {offsets = [0, 0], sizes = [1, 384], strides = [1, 1]} : vector<4x384xf32> to vector<1x384xf32>
    %212 = vector.broadcast %210 : vector<7x1xf32> to vector<7x384xf32>
    %213 = vector.broadcast %211 : vector<1x384xf32> to vector<7x384xf32>
    %214 = arith.mulf %212, %213 : vector<7x384xf32>
    %215 = arith.addf %207, %214 : vector<7x384xf32>
    %c7_117 = arith.constant 7 : index
    %c1_118 = arith.constant 1 : index
    %c0_119 = arith.constant 0 : index
    %c0_120 = arith.constant 0 : index
    %216 = vector.load %arg3[%c7_117, %c1_118, %c0_119, %c0_120] : memref<9x4x7x1xf32, #tpu.memory_space<vmem>>, vector<1x1x7x1xf32>
    %217 = vector.shape_cast %216 : vector<1x1x7x1xf32> to vector<7x1xf32>
    %218 = vector.extract_strided_slice %208 {offsets = [1, 0], sizes = [1, 384], strides = [1, 1]} : vector<4x384xf32> to vector<1x384xf32>
    %219 = vector.broadcast %217 : vector<7x1xf32> to vector<7x384xf32>
    %220 = vector.broadcast %218 : vector<1x384xf32> to vector<7x384xf32>
    %221 = arith.mulf %219, %220 : vector<7x384xf32>
    %222 = arith.addf %215, %221 : vector<7x384xf32>
    %c7_121 = arith.constant 7 : index
    %c2_122 = arith.constant 2 : index
    %c0_123 = arith.constant 0 : index
    %c0_124 = arith.constant 0 : index
    %223 = vector.load %arg3[%c7_121, %c2_122, %c0_123, %c0_124] : memref<9x4x7x1xf32, #tpu.memory_space<vmem>>, vector<1x1x7x1xf32>
    %224 = vector.shape_cast %223 : vector<1x1x7x1xf32> to vector<7x1xf32>
    %225 = vector.extract_strided_slice %208 {offsets = [2, 0], sizes = [1, 384], strides = [1, 1]} : vector<4x384xf32> to vector<1x384xf32>
    %226 = vector.broadcast %224 : vector<7x1xf32> to vector<7x384xf32>
    %227 = vector.broadcast %225 : vector<1x384xf32> to vector<7x384xf32>
    %228 = arith.mulf %226, %227 : vector<7x384xf32>
    %229 = arith.addf %222, %228 : vector<7x384xf32>
    %c7_125 = arith.constant 7 : index
    %c3_126 = arith.constant 3 : index
    %c0_127 = arith.constant 0 : index
    %c0_128 = arith.constant 0 : index
    %230 = vector.load %arg3[%c7_125, %c3_126, %c0_127, %c0_128] : memref<9x4x7x1xf32, #tpu.memory_space<vmem>>, vector<1x1x7x1xf32>
    %231 = vector.shape_cast %230 : vector<1x1x7x1xf32> to vector<7x1xf32>
    %232 = vector.extract_strided_slice %208 {offsets = [3, 0], sizes = [1, 384], strides = [1, 1]} : vector<4x384xf32> to vector<1x384xf32>
    %233 = vector.broadcast %231 : vector<7x1xf32> to vector<7x384xf32>
    %234 = vector.broadcast %232 : vector<1x384xf32> to vector<7x384xf32>
    %235 = arith.mulf %233, %234 : vector<7x384xf32>
    %236 = arith.addf %229, %235 : vector<7x384xf32>
    %c365_i32 = arith.constant 365 : i32
    %237 = tpu.dynamic_rotate %1 by %c365_i32 dim 1 : vector<4x384xf32>, i32 -> vector<4x384xf32>
    %c8 = arith.constant 8 : index
    %c0_129 = arith.constant 0 : index
    %c0_130 = arith.constant 0 : index
    %c0_131 = arith.constant 0 : index
    %238 = vector.load %arg3[%c8, %c0_129, %c0_130, %c0_131] : memref<9x4x7x1xf32, #tpu.memory_space<vmem>>, vector<1x1x7x1xf32>
    %239 = vector.shape_cast %238 : vector<1x1x7x1xf32> to vector<7x1xf32>
    %240 = vector.extract_strided_slice %237 {offsets = [0, 0], sizes = [1, 384], strides = [1, 1]} : vector<4x384xf32> to vector<1x384xf32>
    %241 = vector.broadcast %239 : vector<7x1xf32> to vector<7x384xf32>
    %242 = vector.broadcast %240 : vector<1x384xf32> to vector<7x384xf32>
    %243 = arith.mulf %241, %242 : vector<7x384xf32>
    %244 = arith.addf %236, %243 : vector<7x384xf32>
    %c8_132 = arith.constant 8 : index
    %c1_133 = arith.constant 1 : index
    %c0_134 = arith.constant 0 : index
    %c0_135 = arith.constant 0 : index
    %245 = vector.load %arg3[%c8_132, %c1_133, %c0_134, %c0_135] : memref<9x4x7x1xf32, #tpu.memory_space<vmem>>, vector<1x1x7x1xf32>
    %246 = vector.shape_cast %245 : vector<1x1x7x1xf32> to vector<7x1xf32>
    %247 = vector.extract_strided_slice %237 {offsets = [1, 0], sizes = [1, 384], strides = [1, 1]} : vector<4x384xf32> to vector<1x384xf32>
    %248 = vector.broadcast %246 : vector<7x1xf32> to vector<7x384xf32>
    %249 = vector.broadcast %247 : vector<1x384xf32> to vector<7x384xf32>
    %250 = arith.mulf %248, %249 : vector<7x384xf32>
    %251 = arith.addf %244, %250 : vector<7x384xf32>
    %c8_136 = arith.constant 8 : index
    %c2_137 = arith.constant 2 : index
    %c0_138 = arith.constant 0 : index
    %c0_139 = arith.constant 0 : index
    %252 = vector.load %arg3[%c8_136, %c2_137, %c0_138, %c0_139] : memref<9x4x7x1xf32, #tpu.memory_space<vmem>>, vector<1x1x7x1xf32>
    %253 = vector.shape_cast %252 : vector<1x1x7x1xf32> to vector<7x1xf32>
    %254 = vector.extract_strided_slice %237 {offsets = [2, 0], sizes = [1, 384], strides = [1, 1]} : vector<4x384xf32> to vector<1x384xf32>
    %255 = vector.broadcast %253 : vector<7x1xf32> to vector<7x384xf32>
    %256 = vector.broadcast %254 : vector<1x384xf32> to vector<7x384xf32>
    %257 = arith.mulf %255, %256 : vector<7x384xf32>
    %258 = arith.addf %251, %257 : vector<7x384xf32>
    %c8_140 = arith.constant 8 : index
    %c3_141 = arith.constant 3 : index
    %c0_142 = arith.constant 0 : index
    %c0_143 = arith.constant 0 : index
    %259 = vector.load %arg3[%c8_140, %c3_141, %c0_142, %c0_143] : memref<9x4x7x1xf32, #tpu.memory_space<vmem>>, vector<1x1x7x1xf32>
    %260 = vector.shape_cast %259 : vector<1x1x7x1xf32> to vector<7x1xf32>
    %261 = vector.extract_strided_slice %237 {offsets = [3, 0], sizes = [1, 384], strides = [1, 1]} : vector<4x384xf32> to vector<1x384xf32>
    %262 = vector.broadcast %260 : vector<7x1xf32> to vector<7x384xf32>
    %263 = vector.broadcast %261 : vector<1x384xf32> to vector<7x384xf32>
    %264 = arith.mulf %262, %263 : vector<7x384xf32>
    %265 = arith.addf %258, %264 : vector<7x384xf32>
    %266 = vector.broadcast %3 : vector<7x1xf32> to vector<7x384xf32>
    %267 = arith.mulf %265, %266 : vector<7x384xf32>
    %268 = vector.broadcast %4 : vector<7x1xf32> to vector<7x384xf32>
    %269 = arith.addf %267, %268 : vector<7x384xf32>
    %cst_144 = arith.constant 0.000000e+00 : f32
    %270 = vector.broadcast %cst_144 : f32 to vector<7x384xf32>
    %271 = arith.maximumf %269, %270 : vector<7x384xf32>
    %272 = vector.broadcast %2 : vector<1x384xf32> to vector<7x384xf32>
    %273 = arith.mulf %271, %272 : vector<7x384xf32>
    %cst_145 = arith.constant 0.000000e+00 : f32
    %274 = vector.broadcast %cst_145 : f32 to vector<4x384xf32>
    %c19_i32_146 = arith.constant 19 : i32
    %275 = tpu.dynamic_rotate %273 by %c19_i32_146 dim 1 : vector<7x384xf32>, i32 -> vector<7x384xf32>
    %c0_147 = arith.constant 0 : index
    %c0_148 = arith.constant 0 : index
    %c0_149 = arith.constant 0 : index
    %c0_150 = arith.constant 0 : index
    %276 = vector.load %arg4[%c0_147, %c0_148, %c0_149, %c0_150] : memref<9x7x4x1xf32, #tpu.memory_space<vmem>>, vector<1x1x4x1xf32>
    %277 = vector.shape_cast %276 : vector<1x1x4x1xf32> to vector<4x1xf32>
    %278 = vector.extract_strided_slice %275 {offsets = [0, 0], sizes = [1, 384], strides = [1, 1]} : vector<7x384xf32> to vector<1x384xf32>
    %279 = vector.broadcast %277 : vector<4x1xf32> to vector<4x384xf32>
    %280 = vector.broadcast %278 : vector<1x384xf32> to vector<4x384xf32>
    %281 = arith.mulf %279, %280 : vector<4x384xf32>
    %282 = arith.addf %274, %281 : vector<4x384xf32>
    %c0_151 = arith.constant 0 : index
    %c1_152 = arith.constant 1 : index
    %c0_153 = arith.constant 0 : index
    %c0_154 = arith.constant 0 : index
    %283 = vector.load %arg4[%c0_151, %c1_152, %c0_153, %c0_154] : memref<9x7x4x1xf32, #tpu.memory_space<vmem>>, vector<1x1x4x1xf32>
    %284 = vector.shape_cast %283 : vector<1x1x4x1xf32> to vector<4x1xf32>
    %285 = vector.extract_strided_slice %275 {offsets = [1, 0], sizes = [1, 384], strides = [1, 1]} : vector<7x384xf32> to vector<1x384xf32>
    %286 = vector.broadcast %284 : vector<4x1xf32> to vector<4x384xf32>
    %287 = vector.broadcast %285 : vector<1x384xf32> to vector<4x384xf32>
    %288 = arith.mulf %286, %287 : vector<4x384xf32>
    %289 = arith.addf %282, %288 : vector<4x384xf32>
    %c0_155 = arith.constant 0 : index
    %c2_156 = arith.constant 2 : index
    %c0_157 = arith.constant 0 : index
    %c0_158 = arith.constant 0 : index
    %290 = vector.load %arg4[%c0_155, %c2_156, %c0_157, %c0_158] : memref<9x7x4x1xf32, #tpu.memory_space<vmem>>, vector<1x1x4x1xf32>
    %291 = vector.shape_cast %290 : vector<1x1x4x1xf32> to vector<4x1xf32>
    %292 = vector.extract_strided_slice %275 {offsets = [2, 0], sizes = [1, 384], strides = [1, 1]} : vector<7x384xf32> to vector<1x384xf32>
    %293 = vector.broadcast %291 : vector<4x1xf32> to vector<4x384xf32>
    %294 = vector.broadcast %292 : vector<1x384xf32> to vector<4x384xf32>
    %295 = arith.mulf %293, %294 : vector<4x384xf32>
    %296 = arith.addf %289, %295 : vector<4x384xf32>
    %c0_159 = arith.constant 0 : index
    %c3_160 = arith.constant 3 : index
    %c0_161 = arith.constant 0 : index
    %c0_162 = arith.constant 0 : index
    %297 = vector.load %arg4[%c0_159, %c3_160, %c0_161, %c0_162] : memref<9x7x4x1xf32, #tpu.memory_space<vmem>>, vector<1x1x4x1xf32>
    %298 = vector.shape_cast %297 : vector<1x1x4x1xf32> to vector<4x1xf32>
    %299 = vector.extract_strided_slice %275 {offsets = [3, 0], sizes = [1, 384], strides = [1, 1]} : vector<7x384xf32> to vector<1x384xf32>
    %300 = vector.broadcast %298 : vector<4x1xf32> to vector<4x384xf32>
    %301 = vector.broadcast %299 : vector<1x384xf32> to vector<4x384xf32>
    %302 = arith.mulf %300, %301 : vector<4x384xf32>
    %303 = arith.addf %296, %302 : vector<4x384xf32>
    %c0_163 = arith.constant 0 : index
    %c4_164 = arith.constant 4 : index
    %c0_165 = arith.constant 0 : index
    %c0_166 = arith.constant 0 : index
    %304 = vector.load %arg4[%c0_163, %c4_164, %c0_165, %c0_166] : memref<9x7x4x1xf32, #tpu.memory_space<vmem>>, vector<1x1x4x1xf32>
    %305 = vector.shape_cast %304 : vector<1x1x4x1xf32> to vector<4x1xf32>
    %306 = vector.extract_strided_slice %275 {offsets = [4, 0], sizes = [1, 384], strides = [1, 1]} : vector<7x384xf32> to vector<1x384xf32>
    %307 = vector.broadcast %305 : vector<4x1xf32> to vector<4x384xf32>
    %308 = vector.broadcast %306 : vector<1x384xf32> to vector<4x384xf32>
    %309 = arith.mulf %307, %308 : vector<4x384xf32>
    %310 = arith.addf %303, %309 : vector<4x384xf32>
    %c0_167 = arith.constant 0 : index
    %c5_168 = arith.constant 5 : index
    %c0_169 = arith.constant 0 : index
    %c0_170 = arith.constant 0 : index
    %311 = vector.load %arg4[%c0_167, %c5_168, %c0_169, %c0_170] : memref<9x7x4x1xf32, #tpu.memory_space<vmem>>, vector<1x1x4x1xf32>
    %312 = vector.shape_cast %311 : vector<1x1x4x1xf32> to vector<4x1xf32>
    %313 = vector.extract_strided_slice %275 {offsets = [5, 0], sizes = [1, 384], strides = [1, 1]} : vector<7x384xf32> to vector<1x384xf32>
    %314 = vector.broadcast %312 : vector<4x1xf32> to vector<4x384xf32>
    %315 = vector.broadcast %313 : vector<1x384xf32> to vector<4x384xf32>
    %316 = arith.mulf %314, %315 : vector<4x384xf32>
    %317 = arith.addf %310, %316 : vector<4x384xf32>
    %c0_171 = arith.constant 0 : index
    %c6_172 = arith.constant 6 : index
    %c0_173 = arith.constant 0 : index
    %c0_174 = arith.constant 0 : index
    %318 = vector.load %arg4[%c0_171, %c6_172, %c0_173, %c0_174] : memref<9x7x4x1xf32, #tpu.memory_space<vmem>>, vector<1x1x4x1xf32>
    %319 = vector.shape_cast %318 : vector<1x1x4x1xf32> to vector<4x1xf32>
    %320 = vector.extract_strided_slice %275 {offsets = [6, 0], sizes = [1, 384], strides = [1, 1]} : vector<7x384xf32> to vector<1x384xf32>
    %321 = vector.broadcast %319 : vector<4x1xf32> to vector<4x384xf32>
    %322 = vector.broadcast %320 : vector<1x384xf32> to vector<4x384xf32>
    %323 = arith.mulf %321, %322 : vector<4x384xf32>
    %324 = arith.addf %317, %323 : vector<4x384xf32>
    %c18_i32_175 = arith.constant 18 : i32
    %325 = tpu.dynamic_rotate %273 by %c18_i32_175 dim 1 : vector<7x384xf32>, i32 -> vector<7x384xf32>
    %c1_176 = arith.constant 1 : index
    %c0_177 = arith.constant 0 : index
    %c0_178 = arith.constant 0 : index
    %c0_179 = arith.constant 0 : index
    %326 = vector.load %arg4[%c1_176, %c0_177, %c0_178, %c0_179] : memref<9x7x4x1xf32, #tpu.memory_space<vmem>>, vector<1x1x4x1xf32>
    %327 = vector.shape_cast %326 : vector<1x1x4x1xf32> to vector<4x1xf32>
    %328 = vector.extract_strided_slice %325 {offsets = [0, 0], sizes = [1, 384], strides = [1, 1]} : vector<7x384xf32> to vector<1x384xf32>
    %329 = vector.broadcast %327 : vector<4x1xf32> to vector<4x384xf32>
    %330 = vector.broadcast %328 : vector<1x384xf32> to vector<4x384xf32>
    %331 = arith.mulf %329, %330 : vector<4x384xf32>
    %332 = arith.addf %324, %331 : vector<4x384xf32>
    %c1_180 = arith.constant 1 : index
    %c1_181 = arith.constant 1 : index
    %c0_182 = arith.constant 0 : index
    %c0_183 = arith.constant 0 : index
    %333 = vector.load %arg4[%c1_180, %c1_181, %c0_182, %c0_183] : memref<9x7x4x1xf32, #tpu.memory_space<vmem>>, vector<1x1x4x1xf32>
    %334 = vector.shape_cast %333 : vector<1x1x4x1xf32> to vector<4x1xf32>
    %335 = vector.extract_strided_slice %325 {offsets = [1, 0], sizes = [1, 384], strides = [1, 1]} : vector<7x384xf32> to vector<1x384xf32>
    %336 = vector.broadcast %334 : vector<4x1xf32> to vector<4x384xf32>
    %337 = vector.broadcast %335 : vector<1x384xf32> to vector<4x384xf32>
    %338 = arith.mulf %336, %337 : vector<4x384xf32>
    %339 = arith.addf %332, %338 : vector<4x384xf32>
    %c1_184 = arith.constant 1 : index
    %c2_185 = arith.constant 2 : index
    %c0_186 = arith.constant 0 : index
    %c0_187 = arith.constant 0 : index
    %340 = vector.load %arg4[%c1_184, %c2_185, %c0_186, %c0_187] : memref<9x7x4x1xf32, #tpu.memory_space<vmem>>, vector<1x1x4x1xf32>
    %341 = vector.shape_cast %340 : vector<1x1x4x1xf32> to vector<4x1xf32>
    %342 = vector.extract_strided_slice %325 {offsets = [2, 0], sizes = [1, 384], strides = [1, 1]} : vector<7x384xf32> to vector<1x384xf32>
    %343 = vector.broadcast %341 : vector<4x1xf32> to vector<4x384xf32>
    %344 = vector.broadcast %342 : vector<1x384xf32> to vector<4x384xf32>
    %345 = arith.mulf %343, %344 : vector<4x384xf32>
    %346 = arith.addf %339, %345 : vector<4x384xf32>
    %c1_188 = arith.constant 1 : index
    %c3_189 = arith.constant 3 : index
    %c0_190 = arith.constant 0 : index
    %c0_191 = arith.constant 0 : index
    %347 = vector.load %arg4[%c1_188, %c3_189, %c0_190, %c0_191] : memref<9x7x4x1xf32, #tpu.memory_space<vmem>>, vector<1x1x4x1xf32>
    %348 = vector.shape_cast %347 : vector<1x1x4x1xf32> to vector<4x1xf32>
    %349 = vector.extract_strided_slice %325 {offsets = [3, 0], sizes = [1, 384], strides = [1, 1]} : vector<7x384xf32> to vector<1x384xf32>
    %350 = vector.broadcast %348 : vector<4x1xf32> to vector<4x384xf32>
    %351 = vector.broadcast %349 : vector<1x384xf32> to vector<4x384xf32>
    %352 = arith.mulf %350, %351 : vector<4x384xf32>
    %353 = arith.addf %346, %352 : vector<4x384xf32>
    %c1_192 = arith.constant 1 : index
    %c4_193 = arith.constant 4 : index
    %c0_194 = arith.constant 0 : index
    %c0_195 = arith.constant 0 : index
    %354 = vector.load %arg4[%c1_192, %c4_193, %c0_194, %c0_195] : memref<9x7x4x1xf32, #tpu.memory_space<vmem>>, vector<1x1x4x1xf32>
    %355 = vector.shape_cast %354 : vector<1x1x4x1xf32> to vector<4x1xf32>
    %356 = vector.extract_strided_slice %325 {offsets = [4, 0], sizes = [1, 384], strides = [1, 1]} : vector<7x384xf32> to vector<1x384xf32>
    %357 = vector.broadcast %355 : vector<4x1xf32> to vector<4x384xf32>
    %358 = vector.broadcast %356 : vector<1x384xf32> to vector<4x384xf32>
    %359 = arith.mulf %357, %358 : vector<4x384xf32>
    %360 = arith.addf %353, %359 : vector<4x384xf32>
    %c1_196 = arith.constant 1 : index
    %c5_197 = arith.constant 5 : index
    %c0_198 = arith.constant 0 : index
    %c0_199 = arith.constant 0 : index
    %361 = vector.load %arg4[%c1_196, %c5_197, %c0_198, %c0_199] : memref<9x7x4x1xf32, #tpu.memory_space<vmem>>, vector<1x1x4x1xf32>
    %362 = vector.shape_cast %361 : vector<1x1x4x1xf32> to vector<4x1xf32>
    %363 = vector.extract_strided_slice %325 {offsets = [5, 0], sizes = [1, 384], strides = [1, 1]} : vector<7x384xf32> to vector<1x384xf32>
    %364 = vector.broadcast %362 : vector<4x1xf32> to vector<4x384xf32>
    %365 = vector.broadcast %363 : vector<1x384xf32> to vector<4x384xf32>
    %366 = arith.mulf %364, %365 : vector<4x384xf32>
    %367 = arith.addf %360, %366 : vector<4x384xf32>
    %c1_200 = arith.constant 1 : index
    %c6_201 = arith.constant 6 : index
    %c0_202 = arith.constant 0 : index
    %c0_203 = arith.constant 0 : index
    %368 = vector.load %arg4[%c1_200, %c6_201, %c0_202, %c0_203] : memref<9x7x4x1xf32, #tpu.memory_space<vmem>>, vector<1x1x4x1xf32>
    %369 = vector.shape_cast %368 : vector<1x1x4x1xf32> to vector<4x1xf32>
    %370 = vector.extract_strided_slice %325 {offsets = [6, 0], sizes = [1, 384], strides = [1, 1]} : vector<7x384xf32> to vector<1x384xf32>
    %371 = vector.broadcast %369 : vector<4x1xf32> to vector<4x384xf32>
    %372 = vector.broadcast %370 : vector<1x384xf32> to vector<4x384xf32>
    %373 = arith.mulf %371, %372 : vector<4x384xf32>
    %374 = arith.addf %367, %373 : vector<4x384xf32>
    %c17_i32_204 = arith.constant 17 : i32
    %375 = tpu.dynamic_rotate %273 by %c17_i32_204 dim 1 : vector<7x384xf32>, i32 -> vector<7x384xf32>
    %c2_205 = arith.constant 2 : index
    %c0_206 = arith.constant 0 : index
    %c0_207 = arith.constant 0 : index
    %c0_208 = arith.constant 0 : index
    %376 = vector.load %arg4[%c2_205, %c0_206, %c0_207, %c0_208] : memref<9x7x4x1xf32, #tpu.memory_space<vmem>>, vector<1x1x4x1xf32>
    %377 = vector.shape_cast %376 : vector<1x1x4x1xf32> to vector<4x1xf32>
    %378 = vector.extract_strided_slice %375 {offsets = [0, 0], sizes = [1, 384], strides = [1, 1]} : vector<7x384xf32> to vector<1x384xf32>
    %379 = vector.broadcast %377 : vector<4x1xf32> to vector<4x384xf32>
    %380 = vector.broadcast %378 : vector<1x384xf32> to vector<4x384xf32>
    %381 = arith.mulf %379, %380 : vector<4x384xf32>
    %382 = arith.addf %374, %381 : vector<4x384xf32>
    %c2_209 = arith.constant 2 : index
    %c1_210 = arith.constant 1 : index
    %c0_211 = arith.constant 0 : index
    %c0_212 = arith.constant 0 : index
    %383 = vector.load %arg4[%c2_209, %c1_210, %c0_211, %c0_212] : memref<9x7x4x1xf32, #tpu.memory_space<vmem>>, vector<1x1x4x1xf32>
    %384 = vector.shape_cast %383 : vector<1x1x4x1xf32> to vector<4x1xf32>
    %385 = vector.extract_strided_slice %375 {offsets = [1, 0], sizes = [1, 384], strides = [1, 1]} : vector<7x384xf32> to vector<1x384xf32>
    %386 = vector.broadcast %384 : vector<4x1xf32> to vector<4x384xf32>
    %387 = vector.broadcast %385 : vector<1x384xf32> to vector<4x384xf32>
    %388 = arith.mulf %386, %387 : vector<4x384xf32>
    %389 = arith.addf %382, %388 : vector<4x384xf32>
    %c2_213 = arith.constant 2 : index
    %c2_214 = arith.constant 2 : index
    %c0_215 = arith.constant 0 : index
    %c0_216 = arith.constant 0 : index
    %390 = vector.load %arg4[%c2_213, %c2_214, %c0_215, %c0_216] : memref<9x7x4x1xf32, #tpu.memory_space<vmem>>, vector<1x1x4x1xf32>
    %391 = vector.shape_cast %390 : vector<1x1x4x1xf32> to vector<4x1xf32>
    %392 = vector.extract_strided_slice %375 {offsets = [2, 0], sizes = [1, 384], strides = [1, 1]} : vector<7x384xf32> to vector<1x384xf32>
    %393 = vector.broadcast %391 : vector<4x1xf32> to vector<4x384xf32>
    %394 = vector.broadcast %392 : vector<1x384xf32> to vector<4x384xf32>
    %395 = arith.mulf %393, %394 : vector<4x384xf32>
    %396 = arith.addf %389, %395 : vector<4x384xf32>
    %c2_217 = arith.constant 2 : index
    %c3_218 = arith.constant 3 : index
    %c0_219 = arith.constant 0 : index
    %c0_220 = arith.constant 0 : index
    %397 = vector.load %arg4[%c2_217, %c3_218, %c0_219, %c0_220] : memref<9x7x4x1xf32, #tpu.memory_space<vmem>>, vector<1x1x4x1xf32>
    %398 = vector.shape_cast %397 : vector<1x1x4x1xf32> to vector<4x1xf32>
    %399 = vector.extract_strided_slice %375 {offsets = [3, 0], sizes = [1, 384], strides = [1, 1]} : vector<7x384xf32> to vector<1x384xf32>
    %400 = vector.broadcast %398 : vector<4x1xf32> to vector<4x384xf32>
    %401 = vector.broadcast %399 : vector<1x384xf32> to vector<4x384xf32>
    %402 = arith.mulf %400, %401 : vector<4x384xf32>
    %403 = arith.addf %396, %402 : vector<4x384xf32>
    %c2_221 = arith.constant 2 : index
    %c4_222 = arith.constant 4 : index
    %c0_223 = arith.constant 0 : index
    %c0_224 = arith.constant 0 : index
    %404 = vector.load %arg4[%c2_221, %c4_222, %c0_223, %c0_224] : memref<9x7x4x1xf32, #tpu.memory_space<vmem>>, vector<1x1x4x1xf32>
    %405 = vector.shape_cast %404 : vector<1x1x4x1xf32> to vector<4x1xf32>
    %406 = vector.extract_strided_slice %375 {offsets = [4, 0], sizes = [1, 384], strides = [1, 1]} : vector<7x384xf32> to vector<1x384xf32>
    %407 = vector.broadcast %405 : vector<4x1xf32> to vector<4x384xf32>
    %408 = vector.broadcast %406 : vector<1x384xf32> to vector<4x384xf32>
    %409 = arith.mulf %407, %408 : vector<4x384xf32>
    %410 = arith.addf %403, %409 : vector<4x384xf32>
    %c2_225 = arith.constant 2 : index
    %c5_226 = arith.constant 5 : index
    %c0_227 = arith.constant 0 : index
    %c0_228 = arith.constant 0 : index
    %411 = vector.load %arg4[%c2_225, %c5_226, %c0_227, %c0_228] : memref<9x7x4x1xf32, #tpu.memory_space<vmem>>, vector<1x1x4x1xf32>
    %412 = vector.shape_cast %411 : vector<1x1x4x1xf32> to vector<4x1xf32>
    %413 = vector.extract_strided_slice %375 {offsets = [5, 0], sizes = [1, 384], strides = [1, 1]} : vector<7x384xf32> to vector<1x384xf32>
    %414 = vector.broadcast %412 : vector<4x1xf32> to vector<4x384xf32>
    %415 = vector.broadcast %413 : vector<1x384xf32> to vector<4x384xf32>
    %416 = arith.mulf %414, %415 : vector<4x384xf32>
    %417 = arith.addf %410, %416 : vector<4x384xf32>
    %c2_229 = arith.constant 2 : index
    %c6_230 = arith.constant 6 : index
    %c0_231 = arith.constant 0 : index
    %c0_232 = arith.constant 0 : index
    %418 = vector.load %arg4[%c2_229, %c6_230, %c0_231, %c0_232] : memref<9x7x4x1xf32, #tpu.memory_space<vmem>>, vector<1x1x4x1xf32>
    %419 = vector.shape_cast %418 : vector<1x1x4x1xf32> to vector<4x1xf32>
    %420 = vector.extract_strided_slice %375 {offsets = [6, 0], sizes = [1, 384], strides = [1, 1]} : vector<7x384xf32> to vector<1x384xf32>
    %421 = vector.broadcast %419 : vector<4x1xf32> to vector<4x384xf32>
    %422 = vector.broadcast %420 : vector<1x384xf32> to vector<4x384xf32>
    %423 = arith.mulf %421, %422 : vector<4x384xf32>
    %424 = arith.addf %417, %423 : vector<4x384xf32>
    %c1_i32_233 = arith.constant 1 : i32
    %425 = tpu.dynamic_rotate %273 by %c1_i32_233 dim 1 : vector<7x384xf32>, i32 -> vector<7x384xf32>
    %c3_234 = arith.constant 3 : index
    %c0_235 = arith.constant 0 : index
    %c0_236 = arith.constant 0 : index
    %c0_237 = arith.constant 0 : index
    %426 = vector.load %arg4[%c3_234, %c0_235, %c0_236, %c0_237] : memref<9x7x4x1xf32, #tpu.memory_space<vmem>>, vector<1x1x4x1xf32>
    %427 = vector.shape_cast %426 : vector<1x1x4x1xf32> to vector<4x1xf32>
    %428 = vector.extract_strided_slice %425 {offsets = [0, 0], sizes = [1, 384], strides = [1, 1]} : vector<7x384xf32> to vector<1x384xf32>
    %429 = vector.broadcast %427 : vector<4x1xf32> to vector<4x384xf32>
    %430 = vector.broadcast %428 : vector<1x384xf32> to vector<4x384xf32>
    %431 = arith.mulf %429, %430 : vector<4x384xf32>
    %432 = arith.addf %424, %431 : vector<4x384xf32>
    %c3_238 = arith.constant 3 : index
    %c1_239 = arith.constant 1 : index
    %c0_240 = arith.constant 0 : index
    %c0_241 = arith.constant 0 : index
    %433 = vector.load %arg4[%c3_238, %c1_239, %c0_240, %c0_241] : memref<9x7x4x1xf32, #tpu.memory_space<vmem>>, vector<1x1x4x1xf32>
    %434 = vector.shape_cast %433 : vector<1x1x4x1xf32> to vector<4x1xf32>
    %435 = vector.extract_strided_slice %425 {offsets = [1, 0], sizes = [1, 384], strides = [1, 1]} : vector<7x384xf32> to vector<1x384xf32>
    %436 = vector.broadcast %434 : vector<4x1xf32> to vector<4x384xf32>
    %437 = vector.broadcast %435 : vector<1x384xf32> to vector<4x384xf32>
    %438 = arith.mulf %436, %437 : vector<4x384xf32>
    %439 = arith.addf %432, %438 : vector<4x384xf32>
    %c3_242 = arith.constant 3 : index
    %c2_243 = arith.constant 2 : index
    %c0_244 = arith.constant 0 : index
    %c0_245 = arith.constant 0 : index
    %440 = vector.load %arg4[%c3_242, %c2_243, %c0_244, %c0_245] : memref<9x7x4x1xf32, #tpu.memory_space<vmem>>, vector<1x1x4x1xf32>
    %441 = vector.shape_cast %440 : vector<1x1x4x1xf32> to vector<4x1xf32>
    %442 = vector.extract_strided_slice %425 {offsets = [2, 0], sizes = [1, 384], strides = [1, 1]} : vector<7x384xf32> to vector<1x384xf32>
    %443 = vector.broadcast %441 : vector<4x1xf32> to vector<4x384xf32>
    %444 = vector.broadcast %442 : vector<1x384xf32> to vector<4x384xf32>
    %445 = arith.mulf %443, %444 : vector<4x384xf32>
    %446 = arith.addf %439, %445 : vector<4x384xf32>
    %c3_246 = arith.constant 3 : index
    %c3_247 = arith.constant 3 : index
    %c0_248 = arith.constant 0 : index
    %c0_249 = arith.constant 0 : index
    %447 = vector.load %arg4[%c3_246, %c3_247, %c0_248, %c0_249] : memref<9x7x4x1xf32, #tpu.memory_space<vmem>>, vector<1x1x4x1xf32>
    %448 = vector.shape_cast %447 : vector<1x1x4x1xf32> to vector<4x1xf32>
    %449 = vector.extract_strided_slice %425 {offsets = [3, 0], sizes = [1, 384], strides = [1, 1]} : vector<7x384xf32> to vector<1x384xf32>
    %450 = vector.broadcast %448 : vector<4x1xf32> to vector<4x384xf32>
    %451 = vector.broadcast %449 : vector<1x384xf32> to vector<4x384xf32>
    %452 = arith.mulf %450, %451 : vector<4x384xf32>
    %453 = arith.addf %446, %452 : vector<4x384xf32>
    %c3_250 = arith.constant 3 : index
    %c4_251 = arith.constant 4 : index
    %c0_252 = arith.constant 0 : index
    %c0_253 = arith.constant 0 : index
    %454 = vector.load %arg4[%c3_250, %c4_251, %c0_252, %c0_253] : memref<9x7x4x1xf32, #tpu.memory_space<vmem>>, vector<1x1x4x1xf32>
    %455 = vector.shape_cast %454 : vector<1x1x4x1xf32> to vector<4x1xf32>
    %456 = vector.extract_strided_slice %425 {offsets = [4, 0], sizes = [1, 384], strides = [1, 1]} : vector<7x384xf32> to vector<1x384xf32>
    %457 = vector.broadcast %455 : vector<4x1xf32> to vector<4x384xf32>
    %458 = vector.broadcast %456 : vector<1x384xf32> to vector<4x384xf32>
    %459 = arith.mulf %457, %458 : vector<4x384xf32>
    %460 = arith.addf %453, %459 : vector<4x384xf32>
    %c3_254 = arith.constant 3 : index
    %c5_255 = arith.constant 5 : index
    %c0_256 = arith.constant 0 : index
    %c0_257 = arith.constant 0 : index
    %461 = vector.load %arg4[%c3_254, %c5_255, %c0_256, %c0_257] : memref<9x7x4x1xf32, #tpu.memory_space<vmem>>, vector<1x1x4x1xf32>
    %462 = vector.shape_cast %461 : vector<1x1x4x1xf32> to vector<4x1xf32>
    %463 = vector.extract_strided_slice %425 {offsets = [5, 0], sizes = [1, 384], strides = [1, 1]} : vector<7x384xf32> to vector<1x384xf32>
    %464 = vector.broadcast %462 : vector<4x1xf32> to vector<4x384xf32>
    %465 = vector.broadcast %463 : vector<1x384xf32> to vector<4x384xf32>
    %466 = arith.mulf %464, %465 : vector<4x384xf32>
    %467 = arith.addf %460, %466 : vector<4x384xf32>
    %c3_258 = arith.constant 3 : index
    %c6_259 = arith.constant 6 : index
    %c0_260 = arith.constant 0 : index
    %c0_261 = arith.constant 0 : index
    %468 = vector.load %arg4[%c3_258, %c6_259, %c0_260, %c0_261] : memref<9x7x4x1xf32, #tpu.memory_space<vmem>>, vector<1x1x4x1xf32>
    %469 = vector.shape_cast %468 : vector<1x1x4x1xf32> to vector<4x1xf32>
    %470 = vector.extract_strided_slice %425 {offsets = [6, 0], sizes = [1, 384], strides = [1, 1]} : vector<7x384xf32> to vector<1x384xf32>
    %471 = vector.broadcast %469 : vector<4x1xf32> to vector<4x384xf32>
    %472 = vector.broadcast %470 : vector<1x384xf32> to vector<4x384xf32>
    %473 = arith.mulf %471, %472 : vector<4x384xf32>
    %474 = arith.addf %467, %473 : vector<4x384xf32>
    %c4_262 = arith.constant 4 : index
    %c0_263 = arith.constant 0 : index
    %c0_264 = arith.constant 0 : index
    %c0_265 = arith.constant 0 : index
    %475 = vector.load %arg4[%c4_262, %c0_263, %c0_264, %c0_265] : memref<9x7x4x1xf32, #tpu.memory_space<vmem>>, vector<1x1x4x1xf32>
    %476 = vector.shape_cast %475 : vector<1x1x4x1xf32> to vector<4x1xf32>
    %477 = vector.extract_strided_slice %273 {offsets = [0, 0], sizes = [1, 384], strides = [1, 1]} : vector<7x384xf32> to vector<1x384xf32>
    %478 = vector.broadcast %476 : vector<4x1xf32> to vector<4x384xf32>
    %479 = vector.broadcast %477 : vector<1x384xf32> to vector<4x384xf32>
    %480 = arith.mulf %478, %479 : vector<4x384xf32>
    %481 = arith.addf %474, %480 : vector<4x384xf32>
    %c4_266 = arith.constant 4 : index
    %c1_267 = arith.constant 1 : index
    %c0_268 = arith.constant 0 : index
    %c0_269 = arith.constant 0 : index
    %482 = vector.load %arg4[%c4_266, %c1_267, %c0_268, %c0_269] : memref<9x7x4x1xf32, #tpu.memory_space<vmem>>, vector<1x1x4x1xf32>
    %483 = vector.shape_cast %482 : vector<1x1x4x1xf32> to vector<4x1xf32>
    %484 = vector.extract_strided_slice %273 {offsets = [1, 0], sizes = [1, 384], strides = [1, 1]} : vector<7x384xf32> to vector<1x384xf32>
    %485 = vector.broadcast %483 : vector<4x1xf32> to vector<4x384xf32>
    %486 = vector.broadcast %484 : vector<1x384xf32> to vector<4x384xf32>
    %487 = arith.mulf %485, %486 : vector<4x384xf32>
    %488 = arith.addf %481, %487 : vector<4x384xf32>
    %c4_270 = arith.constant 4 : index
    %c2_271 = arith.constant 2 : index
    %c0_272 = arith.constant 0 : index
    %c0_273 = arith.constant 0 : index
    %489 = vector.load %arg4[%c4_270, %c2_271, %c0_272, %c0_273] : memref<9x7x4x1xf32, #tpu.memory_space<vmem>>, vector<1x1x4x1xf32>
    %490 = vector.shape_cast %489 : vector<1x1x4x1xf32> to vector<4x1xf32>
    %491 = vector.extract_strided_slice %273 {offsets = [2, 0], sizes = [1, 384], strides = [1, 1]} : vector<7x384xf32> to vector<1x384xf32>
    %492 = vector.broadcast %490 : vector<4x1xf32> to vector<4x384xf32>
    %493 = vector.broadcast %491 : vector<1x384xf32> to vector<4x384xf32>
    %494 = arith.mulf %492, %493 : vector<4x384xf32>
    %495 = arith.addf %488, %494 : vector<4x384xf32>
    %c4_274 = arith.constant 4 : index
    %c3_275 = arith.constant 3 : index
    %c0_276 = arith.constant 0 : index
    %c0_277 = arith.constant 0 : index
    %496 = vector.load %arg4[%c4_274, %c3_275, %c0_276, %c0_277] : memref<9x7x4x1xf32, #tpu.memory_space<vmem>>, vector<1x1x4x1xf32>
    %497 = vector.shape_cast %496 : vector<1x1x4x1xf32> to vector<4x1xf32>
    %498 = vector.extract_strided_slice %273 {offsets = [3, 0], sizes = [1, 384], strides = [1, 1]} : vector<7x384xf32> to vector<1x384xf32>
    %499 = vector.broadcast %497 : vector<4x1xf32> to vector<4x384xf32>
    %500 = vector.broadcast %498 : vector<1x384xf32> to vector<4x384xf32>
    %501 = arith.mulf %499, %500 : vector<4x384xf32>
    %502 = arith.addf %495, %501 : vector<4x384xf32>
    %c4_278 = arith.constant 4 : index
    %c4_279 = arith.constant 4 : index
    %c0_280 = arith.constant 0 : index
    %c0_281 = arith.constant 0 : index
    %503 = vector.load %arg4[%c4_278, %c4_279, %c0_280, %c0_281] : memref<9x7x4x1xf32, #tpu.memory_space<vmem>>, vector<1x1x4x1xf32>
    %504 = vector.shape_cast %503 : vector<1x1x4x1xf32> to vector<4x1xf32>
    %505 = vector.extract_strided_slice %273 {offsets = [4, 0], sizes = [1, 384], strides = [1, 1]} : vector<7x384xf32> to vector<1x384xf32>
    %506 = vector.broadcast %504 : vector<4x1xf32> to vector<4x384xf32>
    %507 = vector.broadcast %505 : vector<1x384xf32> to vector<4x384xf32>
    %508 = arith.mulf %506, %507 : vector<4x384xf32>
    %509 = arith.addf %502, %508 : vector<4x384xf32>
    %c4_282 = arith.constant 4 : index
    %c5_283 = arith.constant 5 : index
    %c0_284 = arith.constant 0 : index
    %c0_285 = arith.constant 0 : index
    %510 = vector.load %arg4[%c4_282, %c5_283, %c0_284, %c0_285] : memref<9x7x4x1xf32, #tpu.memory_space<vmem>>, vector<1x1x4x1xf32>
    %511 = vector.shape_cast %510 : vector<1x1x4x1xf32> to vector<4x1xf32>
    %512 = vector.extract_strided_slice %273 {offsets = [5, 0], sizes = [1, 384], strides = [1, 1]} : vector<7x384xf32> to vector<1x384xf32>
    %513 = vector.broadcast %511 : vector<4x1xf32> to vector<4x384xf32>
    %514 = vector.broadcast %512 : vector<1x384xf32> to vector<4x384xf32>
    %515 = arith.mulf %513, %514 : vector<4x384xf32>
    %516 = arith.addf %509, %515 : vector<4x384xf32>
    %c4_286 = arith.constant 4 : index
    %c6_287 = arith.constant 6 : index
    %c0_288 = arith.constant 0 : index
    %c0_289 = arith.constant 0 : index
    %517 = vector.load %arg4[%c4_286, %c6_287, %c0_288, %c0_289] : memref<9x7x4x1xf32, #tpu.memory_space<vmem>>, vector<1x1x4x1xf32>
    %518 = vector.shape_cast %517 : vector<1x1x4x1xf32> to vector<4x1xf32>
    %519 = vector.extract_strided_slice %273 {offsets = [6, 0], sizes = [1, 384], strides = [1, 1]} : vector<7x384xf32> to vector<1x384xf32>
    %520 = vector.broadcast %518 : vector<4x1xf32> to vector<4x384xf32>
    %521 = vector.broadcast %519 : vector<1x384xf32> to vector<4x384xf32>
    %522 = arith.mulf %520, %521 : vector<4x384xf32>
    %523 = arith.addf %516, %522 : vector<4x384xf32>
    %c383_i32_290 = arith.constant 383 : i32
    %524 = tpu.dynamic_rotate %273 by %c383_i32_290 dim 1 : vector<7x384xf32>, i32 -> vector<7x384xf32>
    %c5_291 = arith.constant 5 : index
    %c0_292 = arith.constant 0 : index
    %c0_293 = arith.constant 0 : index
    %c0_294 = arith.constant 0 : index
    %525 = vector.load %arg4[%c5_291, %c0_292, %c0_293, %c0_294] : memref<9x7x4x1xf32, #tpu.memory_space<vmem>>, vector<1x1x4x1xf32>
    %526 = vector.shape_cast %525 : vector<1x1x4x1xf32> to vector<4x1xf32>
    %527 = vector.extract_strided_slice %524 {offsets = [0, 0], sizes = [1, 384], strides = [1, 1]} : vector<7x384xf32> to vector<1x384xf32>
    %528 = vector.broadcast %526 : vector<4x1xf32> to vector<4x384xf32>
    %529 = vector.broadcast %527 : vector<1x384xf32> to vector<4x384xf32>
    %530 = arith.mulf %528, %529 : vector<4x384xf32>
    %531 = arith.addf %523, %530 : vector<4x384xf32>
    %c5_295 = arith.constant 5 : index
    %c1_296 = arith.constant 1 : index
    %c0_297 = arith.constant 0 : index
    %c0_298 = arith.constant 0 : index
    %532 = vector.load %arg4[%c5_295, %c1_296, %c0_297, %c0_298] : memref<9x7x4x1xf32, #tpu.memory_space<vmem>>, vector<1x1x4x1xf32>
    %533 = vector.shape_cast %532 : vector<1x1x4x1xf32> to vector<4x1xf32>
    %534 = vector.extract_strided_slice %524 {offsets = [1, 0], sizes = [1, 384], strides = [1, 1]} : vector<7x384xf32> to vector<1x384xf32>
    %535 = vector.broadcast %533 : vector<4x1xf32> to vector<4x384xf32>
    %536 = vector.broadcast %534 : vector<1x384xf32> to vector<4x384xf32>
    %537 = arith.mulf %535, %536 : vector<4x384xf32>
    %538 = arith.addf %531, %537 : vector<4x384xf32>
    %c5_299 = arith.constant 5 : index
    %c2_300 = arith.constant 2 : index
    %c0_301 = arith.constant 0 : index
    %c0_302 = arith.constant 0 : index
    %539 = vector.load %arg4[%c5_299, %c2_300, %c0_301, %c0_302] : memref<9x7x4x1xf32, #tpu.memory_space<vmem>>, vector<1x1x4x1xf32>
    %540 = vector.shape_cast %539 : vector<1x1x4x1xf32> to vector<4x1xf32>
    %541 = vector.extract_strided_slice %524 {offsets = [2, 0], sizes = [1, 384], strides = [1, 1]} : vector<7x384xf32> to vector<1x384xf32>
    %542 = vector.broadcast %540 : vector<4x1xf32> to vector<4x384xf32>
    %543 = vector.broadcast %541 : vector<1x384xf32> to vector<4x384xf32>
    %544 = arith.mulf %542, %543 : vector<4x384xf32>
    %545 = arith.addf %538, %544 : vector<4x384xf32>
    %c5_303 = arith.constant 5 : index
    %c3_304 = arith.constant 3 : index
    %c0_305 = arith.constant 0 : index
    %c0_306 = arith.constant 0 : index
    %546 = vector.load %arg4[%c5_303, %c3_304, %c0_305, %c0_306] : memref<9x7x4x1xf32, #tpu.memory_space<vmem>>, vector<1x1x4x1xf32>
    %547 = vector.shape_cast %546 : vector<1x1x4x1xf32> to vector<4x1xf32>
    %548 = vector.extract_strided_slice %524 {offsets = [3, 0], sizes = [1, 384], strides = [1, 1]} : vector<7x384xf32> to vector<1x384xf32>
    %549 = vector.broadcast %547 : vector<4x1xf32> to vector<4x384xf32>
    %550 = vector.broadcast %548 : vector<1x384xf32> to vector<4x384xf32>
    %551 = arith.mulf %549, %550 : vector<4x384xf32>
    %552 = arith.addf %545, %551 : vector<4x384xf32>
    %c5_307 = arith.constant 5 : index
    %c4_308 = arith.constant 4 : index
    %c0_309 = arith.constant 0 : index
    %c0_310 = arith.constant 0 : index
    %553 = vector.load %arg4[%c5_307, %c4_308, %c0_309, %c0_310] : memref<9x7x4x1xf32, #tpu.memory_space<vmem>>, vector<1x1x4x1xf32>
    %554 = vector.shape_cast %553 : vector<1x1x4x1xf32> to vector<4x1xf32>
    %555 = vector.extract_strided_slice %524 {offsets = [4, 0], sizes = [1, 384], strides = [1, 1]} : vector<7x384xf32> to vector<1x384xf32>
    %556 = vector.broadcast %554 : vector<4x1xf32> to vector<4x384xf32>
    %557 = vector.broadcast %555 : vector<1x384xf32> to vector<4x384xf32>
    %558 = arith.mulf %556, %557 : vector<4x384xf32>
    %559 = arith.addf %552, %558 : vector<4x384xf32>
    %c5_311 = arith.constant 5 : index
    %c5_312 = arith.constant 5 : index
    %c0_313 = arith.constant 0 : index
    %c0_314 = arith.constant 0 : index
    %560 = vector.load %arg4[%c5_311, %c5_312, %c0_313, %c0_314] : memref<9x7x4x1xf32, #tpu.memory_space<vmem>>, vector<1x1x4x1xf32>
    %561 = vector.shape_cast %560 : vector<1x1x4x1xf32> to vector<4x1xf32>
    %562 = vector.extract_strided_slice %524 {offsets = [5, 0], sizes = [1, 384], strides = [1, 1]} : vector<7x384xf32> to vector<1x384xf32>
    %563 = vector.broadcast %561 : vector<4x1xf32> to vector<4x384xf32>
    %564 = vector.broadcast %562 : vector<1x384xf32> to vector<4x384xf32>
    %565 = arith.mulf %563, %564 : vector<4x384xf32>
    %566 = arith.addf %559, %565 : vector<4x384xf32>
    %c5_315 = arith.constant 5 : index
    %c6_316 = arith.constant 6 : index
    %c0_317 = arith.constant 0 : index
    %c0_318 = arith.constant 0 : index
    %567 = vector.load %arg4[%c5_315, %c6_316, %c0_317, %c0_318] : memref<9x7x4x1xf32, #tpu.memory_space<vmem>>, vector<1x1x4x1xf32>
    %568 = vector.shape_cast %567 : vector<1x1x4x1xf32> to vector<4x1xf32>
    %569 = vector.extract_strided_slice %524 {offsets = [6, 0], sizes = [1, 384], strides = [1, 1]} : vector<7x384xf32> to vector<1x384xf32>
    %570 = vector.broadcast %568 : vector<4x1xf32> to vector<4x384xf32>
    %571 = vector.broadcast %569 : vector<1x384xf32> to vector<4x384xf32>
    %572 = arith.mulf %570, %571 : vector<4x384xf32>
    %573 = arith.addf %566, %572 : vector<4x384xf32>
    %c367_i32_319 = arith.constant 367 : i32
    %574 = tpu.dynamic_rotate %273 by %c367_i32_319 dim 1 : vector<7x384xf32>, i32 -> vector<7x384xf32>
    %c6_320 = arith.constant 6 : index
    %c0_321 = arith.constant 0 : index
    %c0_322 = arith.constant 0 : index
    %c0_323 = arith.constant 0 : index
    %575 = vector.load %arg4[%c6_320, %c0_321, %c0_322, %c0_323] : memref<9x7x4x1xf32, #tpu.memory_space<vmem>>, vector<1x1x4x1xf32>
    %576 = vector.shape_cast %575 : vector<1x1x4x1xf32> to vector<4x1xf32>
    %577 = vector.extract_strided_slice %574 {offsets = [0, 0], sizes = [1, 384], strides = [1, 1]} : vector<7x384xf32> to vector<1x384xf32>
    %578 = vector.broadcast %576 : vector<4x1xf32> to vector<4x384xf32>
    %579 = vector.broadcast %577 : vector<1x384xf32> to vector<4x384xf32>
    %580 = arith.mulf %578, %579 : vector<4x384xf32>
    %581 = arith.addf %573, %580 : vector<4x384xf32>
    %c6_324 = arith.constant 6 : index
    %c1_325 = arith.constant 1 : index
    %c0_326 = arith.constant 0 : index
    %c0_327 = arith.constant 0 : index
    %582 = vector.load %arg4[%c6_324, %c1_325, %c0_326, %c0_327] : memref<9x7x4x1xf32, #tpu.memory_space<vmem>>, vector<1x1x4x1xf32>
    %583 = vector.shape_cast %582 : vector<1x1x4x1xf32> to vector<4x1xf32>
    %584 = vector.extract_strided_slice %574 {offsets = [1, 0], sizes = [1, 384], strides = [1, 1]} : vector<7x384xf32> to vector<1x384xf32>
    %585 = vector.broadcast %583 : vector<4x1xf32> to vector<4x384xf32>
    %586 = vector.broadcast %584 : vector<1x384xf32> to vector<4x384xf32>
    %587 = arith.mulf %585, %586 : vector<4x384xf32>
    %588 = arith.addf %581, %587 : vector<4x384xf32>
    %c6_328 = arith.constant 6 : index
    %c2_329 = arith.constant 2 : index
    %c0_330 = arith.constant 0 : index
    %c0_331 = arith.constant 0 : index
    %589 = vector.load %arg4[%c6_328, %c2_329, %c0_330, %c0_331] : memref<9x7x4x1xf32, #tpu.memory_space<vmem>>, vector<1x1x4x1xf32>
    %590 = vector.shape_cast %589 : vector<1x1x4x1xf32> to vector<4x1xf32>
    %591 = vector.extract_strided_slice %574 {offsets = [2, 0], sizes = [1, 384], strides = [1, 1]} : vector<7x384xf32> to vector<1x384xf32>
    %592 = vector.broadcast %590 : vector<4x1xf32> to vector<4x384xf32>
    %593 = vector.broadcast %591 : vector<1x384xf32> to vector<4x384xf32>
    %594 = arith.mulf %592, %593 : vector<4x384xf32>
    %595 = arith.addf %588, %594 : vector<4x384xf32>
    %c6_332 = arith.constant 6 : index
    %c3_333 = arith.constant 3 : index
    %c0_334 = arith.constant 0 : index
    %c0_335 = arith.constant 0 : index
    %596 = vector.load %arg4[%c6_332, %c3_333, %c0_334, %c0_335] : memref<9x7x4x1xf32, #tpu.memory_space<vmem>>, vector<1x1x4x1xf32>
    %597 = vector.shape_cast %596 : vector<1x1x4x1xf32> to vector<4x1xf32>
    %598 = vector.extract_strided_slice %574 {offsets = [3, 0], sizes = [1, 384], strides = [1, 1]} : vector<7x384xf32> to vector<1x384xf32>
    %599 = vector.broadcast %597 : vector<4x1xf32> to vector<4x384xf32>
    %600 = vector.broadcast %598 : vector<1x384xf32> to vector<4x384xf32>
    %601 = arith.mulf %599, %600 : vector<4x384xf32>
    %602 = arith.addf %595, %601 : vector<4x384xf32>
    %c6_336 = arith.constant 6 : index
    %c4_337 = arith.constant 4 : index
    %c0_338 = arith.constant 0 : index
    %c0_339 = arith.constant 0 : index
    %603 = vector.load %arg4[%c6_336, %c4_337, %c0_338, %c0_339] : memref<9x7x4x1xf32, #tpu.memory_space<vmem>>, vector<1x1x4x1xf32>
    %604 = vector.shape_cast %603 : vector<1x1x4x1xf32> to vector<4x1xf32>
    %605 = vector.extract_strided_slice %574 {offsets = [4, 0], sizes = [1, 384], strides = [1, 1]} : vector<7x384xf32> to vector<1x384xf32>
    %606 = vector.broadcast %604 : vector<4x1xf32> to vector<4x384xf32>
    %607 = vector.broadcast %605 : vector<1x384xf32> to vector<4x384xf32>
    %608 = arith.mulf %606, %607 : vector<4x384xf32>
    %609 = arith.addf %602, %608 : vector<4x384xf32>
    %c6_340 = arith.constant 6 : index
    %c5_341 = arith.constant 5 : index
    %c0_342 = arith.constant 0 : index
    %c0_343 = arith.constant 0 : index
    %610 = vector.load %arg4[%c6_340, %c5_341, %c0_342, %c0_343] : memref<9x7x4x1xf32, #tpu.memory_space<vmem>>, vector<1x1x4x1xf32>
    %611 = vector.shape_cast %610 : vector<1x1x4x1xf32> to vector<4x1xf32>
    %612 = vector.extract_strided_slice %574 {offsets = [5, 0], sizes = [1, 384], strides = [1, 1]} : vector<7x384xf32> to vector<1x384xf32>
    %613 = vector.broadcast %611 : vector<4x1xf32> to vector<4x384xf32>
    %614 = vector.broadcast %612 : vector<1x384xf32> to vector<4x384xf32>
    %615 = arith.mulf %613, %614 : vector<4x384xf32>
    %616 = arith.addf %609, %615 : vector<4x384xf32>
    %c6_344 = arith.constant 6 : index
    %c6_345 = arith.constant 6 : index
    %c0_346 = arith.constant 0 : index
    %c0_347 = arith.constant 0 : index
    %617 = vector.load %arg4[%c6_344, %c6_345, %c0_346, %c0_347] : memref<9x7x4x1xf32, #tpu.memory_space<vmem>>, vector<1x1x4x1xf32>
    %618 = vector.shape_cast %617 : vector<1x1x4x1xf32> to vector<4x1xf32>
    %619 = vector.extract_strided_slice %574 {offsets = [6, 0], sizes = [1, 384], strides = [1, 1]} : vector<7x384xf32> to vector<1x384xf32>
    %620 = vector.broadcast %618 : vector<4x1xf32> to vector<4x384xf32>
    %621 = vector.broadcast %619 : vector<1x384xf32> to vector<4x384xf32>
    %622 = arith.mulf %620, %621 : vector<4x384xf32>
    %623 = arith.addf %616, %622 : vector<4x384xf32>
    %c366_i32_348 = arith.constant 366 : i32
    %624 = tpu.dynamic_rotate %273 by %c366_i32_348 dim 1 : vector<7x384xf32>, i32 -> vector<7x384xf32>
    %c7_349 = arith.constant 7 : index
    %c0_350 = arith.constant 0 : index
    %c0_351 = arith.constant 0 : index
    %c0_352 = arith.constant 0 : index
    %625 = vector.load %arg4[%c7_349, %c0_350, %c0_351, %c0_352] : memref<9x7x4x1xf32, #tpu.memory_space<vmem>>, vector<1x1x4x1xf32>
    %626 = vector.shape_cast %625 : vector<1x1x4x1xf32> to vector<4x1xf32>
    %627 = vector.extract_strided_slice %624 {offsets = [0, 0], sizes = [1, 384], strides = [1, 1]} : vector<7x384xf32> to vector<1x384xf32>
    %628 = vector.broadcast %626 : vector<4x1xf32> to vector<4x384xf32>
    %629 = vector.broadcast %627 : vector<1x384xf32> to vector<4x384xf32>
    %630 = arith.mulf %628, %629 : vector<4x384xf32>
    %631 = arith.addf %623, %630 : vector<4x384xf32>
    %c7_353 = arith.constant 7 : index
    %c1_354 = arith.constant 1 : index
    %c0_355 = arith.constant 0 : index
    %c0_356 = arith.constant 0 : index
    %632 = vector.load %arg4[%c7_353, %c1_354, %c0_355, %c0_356] : memref<9x7x4x1xf32, #tpu.memory_space<vmem>>, vector<1x1x4x1xf32>
    %633 = vector.shape_cast %632 : vector<1x1x4x1xf32> to vector<4x1xf32>
    %634 = vector.extract_strided_slice %624 {offsets = [1, 0], sizes = [1, 384], strides = [1, 1]} : vector<7x384xf32> to vector<1x384xf32>
    %635 = vector.broadcast %633 : vector<4x1xf32> to vector<4x384xf32>
    %636 = vector.broadcast %634 : vector<1x384xf32> to vector<4x384xf32>
    %637 = arith.mulf %635, %636 : vector<4x384xf32>
    %638 = arith.addf %631, %637 : vector<4x384xf32>
    %c7_357 = arith.constant 7 : index
    %c2_358 = arith.constant 2 : index
    %c0_359 = arith.constant 0 : index
    %c0_360 = arith.constant 0 : index
    %639 = vector.load %arg4[%c7_357, %c2_358, %c0_359, %c0_360] : memref<9x7x4x1xf32, #tpu.memory_space<vmem>>, vector<1x1x4x1xf32>
    %640 = vector.shape_cast %639 : vector<1x1x4x1xf32> to vector<4x1xf32>
    %641 = vector.extract_strided_slice %624 {offsets = [2, 0], sizes = [1, 384], strides = [1, 1]} : vector<7x384xf32> to vector<1x384xf32>
    %642 = vector.broadcast %640 : vector<4x1xf32> to vector<4x384xf32>
    %643 = vector.broadcast %641 : vector<1x384xf32> to vector<4x384xf32>
    %644 = arith.mulf %642, %643 : vector<4x384xf32>
    %645 = arith.addf %638, %644 : vector<4x384xf32>
    %c7_361 = arith.constant 7 : index
    %c3_362 = arith.constant 3 : index
    %c0_363 = arith.constant 0 : index
    %c0_364 = arith.constant 0 : index
    %646 = vector.load %arg4[%c7_361, %c3_362, %c0_363, %c0_364] : memref<9x7x4x1xf32, #tpu.memory_space<vmem>>, vector<1x1x4x1xf32>
    %647 = vector.shape_cast %646 : vector<1x1x4x1xf32> to vector<4x1xf32>
    %648 = vector.extract_strided_slice %624 {offsets = [3, 0], sizes = [1, 384], strides = [1, 1]} : vector<7x384xf32> to vector<1x384xf32>
    %649 = vector.broadcast %647 : vector<4x1xf32> to vector<4x384xf32>
    %650 = vector.broadcast %648 : vector<1x384xf32> to vector<4x384xf32>
    %651 = arith.mulf %649, %650 : vector<4x384xf32>
    %652 = arith.addf %645, %651 : vector<4x384xf32>
    %c7_365 = arith.constant 7 : index
    %c4_366 = arith.constant 4 : index
    %c0_367 = arith.constant 0 : index
    %c0_368 = arith.constant 0 : index
    %653 = vector.load %arg4[%c7_365, %c4_366, %c0_367, %c0_368] : memref<9x7x4x1xf32, #tpu.memory_space<vmem>>, vector<1x1x4x1xf32>
    %654 = vector.shape_cast %653 : vector<1x1x4x1xf32> to vector<4x1xf32>
    %655 = vector.extract_strided_slice %624 {offsets = [4, 0], sizes = [1, 384], strides = [1, 1]} : vector<7x384xf32> to vector<1x384xf32>
    %656 = vector.broadcast %654 : vector<4x1xf32> to vector<4x384xf32>
    %657 = vector.broadcast %655 : vector<1x384xf32> to vector<4x384xf32>
    %658 = arith.mulf %656, %657 : vector<4x384xf32>
    %659 = arith.addf %652, %658 : vector<4x384xf32>
    %c7_369 = arith.constant 7 : index
    %c5_370 = arith.constant 5 : index
    %c0_371 = arith.constant 0 : index
    %c0_372 = arith.constant 0 : index
    %660 = vector.load %arg4[%c7_369, %c5_370, %c0_371, %c0_372] : memref<9x7x4x1xf32, #tpu.memory_space<vmem>>, vector<1x1x4x1xf32>
    %661 = vector.shape_cast %660 : vector<1x1x4x1xf32> to vector<4x1xf32>
    %662 = vector.extract_strided_slice %624 {offsets = [5, 0], sizes = [1, 384], strides = [1, 1]} : vector<7x384xf32> to vector<1x384xf32>
    %663 = vector.broadcast %661 : vector<4x1xf32> to vector<4x384xf32>
    %664 = vector.broadcast %662 : vector<1x384xf32> to vector<4x384xf32>
    %665 = arith.mulf %663, %664 : vector<4x384xf32>
    %666 = arith.addf %659, %665 : vector<4x384xf32>
    %c7_373 = arith.constant 7 : index
    %c6_374 = arith.constant 6 : index
    %c0_375 = arith.constant 0 : index
    %c0_376 = arith.constant 0 : index
    %667 = vector.load %arg4[%c7_373, %c6_374, %c0_375, %c0_376] : memref<9x7x4x1xf32, #tpu.memory_space<vmem>>, vector<1x1x4x1xf32>
    %668 = vector.shape_cast %667 : vector<1x1x4x1xf32> to vector<4x1xf32>
    %669 = vector.extract_strided_slice %624 {offsets = [6, 0], sizes = [1, 384], strides = [1, 1]} : vector<7x384xf32> to vector<1x384xf32>
    %670 = vector.broadcast %668 : vector<4x1xf32> to vector<4x384xf32>
    %671 = vector.broadcast %669 : vector<1x384xf32> to vector<4x384xf32>
    %672 = arith.mulf %670, %671 : vector<4x384xf32>
    %673 = arith.addf %666, %672 : vector<4x384xf32>
    %c365_i32_377 = arith.constant 365 : i32
    %674 = tpu.dynamic_rotate %273 by %c365_i32_377 dim 1 : vector<7x384xf32>, i32 -> vector<7x384xf32>
    %c8_378 = arith.constant 8 : index
    %c0_379 = arith.constant 0 : index
    %c0_380 = arith.constant 0 : index
    %c0_381 = arith.constant 0 : index
    %675 = vector.load %arg4[%c8_378, %c0_379, %c0_380, %c0_381] : memref<9x7x4x1xf32, #tpu.memory_space<vmem>>, vector<1x1x4x1xf32>
    %676 = vector.shape_cast %675 : vector<1x1x4x1xf32> to vector<4x1xf32>
    %677 = vector.extract_strided_slice %674 {offsets = [0, 0], sizes = [1, 384], strides = [1, 1]} : vector<7x384xf32> to vector<1x384xf32>
    %678 = vector.broadcast %676 : vector<4x1xf32> to vector<4x384xf32>
    %679 = vector.broadcast %677 : vector<1x384xf32> to vector<4x384xf32>
    %680 = arith.mulf %678, %679 : vector<4x384xf32>
    %681 = arith.addf %673, %680 : vector<4x384xf32>
    %c8_382 = arith.constant 8 : index
    %c1_383 = arith.constant 1 : index
    %c0_384 = arith.constant 0 : index
    %c0_385 = arith.constant 0 : index
    %682 = vector.load %arg4[%c8_382, %c1_383, %c0_384, %c0_385] : memref<9x7x4x1xf32, #tpu.memory_space<vmem>>, vector<1x1x4x1xf32>
    %683 = vector.shape_cast %682 : vector<1x1x4x1xf32> to vector<4x1xf32>
    %684 = vector.extract_strided_slice %674 {offsets = [1, 0], sizes = [1, 384], strides = [1, 1]} : vector<7x384xf32> to vector<1x384xf32>
    %685 = vector.broadcast %683 : vector<4x1xf32> to vector<4x384xf32>
    %686 = vector.broadcast %684 : vector<1x384xf32> to vector<4x384xf32>
    %687 = arith.mulf %685, %686 : vector<4x384xf32>
    %688 = arith.addf %681, %687 : vector<4x384xf32>
    %c8_386 = arith.constant 8 : index
    %c2_387 = arith.constant 2 : index
    %c0_388 = arith.constant 0 : index
    %c0_389 = arith.constant 0 : index
    %689 = vector.load %arg4[%c8_386, %c2_387, %c0_388, %c0_389] : memref<9x7x4x1xf32, #tpu.memory_space<vmem>>, vector<1x1x4x1xf32>
    %690 = vector.shape_cast %689 : vector<1x1x4x1xf32> to vector<4x1xf32>
    %691 = vector.extract_strided_slice %674 {offsets = [2, 0], sizes = [1, 384], strides = [1, 1]} : vector<7x384xf32> to vector<1x384xf32>
    %692 = vector.broadcast %690 : vector<4x1xf32> to vector<4x384xf32>
    %693 = vector.broadcast %691 : vector<1x384xf32> to vector<4x384xf32>
    %694 = arith.mulf %692, %693 : vector<4x384xf32>
    %695 = arith.addf %688, %694 : vector<4x384xf32>
    %c8_390 = arith.constant 8 : index
    %c3_391 = arith.constant 3 : index
    %c0_392 = arith.constant 0 : index
    %c0_393 = arith.constant 0 : index
    %696 = vector.load %arg4[%c8_390, %c3_391, %c0_392, %c0_393] : memref<9x7x4x1xf32, #tpu.memory_space<vmem>>, vector<1x1x4x1xf32>
    %697 = vector.shape_cast %696 : vector<1x1x4x1xf32> to vector<4x1xf32>
    %698 = vector.extract_strided_slice %674 {offsets = [3, 0], sizes = [1, 384], strides = [1, 1]} : vector<7x384xf32> to vector<1x384xf32>
    %699 = vector.broadcast %697 : vector<4x1xf32> to vector<4x384xf32>
    %700 = vector.broadcast %698 : vector<1x384xf32> to vector<4x384xf32>
    %701 = arith.mulf %699, %700 : vector<4x384xf32>
    %702 = arith.addf %695, %701 : vector<4x384xf32>
    %c8_394 = arith.constant 8 : index
    %c4_395 = arith.constant 4 : index
    %c0_396 = arith.constant 0 : index
    %c0_397 = arith.constant 0 : index
    %703 = vector.load %arg4[%c8_394, %c4_395, %c0_396, %c0_397] : memref<9x7x4x1xf32, #tpu.memory_space<vmem>>, vector<1x1x4x1xf32>
    %704 = vector.shape_cast %703 : vector<1x1x4x1xf32> to vector<4x1xf32>
    %705 = vector.extract_strided_slice %674 {offsets = [4, 0], sizes = [1, 384], strides = [1, 1]} : vector<7x384xf32> to vector<1x384xf32>
    %706 = vector.broadcast %704 : vector<4x1xf32> to vector<4x384xf32>
    %707 = vector.broadcast %705 : vector<1x384xf32> to vector<4x384xf32>
    %708 = arith.mulf %706, %707 : vector<4x384xf32>
    %709 = arith.addf %702, %708 : vector<4x384xf32>
    %c8_398 = arith.constant 8 : index
    %c5_399 = arith.constant 5 : index
    %c0_400 = arith.constant 0 : index
    %c0_401 = arith.constant 0 : index
    %710 = vector.load %arg4[%c8_398, %c5_399, %c0_400, %c0_401] : memref<9x7x4x1xf32, #tpu.memory_space<vmem>>, vector<1x1x4x1xf32>
    %711 = vector.shape_cast %710 : vector<1x1x4x1xf32> to vector<4x1xf32>
    %712 = vector.extract_strided_slice %674 {offsets = [5, 0], sizes = [1, 384], strides = [1, 1]} : vector<7x384xf32> to vector<1x384xf32>
    %713 = vector.broadcast %711 : vector<4x1xf32> to vector<4x384xf32>
    %714 = vector.broadcast %712 : vector<1x384xf32> to vector<4x384xf32>
    %715 = arith.mulf %713, %714 : vector<4x384xf32>
    %716 = arith.addf %709, %715 : vector<4x384xf32>
    %c8_402 = arith.constant 8 : index
    %c6_403 = arith.constant 6 : index
    %c0_404 = arith.constant 0 : index
    %c0_405 = arith.constant 0 : index
    %717 = vector.load %arg4[%c8_402, %c6_403, %c0_404, %c0_405] : memref<9x7x4x1xf32, #tpu.memory_space<vmem>>, vector<1x1x4x1xf32>
    %718 = vector.shape_cast %717 : vector<1x1x4x1xf32> to vector<4x1xf32>
    %719 = vector.extract_strided_slice %674 {offsets = [6, 0], sizes = [1, 384], strides = [1, 1]} : vector<7x384xf32> to vector<1x384xf32>
    %720 = vector.broadcast %718 : vector<4x1xf32> to vector<4x384xf32>
    %721 = vector.broadcast %719 : vector<1x384xf32> to vector<4x384xf32>
    %722 = arith.mulf %720, %721 : vector<4x384xf32>
    %723 = arith.addf %716, %722 : vector<4x384xf32>
    %724 = vector.broadcast %2 : vector<1x384xf32> to vector<4x384xf32>
    %725 = arith.mulf %723, %724 : vector<4x384xf32>
    %cst_406 = arith.constant dense<0.000000e+00> : vector<4xf32>
    %726 = vector.multi_reduction <add>, %725, %cst_406 [1] : vector<4x384xf32> to vector<4xf32>
    %727 = vector.shape_cast %726 : vector<4xf32> to vector<4x1xf32>
    %c0_407 = arith.constant 0 : index
    %c0_408 = arith.constant 0 : index
    %c0_409 = arith.constant 0 : index
    %728 = vector.load %arg7[%c0_407, %c0_408, %c0_409] : memref<1x4x1xf32, #tpu.memory_space<vmem>>, vector<1x4x1xf32>
    %729 = vector.shape_cast %728 : vector<1x4x1xf32> to vector<4x1xf32>
    %730 = vector.shape_cast %727 : vector<4x1xf32> to vector<1x4x1xf32>
    tpu.vector_store %arg7[%c0_407, %c0_408, %c0_409], %730 {strides = array<i32>} : memref<1x4x1xf32, #tpu.memory_space<vmem>>, vector<1x4x1xf32>,
    %731 = arith.mulf %725, %723 : vector<4x384xf32>
    %cst_410 = arith.constant dense<0.000000e+00> : vector<4xf32>
    %732 = vector.multi_reduction <add>, %731, %cst_410 [1] : vector<4x384xf32> to vector<4xf32>
    %733 = vector.shape_cast %732 : vector<4xf32> to vector<4x1xf32>
    %c0_411 = arith.constant 0 : index
    %c0_412 = arith.constant 0 : index
    %c0_413 = arith.constant 0 : index
    %734 = vector.load %arg8[%c0_411, %c0_412, %c0_413] : memref<1x4x1xf32, #tpu.memory_space<vmem>>, vector<1x4x1xf32>
    %735 = vector.shape_cast %734 : vector<1x4x1xf32> to vector<4x1xf32>
    %736 = vector.shape_cast %733 : vector<4x1xf32> to vector<1x4x1xf32>
    tpu.vector_store %arg8[%c0_411, %c0_412, %c0_413], %736 {strides = array<i32>} : memref<1x4x1xf32, #tpu.memory_space<vmem>>, vector<1x4x1xf32>,
    return
  }
  func.func @transform_0(%arg0: i32) -> (i32, i32, i32) {
    %c0_i32 = arith.constant 0 : i32
    %c0_i32_0 = arith.constant 0 : i32
    %c0_i32_1 = arith.constant 0 : i32
    return %arg0, %c0_i32, %c0_i32_0 : i32, i32, i32
  }
  func.func @transform_1(%arg0: i32) -> (i32, i32) {
    %c0_i32 = arith.constant 0 : i32
    %c0_i32_0 = arith.constant 0 : i32
    %c0_i32_1 = arith.constant 0 : i32
    return %c0_i32, %c0_i32_0 : i32, i32
  }
  func.func @transform_2(%arg0: i32) -> (i32, i32, i32, i32) {
    %c0_i32 = arith.constant 0 : i32
    %c0_i32_0 = arith.constant 0 : i32
    %c0_i32_1 = arith.constant 0 : i32
    %c0_i32_2 = arith.constant 0 : i32
    %c0_i32_3 = arith.constant 0 : i32
    return %c0_i32, %c0_i32_0, %c0_i32_1, %c0_i32_2 : i32, i32, i32, i32
  }
  func.func @transform_3(%arg0: i32) -> (i32, i32, i32, i32) {
    %c0_i32 = arith.constant 0 : i32
    %c0_i32_0 = arith.constant 0 : i32
    %c0_i32_1 = arith.constant 0 : i32
    %c0_i32_2 = arith.constant 0 : i32
    %c0_i32_3 = arith.constant 0 : i32
    return %c0_i32, %c0_i32_0, %c0_i32_1, %c0_i32_2 : i32, i32, i32, i32
  }
  func.func @transform_4(%arg0: i32) -> (i32, i32) {
    %c0_i32 = arith.constant 0 : i32
    %c0_i32_0 = arith.constant 0 : i32
    %c0_i32_1 = arith.constant 0 : i32
    return %c0_i32, %c0_i32_0 : i32, i32
  }
  func.func @transform_5(%arg0: i32) -> (i32, i32) {
    %c0_i32 = arith.constant 0 : i32
    %c0_i32_0 = arith.constant 0 : i32
    %c0_i32_1 = arith.constant 0 : i32
    return %c0_i32, %c0_i32_0 : i32, i32
  }
  func.func @transform_6(%arg0: i32) -> (i32, i32, i32) {
    %c0_i32 = arith.constant 0 : i32
    %c0_i32_0 = arith.constant 0 : i32
    %c0_i32_1 = arith.constant 0 : i32
    return %arg0, %c0_i32, %c0_i32_0 : i32, i32, i32
  }
  func.func @transform_7(%arg0: i32) -> (i32, i32, i32) {
    %c0_i32 = arith.constant 0 : i32
    %c0_i32_0 = arith.constant 0 : i32
    %c0_i32_1 = arith.constant 0 : i32
    return %arg0, %c0_i32, %c0_i32_0 : i32, i32, i32
  }
}

</mosaic_0001>

<bundles_post_ra>
// kernel: res_level_forward.3
= control target key start
LH: loop header
LB: loop body
LE: loop exit
PB: predicated region body
PF: predicated region fallthrough
CT: control target
= control target key end

     0   :  { %s1487_s15 = smov 0   ;;  %s1867_s0 = inlined_call_operand.vmem [shape: f32[2,4,384], index: 0, kind: input, shape index: {}]   ;;  %s1868_s1 = inlined_call_operand.vmem [shape: f32[1,384], index: 1, kind: input, shape index: {}]   ;;  %s1869_s2 = inlined_call_operand.vmem [shape: f32[9,4,7,1], index: 2, kind: input, shape index: {}]   ;;  %s1870_s3 = inlined_call_operand.vmem [shape: f32[2,7,1], index: 3, kind: output, shape index: {0}]   ;;  %s1871_s4 = inlined_call_operand.vmem [shape: f32[2,7,1], index: 4, kind: output, shape index: {1}]  }
   0x1 LB: > { %s1379_s16 = sadd.s32 4294967295, %s1451_s15   ;;  %p1383_p0 = scmp.ge.s32.totalorder %s1451_s15, 1  ;;  %s1451_s15 = sphi %s1487_s15, %s15_s15  }
   0x2   : > { %p165_p1 = scmp.lt.s32.totalorder %s1451_s15, 3 }
   0x4   : > { %p166_p2 = pnand %p1383_p0, %p165_p1 }
   0x5   : > { %v1388_v0 = vld [vmem:[%s1869_s2 + $0x10] sm:$0x7f] (!%p166_p2)  ;;  %v226_v1 = vld [vmem:[%s1869_s2] sm:$0x7f] (!%p166_p2)  ;;  %p194_p3 = scmp.lt.s32.totalorder (!%p166_p2), %s1379_s16, 1  ;;  %v1453_v2 = vmov (!%p166_p2), 0   ;;  %v220_v40 = vlaneseq (!%p166_p2) }
   0x6   : > { %169 = sbr.rel (%p166_p2) target bundleno = 419 (0x1a3), region = 32  ;;  %1443 = vset.pattern.permute.xlu1 (!%p166_p2), %v1453_v2  ;;  %1442 = vset.pattern.permute.xlu0 (!%p166_p2), %v1453_v2  ;;  %v1387_v3 = vld [vmem:[%s1869_s2 + $0x8] sm:$0x7f] (!%p166_p2)  ;;  %s1454_s27 = smov (!%p166_p2), 19   ;;  %v1389_v7 = vld [vmem:[%s1869_s2 + $0x18] sm:$0x7f] (!%p166_p2) }
   0x7   : > { %279 = vperm.xlu1 (!%p166_p2), %1443, %v1388_v0   ;;  %229 = vperm.xlu0 (!%p166_p2), %1442, %v226_v1   ;;  %v1390_v8 = vld [vmem:[%s1869_s2 + $0x20] sm:$0x7f] (!%p166_p2)  ;;  %v1391_v9 = vld [vmem:[%s1869_s2 + $0x28] sm:$0x7f] (!%p166_p2)  ;;  %s1455_s8 = smov (!%p166_p2), 18   ;;  %s1456_s19 = smov (!%p166_p2), 17  }
   0x8   : > { %v1392_v10 = vld [vmem:[%s1869_s2 + $0x30] sm:$0x7f] (!%p166_p2)  ;;  %v1393_v11 = vld [vmem:[%s1869_s2 + $0x38] sm:$0x7f] (!%p166_p2)  ;;  %v1394_v12 = vld [vmem:[%s1869_s2 + $0x40] sm:$0x7f] (!%p166_p2) }
   0x9   : > { %v1395_v13 = vld [vmem:[%s1869_s2 + $0x48] sm:$0x7f] (!%p166_p2)  ;;  %v1396_v14 = vld [vmem:[%s1869_s2 + $0x50] sm:$0x7f] (!%p166_p2)  ;;  %v1397_v15 = vld [vmem:[%s1869_s2 + $0x58] sm:$0x7f] (!%p166_p2) }
   0xa   : > { %v1398_v16 = vld [vmem:[%s1869_s2 + $0x60] sm:$0x7f] (!%p166_p2)  ;;  %v1399_v17 = vld [vmem:[%s1869_s2 + $0x68] sm:$0x7f] (!%p166_p2)  ;;  %s1457_s28 = smov (!%p166_p2), 1   ;;  %s1458_s21 = smov (!%p166_p2), 127  }
   0xb   : > { %254 = vperm.xlu0 (!%p166_p2), %1442, %v1387_v3   ;;  %v1400_v18 = vld [vmem:[%s1869_s2 + $0x70] sm:$0x7f] (!%p166_p2)  ;;  %v1401_v19 = vld [vmem:[%s1869_s2 + $0x78] sm:$0x7f] (!%p166_p2)  ;;  %v1402_v20 = vld [vmem:[%s1869_s2 + $0x80] sm:$0x7f] (!%p166_p2) }
   0xc   : > { %v1403_v21 = vld [vmem:[%s1869_s2 + $0x88] sm:$0x7f] (!%p166_p2)  ;;  %v1404_v22 = vld [vmem:[%s1869_s2 + $0x90] sm:$0x7f] (!%p166_p2)  ;;  %v1405_v23 = vld [vmem:[%s1869_s2 + $0x98] sm:$0x7f] (!%p166_p2) }
   0xd   : > { %s1873_s16 = smov (!%p194_p3, %s1379_s16), 1  ;;  %v1406_v24 = vld [vmem:[%s1869_s2 + $0xa0] sm:$0x7f]  ;;  %v1407_v25 = vld [vmem:[%s1869_s2 + $0xa8] sm:$0x7f]  ;;  %s1459_s30 = smov 111  }
   0xe   : > { %s1424_s23 = smul.u32 12, %s1873_s16  ;;  %v1408_v26 = vld [vmem:[%s1869_s2 + $0xb0] sm:$0x7f]  ;;  %v1409_v27 = vld [vmem:[%s1869_s2 + $0xb8] sm:$0x7f]  ;;  %s1460_s13 = smov 110  }
   0xf   : > { %v1410_v28 = vld [vmem:[%s1869_s2 + $0xc0] sm:$0x7f]  ;;  %v1411_v29 = vld [vmem:[%s1869_s2 + $0xc8] sm:$0x7f]  ;;  %v1412_v30 = vld [vmem:[%s1869_s2 + $0xd0] sm:$0x7f] }
  0x10   : > { %s198_s26 = scalar_lea.vmem %s1867_s0, %s1424_s23  ;;  %v1413_v31 = vld [vmem:[%s1869_s2 + $0xd8] sm:$0x7f]  ;;  %v1414_v32 = vld [vmem:[%s1869_s2 + $0xe0] sm:$0x7f]  ;;  %v1415_v33 = vld [vmem:[%s1869_s2 + $0xe8] sm:$0x7f] }
  0x11   : > { %v1510_v4 = vld [vmem:[%s198_s26] sm:$0xff]  ;;  %v1517_v6 = vld [vmem:[%s198_s26 + $0x8] sm:$0xf]  ;;  %v1416_v34 = vld [vmem:[%s1869_s2 + $0xf0] sm:$0x7f]  ;;  %s1461_s24 = smov 109  }
  0x12   : > { %214 = vrot.lane.b32.xlu1 %v1510_v4, %s1454_s27  ;;  %v1515_v5 = vcombine.high %v1510_v4, %v1510_v4  ;;  %v1417_v35 = vld [vmem:[%s1869_s2 + $0xf8] sm:$0x7f]  ;;  %v1418_v36 = vld [vmem:[%s1869_s2 + $0x100] sm:$0x7f]  ;;  %v1419_v37 = vld [vmem:[%s1869_s2 + $0x108] sm:$0x7f] }
  0x13   : > { %v1420_v38 = vld [vmem:[%s1869_s2 + $0x110] sm:$0x7f]  ;;  %v1421_v39 = vld [vmem:[%s1869_s2 + $0x118] sm:$0x7f]  ;;  %v1641_v43 = vand.u32 127, %v220_v40  ;;  %v1643_v44 = vshrl.u32 %v220_v40, 7 }
  0x14   : > { %216 = vrot.lane.b32.xlu0 %v1515_v5, %s1454_s27  ;;  %vm1274_vm8 = vcmask 1046528   ;;  %s1385_s5 = sshll.u32 %s1873_s16, 3  ;;  %vm1282_vm9 = vcmask 6144  }
  0x15   : > { %vm222_vm0 = vcmp.lt.s32.totalorder %v1641_v43, 19  ;;  %v1647_v47 = vsub.s32 0, %v1643_v44  ;;  %v1650_v48 = vsub.s32 1, %v1643_v44  ;;  %v1653_v54 = vsub.s32 2, %v1643_v44  ;;  %s206_s11 = scalar_lea.vmem %s1871_s4, %s1385_s5 }
  0x16   : > { %218 = vrot.lane.b32.xlu1 %v1517_v6, %s1454_s27  ;;  %v1662_v2 = vsub.s32 3, %v1643_v44  ;;  %vm331_vm1 = vcmp.lt.s32.totalorder %v1641_v43, 18  ;;  %vm441_vm2 = vcmp.lt.s32.totalorder %v1641_v43, 17  ;;  %vm551_vm3 = vcmp.lt.s32.totalorder %v1641_v43, 1 }
  0x17   : > { %vm821_vm4 = vcmp.lt.s32.totalorder %v1641_v43, 127  ;;  %vm931_vm5 = vcmp.lt.s32.totalorder %v1641_v43, 111  ;;  %vm1041_vm6 = vcmp.lt.s32.totalorder %v1641_v43, 110  ;;  %vm1151_vm7 = vcmp.lt.s32.totalorder %v1641_v43, 109 }
  0x18   : > { %304 = vperm.xlu0 %1442, %v1389_v7  }
  0x1a   : > { %339 = vperm.xlu1 %1443, %v1390_v8  }
  0x1c   : > { %364 = vperm.xlu0 %1442, %v1391_v9  }
  0x1e   : > { %325 = vrot.lane.b32.xlu1 %v1510_v4, %s1455_s8 }
  0x20   : > { %327 = vrot.lane.b32.xlu0 %v1515_v5, %s1455_s8 }
  0x22   : > { %329 = vrot.lane.b32.xlu1 %v1517_v6, %s1455_s8  ;;  %s202_s8 = scalar_lea.vmem %s1870_s3, %s1385_s5 }
  0x24   : > { %389 = vperm.xlu0 %1442, %v1392_v10  }
  0x26   : > { %414 = vperm.xlu1 %1443, %v1393_v11  }
  0x28   : > { %449 = vperm.xlu0 %1442, %v1394_v12  }
  0x2a   : > { %474 = vperm.xlu1 %1443, %v1395_v13  }
  0x2c   : > { %435 = vrot.lane.b32.xlu0 %v1510_v4, %s1456_s19 }
  0x2e   : > { %437 = vrot.lane.b32.xlu1 %v1515_v5, %s1456_s19 }
  0x30   : > { %439 = vrot.lane.b32.xlu0 %v1517_v6, %s1456_s19 }
  0x32   : > { %499 = vperm.xlu1 %1443, %v1396_v14  }
  0x34   : > { %524 = vperm.xlu0 %1442, %v1397_v15  }
  0x36   : > { %559 = vperm.xlu1 %1443, %v1398_v16  }
  0x38   : > { %584 = vperm.xlu0 %1442, %v1399_v17  }
  0x3a   : > { %545 = vrot.lane.b32.xlu1 %v1510_v4, %s1457_s28 }
  0x3c   : > { %547 = vrot.lane.b32.xlu0 %v1515_v5, %s1457_s28 }
  0x3e   : > { %549 = vrot.lane.b32.xlu1 %v1517_v6, %s1457_s28 }
  0x40   : > { %609 = vperm.xlu0 %1442, %v1400_v18  }
  0x42   : > { %634 = vperm.xlu1 %1443, %v1401_v19  }
  0x44   : > { %659 = vperm.xlu0 %1442, %v1402_v20  }
  0x46   : > { %699 = vperm.xlu1 %1443, %v1403_v21  }
  0x48   : > { %739 = vperm.xlu0 %1442, %v1404_v22  }
  0x4a   : > { %779 = vperm.xlu1 %1443, %v1405_v23  }
  0x4c   : > { %829 = vperm.xlu0 %1442, %v1406_v24  }
  0x4e   : > { %854 = vperm.xlu1 %1443, %v1407_v25  }
  0x50   : > { %815 = vrot.lane.b32.xlu0 %v1510_v4, %s1458_s21 }
  0x52   : > { %817 = vrot.lane.b32.xlu1 %v1515_v5, %s1458_s21 }
  0x54   : > { %819 = vrot.lane.b32.xlu0 %v1517_v6, %s1458_s21 }
  0x56   : > { %879 = vperm.xlu1 %1443, %v1408_v26  }
  0x58   : > { %904 = vperm.xlu0 %1442, %v1409_v27  }
  0x5a   : > { %939 = vperm.xlu1 %1443, %v1410_v28  }
  0x5c   : > { %964 = vperm.xlu0 %1442, %v1411_v29  }
  0x5e   : > { %925 = vrot.lane.b32.xlu1 %v1510_v4, %s1459_s30 }
  0x60   : > { %927 = vrot.lane.b32.xlu0 %v1515_v5, %s1459_s30 }
  0x62   : > { %929 = vrot.lane.b32.xlu1 %v1517_v6, %s1459_s30 }
  0x64   : > { %989 = vperm.xlu0 %1442, %v1412_v30  }
  0x66   : > { %1014 = vperm.xlu1 %1443, %v1413_v31  }
  0x68   : > { %1049 = vperm.xlu0 %1442, %v1414_v32  }
  0x6a   : > { %1074 = vperm.xlu1 %1443, %v1415_v33  }
  0x6c   : > { %1035 = vrot.lane.b32.xlu0 %v1510_v4, %s1460_s13 }
  0x6e   : > { %1037 = vrot.lane.b32.xlu1 %v1515_v5, %s1460_s13 }
  0x70   : > { %1039 = vrot.lane.b32.xlu0 %v1517_v6, %s1460_s13 }
  0x72   : > { %1099 = vperm.xlu1 %1443, %v1416_v34  }
  0x74   : > { %1124 = vperm.xlu0 %1442, %v1417_v35  }
  0x76   : > { %1159 = vperm.xlu1 %1443, %v1418_v36  }
  0x78   : > { %1184 = vperm.xlu0 %1442, %v1419_v37  }
  0x7a   : > { %1145 = vrot.lane.b32.xlu1 %v1510_v4, %s1461_s24 }
  0x7c   : > { %1147 = vrot.lane.b32.xlu0 %v1515_v5, %s1461_s24 }
  0x7e   : > { %1149 = vrot.lane.b32.xlu1 %v1517_v6, %s1461_s24 }
  0x80   : > { %1209 = vperm.xlu0 %1442, %v1420_v38  }
  0x82   : > { %1234 = vperm.xlu1 %1443, %v1421_v39  }
  0x86   : > { %v280_v41 = vpop.permute.xlu1 %279  ;;  %v230_v42 = vpop.permute.xlu0 %229 }
  0x8a   : > { %v255_v45 = vpop.permute.xlu0 %254  ;;  %v215_v46 = vpop.permute.xlu1 %214 }
  0x8e   : > { %v219_v49 = vpop.permute.xlu1 %218  ;;  %v217_v50 = vpop.permute.xlu0 %216 }
  0x8f   : > { %v225_v51 = vsel %vm222_vm0, %v219_v49, %v215_v46  ;;  %v223_v52 = vsel %vm222_vm0, %v217_v50, %v219_v49  ;;  %v224_v53 = vsel %vm222_vm0, %v215_v46, %v217_v50 }
  0x90   : > { %v235_v55 = vrot.slane %v225_v51, %v1647_v47  ;;  %v260_v56 = vrot.slane %v225_v51, %v1650_v48  ;;  %v239_v57 = vrot.slane %v224_v53, %v1647_v47  ;;  %v243_v58 = vrot.slane %v223_v52, %v1647_v47 }
  0x91   : > { %v264_v59 = vrot.slane %v224_v53, %v1650_v48  ;;  %v268_v60 = vrot.slane %v223_v52, %v1650_v48  ;;  %v289_v7 = vrot.slane %v224_v53, %v1653_v54  ;;  %v285_v9 = vrot.slane %v225_v51, %v1653_v54 }
  0x92   : > { %v245_v61 = vmul.f32 %v239_v57, %v230_v42  ;;  %v244_v63 = vmul.f32 %v235_v55, %v230_v42  ;;  %v269_v0 = vmul.f32 %v260_v56, %v255_v45  ;;  %v246_v3 = vmul.f32 %v243_v58, %v230_v42 }
  0x93   : > { %v270_v1 = vmul.f32 %v264_v59, %v255_v45  ;;  %v271_v5 = vmul.f32 %v268_v60, %v255_v45  ;;  %v293_v10 = vrot.slane %v223_v52, %v1653_v54  ;;  %v295_v14 = vmul.f32 %v289_v7, %v280_v41 }
  0x94   : > { %v272_v13 = vadd.f32 %v269_v0, %v244_v63  ;;  %v310_v16 = vrot.slane %v225_v51, %v1662_v2  ;;  %v314_v17 = vrot.slane %v224_v53, %v1662_v2  ;;  %v294_v19 = vmul.f32 %v285_v9, %v280_v41 }
  0x95   : > { %v273_v11 = vadd.f32 %v270_v1, %v245_v61  ;;  %v274_v15 = vadd.f32 %v271_v5, %v246_v3  ;;  %v318_v20 = vrot.slane %v223_v52, %v1662_v2  ;;  %v296_v21 = vmul.f32 %v293_v10, %v280_v41 }
  0x96   : > { %v297_v24 = vadd.f32 %v294_v19, %v272_v13 }
  0x97   : > { %v305_v62 = vpop.permute.xlu0 %304  ;;  %v298_v22 = vadd.f32 %v295_v14, %v273_v11  ;;  %v299_v26 = vadd.f32 %v296_v21, %v274_v15 }
  0x98   : > { %v319_v27 = vmul.f32 %v310_v16, %v305_v62  ;;  %v320_v28 = vmul.f32 %v314_v17, %v305_v62  ;;  %v321_v31 = vmul.f32 %v318_v20, %v305_v62 }
  0x99   : > { %v340_v8 = vpop.permute.xlu1 %339 }
  0x9a   : > { %v323_v35 = vadd.f32 %v320_v28, %v298_v22  ;;  %v322_v40 = vadd.f32 %v319_v27, %v297_v24  ;;  %v324_v45 = vadd.f32 %v321_v31, %v299_v26  ;;  %v668_v22 = vsub.s32 4, %v1643_v44 }
  0x9b   : > { %v365_v12 = vpop.permute.xlu0 %364 }
  0x9d   : > { %v326_v18 = vpop.permute.xlu1 %325 }
  0x9f   : > { %v328_v23 = vpop.permute.xlu0 %327 }
  0xa0   : > { %v333_v25 = vsel %vm331_vm1, %v326_v18, %v328_v23 }
  0xa1   : > { %v349_v29 = vrot.slane %v333_v25, %v1647_v47  ;;  %v330_v30 = vpop.permute.xlu1 %329  ;;  %v374_v32 = vrot.slane %v333_v25, %v1650_v48  ;;  %v399_v53 = vrot.slane %v333_v25, %v1653_v54  ;;  %v424_v11 = vrot.slane %v333_v25, %v1662_v2 }
  0xa2   : > { %v332_v33 = vsel %vm331_vm1, %v328_v23, %v330_v30  ;;  %v334_v34 = vsel %vm331_vm1, %v330_v30, %v326_v18 }
  0xa3   : > { %v355_v36 = vmul.f32 %v349_v29, %v340_v8  ;;  %v345_v37 = vrot.slane %v334_v34, %v1647_v47  ;;  %v353_v38 = vrot.slane %v332_v33, %v1647_v47  ;;  %v390_v39 = vpop.permute.xlu0 %389  ;;  %v370_v41 = vrot.slane %v334_v34, %v1650_v48 }
  0xa4   : > { %v378_v42 = vrot.slane %v332_v33, %v1650_v48  ;;  %v380_v52 = vmul.f32 %v374_v32, %v365_v12  ;;  %v395_v58 = vrot.slane %v334_v34, %v1653_v54  ;;  %v403_v62 = vrot.slane %v332_v33, %v1653_v54 }
  0xa5   : > { %v354_v46 = vmul.f32 %v345_v37, %v340_v8  ;;  %v356_v49 = vmul.f32 %v353_v38, %v340_v8  ;;  %v358_v50 = vadd.f32 %v355_v36, %v323_v35  ;;  %v415_v51 = vpop.permute.xlu1 %414  ;;  %v379_v55 = vmul.f32 %v370_v41, %v365_v12 }
  0xa6   : > { %v381_v60 = vmul.f32 %v378_v42, %v365_v12  ;;  %v405_v3 = vmul.f32 %v399_v53, %v390_v39  ;;  %v404_v5 = vmul.f32 %v395_v58, %v390_v39  ;;  %v420_v7 = vrot.slane %v334_v34, %v1662_v2 }
  0xa7   : > { %v357_v56 = vadd.f32 %v354_v46, %v322_v40  ;;  %v359_v57 = vadd.f32 %v356_v49, %v324_v45  ;;  %v450_v59 = vpop.permute.xlu0 %449  ;;  %v383_v61 = vadd.f32 %v380_v52, %v358_v50  ;;  %v406_v9 = vmul.f32 %v403_v62, %v390_v39 }
  0xa8   : > { %v428_v13 = vrot.slane %v332_v33, %v1662_v2  ;;  %v430_v16 = vmul.f32 %v424_v11, %v415_v51  ;;  %v429_v18 = vmul.f32 %v420_v7, %v415_v51  ;;  %v665_v53 = vrot.slane %v1510_v4, %v1647_v47 }
  0xa9   : > { %v382_v63 = vadd.f32 %v379_v55, %v357_v56  ;;  %v475_v0 = vpop.permute.xlu1 %474  ;;  %v384_v1 = vadd.f32 %v381_v60, %v359_v57  ;;  %v408_v10 = vadd.f32 %v405_v3, %v383_v61  ;;  %v1709_v55 = vrot.slane %v1510_v4, %v668_v22 }
  0xaa   : > { %v431_v23 = vmul.f32 %v428_v13, %v415_v51  ;;  %v673_v56 = vrot.slane %v1517_v6, %v1647_v47  ;;  %v708_v61 = vsub.s32 5, %v1643_v44 }
  0xab   : > { %v436_v8 = vpop.permute.xlu0 %435  ;;  %v407_v12 = vadd.f32 %v404_v5, %v382_v63  ;;  %v409_v15 = vadd.f32 %v406_v9, %v384_v1  ;;  %v433_v24 = vadd.f32 %v430_v16, %v408_v10  ;;  %v1719_v9 = vrot.slane %v665_v53, %v1647_v47 }
  0xac   : > { %v684_v10 = vrot.slane %v1709_v55, %v1647_v47  ;;  %v1724_v11 = vrot.slane %v673_v56, %v1647_v47  ;;  %v1729_v16 = vrot.slane %v1510_v4, %v708_v61 }
  0xad   : > { %v438_v14 = vpop.permute.xlu1 %437  ;;  %v432_v27 = vadd.f32 %v429_v18, %v407_v12  ;;  %v434_v32 = vadd.f32 %v431_v23, %v409_v15  ;;  %v705_v15 = vrot.slane %v1510_v4, %v1650_v48 }
  0xae   : > { %v443_v17 = vsel %vm441_vm2, %v436_v8, %v438_v14 }
  0xaf   : > { %v459_v19 = vrot.slane %v443_v17, %v1647_v47  ;;  %v484_v20 = vrot.slane %v443_v17, %v1650_v48  ;;  %v440_v21 = vpop.permute.xlu0 %439  ;;  %v509_v35 = vrot.slane %v443_v17, %v1653_v54  ;;  %v534_v3 = vrot.slane %v443_v17, %v1662_v2 }
  0xb0   : > { %v442_v25 = vsel %vm441_vm2, %v438_v14, %v440_v21  ;;  %v444_v26 = vsel %vm441_vm2, %v440_v21, %v436_v8 }
  0xb1   : > { %v465_v28 = vmul.f32 %v459_v19, %v450_v59  ;;  %v455_v29 = vrot.slane %v444_v26, %v1647_v47  ;;  %v463_v30 = vrot.slane %v442_v25, %v1647_v47  ;;  %v500_v31 = vpop.permute.xlu1 %499  ;;  %v480_v33 = vrot.slane %v444_v26, %v1650_v48 }
  0xb2   : > { %v488_v34 = vrot.slane %v442_v25, %v1650_v48  ;;  %v490_v36 = vmul.f32 %v484_v20, %v475_v0  ;;  %v505_v42 = vrot.slane %v444_v26, %v1653_v54  ;;  %v513_v45 = vrot.slane %v442_v25, %v1653_v54 }
  0xb3   : > { %v464_v37 = vmul.f32 %v455_v29, %v450_v59  ;;  %v466_v38 = vmul.f32 %v463_v30, %v450_v59  ;;  %v468_v39 = vadd.f32 %v465_v28, %v433_v24  ;;  %v525_v40 = vpop.permute.xlu0 %524  ;;  %v489_v41 = vmul.f32 %v480_v33, %v475_v0 }
  0xb4   : > { %v491_v46 = vmul.f32 %v488_v34, %v475_v0  ;;  %v515_v59 = vmul.f32 %v509_v35, %v500_v31  ;;  %v514_v62 = vmul.f32 %v505_v42, %v500_v31  ;;  %v530_v63 = vrot.slane %v444_v26, %v1662_v2 }
  0xb5   : > { %v467_v49 = vadd.f32 %v464_v37, %v432_v27  ;;  %v469_v50 = vadd.f32 %v466_v38, %v434_v32  ;;  %v493_v51 = vadd.f32 %v490_v36, %v468_v39  ;;  %v560_v52 = vpop.permute.xlu1 %559  ;;  %v516_v0 = vmul.f32 %v513_v45, %v500_v31 }
  0xb6   : > { %v538_v5 = vrot.slane %v442_v25, %v1662_v2  ;;  %v540_v12 = vmul.f32 %v534_v3, %v525_v40  ;;  %v539_v17 = vmul.f32 %v530_v63, %v525_v40  ;;  %v713_v19 = vrot.slane %v1517_v6, %v1650_v48 }
  0xb7   : > { %v492_v57 = vadd.f32 %v489_v41, %v467_v49  ;;  %v494_v58 = vadd.f32 %v491_v46, %v469_v50  ;;  %v585_v60 = vpop.permute.xlu0 %584  ;;  %v518_v1 = vadd.f32 %v515_v59, %v493_v51  ;;  %v748_v20 = vsub.s32 6, %v1643_v44 }
  0xb8   : > { %v541_v21 = vmul.f32 %v538_v5, %v525_v40  ;;  %v720_v63 = vrot.slane %v705_v15, %v1650_v48 }
  0xb9   : > { %v546_v7 = vpop.permute.xlu1 %545  ;;  %v517_v8 = vadd.f32 %v514_v62, %v492_v57  ;;  %v519_v13 = vadd.f32 %v516_v0, %v494_v58  ;;  %v543_v22 = vadd.f32 %v540_v12, %v518_v1 }
  0xbb   : > { %v548_v14 = vpop.permute.xlu0 %547  ;;  %v542_v26 = vadd.f32 %v539_v17, %v517_v8  ;;  %v544_v30 = vadd.f32 %v541_v21, %v519_v13  ;;  %v753_v8 = vrot.slane %v1517_v6, %v1653_v54  ;;  %v788_v13 = vsub.s32 7, %v1643_v44 }
  0xbc   : > { %v553_v18 = vsel %vm551_vm3, %v546_v7, %v548_v14 }
  0xbd   : > { %v569_v23 = vrot.slane %v553_v18, %v1647_v47  ;;  %v594_v24 = vrot.slane %v553_v18, %v1650_v48  ;;  %v550_v25 = vpop.permute.xlu1 %549  ;;  %v619_v29 = vrot.slane %v553_v18, %v1653_v54  ;;  %v644_v51 = vrot.slane %v553_v18, %v1662_v2 }
  0xbe   : > { %v552_v27 = vsel %vm551_vm3, %v548_v14, %v550_v25  ;;  %v554_v28 = vsel %vm551_vm3, %v550_v25, %v546_v7  ;;  %v745_v7 = vrot.slane %v1510_v4, %v1653_v54 }
  0xbf   : > { %v575_v31 = vmul.f32 %v569_v23, %v560_v52  ;;  %v565_v32 = vrot.slane %v554_v28, %v1647_v47  ;;  %v573_v33 = vrot.slane %v552_v27, %v1647_v47  ;;  %v610_v34 = vpop.permute.xlu0 %609  ;;  %v590_v35 = vrot.slane %v554_v28, %v1650_v48 }
  0xc0   : > { %v598_v36 = vrot.slane %v552_v27, %v1650_v48  ;;  %v615_v37 = vrot.slane %v554_v28, %v1653_v54  ;;  %v623_v38 = vrot.slane %v552_v27, %v1653_v54  ;;  %v600_v39 = vmul.f32 %v594_v24, %v585_v60 }
  0xc1   : > { %v574_v40 = vmul.f32 %v565_v32, %v560_v52  ;;  %v576_v41 = vmul.f32 %v573_v33, %v560_v52  ;;  %v578_v42 = vadd.f32 %v575_v31, %v543_v22  ;;  %v635_v45 = vpop.permute.xlu1 %634  ;;  %v599_v46 = vmul.f32 %v590_v35, %v585_v60 }
  0xc2   : > { %v601_v49 = vmul.f32 %v598_v36, %v585_v60  ;;  %v625_v50 = vmul.f32 %v619_v29, %v610_v34  ;;  %v640_v57 = vrot.slane %v554_v28, %v1662_v2  ;;  %v624_v59 = vmul.f32 %v615_v37, %v610_v34 }
  0xc3   : > { %v577_v53 = vadd.f32 %v574_v40, %v542_v26  ;;  %v579_v55 = vadd.f32 %v576_v41, %v544_v30  ;;  %v603_v56 = vadd.f32 %v600_v39, %v578_v42  ;;  %v660_v58 = vpop.permute.xlu0 %659  ;;  %v626_v61 = vmul.f32 %v623_v38, %v610_v34 }
  0xc4   : > { %v648_v62 = vrot.slane %v552_v27, %v1662_v2  ;;  %v650_v3 = vmul.f32 %v644_v51, %v635_v45  ;;  %v649_v5 = vmul.f32 %v640_v57, %v635_v45  ;;  %v690_v15 = vmul.f32 %v684_v10, %v660_v58 }
  0xc5   : > { %v602_v52 = vadd.f32 %v599_v46, %v577_v53  ;;  %v604_v0 = vadd.f32 %v601_v49, %v579_v55  ;;  %v628_v1 = vadd.f32 %v625_v50, %v603_v56  ;;  %v700_v60 = vpop.permute.xlu1 %699  ;;  %v724_v22 = vrot.slane %v1729_v16, %v1650_v48 }
  0xc6   : > { %v651_v17 = vmul.f32 %v648_v62, %v635_v45  ;;  %v728_v23 = vrot.slane %v713_v19, %v1650_v48  ;;  %v749_v24 = vrot.slane %v1510_v4, %v748_v20  ;;  %v689_v27 = vmul.f32 %v1719_v9, %v660_v58 }
  0xc7   : > { %v627_v12 = vadd.f32 %v624_v59, %v602_v52  ;;  %v629_v14 = vadd.f32 %v626_v61, %v604_v0  ;;  %v653_v18 = vadd.f32 %v650_v3, %v628_v1  ;;  %v740_v21 = vpop.permute.xlu0 %739  ;;  %v691_v28 = vmul.f32 %v1724_v11, %v660_v58 }
  0xc8   : > { %v760_v30 = vrot.slane %v745_v7, %v1653_v54  ;;  %v768_v31 = vrot.slane %v753_v8, %v1653_v54  ;;  %v785_v10 = vrot.slane %v1510_v4, %v1662_v2  ;;  %v729_v19 = vmul.f32 %v720_v63, %v700_v60 }
  0xc9   : > { %v652_v25 = vadd.f32 %v649_v5, %v627_v12  ;;  %v654_v26 = vadd.f32 %v651_v17, %v629_v14  ;;  %v780_v44 = vpop.permute.xlu1 %779  ;;  %v693_v29 = vadd.f32 %v690_v15, %v653_v18  ;;  %v789_v20 = vrot.slane %v1510_v4, %v788_v13 }
  0xca   : > { %v730_v34 = vmul.f32 %v724_v22, %v700_v60  ;;  %v731_v35 = vmul.f32 %v728_v23, %v700_v60  ;;  %v764_v9 = vrot.slane %v749_v24, %v1653_v54  ;;  %v793_v11 = vrot.slane %v1517_v6, %v1662_v2 }
  0xcb   : > { %v692_v16 = vadd.f32 %v689_v27, %v652_v25  ;;  %v694_v32 = vadd.f32 %v691_v28, %v654_v26  ;;  %v830_v33 = vpop.permute.xlu0 %829  ;;  %v769_v40 = vmul.f32 %v760_v30, %v740_v21  ;;  %v800_v41 = vrot.slane %v785_v10, %v1662_v2 }
  0xcc   : > { %v733_v38 = vadd.f32 %v730_v34, %v693_v29  ;;  %v804_v42 = vrot.slane %v789_v20, %v1662_v2  ;;  %v770_v4 = vmul.f32 %v764_v9, %v740_v21  ;;  %v771_v46 = vmul.f32 %v768_v31, %v740_v21 }
  0xcd   : > { %v732_v36 = vadd.f32 %v729_v19, %v692_v16  ;;  %v855_v37 = vpop.permute.xlu1 %854  ;;  %v734_v39 = vadd.f32 %v731_v35, %v694_v32  ;;  %v808_v50 = vrot.slane %v793_v11, %v1662_v2  ;;  %v809_v55 = vmul.f32 %v800_v41, %v780_v44 }
  0xce   : > { %v773_v53 = vadd.f32 %v770_v4, %v733_v38  ;;  %v810_v57 = vmul.f32 %v804_v42, %v780_v44 }
  0xcf   : > { %v816_v45 = vpop.permute.xlu0 %815  ;;  %v772_v49 = vadd.f32 %v769_v40, %v732_v36  ;;  %v774_v6 = vadd.f32 %v771_v46, %v734_v39  ;;  %v811_v61 = vmul.f32 %v808_v50, %v780_v44 }
  0xd0   : > { %v813_v7 = vadd.f32 %v810_v57, %v773_v53 }
  0xd1   : > { %v818_v51 = vpop.permute.xlu1 %817  ;;  %v812_v62 = vadd.f32 %v809_v55, %v772_v49  ;;  %v814_v8 = vadd.f32 %v811_v61, %v774_v6 }
  0xd2   : > { %v823_v56 = vsel %vm821_vm4, %v816_v45, %v818_v51 }
  0xd3   : > { %v835_v58 = vrot.slane %v823_v56, %v1647_v47  ;;  %v820_v59 = vpop.permute.xlu0 %819  ;;  %v860_v1 = vrot.slane %v823_v56, %v1650_v48  ;;  %v885_v24 = vrot.slane %v823_v56, %v1653_v54  ;;  %v910_v9 = vrot.slane %v823_v56, %v1662_v2 }
  0xd4   : > { %v822_v63 = vsel %vm821_vm4, %v818_v51, %v820_v59  ;;  %v824_v52 = vsel %vm821_vm4, %v820_v59, %v816_v45 }
  0xd5   : > { %v844_v0 = vmul.f32 %v835_v58, %v830_v33  ;;  %v839_v3 = vrot.slane %v822_v63, %v1647_v47  ;;  %v843_v60 = vrot.slane %v824_v52, %v1647_v47  ;;  %v880_v5 = vpop.permute.xlu1 %879  ;;  %v864_v13 = vrot.slane %v822_v63, %v1650_v48 }
  0xd6   : > { %v868_v17 = vrot.slane %v824_v52, %v1650_v48  ;;  %v869_v15 = vmul.f32 %v860_v1, %v855_v37  ;;  %v889_v27 = vrot.slane %v822_v63, %v1653_v54  ;;  %v893_v29 = vrot.slane %v824_v52, %v1653_v54 }
  0xd7   : > { %v845_v12 = vmul.f32 %v839_v3, %v830_v33  ;;  %v846_v14 = vmul.f32 %v843_v60, %v830_v33  ;;  %v847_v18 = vadd.f32 %v844_v0, %v812_v62  ;;  %v905_v21 = vpop.permute.xlu0 %904  ;;  %v870_v26 = vmul.f32 %v864_v13, %v855_v37 }
  0xd8   : > { %v871_v28 = vmul.f32 %v868_v17, %v855_v37  ;;  %v894_v16 = vmul.f32 %v885_v24, %v880_v5  ;;  %v914_v32 = vrot.slane %v822_v63, %v1662_v2  ;;  %v895_v20 = vmul.f32 %v889_v27, %v880_v5 }
  0xd9   : > { %v848_v22 = vadd.f32 %v845_v12, %v813_v7  ;;  %v849_v23 = vadd.f32 %v846_v14, %v814_v8  ;;  %v940_v25 = vpop.permute.xlu1 %939  ;;  %v872_v44 = vadd.f32 %v869_v15, %v847_v18  ;;  %v918_v33 = vrot.slane %v824_v52, %v1662_v2 }
  0xda   : > { %v896_v34 = vmul.f32 %v893_v29, %v880_v5  ;;  %v919_v39 = vmul.f32 %v910_v9, %v905_v21  ;;  %v920_v40 = vmul.f32 %v914_v32, %v905_v21 }
  0xdb   : > { %v965_v30 = vpop.permute.xlu0 %964  ;;  %v873_v31 = vadd.f32 %v870_v26, %v848_v22  ;;  %v874_v10 = vadd.f32 %v871_v28, %v849_v23  ;;  %v897_v35 = vadd.f32 %v894_v16, %v872_v44  ;;  %v921_v45 = vmul.f32 %v918_v33, %v905_v21 }
  0xdd   : > { %v926_v19 = vpop.permute.xlu1 %925  ;;  %v898_v36 = vadd.f32 %v895_v20, %v873_v31  ;;  %v899_v38 = vadd.f32 %v896_v34, %v874_v10  ;;  %v922_v50 = vadd.f32 %v919_v39, %v897_v35 }
  0xdf   : > { %v928_v11 = vpop.permute.xlu0 %927  ;;  %v923_v56 = vadd.f32 %v920_v40, %v898_v36  ;;  %v924_v59 = vadd.f32 %v921_v45, %v899_v38 }
  0xe0   : > { %v933_v37 = vsel %vm931_vm5, %v926_v19, %v928_v11 }
  0xe1   : > { %v945_v41 = vrot.slane %v933_v37, %v1647_v47  ;;  %v930_v42 = vpop.permute.xlu1 %929  ;;  %v970_v4 = vrot.slane %v933_v37, %v1650_v48  ;;  %v995_v1 = vrot.slane %v933_v37, %v1653_v54  ;;  %v1020_v28 = vrot.slane %v933_v37, %v1662_v2 }
  0xe2   : > { %v932_v46 = vsel %vm931_vm5, %v928_v11, %v930_v42  ;;  %v934_v49 = vsel %vm931_vm5, %v930_v42, %v926_v19 }
  0xe3   : > { %v954_v51 = vmul.f32 %v945_v41, %v940_v25  ;;  %v949_v53 = vrot.slane %v932_v46, %v1647_v47  ;;  %v953_v6 = vrot.slane %v934_v49, %v1647_v47  ;;  %v990_v55 = vpop.permute.xlu0 %989  ;;  %v974_v57 = vrot.slane %v932_v46, %v1650_v48 }
  0xe4   : > { %v978_v58 = vrot.slane %v934_v49, %v1650_v48  ;;  %v979_v0 = vmul.f32 %v970_v4, %v965_v30  ;;  %v999_v7 = vrot.slane %v932_v46, %v1653_v54  ;;  %v1003_v14 = vrot.slane %v934_v49, %v1653_v54 }
  0xe5   : > { %v955_v61 = vmul.f32 %v949_v53, %v940_v25  ;;  %v956_v62 = vmul.f32 %v953_v6, %v940_v25  ;;  %v957_v63 = vadd.f32 %v954_v51, %v922_v50  ;;  %v1015_v52 = vpop.permute.xlu1 %1014  ;;  %v980_v3 = vmul.f32 %v974_v57, %v965_v30 }
  0xe6   : > { %v981_v13 = vmul.f32 %v978_v58, %v965_v30  ;;  %v1004_v15 = vmul.f32 %v995_v1, %v990_v55  ;;  %v1005_v22 = vmul.f32 %v999_v7, %v990_v55  ;;  %v1024_v23 = vrot.slane %v932_v46, %v1662_v2 }
  0xe7   : > { %v958_v60 = vadd.f32 %v955_v61, %v923_v56  ;;  %v959_v5 = vadd.f32 %v956_v62, %v924_v59  ;;  %v1050_v8 = vpop.permute.xlu0 %1049  ;;  %v982_v12 = vadd.f32 %v979_v0, %v957_v63  ;;  %v1006_v25 = vmul.f32 %v1003_v14, %v990_v55 }
  0xe8   : > { %v1028_v27 = vrot.slane %v934_v49, %v1662_v2  ;;  %v1029_v31 = vmul.f32 %v1020_v28, %v1015_v52  ;;  %v1030_v16 = vmul.f32 %v1024_v23, %v1015_v52 }
  0xe9   : > { %v983_v17 = vadd.f32 %v980_v3, %v958_v60  ;;  %v1075_v18 = vpop.permute.xlu1 %1074  ;;  %v984_v21 = vadd.f32 %v981_v13, %v959_v5  ;;  %v1007_v26 = vadd.f32 %v1004_v15, %v982_v12 }
  0xea   : > { %v1031_v33 = vmul.f32 %v1028_v27, %v1015_v52 }
  0xeb   : > { %v1036_v24 = vpop.permute.xlu0 %1035  ;;  %v1008_v44 = vadd.f32 %v1005_v22, %v983_v17  ;;  %v1009_v30 = vadd.f32 %v1006_v25, %v984_v21  ;;  %v1032_v34 = vadd.f32 %v1029_v31, %v1007_v26 }
  0xed   : > { %v1038_v29 = vpop.permute.xlu1 %1037  ;;  %v1033_v11 = vadd.f32 %v1030_v16, %v1008_v44  ;;  %v1034_v40 = vadd.f32 %v1031_v33, %v1009_v30 }
  0xee   : > { %v1043_v10 = vsel %vm1041_vm6, %v1036_v24, %v1038_v29 }
  0xef   : > { %v1055_v32 = vrot.slane %v1043_v10, %v1647_v47  ;;  %v1080_v19 = vrot.slane %v1043_v10, %v1650_v48  ;;  %v1040_v20 = vpop.permute.xlu0 %1039  ;;  %v1105_v45 = vrot.slane %v1043_v10, %v1653_v54  ;;  %v1130_v7 = vrot.slane %v1043_v10, %v1662_v2 }
  0xf0   : > { %v1042_v35 = vsel %vm1041_vm6, %v1038_v29, %v1040_v20  ;;  %v1044_v9 = vsel %vm1041_vm6, %v1040_v20, %v1036_v24 }
  0xf1   : > { %v1064_v36 = vmul.f32 %v1055_v32, %v1050_v8  ;;  %v1059_v37 = vrot.slane %v1042_v35, %v1647_v47  ;;  %v1063_v38 = vrot.slane %v1044_v9, %v1647_v47  ;;  %v1100_v39 = vpop.permute.xlu1 %1099  ;;  %v1084_v41 = vrot.slane %v1042_v35, %v1650_v48 }
  0xf2   : > { %v1088_v42 = vrot.slane %v1044_v9, %v1650_v48  ;;  %v1089_v4 = vmul.f32 %v1080_v19, %v1075_v18  ;;  %v1109_v6 = vrot.slane %v1042_v35, %v1653_v54  ;;  %v1113_v55 = vrot.slane %v1044_v9, %v1653_v54 }
  0xf3   : > { %v1065_v46 = vmul.f32 %v1059_v37, %v1050_v8  ;;  %v1066_v49 = vmul.f32 %v1063_v38, %v1050_v8  ;;  %v1067_v50 = vadd.f32 %v1064_v36, %v1032_v34  ;;  %v1125_v51 = vpop.permute.xlu0 %1124  ;;  %v1090_v53 = vmul.f32 %v1084_v41, %v1075_v18  ;;  %v209_v36 = vld [vmem:[%s1868_s1] sm:$0x7] }
  0xf4   : > { %v1091_v56 = vmul.f32 %v1088_v42, %v1075_v18  ;;  %v1114_v52 = vmul.f32 %v1105_v45, %v1100_v39  ;;  %v1115_v1 = vmul.f32 %v1109_v6, %v1100_v39  ;;  %v1134_v3 = vrot.slane %v1042_v35, %v1662_v2 }
  0xf5   : > { %v1068_v57 = vadd.f32 %v1065_v46, %v1033_v11  ;;  %v1069_v58 = vadd.f32 %v1066_v49, %v1034_v40  ;;  %v1092_v59 = vadd.f32 %v1089_v4, %v1067_v50  ;;  %v1160_v61 = vpop.permute.xlu1 %1159  ;;  %v1116_v60 = vmul.f32 %v1113_v55, %v1100_v39 }
  0xf6   : > { %v1138_v8 = vrot.slane %v1044_v9, %v1662_v2  ;;  %v1139_v17 = vmul.f32 %v1130_v7, %v1125_v51  ;;  %v1140_v21 = vmul.f32 %v1134_v3, %v1125_v51 }
  0xf7   : > { %v1093_v62 = vadd.f32 %v1090_v53, %v1068_v57  ;;  %v1094_v63 = vadd.f32 %v1091_v56, %v1069_v58  ;;  %v1185_v0 = vpop.permute.xlu0 %1184  ;;  %v1117_v5 = vadd.f32 %v1114_v52, %v1092_v59  ;;  %v1259_v53 = vrot.slane %v209_v36, %v1647_v47 }
  0xf8   : > { %v1141_v22 = vmul.f32 %v1138_v8, %v1125_v51  ;;  %v1263_v59 = vrot.slane %v209_v36, %v1650_v48 }
  0xf9   : > { %v1146_v13 = vpop.permute.xlu1 %1145  ;;  %v1118_v12 = vadd.f32 %v1115_v1, %v1093_v62  ;;  %v1119_v14 = vadd.f32 %v1116_v60, %v1094_v63  ;;  %v1142_v23 = vadd.f32 %v1139_v17, %v1117_v5 }
  0xfb   : > { %v1148_v18 = vpop.permute.xlu0 %1147  ;;  %v1143_v27 = vadd.f32 %v1140_v21, %v1118_v12  ;;  %v1144_v30 = vadd.f32 %v1141_v22, %v1119_v14 }
  0xfc   : > { %v1153_v15 = vsel %vm1151_vm7, %v1146_v13, %v1148_v18 }
  0xfd   : > { %v1165_v24 = vrot.slane %v1153_v15, %v1647_v47  ;;  %v1190_v25 = vrot.slane %v1153_v15, %v1650_v48  ;;  %v1150_v26 = vpop.permute.xlu1 %1149  ;;  %v1215_v29 = vrot.slane %v1153_v15, %v1653_v54  ;;  %v1240_v41 = vrot.slane %v1153_v15, %v1662_v2 }
  0xfe   : > { %v1152_v28 = vsel %vm1151_vm7, %v1148_v18, %v1150_v26  ;;  %v1154_v44 = vsel %vm1151_vm7, %v1150_v26, %v1146_v13 }
  0xff   : > { %v1174_v31 = vmul.f32 %v1165_v24, %v1160_v61  ;;  %v1169_v10 = vrot.slane %v1152_v28, %v1647_v47  ;;  %v1173_v16 = vrot.slane %v1154_v44, %v1647_v47  ;;  %v1210_v32 = vpop.permute.xlu0 %1209  ;;  %v1194_v19 = vrot.slane %v1152_v28, %v1650_v48 }
 0x100   : > { %v1198_v20 = vrot.slane %v1154_v44, %v1650_v48  ;;  %v1219_v33 = vrot.slane %v1152_v28, %v1653_v54  ;;  %v1223_v34 = vrot.slane %v1154_v44, %v1653_v54  ;;  %v1199_v35 = vmul.f32 %v1190_v25, %v1185_v0 }
 0x101   : > { %v1175_v43 = vmul.f32 %v1169_v10, %v1160_v61  ;;  %v1176_v9 = vmul.f32 %v1173_v16, %v1160_v61  ;;  %v1177_v11 = vadd.f32 %v1174_v31, %v1142_v23  ;;  %v1200_v37 = vmul.f32 %v1194_v19, %v1185_v0  ;;  %v1235_v40 = vpop.permute.xlu1 %1234 }
 0x102   : > { %v1201_v38 = vmul.f32 %v1198_v20, %v1185_v0  ;;  %v1224_v39 = vmul.f32 %v1215_v29, %v1210_v32  ;;  %v1248_v46 = vrot.slane %v1154_v44, %v1662_v2  ;;  %v1225_v49 = vmul.f32 %v1219_v33, %v1210_v32 }
 0x103   : > { %v1178_v42 = vadd.f32 %v1175_v43, %v1143_v27  ;;  %v1179_v45 = vadd.f32 %v1176_v9, %v1144_v30  ;;  %v1202_v4 = vadd.f32 %v1199_v35, %v1177_v11  ;;  %v1226_v50 = vmul.f32 %v1223_v34, %v1210_v32 }
 0x104   : > { %v1244_v51 = vrot.slane %v1152_v28, %v1662_v2  ;;  %v1249_v57 = vmul.f32 %v1240_v41, %v1235_v40  ;;  %v1251_v58 = vmul.f32 %v1248_v46, %v1235_v40  ;;  %v1267_v61 = vrot.slane %v209_v36, %v1653_v54 }
 0x105   : > { %v1203_v6 = vadd.f32 %v1200_v37, %v1178_v42  ;;  %v1204_v55 = vadd.f32 %v1201_v38, %v1179_v45  ;;  %v1227_v56 = vadd.f32 %v1224_v39, %v1202_v4 }
 0x106   : > { %v1250_v52 = vmul.f32 %v1244_v51, %v1235_v40 }
 0x107   : > { %v1228_v62 = vadd.f32 %v1225_v49, %v1203_v6  ;;  %v1229_v63 = vadd.f32 %v1226_v50, %v1204_v55  ;;  %v1252_v0 = vadd.f32 %v1249_v57, %v1227_v56 }
 0x109   : > { %v1253_v1 = vadd.f32 %v1250_v52, %v1228_v62  ;;  %v1254_v3 = vadd.f32 %v1251_v58, %v1229_v63  ;;  %v1271_v60 = vmul.f32 %v1259_v53, %v1252_v0 }
 0x10b   : > { %v1272_v2 = vmul.f32 %v1263_v59, %v1253_v1  ;;  %v1273_v5 = vmul.f32 %v1267_v61, %v1254_v3  ;;  %v1284_v47 = vmul.f32 %v1271_v60, %v1252_v0  ;;  %v1275_v7 = vsel %vm1274_vm8, %v1271_v60, 0.0 }
 0x10d   : > { %v1276_v8 = vsel %vm1274_vm8, %v1272_v2, 0.0  ;;  %v1285_v13 = vmul.f32 %v1272_v2, %v1253_v1  ;;  %v1286_v12 = vmul.f32 %v1273_v5, %v1254_v3  ;;  %v1278_v48 = vsel %vm1274_vm8, %v1273_v5, 0.0 }
 0x10e   : > { %v1277_v14 = vadd.f32 %v1276_v8, %v1275_v7  ;;  %v1287_v17 = vsel %vm1274_vm8, %v1284_v47, 0.0 }
 0x10f   : > { %v1288_v54 = vsel %vm1274_vm8, %v1285_v13, 0.0  ;;  %v1290_v15 = vsel %vm1274_vm8, %v1286_v12, 0.0 }
 0x110   : > { %v1279_v18 = vadd.f32 %v1278_v48, %v1277_v14  ;;  %v1289_v21 = vadd.f32 %v1288_v54, %v1287_v17 }
 0x112   : > { %1280 = vadd.xlane.f32.xlu0 %v1279_v18  ;;  %v1291_v22 = vadd.f32 %v1290_v15, %v1289_v21 }
 0x114   : > { %1292 = vadd.xlane.f32.xlu1 %v1291_v22 }
 0x19f   : > { %v1281_v23 = vpop.xlane.xlu0 %1280 }
 0x1a0   : > { %1283 = vst.msk [vmem:[%s202_s8] sm:$0x7f] %vm1282_vm9, %v1281_v23 }
 0x1a1   : > { %v1293_v24 = vpop.xlane.xlu1 %1292 }
 0x1a2   : > { %1294 = vst.msk [vmem:[%s206_s11] sm:$0x7f] %vm1282_vm9, %v1293_v24 }
 0x1a3 PF: > { %s15_s15 = sadd.s32 1, %s1451_s15  }
 0x1a4   : > { %p12_p4 = scmp.ge.s32.totalorder %s15_s15, 4  }
 0x1a6   :  { %14 = sbr.rel (!%p12_p4) target bundleno = 1 (0x1), region = 109 }

// kernel: res_level_forward.5
= control target key start
LH: loop header
LB: loop body
LE: loop exit
PB: predicated region body
PF: predicated region fallthrough
CT: control target
= control target key end

     0   :  { %s3319_s27 = smov 0   ;;  %s4949_s0 = inlined_call_operand.vmem [shape: f32[2,4,384], index: 0, kind: input, shape index: {}]   ;;  %s4950_s1 = inlined_call_operand.vmem [shape: f32[1,384], index: 1, kind: input, shape index: {}]   ;;  %s4951_s2 = inlined_call_operand.vmem [shape: f32[9,4,7,1], index: 2, kind: input, shape index: {}]   ;;  %s4952_s3 = inlined_call_operand.vmem [shape: f32[9,7,4,1], index: 3, kind: input, shape index: {}]   ;;  %s4953_s4 = inlined_call_operand.vmem [shape: f32[7,1], index: 4, kind: input, shape index: {}]   ;;  %s4954_s5 = inlined_call_operand.vmem [shape: f32[7,1], index: 5, kind: input, shape index: {}]   ;;  %s4955_s6 = inlined_call_operand.vmem [shape: f32[4,1], index: 6, kind: input, shape index: {}]   ;;  %s4956_s7 = inlined_call_operand.vmem [shape: f32[4,1], index: 7, kind: input, shape index: {}]   ;;  %s4957_s8 = inlined_call_operand.vmem [shape: f32[2,4,384], index: 8, kind: output, shape index: {}]  }
   0x1 LB: > { %s3128_s28 = sadd.s32 4294967295, %s3263_s27   ;;  %p3132_p0 = scmp.ge.s32.totalorder %s3263_s27, 1  ;;  %s3263_s27 = sphi %s3319_s27, %s18_s27  }
   0x2   : > { %p262_p1 = scmp.lt.s32.totalorder %s3263_s27, 3 }
   0x4   : > { %p263_p2 = pnand %p3132_p0, %p262_p1 }
   0x6   : > { %266 = sbr.rel (%p263_p2) target bundleno = 575 (0x23f), region = 52 }
   0xd   : > { %v327_v0 = vld [vmem:[%s4951_s2] sm:$0x7f]  ;;  %p296_p3 = scmp.lt.s32.totalorder %s3128_s28, 1  ;;  %v3265_v1 = vmov 0   ;;  %s3266_s13 = smov 19   ;;  %v321_v43 = vlaneseq }
   0xe   : > { %3252 = vset.pattern.permute.xlu1 %v3265_v1  ;;  %3253 = vset.pattern.permute.xlu0 %v3265_v1  ;;  %v3136_v5 = vld [vmem:[%s4951_s2 + $0x10] sm:$0x7f]  ;;  %v3137_v6 = vld [vmem:[%s4951_s2 + $0x18] sm:$0x7f]  ;;  %v3135_v7 = vld [vmem:[%s4951_s2 + $0x8] sm:$0x7f] }
   0xf   : > { %330 = vperm.xlu1 %3252, %v327_v0   ;;  %s5009_s28 = smov (!%p296_p3, %s3128_s28), 1  ;;  %s3267_s20 = smov 18   ;;  %v3138_v8 = vld [vmem:[%s4951_s2 + $0x20] sm:$0x7f]  ;;  %v3140_v9 = vld [vmem:[%s4951_s2 + $0x30] sm:$0x7f] }
  0x10   : > { %s3234_s9 = smul.u32 12, %s5009_s28  ;;  %v3139_v10 = vld [vmem:[%s4951_s2 + $0x28] sm:$0x7f]  ;;  %v3141_v11 = vld [vmem:[%s4951_s2 + $0x38] sm:$0x7f]  ;;  %s3268_s10 = smov 17  }
  0x11   : > { %v3143_v12 = vld [vmem:[%s4951_s2 + $0x48] sm:$0x7f]  ;;  %v3142_v13 = vld [vmem:[%s4951_s2 + $0x40] sm:$0x7f]  ;;  %v3145_v14 = vld [vmem:[%s4951_s2 + $0x58] sm:$0x7f] }
  0x12   : > { %s3338_s12 = scalar_lea.vmem %s4949_s0, %s3234_s9  ;;  %v3144_v15 = vld [vmem:[%s4951_s2 + $0x50] sm:$0x7f]  ;;  %s3269_s22 = smov 1   ;;  %v3146_v16 = vld [vmem:[%s4951_s2 + $0x60] sm:$0x7f]  ;;  %v3518_v48 = vand.u32 127, %v321_v43 }
  0x13   : > { %v3341_v2 = vld [vmem:[%s3338_s12 + $0x8] sm:$0xf]  ;;  %v3344_v3 = vld [vmem:[%s3338_s12] sm:$0xff]  ;;  %v3148_v17 = vld [vmem:[%s4951_s2 + $0x70] sm:$0x7f]  ;;  %s3270_s25 = smov 127  }
  0x14   : > { %319 = vrot.lane.b32.xlu1 %v3341_v2, %s3266_s13  ;;  %315 = vrot.lane.b32.xlu0 %v3344_v3, %s3266_s13  ;;  %v3352_v4 = vcombine.high %v3344_v3, %v3344_v3  ;;  %v3147_v18 = vld [vmem:[%s4951_s2 + $0x68] sm:$0x7f]  ;;  %v3150_v19 = vld [vmem:[%s4951_s2 + $0x80] sm:$0x7f]  ;;  %s3271_s18 = smov 111   ;;  %s3272_s14 = smov 110  }
  0x15   : > { %v3149_v20 = vld [vmem:[%s4951_s2 + $0x78] sm:$0x7f]  ;;  %v3152_v21 = vld [vmem:[%s4951_s2 + $0x90] sm:$0x7f]  ;;  %v3151_v22 = vld [vmem:[%s4951_s2 + $0x88] sm:$0x7f] }
  0x16   : > { %4963 = vst [vmem:[#allocation2_spill] sm:$0xff] %v3352_v4  ;;  %v3153_v23 = vld [vmem:[%s4951_s2 + $0x98] sm:$0x7f]  ;;  %v3155_v24 = vld [vmem:[%s4951_s2 + $0xa8] sm:$0x7f]  ;;  %s3273_s29 = smov 109  }
  0x17   : > { %v3154_v25 = vld [vmem:[%s4951_s2 + $0xa0] sm:$0x7f]  ;;  %v3157_v26 = vld [vmem:[%s4951_s2 + $0xb8] sm:$0x7f]  ;;  %v3156_v27 = vld [vmem:[%s4951_s2 + $0xb0] sm:$0x7f] }
  0x18   : > { %380 = vperm.xlu1 %3252, %v3136_v5   ;;  %317 = vrot.lane.b32.xlu0 %v3352_v4, %s3266_s13  ;;  %v3158_v28 = vld [vmem:[%s4951_s2 + $0xc0] sm:$0x7f]  ;;  %v3160_v29 = vld [vmem:[%s4951_s2 + $0xd0] sm:$0x7f]  ;;  %v3159_v30 = vld [vmem:[%s4951_s2 + $0xc8] sm:$0x7f] }
  0x19   : > { %v3161_v31 = vld [vmem:[%s4951_s2 + $0xd8] sm:$0x7f]  ;;  %v3163_v32 = vld [vmem:[%s4951_s2 + $0xe8] sm:$0x7f]  ;;  %v3162_v33 = vld [vmem:[%s4951_s2 + $0xe0] sm:$0x7f] }
  0x1a   : > { %v3165_v34 = vld [vmem:[%s4951_s2 + $0xf8] sm:$0x7f]  ;;  %v3164_v35 = vld [vmem:[%s4951_s2 + $0xf0] sm:$0x7f]  ;;  %v3166_v36 = vld [vmem:[%s4951_s2 + $0x100] sm:$0x7f] }
  0x1b   : > { %v3168_v37 = vld [vmem:[%s4951_s2 + $0x110] sm:$0x7f]  ;;  %v3167_v38 = vld [vmem:[%s4951_s2 + $0x108] sm:$0x7f]  ;;  %v309_v39 = vld [vmem:[%s4953_s4] sm:$0x7f] }
  0x1c   : > { %405 = vperm.xlu1 %3252, %v3137_v6   ;;  %355 = vperm.xlu0 %3253, %v3135_v7   ;;  %v3169_v40 = vld [vmem:[%s4951_s2 + $0x118] sm:$0x7f]  ;;  %v3170_v41 = vld [vmem:[%s4952_s3 + $0x4] sm:$0xf]  ;;  %v3172_v45 = vld [vmem:[%s4952_s3 + $0xc] sm:$0xf] }
  0x1d   : > { %v310_v42 = vld [vmem:[%s4954_s5] sm:$0x7f]  ;;  %v3174_v49 = vld [vmem:[%s4952_s3 + $0x14] sm:$0xf]  ;;  %v3523_v50 = vshrl.u32 %v321_v43, 7  ;;  %vm323_vm0 = vcmp.lt.s32.totalorder %v3518_v48, 19 }
  0x1e   : > { %v1403_v47 = vld [vmem:[%s4952_s3] sm:$0xf]  ;;  %v3171_v51 = vld [vmem:[%s4952_s3 + $0x8] sm:$0xf]  ;;  %v3173_v58 = vld [vmem:[%s4952_s3 + $0x10] sm:$0xf] }
  0x1f   : > { %v3177_v54 = vld [vmem:[%s4952_s3 + $0x20] sm:$0xf]  ;;  %v3533_v55 = vsub.s32 0, %v3523_v50  ;;  %v3543_v59 = vsub.s32 1, %v3523_v50  ;;  %v3179_v0 = vld [vmem:[%s4952_s3 + $0x28] sm:$0xf] }
  0x20   : > { %428 = vrot.lane.b32.xlu1 %v3352_v4, %s3267_s20  ;;  %426 = vrot.lane.b32.xlu0 %v3344_v3, %s3267_s20  ;;  %v3175_v6 = vld [vmem:[%s4952_s3 + $0x18] sm:$0xf]  ;;  %vm432_vm1 = vcmp.lt.s32.totalorder %v3518_v48, 18  ;;  %vm542_vm2 = vcmp.lt.s32.totalorder %v3518_v48, 17  ;;  %vm652_vm3 = vcmp.lt.s32.totalorder %v3518_v48, 1  ;;  %vm922_vm4 = vcmp.lt.s32.totalorder %v3518_v48, 127 }
  0x21   : > { %vm1032_vm5 = vcmp.lt.s32.totalorder %v3518_v48, 111  ;;  %vm1142_vm6 = vcmp.lt.s32.totalorder %v3518_v48, 110  ;;  %vm1252_vm7 = vcmp.lt.s32.totalorder %v3518_v48, 109 }
  0x24   : > { %440 = vperm.xlu1 %3252, %v3138_v8   ;;  %430 = vrot.lane.b32.xlu0 %v3341_v2, %s3267_s20 }
  0x28   : > { %490 = vperm.xlu1 %3252, %v3140_v9   ;;  %465 = vperm.xlu0 %3253, %v3139_v10  }
  0x2c   : > { %536 = vrot.lane.b32.xlu1 %v3344_v3, %s3268_s10  ;;  %515 = vperm.xlu0 %3253, %v3141_v11   ;;  %v3564_v11 = vsub.s32 2, %v3523_v50 }
  0x30   : > { %540 = vrot.lane.b32.xlu1 %v3341_v2, %s3268_s10  ;;  %538 = vrot.lane.b32.xlu0 %v3352_v4, %s3268_s10 }
  0x34   : > { %575 = vperm.xlu1 %3252, %v3143_v12   ;;  %550 = vperm.xlu0 %3253, %v3142_v13  }
  0x38   : > { %625 = vperm.xlu1 %3252, %v3145_v14   ;;  %600 = vperm.xlu0 %3253, %v3144_v15  }
  0x3c   : > { %648 = vrot.lane.b32.xlu1 %v3352_v4, %s3269_s22  ;;  %646 = vrot.lane.b32.xlu0 %v3344_v3, %s3269_s22 }
  0x40   : > { %660 = vperm.xlu1 %3252, %v3146_v16   ;;  %650 = vrot.lane.b32.xlu0 %v3341_v2, %s3269_s22 }
  0x44   : > { %710 = vperm.xlu1 %3252, %v3148_v17   ;;  %685 = vperm.xlu0 %3253, %v3147_v18   ;;  %v3181_v17 = vld [vmem:[%s4952_s3 + $0x30] sm:$0xf]  ;;  %v3571_v18 = vsub.s32 3, %v3523_v50 }
  0x48   : > { %760 = vperm.xlu1 %3252, %v3150_v19   ;;  %735 = vperm.xlu0 %3253, %v3149_v20   ;;  %v3176_v20 = vld [vmem:[%s4952_s3 + $0x1c] sm:$0xf] }
  0x4c   : > { %840 = vperm.xlu1 %3252, %v3152_v21   ;;  %800 = vperm.xlu0 %3253, %v3151_v22  }
  0x50   : > { %916 = vrot.lane.b32.xlu1 %v3344_v3, %s3270_s25  ;;  %880 = vperm.xlu0 %3253, %v3153_v23  }
  0x54   : > { %920 = vrot.lane.b32.xlu1 %v3341_v2, %s3270_s25  ;;  %918 = vrot.lane.b32.xlu0 %v3352_v4, %s3270_s25 }
  0x58   : > { %955 = vperm.xlu1 %3252, %v3155_v24   ;;  %930 = vperm.xlu0 %3253, %v3154_v25  }
  0x5c   : > { %1005 = vperm.xlu1 %3252, %v3157_v26   ;;  %980 = vperm.xlu0 %3253, %v3156_v27  }
  0x60   : > { %1028 = vrot.lane.b32.xlu1 %v3352_v4, %s3271_s18  ;;  %1026 = vrot.lane.b32.xlu0 %v3344_v3, %s3271_s18 }
  0x64   : > { %1040 = vperm.xlu1 %3252, %v3158_v28   ;;  %1030 = vrot.lane.b32.xlu0 %v3341_v2, %s3271_s18 }
  0x68   : > { %1090 = vperm.xlu1 %3252, %v3160_v29   ;;  %1065 = vperm.xlu0 %3253, %v3159_v30  }
  0x6c   : > { %1136 = vrot.lane.b32.xlu1 %v3344_v3, %s3272_s14  ;;  %1115 = vperm.xlu0 %3253, %v3161_v31  }
  0x70   : > { %1140 = vrot.lane.b32.xlu1 %v3341_v2, %s3272_s14  ;;  %1138 = vrot.lane.b32.xlu0 %v3352_v4, %s3272_s14 }
  0x74   : > { %1175 = vperm.xlu1 %3252, %v3163_v32   ;;  %1150 = vperm.xlu0 %3253, %v3162_v33   ;;  %v3184_v33 = vld [vmem:[%s4952_s3 + $0x3c] sm:$0xf] }
  0x78   : > { %1225 = vperm.xlu1 %3252, %v3165_v34   ;;  %1200 = vperm.xlu0 %3253, %v3164_v35  }
  0x7c   : > { %1248 = vrot.lane.b32.xlu1 %v3352_v4, %s3273_s29  ;;  %1246 = vrot.lane.b32.xlu0 %v3344_v3, %s3273_s29 }
  0x80   : > { %1260 = vperm.xlu1 %3252, %v3166_v36   ;;  %1250 = vrot.lane.b32.xlu0 %v3341_v2, %s3273_s29 }
  0x84   : > { %1310 = vperm.xlu1 %3252, %v3168_v37   ;;  %1285 = vperm.xlu0 %3253, %v3167_v38   ;;  %v3178_v37 = vld [vmem:[%s4952_s3 + $0x24] sm:$0xf] }
  0x86   : > { %v316_v46 = vpop.permute.xlu0 %315 }
  0x88   : > { %1358 = vperm.xlu1 %3252, %v309_v39   ;;  %1335 = vperm.xlu0 %3253, %v3169_v40  }
  0x8a   : > { %v318_v53 = vpop.permute.xlu0 %317 }
  0x8b   : > { %v3547_v60 = vsel %vm323_vm0, %v316_v46, %v318_v53 }
  0x8c   : > { %1431 = vperm.xlu1 %3252, %v3170_v41   ;;  %1366 = vperm.xlu0 %3253, %v310_v42   ;;  %v340_v1 = vrot.slane %v3547_v60, %v3533_v55  ;;  %v365_v7 = vrot.slane %v3547_v60, %v3543_v59  ;;  %v390_v27 = vrot.slane %v3547_v60, %v3564_v11 }
  0x8d   : > { %v415_v38 = vrot.slane %v3547_v60, %v3571_v18  ;;  %v3180_v60 = vld [vmem:[%s4952_s3 + $0x2c] sm:$0xf] }
  0x8e   : > { %v331_v44 = vpop.permute.xlu1 %330 }
  0x8f   : > { %v346_v19 = vmul.f32 %v340_v1, %v331_v44 }
  0x90   : > { %1481 = vperm.xlu1 %3252, %v3172_v45   ;;  %1406 = vperm.xlu0 %3253, %v1403_v47  }
  0x92   : > { %v320_v52 = vpop.permute.xlu1 %319 }
  0x93   : > { %v324_v56 = vsel %vm323_vm0, %v318_v53, %v320_v52  ;;  %v326_v57 = vsel %vm323_vm0, %v320_v52, %v316_v46 }
  0x94   : > { %1531 = vperm.xlu1 %3252, %v3174_v49   ;;  %1456 = vperm.xlu0 %3253, %v3171_v51   ;;  %v336_v62 = vrot.slane %v326_v57, %v3533_v55  ;;  %v344_v63 = vrot.slane %v324_v56, %v3533_v55  ;;  %v361_v5 = vrot.slane %v326_v57, %v3543_v59 }
  0x95   : > { %v369_v8 = vrot.slane %v324_v56, %v3543_v59  ;;  %v386_v21 = vrot.slane %v326_v57, %v3564_v11  ;;  %v394_v22 = vrot.slane %v324_v56, %v3564_v11  ;;  %v411_v30 = vrot.slane %v326_v57, %v3571_v18 }
  0x96   : > { %v345_v13 = vmul.f32 %v336_v62, %v331_v44  ;;  %v347_v14 = vmul.f32 %v344_v63, %v331_v44  ;;  %v419_v34 = vrot.slane %v324_v56, %v3571_v18 }
  0x97   : > { %v381_v61 = vpop.permute.xlu1 %380 }
  0x98   : > { %1615 = vperm.xlu1 %3252, %v3177_v54   ;;  %1506 = vperm.xlu0 %3253, %v3173_v58   ;;  %v395_v31 = vmul.f32 %v386_v21, %v381_v61  ;;  %v397_v32 = vmul.f32 %v394_v22, %v381_v61  ;;  %v396_v35 = vmul.f32 %v390_v27, %v381_v61  ;;  %v3186_v54 = vld [vmem:[%s4952_s3 + $0x44] sm:$0xf] }
  0x9b   : > { %v406_v9 = vpop.permute.xlu1 %405  ;;  %v356_v10 = vpop.permute.xlu0 %355 }
  0x9c   : > { %v370_v12 = vmul.f32 %v361_v5, %v356_v10  ;;  %1665 = vperm.xlu1 %3252, %v3179_v0   ;;  %v371_v15 = vmul.f32 %v365_v7, %v356_v10  ;;  %v372_v16 = vmul.f32 %v369_v8, %v356_v10  ;;  %1556 = vperm.xlu0 %3253, %v3175_v6  }
  0x9d   : > { %v420_v39 = vmul.f32 %v411_v30, %v406_v9  ;;  %v422_v44 = vmul.f32 %v419_v34, %v406_v9  ;;  %v421_v56 = vmul.f32 %v415_v38, %v406_v9 }
  0x9e   : > { %v373_v23 = vadd.f32 %v370_v12, %v345_v13  ;;  %v375_v24 = vadd.f32 %v372_v16, %v347_v14  ;;  %v374_v28 = vadd.f32 %v371_v15, %v346_v19  ;;  %v3188_v14 = vld [vmem:[%s4952_s3 + $0x4c] sm:$0xf]  ;;  %v3182_v16 = vld [vmem:[%s4952_s3 + $0x34] sm:$0xf] }
  0x9f   : > { %v429_v25 = vpop.permute.xlu1 %428  ;;  %v427_v26 = vpop.permute.xlu0 %426 }
  0xa0   : > { %v3582_v29 = vsel %vm432_vm1, %v427_v26, %v429_v25  ;;  %1715 = vperm.xlu1 %3252, %v3181_v17   ;;  %1590 = vperm.xlu0 %3253, %v3176_v20   ;;  %v398_v40 = vadd.f32 %v395_v31, %v373_v23  ;;  %v400_v41 = vadd.f32 %v397_v32, %v375_v24  ;;  %v3183_v32 = vld [vmem:[%s4952_s3 + $0x38] sm:$0xf] }
  0xa1   : > { %v450_v36 = vrot.slane %v3582_v29, %v3533_v55  ;;  %v399_v45 = vadd.f32 %v396_v35, %v374_v28  ;;  %v475_v57 = vrot.slane %v3582_v29, %v3543_v59  ;;  %v500_v22 = vrot.slane %v3582_v29, %v3564_v11  ;;  %v3191_v28 = vld [vmem:[%s4952_s3 + $0x58] sm:$0xf] }
  0xa2   : > { %v423_v0 = vadd.f32 %v420_v39, %v398_v40  ;;  %v425_v1 = vadd.f32 %v422_v44, %v400_v41  ;;  %v525_v24 = vrot.slane %v3582_v29, %v3571_v18 }
  0xa3   : > { %v441_v42 = vpop.permute.xlu1 %440  ;;  %v431_v43 = vpop.permute.xlu0 %430  ;;  %v424_v6 = vadd.f32 %v421_v56, %v399_v45 }
  0xa4   : > { %v433_v46 = vsel %vm432_vm1, %v429_v25, %v431_v43  ;;  %v435_v47 = vsel %vm432_vm1, %v431_v43, %v427_v26  ;;  %1799 = vperm.xlu1 %3252, %v3184_v33   ;;  %1640 = vperm.xlu0 %3253, %v3178_v37   ;;  %v456_v58 = vmul.f32 %v450_v36, %v441_v42  ;;  %v3634_v33 = vsub.s32 4, %v3523_v50 }
  0xa5   : > { %v446_v49 = vrot.slane %v435_v47, %v3533_v55  ;;  %v454_v51 = vrot.slane %v433_v46, %v3533_v55  ;;  %v471_v52 = vrot.slane %v435_v47, %v3543_v59  ;;  %v479_v53 = vrot.slane %v433_v46, %v3543_v59 }
  0xa6   : > { %v496_v7 = vrot.slane %v435_v47, %v3564_v11  ;;  %v459_v15 = vadd.f32 %v456_v58, %v424_v6  ;;  %v504_v17 = vrot.slane %v433_v46, %v3564_v11  ;;  %v521_v25 = vrot.slane %v435_v47, %v3571_v18  ;;  %v3187_v6 = vld [vmem:[%s4952_s3 + $0x48] sm:$0xf] }
  0xa7   : > { %v455_v61 = vmul.f32 %v446_v49, %v441_v42  ;;  %v457_v62 = vmul.f32 %v454_v51, %v441_v42  ;;  %v491_v63 = vpop.permute.xlu1 %490  ;;  %v466_v5 = vpop.permute.xlu0 %465  ;;  %v529_v30 = vrot.slane %v433_v46, %v3571_v18  ;;  %v3185_v49 = vld [vmem:[%s4952_s3 + $0x40] sm:$0xf]  ;;  %v770_v56 = vrot.slane %v3344_v3, %v3634_v33 }
  0xa8   : > { %v480_v8 = vmul.f32 %v471_v52, %v466_v5  ;;  %1849 = vperm.xlu1 %3252, %v3186_v54   ;;  %v481_v12 = vmul.f32 %v475_v57, %v466_v5  ;;  %v482_v13 = vmul.f32 %v479_v53, %v466_v5  ;;  %1690 = vperm.xlu0 %3253, %v3180_v60  }
  0xa9   : > { %v458_v9 = vadd.f32 %v455_v61, %v423_v0  ;;  %v460_v10 = vadd.f32 %v457_v62, %v425_v1  ;;  %v505_v26 = vmul.f32 %v496_v7, %v491_v63  ;;  %v506_v31 = vmul.f32 %v500_v22, %v491_v63 }
  0xaa   : > { %v484_v23 = vadd.f32 %v481_v12, %v459_v15  ;;  %v507_v29 = vmul.f32 %v504_v17, %v491_v63  ;;  %v766_v54 = vrot.slane %v3344_v3, %v3533_v55  ;;  %v774_v7 = vrot.slane %v3341_v2, %v3533_v55 }
  0xab   : > { %v483_v19 = vadd.f32 %v480_v8, %v458_v9  ;;  %v537_v20 = vpop.permute.xlu1 %536  ;;  %v516_v21 = vpop.permute.xlu0 %515  ;;  %v485_v27 = vadd.f32 %v482_v13, %v460_v10  ;;  %v3686_v22 = vrot.slane %v770_v56, %v3533_v55 }
  0xac   : > { %1899 = vperm.xlu1 %3252, %v3188_v14   ;;  %1740 = vperm.xlu0 %3253, %v3182_v16   ;;  %v530_v35 = vmul.f32 %v521_v25, %v516_v21  ;;  %v531_v36 = vmul.f32 %v525_v24, %v516_v21  ;;  %v509_v39 = vadd.f32 %v506_v31, %v484_v23  ;;  %v3677_v14 = vsub.s32 6, %v3523_v50 }
  0xad   : > { %v508_v34 = vadd.f32 %v505_v26, %v483_v19  ;;  %v510_v43 = vadd.f32 %v507_v29, %v485_v27  ;;  %v532_v44 = vmul.f32 %v529_v30, %v516_v21  ;;  %v3674_v13 = vrot.slane %v766_v54, %v3533_v55 }
  0xae   : > { %v534_v57 = vadd.f32 %v531_v36, %v509_v39  ;;  %v3689_v23 = vsub.s32 5, %v3523_v50  ;;  %v806_v39 = vrot.slane %v3344_v3, %v3543_v59 }
  0xaf   : > { %v541_v37 = vpop.permute.xlu1 %540  ;;  %v539_v38 = vpop.permute.xlu0 %538  ;;  %v533_v51 = vadd.f32 %v530_v35, %v508_v34  ;;  %v535_v62 = vadd.f32 %v532_v44, %v510_v43  ;;  %v3695_v34 = vrot.slane %v774_v7, %v3533_v55  ;;  %v846_v35 = vrot.slane %v3344_v3, %v3564_v11 }
  0xb0   : > { %v3638_v40 = vsel %vm542_vm2, %v541_v37, %v537_v20  ;;  %v3642_v41 = vsel %vm542_vm2, %v539_v38, %v541_v37  ;;  %v3646_v42 = vsel %vm542_vm2, %v537_v20, %v539_v38  ;;  %1983 = vperm.xlu1 %3252, %v3191_v28   ;;  %1774 = vperm.xlu0 %3253, %v3183_v32   ;;  %v3189_v28 = vld [vmem:[%s4952_s3 + $0x50] sm:$0xf] }
  0xb1   : > { %v556_v45 = vrot.slane %v3638_v40, %v3533_v55  ;;  %v560_v46 = vrot.slane %v3646_v42, %v3533_v55  ;;  %v564_v47 = vrot.slane %v3642_v41, %v3533_v55  ;;  %v581_v58 = vrot.slane %v3638_v40, %v3543_v59 }
  0xb2   : > { %v585_v60 = vrot.slane %v3646_v42, %v3543_v59  ;;  %v589_v63 = vrot.slane %v3642_v41, %v3543_v59  ;;  %v606_v15 = vrot.slane %v3638_v40, %v3564_v11  ;;  %v610_v16 = vrot.slane %v3646_v42, %v3564_v11 }
  0xb3   : > { %v576_v52 = vpop.permute.xlu1 %575  ;;  %v551_v53 = vpop.permute.xlu0 %550  ;;  %v614_v20 = vrot.slane %v3642_v41, %v3564_v11  ;;  %v850_v37 = vrot.slane %v3344_v3, %v3677_v14  ;;  %v854_v38 = vrot.slane %v3341_v2, %v3564_v11  ;;  %v631_v43 = vrot.slane %v3638_v40, %v3571_v18 }
  0xb4   : > { %v565_v61 = vmul.f32 %v556_v45, %v551_v53  ;;  %v566_v0 = vmul.f32 %v560_v46, %v551_v53  ;;  %v567_v1 = vmul.f32 %v564_v47, %v551_v53  ;;  %1824 = vperm.xlu0 %3253, %v3185_v49   ;;  %v590_v17 = vmul.f32 %v581_v58, %v576_v52 }
  0xb5   : > { %v591_v19 = vmul.f32 %v585_v60, %v576_v52  ;;  %v592_v21 = vmul.f32 %v589_v63, %v576_v52  ;;  %v635_v44 = vrot.slane %v3646_v42, %v3571_v18  ;;  %v810_v46 = vrot.slane %v3344_v3, %v3689_v23  ;;  %v3190_v52 = vld [vmem:[%s4952_s3 + $0x54] sm:$0xf] }
  0xb6   : > { %v568_v5 = vadd.f32 %v565_v61, %v533_v51  ;;  %v569_v8 = vadd.f32 %v566_v0, %v534_v57  ;;  %v570_v9 = vadd.f32 %v567_v1, %v535_v62  ;;  %v639_v47 = vrot.slane %v3642_v41, %v3571_v18 }
  0xb7   : > { %v626_v10 = vpop.permute.xlu1 %625  ;;  %v601_v12 = vpop.permute.xlu0 %600  ;;  %v814_v40 = vrot.slane %v3341_v2, %v3543_v59  ;;  %v889_v58 = vsub.s32 7, %v3523_v50 }
  0xb8   : > { %1874 = vperm.xlu0 %3253, %v3187_v6   ;;  %v593_v24 = vadd.f32 %v590_v17, %v568_v5  ;;  %v594_v25 = vadd.f32 %v591_v19, %v569_v8  ;;  %v615_v26 = vmul.f32 %v606_v15, %v601_v12  ;;  %v616_v27 = vmul.f32 %v610_v16, %v601_v12 }
  0xb9   : > { %v595_v30 = vadd.f32 %v592_v21, %v570_v9  ;;  %v617_v31 = vmul.f32 %v614_v20, %v601_v12  ;;  %v640_v42 = vmul.f32 %v631_v43, %v626_v10  ;;  %v641_v53 = vmul.f32 %v635_v44, %v626_v10 }
  0xba   : > { %v618_v49 = vadd.f32 %v615_v26, %v593_v24  ;;  %v619_v51 = vadd.f32 %v616_v27, %v594_v25  ;;  %v642_v60 = vmul.f32 %v639_v47, %v626_v10  ;;  %v821_v24 = vrot.slane %v806_v39, %v3543_v59 }
  0xbb   : > { %v649_v32 = vpop.permute.xlu1 %648  ;;  %v647_v29 = vpop.permute.xlu0 %646  ;;  %v620_v54 = vadd.f32 %v617_v31, %v595_v30 }
  0xbc   : > { %v3701_v36 = vsel %vm652_vm3, %v647_v29, %v649_v32  ;;  %1924 = vperm.xlu0 %3253, %v3189_v28   ;;  %v643_v6 = vadd.f32 %v640_v42, %v618_v49  ;;  %v644_v7 = vadd.f32 %v641_v53, %v619_v51  ;;  %v825_v42 = vrot.slane %v810_v46, %v3543_v59 }
  0xbd   : > { %v670_v45 = vrot.slane %v3701_v36, %v3533_v55  ;;  %v695_v50 = vrot.slane %v3701_v36, %v3543_v59  ;;  %v645_v9 = vadd.f32 %v642_v60, %v620_v54  ;;  %v720_v19 = vrot.slane %v3701_v36, %v3564_v11 }
  0xbe   : > { %v745_v30 = vrot.slane %v3701_v36, %v3571_v18  ;;  %v829_v53 = vrot.slane %v814_v40, %v3543_v59 }
  0xbf   : > { %v661_v56 = vpop.permute.xlu1 %660  ;;  %v651_v57 = vpop.permute.xlu0 %650 }
  0xc0   : > { %v676_v61 = vmul.f32 %v670_v45, %v661_v56  ;;  %v653_v41 = vsel %vm652_vm3, %v649_v32, %v651_v57  ;;  %v655_v62 = vsel %vm652_vm3, %v651_v57, %v647_v29  ;;  %1958 = vperm.xlu0 %3253, %v3190_v52  }
  0xc1   : > { %v666_v63 = vrot.slane %v655_v62, %v3533_v55  ;;  %v674_v0 = vrot.slane %v653_v41, %v3533_v55  ;;  %v691_v1 = vrot.slane %v655_v62, %v3543_v59  ;;  %v699_v5 = vrot.slane %v653_v41, %v3543_v59 }
  0xc2   : > { %v716_v8 = vrot.slane %v655_v62, %v3564_v11  ;;  %v724_v15 = vrot.slane %v653_v41, %v3564_v11  ;;  %v679_v20 = vadd.f32 %v676_v61, %v644_v7  ;;  %v741_v31 = vrot.slane %v655_v62, %v3571_v18 }
  0xc3   : > { %v675_v10 = vmul.f32 %v666_v63, %v661_v56  ;;  %v677_v12 = vmul.f32 %v674_v0, %v661_v56  ;;  %v711_v16 = vpop.permute.xlu1 %710  ;;  %v686_v17 = vpop.permute.xlu0 %685  ;;  %v749_v52 = vrot.slane %v653_v41, %v3571_v18  ;;  %v886_v61 = vrot.slane %v3344_v3, %v3571_v18 }
  0xc4   : > { %v700_v21 = vmul.f32 %v691_v1, %v686_v17  ;;  %v701_v27 = vmul.f32 %v695_v50, %v686_v17  ;;  %v702_v28 = vmul.f32 %v699_v5, %v686_v17  ;;  %v725_v32 = vmul.f32 %v716_v8, %v711_v16 }
  0xc5   : > { %v678_v25 = vadd.f32 %v675_v10, %v643_v6  ;;  %v680_v26 = vadd.f32 %v677_v12, %v645_v9  ;;  %v726_v29 = vmul.f32 %v720_v19, %v711_v16  ;;  %v727_v43 = vmul.f32 %v724_v15, %v711_v16 }
  0xc6   : > { %v704_v45 = vadd.f32 %v701_v27, %v679_v20  ;;  %v890_v62 = vrot.slane %v3344_v3, %v889_v58  ;;  %v894_v63 = vrot.slane %v3341_v2, %v3571_v18  ;;  %v861_v7 = vrot.slane %v846_v35, %v3564_v11 }
  0xc7   : > { %v703_v44 = vadd.f32 %v700_v21, %v678_v25  ;;  %v705_v47 = vadd.f32 %v702_v28, %v680_v26  ;;  %v761_v49 = vpop.permute.xlu1 %760  ;;  %v736_v51 = vpop.permute.xlu0 %735  ;;  %v865_v58 = vrot.slane %v850_v37, %v3564_v11  ;;  %v901_v15 = vrot.slane %v886_v61, %v3571_v18 }
  0xc8   : > { %v750_v39 = vmul.f32 %v741_v31, %v736_v51  ;;  %v729_v56 = vadd.f32 %v726_v29, %v704_v45  ;;  %v751_v57 = vmul.f32 %v745_v30, %v736_v51  ;;  %v752_v60 = vmul.f32 %v749_v52, %v736_v51 }
  0xc9   : > { %v728_v54 = vadd.f32 %v725_v32, %v703_v44  ;;  %v730_v36 = vadd.f32 %v727_v43, %v705_v47  ;;  %v790_v41 = vmul.f32 %v3674_v13, %v761_v49  ;;  %v791_v0 = vmul.f32 %v3686_v22, %v761_v49 }
  0xca   : > { %v754_v1 = vadd.f32 %v751_v57, %v729_v56  ;;  %v792_v6 = vmul.f32 %v3695_v34, %v761_v49  ;;  %v869_v34 = vrot.slane %v854_v38, %v3564_v11  ;;  %v905_v19 = vrot.slane %v890_v62, %v3571_v18 }
  0xcb   : > { %v753_v46 = vadd.f32 %v750_v39, %v728_v54  ;;  %v841_v40 = vpop.permute.xlu1 %840  ;;  %v801_v5 = vpop.permute.xlu0 %800  ;;  %v755_v50 = vadd.f32 %v752_v60, %v730_v36  ;;  %v909_v3 = vrot.slane %v894_v63, %v3571_v18 }
  0xcc   : > { %v794_v8 = vadd.f32 %v791_v0, %v754_v1  ;;  %v830_v22 = vmul.f32 %v821_v24, %v801_v5  ;;  %v831_v9 = vmul.f32 %v825_v42, %v801_v5  ;;  %v832_v12 = vmul.f32 %v829_v53, %v801_v5 }
  0xcd   : > { %v793_v13 = vadd.f32 %v790_v41, %v753_v46  ;;  %v795_v10 = vadd.f32 %v792_v6, %v755_v50  ;;  %v870_v21 = vmul.f32 %v861_v7, %v841_v40  ;;  %v871_v24 = vmul.f32 %v865_v58, %v841_v40 }
  0xce   : > { %v834_v35 = vadd.f32 %v831_v9, %v794_v8  ;;  %v872_v25 = vmul.f32 %v869_v34, %v841_v40 }
  0xcf   : > { %v833_v16 = vadd.f32 %v830_v22, %v793_v13  ;;  %v917_v17 = vpop.permute.xlu1 %916  ;;  %v881_v37 = vpop.permute.xlu0 %880  ;;  %v835_v20 = vadd.f32 %v832_v12, %v795_v10 }
  0xd0   : > { %v910_v2 = vmul.f32 %v901_v15, %v881_v37  ;;  %v874_v26 = vadd.f32 %v871_v24, %v834_v35  ;;  %v911_v27 = vmul.f32 %v905_v19, %v881_v37  ;;  %v912_v28 = vmul.f32 %v909_v3, %v881_v37 }
  0xd1   : > { %v873_v38 = vadd.f32 %v870_v21, %v833_v16  ;;  %v875_v32 = vadd.f32 %v872_v25, %v835_v20 }
  0xd2   : > { %v914_v42 = vadd.f32 %v911_v27, %v874_v26 }
  0xd3   : > { %v921_v30 = vpop.permute.xlu1 %920  ;;  %v919_v31 = vpop.permute.xlu0 %918  ;;  %v913_v51 = vadd.f32 %v910_v2, %v873_v38  ;;  %v915_v53 = vadd.f32 %v912_v28, %v875_v32 }
  0xd4   : > { %v925_v29 = vsel %vm922_vm4, %v921_v30, %v917_v17  ;;  %v923_v43 = vsel %vm922_vm4, %v919_v31, %v921_v30  ;;  %v924_v44 = vsel %vm922_vm4, %v917_v17, %v919_v31 }
  0xd5   : > { %v944_v45 = vrot.slane %v925_v29, %v3533_v55  ;;  %v936_v47 = vrot.slane %v924_v44, %v3533_v55  ;;  %v940_v49 = vrot.slane %v923_v43, %v3533_v55  ;;  %v961_v54 = vrot.slane %v924_v44, %v3543_v59 }
  0xd6   : > { %v969_v36 = vrot.slane %v925_v29, %v3543_v59  ;;  %v965_v57 = vrot.slane %v923_v43, %v3543_v59  ;;  %v986_v1 = vrot.slane %v924_v44, %v3564_v11  ;;  %v994_v5 = vrot.slane %v925_v29, %v3564_v11 }
  0xd7   : > { %v956_v52 = vpop.permute.xlu1 %955  ;;  %v931_v39 = vpop.permute.xlu0 %930  ;;  %v990_v6 = vrot.slane %v923_v43, %v3564_v11  ;;  %v1011_v16 = vrot.slane %v924_v44, %v3571_v18  ;;  %v1015_v35 = vrot.slane %v923_v43, %v3571_v18  ;;  %v1019_v19 = vrot.slane %v925_v29, %v3571_v18 }
  0xd8   : > { %v945_v56 = vmul.f32 %v936_v47, %v931_v39  ;;  %v946_v60 = vmul.f32 %v940_v49, %v931_v39  ;;  %v947_v61 = vmul.f32 %v944_v45, %v931_v39  ;;  %v970_v40 = vmul.f32 %v961_v54, %v956_v52 }
  0xd9   : > { %v971_v50 = vmul.f32 %v965_v57, %v956_v52  ;;  %v972_v7 = vmul.f32 %v969_v36, %v956_v52 }
  0xda   : > { %v948_v62 = vadd.f32 %v945_v56, %v913_v51  ;;  %v949_v63 = vadd.f32 %v946_v60, %v914_v42  ;;  %v950_v41 = vadd.f32 %v947_v61, %v915_v53 }
  0xdb   : > { %v1006_v0 = vpop.permute.xlu1 %1005  ;;  %v981_v46 = vpop.permute.xlu0 %980 }
  0xdc   : > { %v973_v58 = vadd.f32 %v970_v40, %v948_v62  ;;  %v995_v13 = vmul.f32 %v986_v1, %v981_v46  ;;  %v974_v8 = vadd.f32 %v971_v50, %v949_v63  ;;  %v975_v22 = vadd.f32 %v972_v7, %v950_v41 }
  0xdd   : > { %v996_v9 = vmul.f32 %v990_v6, %v981_v46  ;;  %v997_v34 = vmul.f32 %v994_v5, %v981_v46  ;;  %v1020_v37 = vmul.f32 %v1011_v16, %v1006_v0  ;;  %v1021_v20 = vmul.f32 %v1015_v35, %v1006_v0 }
  0xde   : > { %v998_v3 = vadd.f32 %v995_v13, %v973_v58  ;;  %v1022_v38 = vmul.f32 %v1019_v19, %v1006_v0 }
  0xdf   : > { %v1029_v10 = vpop.permute.xlu1 %1028  ;;  %v1027_v12 = vpop.permute.xlu0 %1026  ;;  %v999_v21 = vadd.f32 %v996_v9, %v974_v8  ;;  %v1000_v24 = vadd.f32 %v997_v34, %v975_v22 }
  0xe0   : > { %v1034_v15 = vsel %vm1032_vm5, %v1027_v12, %v1029_v10  ;;  %v1023_v44 = vadd.f32 %v1020_v37, %v998_v3 }
  0xe1   : > { %v1046_v17 = vrot.slane %v1034_v15, %v3533_v55  ;;  %v1071_v43 = vrot.slane %v1034_v15, %v3543_v59  ;;  %v1024_v45 = vadd.f32 %v1021_v20, %v999_v21  ;;  %v1025_v47 = vadd.f32 %v1022_v38, %v1000_v24 }
  0xe2   : > { %v1096_v61 = vrot.slane %v1034_v15, %v3564_v11  ;;  %v1121_v1 = vrot.slane %v1034_v15, %v3571_v18 }
  0xe3   : > { %v1041_v25 = vpop.permute.xlu1 %1040  ;;  %v1031_v2 = vpop.permute.xlu0 %1030 }
  0xe4   : > { %v1055_v26 = vmul.f32 %v1046_v17, %v1041_v25  ;;  %v1033_v27 = vsel %vm1032_vm5, %v1029_v10, %v1031_v2  ;;  %v1035_v28 = vsel %vm1032_vm5, %v1031_v2, %v1027_v12 }
  0xe5   : > { %v1050_v30 = vrot.slane %v1033_v27, %v3533_v55  ;;  %v1054_v31 = vrot.slane %v1035_v28, %v3533_v55  ;;  %v1075_v32 = vrot.slane %v1033_v27, %v3543_v59  ;;  %v1079_v29 = vrot.slane %v1035_v28, %v3543_v59 }
  0xe6   : > { %v1058_v42 = vadd.f32 %v1055_v26, %v1023_v44  ;;  %v1100_v60 = vrot.slane %v1033_v27, %v3564_v11  ;;  %v1104_v62 = vrot.slane %v1035_v28, %v3564_v11  ;;  %v1125_v40 = vrot.slane %v1033_v27, %v3571_v18 }
  0xe7   : > { %v1056_v49 = vmul.f32 %v1050_v30, %v1041_v25  ;;  %v1057_v51 = vmul.f32 %v1054_v31, %v1041_v25  ;;  %v1091_v52 = vpop.permute.xlu1 %1090  ;;  %v1066_v39 = vpop.permute.xlu0 %1065  ;;  %v1129_v50 = vrot.slane %v1035_v28, %v3571_v18 }
  0xe8   : > { %v1080_v53 = vmul.f32 %v1071_v43, %v1066_v39  ;;  %v1081_v36 = vmul.f32 %v1075_v32, %v1066_v39  ;;  %v1082_v57 = vmul.f32 %v1079_v29, %v1066_v39  ;;  %v1105_v5 = vmul.f32 %v1096_v61, %v1091_v52 }
  0xe9   : > { %v1059_v54 = vadd.f32 %v1056_v49, %v1024_v45  ;;  %v1060_v56 = vadd.f32 %v1057_v51, %v1025_v47  ;;  %v1106_v7 = vmul.f32 %v1100_v60, %v1091_v52  ;;  %v1107_v58 = vmul.f32 %v1104_v62, %v1091_v52 }
  0xea   : > { %v1083_v63 = vadd.f32 %v1080_v53, %v1058_v42 }
  0xeb   : > { %v1137_v41 = vpop.permute.xlu1 %1136  ;;  %v1116_v0 = vpop.permute.xlu0 %1115  ;;  %v1084_v46 = vadd.f32 %v1081_v36, %v1059_v54  ;;  %v1085_v6 = vadd.f32 %v1082_v57, %v1060_v56 }
  0xec   : > { %v1108_v13 = vadd.f32 %v1105_v5, %v1083_v63  ;;  %v1130_v8 = vmul.f32 %v1121_v1, %v1116_v0  ;;  %v1131_v22 = vmul.f32 %v1125_v40, %v1116_v0  ;;  %v1132_v17 = vmul.f32 %v1129_v50, %v1116_v0 }
  0xed   : > { %v1109_v10 = vadd.f32 %v1106_v7, %v1084_v46  ;;  %v1110_v35 = vadd.f32 %v1107_v58, %v1085_v6 }
  0xee   : > { %v1133_v25 = vadd.f32 %v1130_v8, %v1108_v13 }
  0xef   : > { %v1141_v9 = vpop.permute.xlu1 %1140  ;;  %v1139_v34 = vpop.permute.xlu0 %1138  ;;  %v1134_v2 = vadd.f32 %v1131_v22, %v1109_v10  ;;  %v1135_v27 = vadd.f32 %v1132_v17, %v1110_v35 }
  0xf0   : > { %v1145_v12 = vsel %vm1142_vm6, %v1141_v9, %v1137_v41  ;;  %v1143_v15 = vsel %vm1142_vm6, %v1139_v34, %v1141_v9  ;;  %v1144_v16 = vsel %vm1142_vm6, %v1137_v41, %v1139_v34 }
  0xf1   : > { %v1164_v19 = vrot.slane %v1145_v12, %v3533_v55  ;;  %v1156_v3 = vrot.slane %v1144_v16, %v3533_v55  ;;  %v1160_v37 = vrot.slane %v1143_v15, %v3533_v55  ;;  %v1181_v20 = vrot.slane %v1144_v16, %v3543_v59 }
  0xf2   : > { %v1185_v38 = vrot.slane %v1143_v15, %v3543_v59  ;;  %v1189_v28 = vrot.slane %v1145_v12, %v3543_v59  ;;  %v1206_v29 = vrot.slane %v1144_v16, %v3564_v11  ;;  %v1210_v51 = vrot.slane %v1143_v15, %v3564_v11 }
  0xf3   : > { %v1176_v21 = vpop.permute.xlu1 %1175  ;;  %v1151_v24 = vpop.permute.xlu0 %1150  ;;  %v1214_v39 = vrot.slane %v1145_v12, %v3564_v11  ;;  %v1231_v41 = vrot.slane %v1144_v16, %v3571_v18  ;;  %v1235_v1 = vrot.slane %v1143_v15, %v3571_v18  ;;  %v1239_v5 = vrot.slane %v1145_v12, %v3571_v18 }
  0xf4   : > { %v1165_v26 = vmul.f32 %v1156_v3, %v1151_v24  ;;  %v1166_v30 = vmul.f32 %v1160_v37, %v1151_v24  ;;  %v1167_v31 = vmul.f32 %v1164_v19, %v1151_v24  ;;  %v1190_v43 = vmul.f32 %v1181_v20, %v1176_v21 }
  0xf5   : > { %v1191_v52 = vmul.f32 %v1185_v38, %v1176_v21  ;;  %v1192_v42 = vmul.f32 %v1189_v28, %v1176_v21 }
  0xf6   : > { %v1168_v32 = vadd.f32 %v1165_v26, %v1133_v25  ;;  %v1169_v44 = vadd.f32 %v1166_v30, %v1134_v2  ;;  %v1170_v45 = vadd.f32 %v1167_v31, %v1135_v27 }
  0xf7   : > { %v1226_v47 = vpop.permute.xlu1 %1225  ;;  %v1201_v49 = vpop.permute.xlu0 %1200 }
  0xf8   : > { %v1193_v53 = vadd.f32 %v1190_v43, %v1168_v32  ;;  %v1215_v54 = vmul.f32 %v1206_v29, %v1201_v49  ;;  %v1194_v56 = vadd.f32 %v1191_v52, %v1169_v44  ;;  %v1216_v36 = vmul.f32 %v1210_v51, %v1201_v49 }
  0xf9   : > { %v1195_v57 = vadd.f32 %v1192_v42, %v1170_v45  ;;  %v1217_v60 = vmul.f32 %v1214_v39, %v1201_v49  ;;  %v1240_v6 = vmul.f32 %v1231_v41, %v1226_v47  ;;  %v1241_v13 = vmul.f32 %v1235_v1, %v1226_v47 }
  0xfa   : > { %v1218_v0 = vadd.f32 %v1215_v54, %v1193_v53  ;;  %v1219_v40 = vadd.f32 %v1216_v36, %v1194_v56  ;;  %v1242_v34 = vmul.f32 %v1239_v5, %v1226_v47 }
  0xfb   : > { %v1249_v61 = vpop.permute.xlu1 %1248  ;;  %v1247_v62 = vpop.permute.xlu0 %1246  ;;  %v1220_v50 = vadd.f32 %v1217_v60, %v1195_v57 }
  0xfc   : > { %v1254_v63 = vsel %vm1252_vm7, %v1247_v62, %v1249_v61  ;;  %v1243_v10 = vadd.f32 %v1240_v6, %v1218_v0  ;;  %v1244_v35 = vadd.f32 %v1241_v13, %v1219_v40 }
  0xfd   : > { %v1266_v46 = vrot.slane %v1254_v63, %v3533_v55  ;;  %v1291_v12 = vrot.slane %v1254_v63, %v3543_v59  ;;  %v1245_v24 = vadd.f32 %v1242_v34, %v1220_v50  ;;  %v1316_v38 = vrot.slane %v1254_v63, %v3564_v11  ;;  %v3193_v34 = vld [vmem:[%s4952_s3 + $0x60] sm:$0xf] }
  0xfe   : > { %v1341_v44 = vrot.slane %v1254_v63, %v3571_v18  ;;  %v308_v63 = vld [vmem:[%s4950_s1] sm:$0x7] }
  0xff   : > { %v1261_v7 = vpop.permute.xlu1 %1260  ;;  %v1251_v58 = vpop.permute.xlu0 %1250  ;;  %v3849_v5 = vrot.slane %v308_v63, %v3533_v55  ;;  %v3852_v50 = vrot.slane %v308_v63, %v3543_v59 }
 0x100   : > { %v1275_v8 = vmul.f32 %v1266_v46, %v1261_v7  ;;  %v1253_v22 = vsel %vm1252_vm7, %v1249_v61, %v1251_v58  ;;  %v1255_v9 = vsel %vm1252_vm7, %v1251_v58, %v1247_v62 }
 0x101   : > { %v1270_v16 = vrot.slane %v1253_v22, %v3533_v55  ;;  %v1274_v15 = vrot.slane %v1255_v9, %v3533_v55  ;;  %v1295_v17 = vrot.slane %v1253_v22, %v3543_v59  ;;  %v1299_v19 = vrot.slane %v1255_v9, %v3543_v59  ;;  %4964 = vst [vmem:[#allocation3_spill] sm:$0xff] %v3849_v5 }
 0x102   : > { %v1320_v21 = vrot.slane %v1253_v22, %v3564_v11  ;;  %v1278_v2 = vadd.f32 %v1275_v8, %v1243_v10  ;;  %v1324_v26 = vrot.slane %v1255_v9, %v3564_v11  ;;  %v1345_v45 = vrot.slane %v1253_v22, %v3571_v18  ;;  %4965 = vst [vmem:[#allocation4_spill] sm:$0xff] %v3852_v50 }
 0x103   : > { %v1276_v3 = vmul.f32 %v1270_v16, %v1261_v7  ;;  %v1277_v37 = vmul.f32 %v1274_v15, %v1261_v7  ;;  %v1311_v20 = vpop.permute.xlu1 %1310  ;;  %v1286_v25 = vpop.permute.xlu0 %1285  ;;  %v1349_v52 = vrot.slane %v1255_v9, %v3571_v18  ;;  %v3192_v16 = vld [vmem:[%s4952_s3 + $0x5c] sm:$0xf]  ;;  %v3195_v15 = vld [vmem:[%s4952_s3 + $0x68] sm:$0xf] }
 0x104   : > { %v1300_v27 = vmul.f32 %v1291_v12, %v1286_v25  ;;  %v1301_v31 = vmul.f32 %v1295_v17, %v1286_v25  ;;  %v1302_v32 = vmul.f32 %v1299_v19, %v1286_v25  ;;  %v1325_v29 = vmul.f32 %v1316_v38, %v1311_v20  ;;  %v3194_v17 = vld [vmem:[%s4952_s3 + $0x64] sm:$0xf] }
 0x105   : > { %v1279_v28 = vadd.f32 %v1276_v3, %v1244_v35  ;;  %v1280_v30 = vadd.f32 %v1277_v37, %v1245_v24  ;;  %v1326_v47 = vmul.f32 %v1320_v21, %v1311_v20  ;;  %v1327_v42 = vmul.f32 %v1324_v26, %v1311_v20  ;;  %v3196_v3 = vld [vmem:[%s4952_s3 + $0x6c] sm:$0xf]  ;;  %v3197_v37 = vld [vmem:[%s4952_s3 + $0x70] sm:$0xf]  ;;  %v3198_v20 = vld [vmem:[%s4952_s3 + $0x74] sm:$0xf] }
 0x106   : > { %v1303_v43 = vadd.f32 %v1300_v27, %v1278_v2  ;;  %v3874_v35 = vrot.slane %v308_v63, %v3564_v11  ;;  %v3199_v21 = vld [vmem:[%s4952_s3 + $0x78] sm:$0xf]  ;;  %v3200_v24 = vld [vmem:[%s4952_s3 + $0x7c] sm:$0xf]  ;;  %v3202_v25 = vld [vmem:[%s4952_s3 + $0x84] sm:$0xf] }
 0x107   : > { %v1304_v49 = vadd.f32 %v1301_v31, %v1279_v28  ;;  %v1305_v51 = vadd.f32 %v1302_v32, %v1280_v30  ;;  %v1336_v39 = vpop.permute.xlu0 %1335  ;;  %v1359_v62 = vpop.permute.xlu1 %1358  ;;  %v3201_v26 = vld [vmem:[%s4952_s3 + $0x80] sm:$0xf]  ;;  %v3205_v27 = vld [vmem:[%s4952_s3 + $0x90] sm:$0xf]  ;;  %v3203_v28 = vld [vmem:[%s4952_s3 + $0x88] sm:$0xf] }
 0x108   : > { %v1328_v53 = vadd.f32 %v1325_v29, %v1303_v43  ;;  %v1350_v54 = vmul.f32 %v1341_v44, %v1336_v39  ;;  %v1351_v56 = vmul.f32 %v1345_v45, %v1336_v39  ;;  %v1352_v60 = vmul.f32 %v1349_v52, %v1336_v39  ;;  %4966 = vst [vmem:[#allocation5_spill] sm:$0xff] %v3874_v35  ;;  %v3207_v30 = vld [vmem:[%s4952_s3 + $0x98] sm:$0xf]  ;;  %v3209_v32 = vld [vmem:[%s4952_s3 + $0xa0] sm:$0xf] }
 0x109   : > { %v1329_v36 = vadd.f32 %v1326_v47, %v1304_v49  ;;  %v1330_v57 = vadd.f32 %v1327_v42, %v1305_v51  ;;  %v3204_v44 = vld [vmem:[%s4952_s3 + $0x8c] sm:$0xf]  ;;  %v3211_v45 = vld [vmem:[%s4952_s3 + $0xa8] sm:$0xf]  ;;  %v3206_v47 = vld [vmem:[%s4952_s3 + $0x94] sm:$0xf] }
 0x10a   : > { %v1353_v61 = vadd.f32 %v1350_v54, %v1328_v53  ;;  %v3208_v52 = vld [vmem:[%s4952_s3 + $0x9c] sm:$0xf]  ;;  %v3210_v53 = vld [vmem:[%s4952_s3 + $0xa4] sm:$0xf]  ;;  %v3214_v54 = vld [vmem:[%s4952_s3 + $0xb4] sm:$0xf] }
 0x10b   : > { %v1354_v41 = vadd.f32 %v1351_v56, %v1329_v36  ;;  %v1367_v1 = vpop.permute.xlu0 %1366  ;;  %v1355_v40 = vadd.f32 %v1352_v60, %v1330_v57  ;;  %v3945_v29 = vpop.permute.xlu1 %1431  ;;  %v3212_v56 = vld [vmem:[%s4952_s3 + $0xac] sm:$0xf]  ;;  %v3216_v57 = vld [vmem:[%s4952_s3 + $0xbc] sm:$0xf]  ;;  %v3213_v63 = vld [vmem:[%s4952_s3 + $0xb0] sm:$0xf] }
 0x10c   : > { %v1361_v0 = vmul.f32 %v1359_v62, %v1353_v61  ;;  %v3218_v61 = vld [vmem:[%s4952_s3 + $0xc4] sm:$0xf] }
 0x10d   : > { %v1362_v46 = vmul.f32 %v1359_v62, %v1354_v41  ;;  %v1363_v8 = vmul.f32 %v1359_v62, %v1355_v40  ;;  %v3217_v40 = vld [vmem:[%s4952_s3 + $0xc0] sm:$0xf] }
 0x10e   : > { %v1369_v6 = vadd.f32 %v1367_v1, %v1361_v0  ;;  %v3215_v0 = vld [vmem:[%s4952_s3 + $0xb8] sm:$0xf] }
 0x10f   : > { %v1370_v7 = vadd.f32 %v1367_v1, %v1362_v46  ;;  %v1371_v10 = vadd.f32 %v1367_v1, %v1363_v8  ;;  %v3916_v2 = vpop.permute.xlu0 %1406  ;;  %v3960_v49 = vpop.permute.xlu1 %1481  ;;  %v3223_v8 = vld [vmem:[%s4952_s3 + $0xd8] sm:$0xf] }
 0x110   : > { %v1372_v58 = vmax.f32 %v1369_v6, 0.0  ;;  %v3221_v6 = vld [vmem:[%s4952_s3 + $0xd0] sm:$0xf] }
 0x111   : > { %v1373_v13 = vmax.f32 %v1370_v7, 0.0  ;;  %v1374_v12 = vmax.f32 %v1371_v10, 0.0  ;;  %v3225_v10 = vld [vmem:[%s4952_s3 + $0xe0] sm:$0xf] }
 0x112   : > { %v3855_v22 = vmul.f32 %v3849_v5, %v1372_v58 }
 0x113   : > { %v3858_v9 = vmul.f32 %v3852_v50, %v1373_v13  ;;  %v3880_v19 = vmul.f32 %v3874_v35, %v1374_v12  ;;  %v3924_v38 = vpop.permute.xlu0 %1456  ;;  %v3969_v39 = vpop.permute.xlu1 %1531  ;;  %v3219_v13 = vld [vmem:[%s4952_s3 + $0xc8] sm:$0xf] }
 0x114   : > { %1394 = vrot.lane.b32.xlu1 %v3855_v22, %s3266_s13 }
 0x115   : > { %1396 = vrot.lane.b32.xlu0 %v3858_v9, %s3266_s13 }
 0x117   : > { %v3940_v31 = vpop.permute.xlu0 %1506  ;;  %v3984_v36 = vpop.permute.xlu1 %1615 }
 0x118   : > { %2033 = vperm.xlu1 %3252, %v3193_v34  }
 0x119   : > { %2008 = vperm.xlu0 %3253, %v3192_v16  }
 0x11b   : > { %v3949_v43 = vpop.permute.xlu0 %1556  ;;  %v3994_v62 = vpop.permute.xlu1 %1665 }
 0x11c   : > { %2083 = vperm.xlu1 %3252, %v3195_v15   ;;  %v3220_v15 = vld [vmem:[%s4952_s3 + $0xcc] sm:$0xf] }
 0x11d   : > { %2058 = vperm.xlu0 %3253, %v3194_v17  }
 0x11f   : > { %v3962_v51 = vpop.permute.xlu0 %1590  ;;  %v4008_v46 = vpop.permute.xlu1 %1715 }
 0x120   : > { %1398 = vrot.lane.b32.xlu1 %v3880_v19, %s3266_s13 }
 0x121   : > { %1579 = vrot.lane.b32.xlu0 %v3858_v9, %s3267_s20 }
 0x123   : > { %v3971_v42 = vpop.permute.xlu0 %1640  ;;  %v4020_v7 = vpop.permute.xlu1 %1799 }
 0x124   : > { %1577 = vrot.lane.b32.xlu1 %v3855_v22, %s3267_s20 }
 0x125   : > { %2108 = vperm.xlu0 %3253, %v3196_v3   ;;  %v3222_v3 = vld [vmem:[%s4952_s3 + $0xd4] sm:$0xf] }
 0x127   : > { %v3989_v60 = vpop.permute.xlu0 %1690  ;;  %v4030_v34 = vpop.permute.xlu1 %1849 }
 0x128   : > { %2133 = vperm.xlu1 %3252, %v3197_v37   ;;  %v3224_v37 = vld [vmem:[%s4952_s3 + $0xdc] sm:$0xf] }
 0x129   : > { %2158 = vperm.xlu0 %3253, %v3198_v20  }
 0x12b   : > { %v3998_v41 = vpop.permute.xlu0 %1740  ;;  %v4042_v12 = vpop.permute.xlu1 %1899 }
 0x12c   : > { %1581 = vrot.lane.b32.xlu1 %v3880_v19, %s3267_s20 }
 0x12d   : > { %1763 = vrot.lane.b32.xlu0 %v3858_v9, %s3268_s10 }
 0x12f   : > { %v4010_v1 = vpop.permute.xlu0 %1774  ;;  %v4056_v20 = vpop.permute.xlu1 %1983 }
 0x130   : > { %2183 = vperm.xlu1 %3252, %v3199_v21   ;;  %v3228_v21 = vld [vmem:[%s4952_s3 + $0xec] sm:$0xf] }
 0x131   : > { %1947 = vrot.lane.b32.xlu0 %v3858_v9, %s3269_s22 }
 0x133   : > { %v4022_v58 = vpop.permute.xlu0 %1824 }
 0x134   : > { %1761 = vrot.lane.b32.xlu1 %v3855_v22, %s3268_s10 }
 0x135   : > { %2208 = vperm.xlu0 %3253, %v3200_v24  }
 0x137   : > { %v4035_v16 = vpop.permute.xlu0 %1874 }
 0x138   : > { %1765 = vrot.lane.b32.xlu1 %v3880_v19, %s3268_s10 }
 0x139   : > { %2258 = vperm.xlu0 %3253, %v3202_v25   ;;  %v3226_v25 = vld [vmem:[%s4952_s3 + $0xe4] sm:$0xf] }
 0x13b   : > { %v4044_v17 = vpop.permute.xlu0 %1924 }
 0x13c   : > { %1945 = vrot.lane.b32.xlu1 %v3855_v22, %s3269_s22 }
 0x13d   : > { %2304 = vrot.lane.b32.xlu0 %v3855_v22, %s3270_s25 }
 0x13f   : > { %v4061_v24 = vpop.permute.xlu0 %1958 }
 0x140   : > { %1949 = vrot.lane.b32.xlu1 %v3880_v19, %s3269_s22 }
 0x141   : > { %2308 = vrot.lane.b32.xlu0 %v3880_v19, %s3270_s25 }
 0x144   : > { %2233 = vperm.xlu1 %3252, %v3201_v26  }
 0x145   : > { %2342 = vperm.xlu0 %3253, %v3205_v27   ;;  %v3230_v27 = vld [vmem:[%s4952_s3 + $0xf4] sm:$0xf] }
 0x148   : > { %2283 = vperm.xlu1 %3252, %v3203_v28  }
 0x149   : > { %2392 = vperm.xlu0 %3253, %v3207_v30  }
 0x14c   : > { %2306 = vrot.lane.b32.xlu1 %v3858_v9, %s3270_s25  ;;  %s305_s25 = scalar_lea.vmem %s4957_s8, %s3234_s9 }
 0x14d   : > { %2442 = vperm.xlu0 %3253, %v3209_v32   ;;  %v3040_v32 = vld [vmem:[%s4955_s6] sm:$0xf] }
 0x150   : > { %2317 = vperm.xlu1 %3252, %v3204_v44  }
 0x151   : > { %2501 = vperm.xlu0 %3253, %v3211_v45  }
 0x154   : > { %2367 = vperm.xlu1 %3252, %v3206_v47   ;;  %v3227_v47 = vld [vmem:[%s4952_s3 + $0xe8] sm:$0xf] }
 0x155   : > { %2488 = vrot.lane.b32.xlu0 %v3855_v22, %s3271_s18 }
 0x158   : > { %2417 = vperm.xlu1 %3252, %v3208_v52  }
 0x159   : > { %2492 = vrot.lane.b32.xlu0 %v3880_v19, %s3271_s18 }
 0x15c   : > { %2467 = vperm.xlu1 %3252, %v3210_v53  }
 0x15d   : > { %2576 = vperm.xlu0 %3253, %v3214_v54   ;;  %v3229_v54 = vld [vmem:[%s4952_s3 + $0xf0] sm:$0xf] }
 0x160   : > { %2526 = vperm.xlu1 %3252, %v3212_v56  }
 0x161   : > { %2626 = vperm.xlu0 %3253, %v3216_v57  }
 0x164   : > { %2490 = vrot.lane.b32.xlu1 %v3858_v9, %s3271_s18 }
 0x165   : > { %2685 = vperm.xlu0 %3253, %v3218_v61   ;;  %v3231_v61 = vld [vmem:[%s4952_s3 + $0xf8] sm:$0xf] }
 0x168   : > { %2551 = vperm.xlu1 %3252, %v3213_v63  }
 0x169   : > { %2672 = vrot.lane.b32.xlu0 %v3855_v22, %s3272_s14 }
 0x16c   : > { %2601 = vperm.xlu1 %3252, %v3215_v0  }
 0x16d   : > { %2676 = vrot.lane.b32.xlu0 %v3880_v19, %s3272_s14 }
 0x170   : > { %2651 = vperm.xlu1 %3252, %v3217_v40  }
 0x171   : > { %2760 = vperm.xlu0 %3253, %v3221_v6  }
 0x174   : > { %2710 = vperm.xlu1 %3252, %v3219_v13  }
 0x175   : > { %2810 = vperm.xlu0 %3253, %v3223_v8   ;;  %v3049_v8 = vld [vmem:[%s4956_s7] sm:$0xf] }
 0x178   : > { %2674 = vrot.lane.b32.xlu1 %v3858_v9, %s3272_s14 }
 0x179   : > { %2869 = vperm.xlu0 %3253, %v3225_v10  }
 0x17c   : > { %2735 = vperm.xlu1 %3252, %v3220_v15  }
 0x17d   : > { %2856 = vrot.lane.b32.xlu0 %v3855_v22, %s3273_s29 }
 0x180   : > { %2785 = vperm.xlu1 %3252, %v3222_v3  }
 0x181   : > { %2860 = vrot.lane.b32.xlu0 %v3880_v19, %s3273_s29 }
 0x184   : > { %2835 = vperm.xlu1 %3252, %v3224_v37  }
 0x185   : > { %2944 = vperm.xlu0 %3253, %v3228_v21  }
 0x186   : > { %v1395_v26 = vpop.permute.xlu1 %1394 }
 0x187   : > { %v1397_v28 = vpop.permute.xlu0 %1396 }
 0x188   : > { %2894 = vperm.xlu1 %3252, %v3226_v25   ;;  %v4071_v30 = vsel %vm323_vm0, %v1395_v26, %v1397_v28 }
 0x189   : > { %2994 = vperm.xlu0 %3253, %v3230_v27   ;;  %v1416_v44 = vrot.slane %v4071_v30, %v3533_v55  ;;  %v1441_v45 = vrot.slane %v4071_v30, %v3543_v59  ;;  %v1466_v56 = vrot.slane %v4071_v30, %v3564_v11  ;;  %v1491_v0 = vrot.slane %v4071_v30, %v3571_v18 }
 0x18a   : > { %v1516_v37 = vrot.slane %v4071_v30, %v3634_v33 }
 0x18b   : > { %v1422_v52 = vmul.f32 %v1416_v44, %v3916_v2  ;;  %v1447_v53 = vmul.f32 %v1441_v45, %v3945_v29  ;;  %v1472_v63 = vmul.f32 %v1466_v56, %v3924_v38  ;;  %v1497_v3 = vmul.f32 %v1491_v0, %v3960_v49 }
 0x18c   : > { %2858 = vrot.lane.b32.xlu1 %v3858_v9, %s3273_s29 }
 0x18d   : > { %3043 = vperm.xlu0 %3253, %v3040_v32   ;;  %v1450_v57 = vadd.f32 %v1447_v53, %v1422_v52 }
 0x18f   : > { %v1475_v6 = vadd.f32 %v1472_v63, %v1450_v57  ;;  %v1541_v63 = vrot.slane %v4071_v30, %v3689_v23  ;;  %v1566_v57 = vrot.slane %v4071_v30, %v3677_v14 }
 0x190   : > { %2919 = vperm.xlu1 %3252, %v3227_v47  }
 0x191   : > { %v1500_v52 = vadd.f32 %v1497_v3, %v1475_v6  ;;  %v1547_v44 = vmul.f32 %v1541_v63, %v3969_v39  ;;  %v1572_v32 = vmul.f32 %v1566_v57, %v3949_v43 }
 0x194   : > { %2969 = vperm.xlu1 %3252, %v3229_v54  }
 0x197   : > { %v4098_v40 = vpop.permute.xlu1 %2033 }
 0x198   : > { %3019 = vperm.xlu1 %3252, %v3231_v61   ;;  %v4100_v13 = vpop.permute.xlu0 %2008 }
 0x19b   : > { %v4116_v27 = vpop.permute.xlu1 %2083 }
 0x19c   : > { %3052 = vperm.xlu1 %3252, %v3049_v8   ;;  %v4126_v53 = vpop.permute.xlu0 %2058  ;;  %v1522_v8 = vmul.f32 %v1516_v37, %v3940_v31 }
 0x19e   : > { %v1525_v3 = vadd.f32 %v1522_v8, %v1500_v52 }
 0x19f   : > { %v1399_v25 = vpop.permute.xlu1 %1398 }
 0x1a0   : > { %v1400_v61 = vsel %vm323_vm0, %v1397_v28, %v1399_v25  ;;  %v1402_v56 = vsel %vm323_vm0, %v1399_v25, %v1395_v26  ;;  %v4163_v54 = vpop.permute.xlu0 %1579 }
 0x1a1   : > { %v1412_v0 = vrot.slane %v1402_v56, %v3533_v55  ;;  %v1420_v21 = vrot.slane %v1400_v61, %v3533_v55  ;;  %v1437_v6 = vrot.slane %v1402_v56, %v3543_v59  ;;  %v1445_v37 = vrot.slane %v1400_v61, %v3543_v59 }
 0x1a2   : > { %v1462_v52 = vrot.slane %v1402_v56, %v3564_v11  ;;  %v1470_v30 = vrot.slane %v1400_v61, %v3564_v11  ;;  %v1487_v8 = vrot.slane %v1402_v56, %v3571_v18  ;;  %v1495_v28 = vrot.slane %v1400_v61, %v3571_v18 }
 0x1a3   : > { %v1421_v26 = vmul.f32 %v1412_v0, %v3916_v2  ;;  %v1423_v25 = vmul.f32 %v1420_v21, %v3916_v2  ;;  %v1446_v47 = vmul.f32 %v1437_v6, %v3945_v29  ;;  %v1448_v45 = vmul.f32 %v1445_v37, %v3945_v29  ;;  %v1578_v15 = vpop.permute.xlu1 %1577 }
 0x1a4   : > { %v1471_v10 = vmul.f32 %v1462_v52, %v3924_v38  ;;  %v1473_v4 = vmul.f32 %v1470_v30, %v3924_v38  ;;  %v4181_v5 = vpop.permute.xlu0 %2108  ;;  %v1512_v0 = vrot.slane %v1402_v56, %v3634_v33  ;;  %v1520_v2 = vrot.slane %v1400_v61, %v3634_v33 }
 0x1a5   : > { %4967 = vst [vmem:[#allocation6_spill] sm:$0xff] %v4181_v5  ;;  %v1449_v35 = vadd.f32 %v1446_v47, %v1421_v26  ;;  %v1451_v50 = vadd.f32 %v1448_v45, %v1423_v25  ;;  %v1550_v21 = vadd.f32 %v1547_v44, %v1525_v3  ;;  %v1496_v29 = vmul.f32 %v1487_v8, %v3960_v49 }
 0x1a6   : > { %v1537_v6 = vrot.slane %v1402_v56, %v3689_v23  ;;  %v1545_v63 = vrot.slane %v1400_v61, %v3689_v23  ;;  %v1498_v52 = vmul.f32 %v1495_v28, %v3960_v49  ;;  %v1562_v38 = vrot.slane %v1402_v56, %v3677_v14 }
 0x1a7   : > { %v1474_v57 = vadd.f32 %v1471_v10, %v1449_v35  ;;  %v1476_v37 = vadd.f32 %v1473_v4, %v1451_v50  ;;  %v2134_v30 = vpop.permute.xlu1 %2133  ;;  %v1521_v45 = vmul.f32 %v1512_v0, %v3940_v31  ;;  %v1523_v47 = vmul.f32 %v1520_v2, %v3940_v31 }
 0x1a8   : > { %v1546_v26 = vmul.f32 %v1537_v6, %v3969_v39  ;;  %v1570_v44 = vrot.slane %v1400_v61, %v3677_v14  ;;  %v4194_v3 = vpop.permute.xlu0 %2158  ;;  %v1548_v35 = vmul.f32 %v1545_v63, %v3969_v39  ;;  %v1584_v4 = vsel %vm432_vm1, %v1578_v15, %v4163_v54 }
 0x1a9   : > { %v1499_v8 = vadd.f32 %v1496_v29, %v1474_v57  ;;  %v1501_v25 = vadd.f32 %v1498_v52, %v1476_v37  ;;  %v1600_v50 = vrot.slane %v1584_v4, %v3533_v55  ;;  %v1625_v49 = vrot.slane %v1584_v4, %v3543_v59 }
 0x1aa   : > { %v1650_v31 = vrot.slane %v1584_v4, %v3564_v11  ;;  %v1675_v10 = vrot.slane %v1584_v4, %v3571_v18  ;;  %v1700_v28 = vrot.slane %v1584_v4, %v3634_v33  ;;  %v1725_v0 = vrot.slane %v1584_v4, %v3689_v23 }
 0x1ab   : > { %v1524_v56 = vadd.f32 %v1521_v45, %v1499_v8  ;;  %v1526_v61 = vadd.f32 %v1523_v47, %v1501_v25  ;;  %v1582_v2 = vpop.permute.xlu1 %1581  ;;  %v1575_v39 = vadd.f32 %v1572_v32, %v1550_v21  ;;  %v1571_v29 = vmul.f32 %v1562_v38, %v3949_v43 }
 0x1ac   : > { %v1573_v6 = vmul.f32 %v1570_v44, %v3949_v43  ;;  %v1606_v63 = vmul.f32 %v1600_v50, %v3962_v51  ;;  %v4209_v57 = vpop.permute.xlu0 %1763  ;;  %v1631_v5 = vmul.f32 %v1625_v49, %v3984_v36  ;;  %v4968_v45 = vrot.slane %v3855_v22, %v3533_v55 }
 0x1ad   : > { %v1549_v37 = vadd.f32 %v1546_v26, %v1524_v56  ;;  %v1551_v52 = vadd.f32 %v1548_v35, %v1526_v61  ;;  %v1656_v32 = vmul.f32 %v1650_v31, %v3971_v42  ;;  %v1681_v21 = vmul.f32 %v1675_v10, %v3994_v62 }
 0x1ae   : > { %v4215_v47 = vmul.f32 %v4968_v45, %v2134_v30  ;;  %v1609_v8 = vadd.f32 %v1606_v63, %v1575_v39  ;;  %v1706_v43 = vmul.f32 %v1700_v28, %v3989_v60  ;;  %v1731_v38 = vmul.f32 %v1725_v0, %v4008_v46 }
 0x1af   : > { %v1750_v44 = vrot.slane %v1584_v4, %v3677_v14  ;;  %v4970_v26 = vrot.slane %v3858_v9, %v3533_v55  ;;  %v4972_v35 = vrot.slane %v3880_v19, %v3533_v55  ;;  %v4232_v49 = vpop.permute.xlu1 %2183  ;;  %v1574_v31 = vadd.f32 %v1571_v29, %v1549_v37 }
 0x1b0   : > { %4969 = vst [vmem:[#allocation7_spill] sm:$0xff] %v4215_v47  ;;  %v1576_v10 = vadd.f32 %v1573_v6, %v1551_v52  ;;  %v1634_v56 = vadd.f32 %v1631_v5, %v1609_v8  ;;  %v4237_v61 = vsel %vm432_vm1, %v4163_v54, %v1582_v2  ;;  %v4239_v4 = vpop.permute.xlu0 %1947  ;;  %v4974_v28 = vrot.slane %v3855_v22, %v3543_v59 }
 0x1b1   : > { %v4225_v25 = vmul.f32 %v4970_v26, %v2134_v30  ;;  %v4230_v50 = vmul.f32 %v4972_v35, %v2134_v30  ;;  %v1585_v30 = vsel %vm432_vm1, %v1582_v2, %v1578_v15  ;;  %v1604_v39 = vrot.slane %v4237_v61, %v3533_v55 }
 0x1b2   : > { %v4245_v0 = vmul.f32 %v4974_v28, %v4194_v3  ;;  %v1629_v5 = vrot.slane %v4237_v61, %v3543_v59  ;;  %v1659_v29 = vadd.f32 %v1656_v32, %v1634_v56  ;;  %v4976_v54 = vrot.slane %v3858_v9, %v3543_v59 }
 0x1b3   : > { %4971 = vst [vmem:[#allocation8_spill] sm:$0xff] %v4225_v25  ;;  %4973 = vst [vmem:[#allocation9_spill] sm:$0xff] %v4230_v50  ;;  %v1596_v63 = vrot.slane %v1585_v30, %v3533_v55  ;;  %v1621_v37 = vrot.slane %v1585_v30, %v3543_v59  ;;  %v1756_v52 = vmul.f32 %v1750_v44, %v3998_v41  ;;  %v4266_v8 = vpop.permute.xlu1 %1761 }
 0x1b4   : > { %4975 = vst [vmem:[#allocation10_spill] sm:$0xff] %v4245_v0  ;;  %v4257_v6 = vmul.f32 %v4976_v54, %v4194_v3  ;;  %v1607_v15 = vmul.f32 %v1604_v39, %v3962_v51  ;;  %v1646_v2 = vrot.slane %v1585_v30, %v3564_v11  ;;  %v1654_v45 = vrot.slane %v4237_v61, %v3564_v11  ;;  %v4271_v28 = vpop.permute.xlu0 %2208 }
 0x1b5   : > { %v1684_v32 = vadd.f32 %v1681_v21, %v1659_v29  ;;  %v1605_v26 = vmul.f32 %v1596_v63, %v3962_v51  ;;  %v1632_v35 = vmul.f32 %v1629_v5, %v3984_v36  ;;  %v1671_v56 = vrot.slane %v1585_v30, %v3571_v18 }
 0x1b6   : > { %4977 = vst [vmem:[#allocation11_spill] sm:$0xff] %v4257_v6  ;;  %v1610_v54 = vadd.f32 %v1607_v15, %v1576_v10  ;;  %v1630_v44 = vmul.f32 %v1621_v37, %v3984_v36  ;;  %v1679_v39 = vrot.slane %v4237_v61, %v3571_v18  ;;  %v1696_v0 = vrot.slane %v1585_v30, %v3634_v33 }
 0x1b7   : > { %v1709_v50 = vadd.f32 %v1706_v43, %v1684_v32  ;;  %v1608_v47 = vadd.f32 %v1605_v26, %v1574_v31  ;;  %v1704_v21 = vrot.slane %v4237_v61, %v3634_v33  ;;  %v1721_v51 = vrot.slane %v1585_v30, %v3689_v23  ;;  %v1766_v37 = vpop.permute.xlu1 %1765 }
 0x1b8   : > { %v4978_v5 = vrot.slane %v3880_v19, %v3543_v59  ;;  %v1635_v10 = vadd.f32 %v1632_v35, %v1610_v54  ;;  %v1657_v36 = vmul.f32 %v1654_v45, %v3971_v42  ;;  %v1729_v63 = vrot.slane %v4237_v61, %v3689_v23  ;;  %v4291_v26 = vpop.permute.xlu0 %2258 }
 0x1b9   : > { %v1734_v43 = vadd.f32 %v1731_v38, %v1709_v50  ;;  %v1633_v31 = vadd.f32 %v1630_v44, %v1608_v47  ;;  %v1655_v15 = vmul.f32 %v1646_v2, %v3971_v42  ;;  %v1680_v32 = vmul.f32 %v1671_v56, %v3994_v62 }
 0x1ba   : > { %v4284_v29 = vmul.f32 %v4978_v5, %v4194_v3  ;;  %v1660_v6 = vadd.f32 %v1657_v36, %v1635_v10  ;;  %v1682_v25 = vmul.f32 %v1679_v39, %v3994_v62  ;;  %v1705_v3 = vmul.f32 %v1696_v0, %v3989_v60 }
 0x1bb   : > { %v1746_v35 = vrot.slane %v1585_v30, %v3677_v14  ;;  %v1658_v45 = vadd.f32 %v1655_v15, %v1633_v31  ;;  %v1707_v54 = vmul.f32 %v1704_v21, %v3989_v60  ;;  %v1730_v5 = vmul.f32 %v1721_v51, %v4008_v46  ;;  %v4307_v0 = vpop.permute.xlu1 %1945 }
 0x1bc   : > { %v1732_v47 = vmul.f32 %v1729_v63, %v4008_v46  ;;  %v1759_v38 = vadd.f32 %v1756_v52, %v1734_v43  ;;  %v1685_v42 = vadd.f32 %v1682_v25, %v1660_v6  ;;  %v1754_v50 = vrot.slane %v4237_v61, %v3677_v14  ;;  %v4322_v61 = vpop.permute.xlu0 %2304 }
 0x1bd   : > { %v4979_v62 = vrot.slane %v3855_v22, %v3564_v11  ;;  %v1683_v30 = vadd.f32 %v1680_v32, %v1658_v45  ;;  %v1755_v60 = vmul.f32 %v1746_v35, %v3998_v41  ;;  %v4980_v46 = vrot.slane %v3858_v9, %v3564_v11 }
 0x1be   : > { %v4320_v25 = vsel %vm542_vm2, %v4266_v8, %v4209_v57  ;;  %v1710_v6 = vadd.f32 %v1707_v54, %v1685_v42  ;;  %v1757_v43 = vmul.f32 %v1754_v50, %v3998_v41  ;;  %v4981_v31 = vrot.slane %v3880_v19, %v3564_v11 }
 0x1bf   : > { %v4305_v2 = vmul.f32 %v4979_v62, %v4232_v49  ;;  %v4314_v52 = vmul.f32 %v4980_v46, %v4232_v49  ;;  %v1784_v56 = vrot.slane %v4320_v25, %v3533_v55  ;;  %v1809_v44 = vrot.slane %v4320_v25, %v3543_v59 }
 0x1c0   : > { %v1834_v39 = vrot.slane %v4320_v25, %v3564_v11  ;;  %v1708_v21 = vadd.f32 %v1705_v3, %v1683_v30  ;;  %v1859_v51 = vrot.slane %v4320_v25, %v3571_v18  ;;  %v1884_v10 = vrot.slane %v4320_v25, %v3634_v33  ;;  %v4344_v3 = vpop.permute.xlu1 %1949 }
 0x1c1   : > { %v1909_v36 = vrot.slane %v4320_v25, %v3689_v23  ;;  %v1735_v63 = vadd.f32 %v1732_v47, %v1710_v6  ;;  %v4341_v15 = vmul.f32 %v4981_v31, %v4232_v49  ;;  %v1790_v32 = vmul.f32 %v1784_v56, %v4010_v1  ;;  %v4359_v49 = vpop.permute.xlu0 %2308 }
 0x1c2   : > { %v1733_v35 = vadd.f32 %v1730_v5, %v1708_v21  ;;  %v1815_v45 = vmul.f32 %v1809_v44, %v4020_v7  ;;  %v4982_v54 = vrot.slane %v3855_v22, %v3571_v18  ;;  %v4984_v41 = vrot.slane %v3858_v9, %v3571_v18 }
 0x1c3   : > { %v1793_v50 = vadd.f32 %v1790_v32, %v1759_v38  ;;  %v1840_v62 = vmul.f32 %v1834_v39, %v4022_v58  ;;  %v1865_v5 = vmul.f32 %v1859_v51, %v4030_v34  ;;  %v1890_v30 = vmul.f32 %v1884_v10, %v4035_v16 }
 0x1c4   : > { %v4351_v47 = vmul.f32 %v4982_v54, %v4271_v28  ;;  %v4357_v42 = vmul.f32 %v4984_v41, %v4271_v28  ;;  %v1760_v46 = vadd.f32 %v1757_v43, %v1735_v63  ;;  %v1915_v6 = vmul.f32 %v1909_v36, %v4042_v12  ;;  %v4373_v51 = vpop.permute.xlu1 %2233 }
 0x1c5   : > { %v1767_v56 = vsel %vm542_vm2, %v4209_v57, %v1766_v37  ;;  %v1769_v44 = vsel %vm542_vm2, %v1766_v37, %v4266_v8  ;;  %v1758_v21 = vadd.f32 %v1755_v60, %v1733_v35  ;;  %v1818_v31 = vadd.f32 %v1815_v45, %v1793_v50  ;;  %v4379_v43 = vpop.permute.xlu0 %2342 }
 0x1c6   : > { %4983 = vst [vmem:[#allocation12_spill] sm:$0xff] %v4351_v47  ;;  %v1780_v38 = vrot.slane %v1769_v44, %v3533_v55  ;;  %v1788_v39 = vrot.slane %v1767_v56, %v3533_v55  ;;  %v1805_v10 = vrot.slane %v1769_v44, %v3543_v59  ;;  %v1813_v36 = vrot.slane %v1767_v56, %v3543_v59 }
 0x1c7   : > { %v1830_v63 = vrot.slane %v1769_v44, %v3564_v11  ;;  %v1838_v57 = vrot.slane %v1767_v56, %v3564_v11  ;;  %v1843_v32 = vadd.f32 %v1840_v62, %v1818_v31  ;;  %v1934_v8 = vrot.slane %v4320_v25, %v3677_v14 }
 0x1c8   : > { %v1789_v37 = vmul.f32 %v1780_v38, %v4010_v1  ;;  %v1791_v60 = vmul.f32 %v1788_v39, %v4010_v1  ;;  %v4985_v35 = vrot.slane %v3880_v19, %v3571_v18  ;;  %v1814_v54 = vmul.f32 %v1805_v10, %v4020_v7  ;;  %v4395_v38 = vpop.permute.xlu1 %2283 }
 0x1c9   : > { %v1816_v41 = vmul.f32 %v1813_v36, %v4020_v7  ;;  %v1855_v50 = vrot.slane %v1769_v44, %v3571_v18  ;;  %v1868_v62 = vadd.f32 %v1865_v5, %v1843_v32  ;;  %v1863_v25 = vrot.slane %v1767_v56, %v3571_v18  ;;  %v4401_v10 = vpop.permute.xlu0 %2392 }
 0x1ca   : > { %v4389_v45 = vmul.f32 %v4985_v35, %v4271_v28  ;;  %v1792_v31 = vadd.f32 %v1789_v37, %v1758_v21  ;;  %v1794_v47 = vadd.f32 %v1791_v60, %v1760_v46  ;;  %v1839_v1 = vmul.f32 %v1830_v63, %v4022_v58 }
 0x1cb   : > { %v1841_v39 = vmul.f32 %v1838_v57, %v4022_v58  ;;  %v1880_v28 = vrot.slane %v1769_v44, %v3634_v33  ;;  %v1888_v35 = vrot.slane %v1767_v56, %v3634_v33  ;;  %v1893_v7 = vadd.f32 %v1890_v30, %v1868_v62 }
 0x1cc   : > { %4986 = vst [vmem:[#allocation13_spill] sm:$0xff] %v4389_v45  ;;  %v1817_v36 = vadd.f32 %v1814_v54, %v1792_v31  ;;  %v1819_v45 = vadd.f32 %v1816_v41, %v1794_v47  ;;  %v1905_v5 = vrot.slane %v1769_v44, %v3689_v23  ;;  %v1864_v46 = vmul.f32 %v1855_v50, %v4030_v34  ;;  %v4414_v47 = vpop.permute.xlu1 %2306 }
 0x1cd   : > { %v1866_v21 = vmul.f32 %v1863_v25, %v4030_v34  ;;  %v1913_v32 = vrot.slane %v1767_v56, %v3689_v23  ;;  %v4987_v58 = vrot.slane %v3855_v22, %v3689_v23  ;;  %v1918_v57 = vadd.f32 %v1915_v6, %v1893_v7  ;;  %v4420_v62 = vpop.permute.xlu0 %2442 }
 0x1ce   : > { %v1842_v37 = vadd.f32 %v1839_v1, %v1817_v36  ;;  %v1844_v60 = vadd.f32 %v1841_v39, %v1819_v45  ;;  %v1930_v30 = vrot.slane %v1769_v44, %v3677_v14  ;;  %v1940_v54 = vmul.f32 %v1934_v8, %v4044_v17 }
 0x1cf   : > { %v4411_v63 = vmul.f32 %v4987_v58, %v4291_v26  ;;  %v1889_v41 = vmul.f32 %v1880_v28, %v4035_v16  ;;  %v1891_v34 = vmul.f32 %v1888_v35, %v4035_v16  ;;  %v1938_v50 = vrot.slane %v1767_v56, %v3677_v14 }
 0x1d0   : > { %v1867_v31 = vadd.f32 %v1864_v46, %v1842_v37  ;;  %v1869_v25 = vadd.f32 %v1866_v21, %v1844_v60  ;;  %v1914_v6 = vmul.f32 %v1905_v5, %v4042_v12  ;;  %v1916_v45 = vmul.f32 %v1913_v32, %v4042_v12  ;;  %v4441_v7 = vpop.permute.xlu1 %2317 }
 0x1d1   : > { %v1943_v1 = vadd.f32 %v1940_v54, %v1918_v57  ;;  %v1939_v44 = vmul.f32 %v1930_v30, %v4044_v17  ;;  %v4988_v8 = vrot.slane %v3858_v9, %v3689_v23  ;;  %v4435_v16 = vsel %vm652_vm3, %v4307_v0, %v4239_v4  ;;  %v4458_v32 = vpop.permute.xlu0 %2501 }
 0x1d2   : > { %v1892_v56 = vadd.f32 %v1889_v41, %v1867_v31  ;;  %v1894_v28 = vadd.f32 %v1891_v34, %v1869_v25  ;;  %v1968_v12 = vrot.slane %v4435_v16, %v3533_v55  ;;  %v1993_v35 = vrot.slane %v4435_v16, %v3543_v59 }
 0x1d3   : > { %v4429_v39 = vmul.f32 %v4988_v8, %v4291_v26  ;;  %v1941_v36 = vmul.f32 %v1938_v50, %v4044_v17  ;;  %v2018_v5 = vrot.slane %v4435_v16, %v3564_v11  ;;  %v4450_v46 = vsel %vm652_vm3, %v4239_v4, %v4344_v3 }
 0x1d4   : > { %v4456_v21 = vsel %vm652_vm3, %v4344_v3, %v4307_v0  ;;  %v1917_v58 = vadd.f32 %v1914_v6, %v1892_v56  ;;  %v1919_v57 = vadd.f32 %v1916_v45, %v1894_v28  ;;  %v1974_v17 = vmul.f32 %v1968_v12, %v4061_v24  ;;  %v4475_v31 = vpop.permute.xlu1 %2367 }
 0x1d5   : > { %v2043_v37 = vrot.slane %v4435_v16, %v3571_v18  ;;  %v4989_v4 = vrot.slane %v3880_v19, %v3689_v23  ;;  %v1999_v30 = vmul.f32 %v1993_v35, %v4056_v20  ;;  %v2068_v0 = vrot.slane %v4435_v16, %v3634_v33  ;;  %v4485_v8 = vpop.permute.xlu0 %2488 }
 0x1d6   : > { %v2093_v3 = vrot.slane %v4435_v16, %v3689_v23  ;;  %v1942_v54 = vadd.f32 %v1939_v44, %v1917_v58  ;;  %v1944_v41 = vadd.f32 %v1941_v36, %v1919_v57  ;;  %v1977_v34 = vadd.f32 %v1974_v17, %v1943_v1 }
 0x1d7   : > { %v4467_v60 = vmul.f32 %v4989_v4, %v4291_v26  ;;  %v2024_v50 = vmul.f32 %v2018_v5, %v4100_v13  ;;  %v1964_v25 = vrot.slane %v4456_v21, %v3533_v55  ;;  %v1972_v26 = vrot.slane %v4450_v46, %v3533_v55 }
 0x1d8   : > { %v1989_v6 = vrot.slane %v4456_v21, %v3543_v59  ;;  %v1997_v45 = vrot.slane %v4450_v46, %v3543_v59  ;;  %v2002_v44 = vadd.f32 %v1999_v30, %v1977_v34  ;;  %v2049_v1 = vmul.f32 %v2043_v37, %v4098_v40  ;;  %v4501_v4 = vpop.permute.xlu1 %2417 }
 0x1d9   : > { %v2014_v56 = vrot.slane %v4456_v21, %v3564_v11  ;;  %v2022_v28 = vrot.slane %v4450_v46, %v3564_v11  ;;  %v2074_v12 = vmul.f32 %v2068_v0, %v4126_v53  ;;  %v2099_v35 = vmul.f32 %v2093_v3, %v4116_v27 }
 0x1da   : > { %v1973_v36 = vmul.f32 %v1964_v25, %v4061_v24  ;;  %v1975_v5 = vmul.f32 %v1972_v26, %v4061_v24  ;;  %v2027_v58 = vadd.f32 %v2024_v50, %v2002_v44  ;;  %v2118_v57 = vrot.slane %v4435_v16, %v3677_v14  ;;  %v4506_v25 = vpop.permute.xlu0 %2492 }
 0x1db   : > { %v1998_v17 = vmul.f32 %v1989_v6, %v4056_v20  ;;  %v2039_v37 = vrot.slane %v4456_v21, %v3571_v18  ;;  %v2000_v0 = vmul.f32 %v1997_v45, %v4056_v20  ;;  %v2047_v3 = vrot.slane %v4450_v46, %v3571_v18 }
 0x1dc   : > { %v1976_v30 = vadd.f32 %v1973_v36, %v1942_v54  ;;  %v1978_v34 = vadd.f32 %v1975_v5, %v1944_v41  ;;  %v2052_v24 = vadd.f32 %v2049_v1, %v2027_v58  ;;  %v2023_v50 = vmul.f32 %v2014_v56, %v4100_v13 }
 0x1dd   : > { %v2025_v16 = vmul.f32 %v2022_v28, %v4100_v13  ;;  %v2064_v26 = vrot.slane %v4456_v21, %v3634_v33  ;;  %v2072_v54 = vrot.slane %v4450_v46, %v3634_v33  ;;  %v2089_v20 = vrot.slane %v4456_v21, %v3689_v23  ;;  %v4520_v13 = vpop.permute.xlu1 %2467 }
 0x1de   : > { %v2001_v6 = vadd.f32 %v1998_v17, %v1976_v30  ;;  %v2003_v44 = vadd.f32 %v2000_v0, %v1978_v34  ;;  %v2077_v41 = vadd.f32 %v2074_v12, %v2052_v24  ;;  %v2048_v45 = vmul.f32 %v2039_v37, %v4098_v40  ;;  %v4526_v17 = vpop.permute.xlu0 %2576  ;;  %v4990_v12 = vld [vmem:[#allocation6_spill] sm:$0xff] }
 0x1df   : > { %v2050_v1 = vmul.f32 %v2047_v3, %v4098_v40  ;;  %v2097_v56 = vrot.slane %v4450_v46, %v3689_v23  ;;  %v2114_v5 = vrot.slane %v4456_v21, %v3677_v14  ;;  %v2122_v58 = vrot.slane %v4450_v46, %v3677_v14 }
 0x1e0   : > { %v2026_v28 = vadd.f32 %v2023_v50, %v2001_v6  ;;  %v2028_v36 = vadd.f32 %v2025_v16, %v2003_v44  ;;  %v2124_v30 = vmul.f32 %v2118_v57, %v4990_v12  ;;  %v2073_v37 = vmul.f32 %v2064_v26, %v4126_v53 }
 0x1e1   : > { %v4534_v40 = vsel %vm922_vm4, %v4359_v49, %v4322_v61  ;;  %v2102_v34 = vadd.f32 %v2099_v35, %v2077_v41  ;;  %v2075_v21 = vmul.f32 %v2072_v54, %v4126_v53  ;;  %v2098_v24 = vmul.f32 %v2089_v20, %v4116_v27  ;;  %v4546_v6 = vpop.permute.xlu1 %2526  ;;  %v4992_v54 = vld [vmem:[#allocation8_spill] sm:$0xff] }
 0x1e2   : > { %v2051_v0 = vadd.f32 %v2048_v45, %v2026_v28  ;;  %v2053_v3 = vadd.f32 %v2050_v1, %v2028_v36  ;;  %v2100_v46 = vmul.f32 %v2097_v56, %v4116_v27  ;;  %v2123_v50 = vmul.f32 %v2114_v5, %v4990_v12  ;;  %v4566_v5 = vpop.permute.xlu0 %2626 }
 0x1e3   : > { %v2127_v57 = vadd.f32 %v2124_v30, %v2102_v34  ;;  %v4991_v16 = vrot.slane %v3855_v22, %v3634_v33  ;;  %v2125_v41 = vmul.f32 %v2122_v58, %v4990_v12  ;;  %v2356_v53 = vrot.slane %v4534_v40, %v3543_v59 }
 0x1e4   : > { %v2076_v35 = vadd.f32 %v2073_v37, %v2051_v0  ;;  %v2078_v44 = vadd.f32 %v2075_v21, %v2053_v3  ;;  %v4993_v20 = vrot.slane %v3858_v9, %v3634_v33  ;;  %v4994_v1 = vrot.slane %v3880_v19, %v3634_v33  ;;  %v4996_v37 = vld [vmem:[#allocation11_spill] sm:$0xff] }
 0x1e5   : > { %v4544_v26 = vmul.f32 %v4991_v16, %v4373_v51  ;;  %v2152_v27 = vadd.f32 %v4992_v54, %v2127_v57  ;;  %v4995_v28 = vrot.slane %v3855_v22, %v3677_v14  ;;  %v4572_v30 = vsel %vm922_vm4, %v4414_v47, %v4359_v49  ;;  %v4589_v21 = vpop.permute.xlu1 %2490 }
 0x1e6   : > { %v2249_v45 = vmul.f32 %v4993_v20, %v4373_v51  ;;  %v2250_v56 = vmul.f32 %v4994_v1, %v4373_v51  ;;  %v2101_v58 = vadd.f32 %v2098_v24, %v2076_v35  ;;  %v2103_v12 = vadd.f32 %v2100_v46, %v2078_v44  ;;  %v4999_v44 = vld [vmem:[#allocation7_spill] sm:$0xff] }
 0x1e7   : > { %v4564_v36 = vmul.f32 %v4995_v28, %v4395_v38  ;;  %v4578_v51 = vsel %vm922_vm4, %v4322_v61, %v4414_v47  ;;  %v2177_v22 = vadd.f32 %v4996_v37, %v2152_v27  ;;  %v4997_v34 = vrot.slane %v3858_v9, %v3677_v14  ;;  %v4621_v28 = vpop.permute.xlu0 %2685 }
 0x1e8   : > { %v2448_v3 = vrot.slane %v4578_v51, %v3689_v23  ;;  %v2452_v49 = vrot.slane %v4572_v30, %v3689_v23  ;;  %v2126_v24 = vadd.f32 %v2123_v50, %v2101_v58  ;;  %v2128_v46 = vadd.f32 %v2125_v41, %v2103_v12  ;;  %v5001_v12 = vld [vmem:[#allocation10_spill] sm:$0xff] }
 0x1e9   : > { %v2299_v0 = vmul.f32 %v4997_v34, %v4395_v38  ;;  %v4592_v61 = vmul.f32 %v2356_v53, %v4379_v43  ;;  %v2406_v47 = vrot.slane %v4534_v40, %v3571_v18  ;;  %v2202_v57 = vadd.f32 %v4314_v52, %v2177_v22  ;;  %v5000_v53 = vld [vmem:[#allocation9_spill] sm:$0xff]  ;;  %v4623_v58 = vpop.permute.xlu1 %2551 }
 0x1ea   : > { %v4998_v9 = vrot.slane %v3880_v19, %v3677_v14  ;;  %v2323_v35 = vrot.slane %v4578_v51, %v3533_v55  ;;  %v2327_v50 = vrot.slane %v4572_v30, %v3533_v55  ;;  %v2151_v41 = vadd.f32 %v4999_v44, %v2126_v24 }
 0x1eb   : > { %v2153_v54 = vadd.f32 %v5000_v53, %v2128_v46  ;;  %v4608_v27 = vmul.f32 %v2406_v47, %v4401_v10  ;;  %v2456_v52 = vrot.slane %v4534_v40, %v3689_v23  ;;  %v2227_v20 = vadd.f32 %v4357_v42, %v2202_v57 }
 0x1ec   : > { %v2300_v16 = vmul.f32 %v4998_v9, %v4395_v38  ;;  %v4614_v19 = vmul.f32 %v2448_v3, %v4420_v62  ;;  %v4617_v38 = vmul.f32 %v2452_v49, %v4420_v62  ;;  %v2348_v1 = vrot.slane %v4578_v51, %v3543_v59 }
 0x1ed   : > { %v2176_v37 = vadd.f32 %v5001_v12, %v2151_v41  ;;  %v2178_v22 = vadd.f32 %v4284_v29, %v2153_v54  ;;  %v4628_v34 = vmul.f32 %v2456_v52, %v4420_v62  ;;  %v2331_v42 = vrot.slane %v4534_v40, %v3533_v55  ;;  %v4647_v44 = vpop.permute.xlu1 %2601  ;;  %v4658_v12 = vpop.permute.xlu0 %2672 }
 0x1ee   : > { %v2252_v3 = vadd.f32 %v2249_v45, %v2227_v20  ;;  %v2332_v49 = vmul.f32 %v2323_v35, %v4441_v7  ;;  %v2333_v24 = vmul.f32 %v2327_v50, %v4441_v7  ;;  %v2352_v46 = vrot.slane %v4572_v30, %v3543_v59 }
 0x1ef   : > { %v2201_v47 = vadd.f32 %v4305_v2, %v2176_v37  ;;  %v2203_v57 = vadd.f32 %v4341_v15, %v2178_v22  ;;  %v2334_v29 = vmul.f32 %v2331_v42, %v4441_v7  ;;  %v2357_v62 = vmul.f32 %v2348_v1, %v4379_v43  ;;  %v5002_v2 = vld [vmem:[#allocation12_spill] sm:$0xff]  ;;  %v5003_v15 = vld [vmem:[#allocation13_spill] sm:$0xff] }
 0x1f0   : > { %v2277_v9 = vadd.f32 %v4429_v39, %v2252_v3  ;;  %v2373_v45 = vrot.slane %v4578_v51, %v3564_v11  ;;  %v2377_v35 = vrot.slane %v4572_v30, %v3564_v11  ;;  %v2398_v50 = vrot.slane %v4578_v51, %v3571_v18 }
 0x1f1   : > { %v2226_v41 = vadd.f32 %v5002_v2, %v2201_v47  ;;  %v2228_v53 = vadd.f32 %v5003_v15, %v2203_v57  ;;  %v2381_v7 = vrot.slane %v4534_v40, %v3564_v11  ;;  %v2402_v39 = vrot.slane %v4572_v30, %v3571_v18 }
 0x1f2   : > { %v2302_v54 = vadd.f32 %v2299_v0, %v2277_v9  ;;  %v2358_v52 = vmul.f32 %v2352_v46, %v4379_v43  ;;  %v2382_v20 = vmul.f32 %v2373_v45, %v4475_v31  ;;  %v2383_v1 = vmul.f32 %v2377_v35, %v4475_v31  ;;  %v4673_v46 = vpop.permute.xlu1 %2651 }
 0x1f3   : > { %v2251_v37 = vadd.f32 %v4544_v26, %v2226_v41  ;;  %v2253_v22 = vadd.f32 %v2250_v56, %v2228_v53  ;;  %v2384_v42 = vmul.f32 %v2381_v7, %v4475_v31  ;;  %v2407_v3 = vmul.f32 %v2398_v50, %v4401_v10 }
 0x1f4   : > { %v2336_v47 = vadd.f32 %v2333_v24, %v2302_v54  ;;  %v2423_v57 = vrot.slane %v4578_v51, %v3634_v33  ;;  %v2427_v43 = vrot.slane %v4572_v30, %v3634_v33  ;;  %v4671_v0 = vsel %vm1032_vm5, %v4506_v25, %v4485_v8 }
 0x1f5   : > { %v2276_v26 = vadd.f32 %v4411_v63, %v2251_v37  ;;  %v2278_v31 = vadd.f32 %v4467_v60, %v2253_v22  ;;  %v2408_v56 = vmul.f32 %v2402_v39, %v4401_v10  ;;  %v2431_v24 = vrot.slane %v4534_v40, %v3634_v33  ;;  %v4694_v39 = vpop.permute.xlu0 %2676 }
 0x1f6   : > { %v2361_v9 = vadd.f32 %v2358_v52, %v2336_v47  ;;  %v2432_v45 = vmul.f32 %v2423_v57, %v4501_v4  ;;  %v2433_v35 = vmul.f32 %v2427_v43, %v4501_v4  ;;  %v2473_v50 = vrot.slane %v4578_v51, %v3677_v14  ;;  %v4696_v51 = vpop.permute.xlu1 %2710 }
 0x1f7   : > { %v2301_v2 = vadd.f32 %v4564_v36, %v2276_v26  ;;  %v2303_v41 = vadd.f32 %v2300_v16, %v2278_v31  ;;  %v2477_v63 = vrot.slane %v4572_v30, %v3677_v14  ;;  %v2590_v10 = vrot.slane %v4671_v0, %v3571_v18 }
 0x1f8   : > { %v2386_v60 = vadd.f32 %v2383_v1, %v2361_v9  ;;  %v2434_v15 = vmul.f32 %v2431_v24, %v4501_v4  ;;  %v2481_v53 = vrot.slane %v4534_v40, %v3677_v14  ;;  %v2515_v7 = vrot.slane %v4671_v0, %v3533_v55 }
 0x1f9   : > { %v2335_v36 = vadd.f32 %v2332_v49, %v2301_v2  ;;  %v2337_v16 = vadd.f32 %v2334_v29, %v2303_v41  ;;  %v2482_v30 = vmul.f32 %v2473_v50, %v4520_v13  ;;  %v2483_v54 = vmul.f32 %v2477_v63, %v4520_v13  ;;  %v4736_v9 = vpop.permute.xlu0 %2760 }
 0x1fa   : > { %v2411_v52 = vadd.f32 %v2408_v56, %v2386_v60  ;;  %v2484_v1 = vmul.f32 %v2481_v53, %v4520_v13  ;;  %v4705_v4 = vsel %vm1032_vm5, %v4589_v21, %v4506_v25  ;;  %v4711_v40 = vsel %vm1032_vm5, %v4485_v8, %v4589_v21  ;;  %v4724_v8 = vpop.permute.xlu1 %2674 }
 0x1fb   : > { %v2360_v49 = vadd.f32 %v2357_v62, %v2335_v36  ;;  %v2362_v29 = vadd.f32 %v4592_v61, %v2337_v16  ;;  %v4715_v37 = vmul.f32 %v2590_v10, %v4526_v17  ;;  %v2540_v13 = vrot.slane %v4671_v0, %v3543_v59 }
 0x1fc   : > { %v2436_v22 = vadd.f32 %v2433_v35, %v2411_v52  ;;  %v2518_v47 = vmul.f32 %v2515_v7, %v4458_v32  ;;  %v2507_v25 = vrot.slane %v4711_v40, %v3533_v55  ;;  %v2511_v57 = vrot.slane %v4705_v4, %v3533_v55 }
 0x1fd   : > { %v2385_v21 = vadd.f32 %v2382_v20, %v2360_v49  ;;  %v2387_v62 = vadd.f32 %v2384_v42, %v2362_v29  ;;  %v2543_v61 = vmul.f32 %v2540_v13, %v4546_v6  ;;  %v2640_v43 = vrot.slane %v4671_v0, %v3689_v23 }
 0x1fe   : > { %v2461_v26 = vadd.f32 %v4617_v38, %v2436_v22  ;;  %v2532_v31 = vrot.slane %v4711_v40, %v3543_v59  ;;  %v2536_v56 = vrot.slane %v4705_v4, %v3543_v59  ;;  %v2557_v24 = vrot.slane %v4711_v40, %v3564_v11  ;;  %v4748_v10 = vpop.permute.xlu1 %2735 }
 0x1ff   : > { %v2410_v20 = vadd.f32 %v2407_v3, %v2385_v21  ;;  %v2412_v42 = vadd.f32 %v4608_v27, %v2387_v62  ;;  %v4740_v35 = vmul.f32 %v2640_v43, %v4566_v5  ;;  %v2561_v38 = vrot.slane %v4705_v4, %v3564_v11 }
 0x200   : > { %v2486_v50 = vadd.f32 %v2483_v54, %v2461_v26  ;;  %v2516_v2 = vmul.f32 %v2507_v25, %v4458_v32  ;;  %v2517_v41 = vmul.f32 %v2511_v57, %v4458_v32  ;;  %v2582_v63 = vrot.slane %v4711_v40, %v3571_v18  ;;  %v4765_v25 = vpop.permute.xlu0 %2810 }
 0x201   : > { %v2435_v60 = vadd.f32 %v2432_v45, %v2410_v20  ;;  %v2437_v3 = vadd.f32 %v2434_v15, %v2412_v42  ;;  %v2565_v27 = vrot.slane %v4671_v0, %v3564_v11  ;;  %v2586_v53 = vrot.slane %v4705_v4, %v3571_v18 }
 0x202   : > { %v2520_v7 = vadd.f32 %v2517_v41, %v2486_v50  ;;  %v2541_v36 = vmul.f32 %v2532_v31, %v4546_v6  ;;  %v2542_v16 = vmul.f32 %v2536_v56, %v4546_v6  ;;  %v2566_v32 = vmul.f32 %v2557_v24, %v4623_v58 }
 0x203   : > { %v2460_v54 = vadd.f32 %v4614_v19, %v2435_v60  ;;  %v2462_v52 = vadd.f32 %v4628_v34, %v2437_v3  ;;  %v2567_v45 = vmul.f32 %v2561_v38, %v4623_v58  ;;  %v2568_v15 = vmul.f32 %v2565_v27, %v4623_v58 }
 0x204   : > { %v2545_v49 = vadd.f32 %v2542_v16, %v2520_v7  ;;  %v2591_v29 = vmul.f32 %v2582_v63, %v4526_v17  ;;  %v2592_v13 = vmul.f32 %v2586_v53, %v4526_v17  ;;  %v2607_v22 = vrot.slane %v4711_v40, %v3634_v33  ;;  %v4797_v3 = vpop.permute.xlu0 %2869 }
 0x205   : > { %v2485_v6 = vadd.f32 %v2482_v30, %v2460_v54  ;;  %v2487_v57 = vadd.f32 %v2484_v1, %v2462_v52  ;;  %v2611_v19 = vrot.slane %v4705_v4, %v3634_v33  ;;  %v2632_v34 = vrot.slane %v4711_v40, %v3689_v23  ;;  %v4781_v1 = vpop.permute.xlu1 %2785 }
 0x206   : > { %v2570_v21 = vadd.f32 %v2567_v45, %v2545_v49  ;;  %v2615_v58 = vrot.slane %v4671_v0, %v3634_v33  ;;  %v4777_v17 = vsel %vm1142_vm6, %v4694_v39, %v4658_v12  ;;  %v2636_v30 = vrot.slane %v4705_v4, %v3689_v23 }
 0x207   : > { %v2521_v62 = vadd.f32 %v2518_v47, %v2487_v57  ;;  %v2519_v43 = vadd.f32 %v2516_v2, %v2485_v6  ;;  %v2616_v26 = vmul.f32 %v2607_v22, %v4647_v44  ;;  %v2617_v31 = vmul.f32 %v2611_v19, %v4647_v44 }
 0x208   : > { %v2595_v56 = vadd.f32 %v2592_v13, %v2570_v21  ;;  %v2618_v24 = vmul.f32 %v2615_v58, %v4647_v44  ;;  %v2641_v20 = vmul.f32 %v2632_v34, %v4566_v5  ;;  %v2657_v42 = vrot.slane %v4711_v40, %v3677_v14  ;;  %v4837_v57 = vpop.permute.xlu0 %2856 }
 0x209   : > { %v2546_v38 = vadd.f32 %v2543_v61, %v2521_v62  ;;  %v2544_v50 = vadd.f32 %v2541_v36, %v2519_v43  ;;  %v2661_v41 = vrot.slane %v4705_v4, %v3677_v14  ;;  %v2774_v47 = vrot.slane %v4777_v17, %v3571_v18  ;;  %v4811_v36 = vpop.permute.xlu1 %2835 }
 0x20a   : > { %v2620_v2 = vadd.f32 %v2617_v31, %v2595_v56  ;;  %v2642_v63 = vmul.f32 %v2636_v30, %v4566_v5  ;;  %v2665_v60 = vrot.slane %v4671_v0, %v3677_v14  ;;  %v2666_v44 = vmul.f32 %v2657_v42, %v4673_v46 }
 0x20b   : > { %v2569_v27 = vadd.f32 %v2566_v32, %v2544_v50  ;;  %v2571_v40 = vadd.f32 %v2568_v15, %v2546_v38  ;;  %v2667_v61 = vmul.f32 %v2661_v41, %v4673_v46  ;;  %v2699_v4 = vrot.slane %v4777_v17, %v3533_v55 }
 0x20c   : > { %v2645_v53 = vadd.f32 %v2642_v63, %v2620_v2  ;;  %v2668_v7 = vmul.f32 %v2665_v60, %v4673_v46  ;;  %v2724_v5 = vrot.slane %v4777_v17, %v3543_v59  ;;  %v4809_v0 = vsel %vm1142_vm6, %v4724_v8, %v4694_v39 }
 0x20d   : > { %v2594_v16 = vadd.f32 %v2591_v29, %v2569_v27  ;;  %v2596_v32 = vadd.f32 %v4715_v37, %v2571_v40  ;;  %v2777_v54 = vmul.f32 %v2774_v47, %v4736_v9  ;;  %v4819_v46 = vsel %vm1142_vm6, %v4658_v12, %v4724_v8  ;;  %v4846_v31 = vpop.permute.xlu1 %2894  ;;  %v2861_v40 = vpop.permute.xlu0 %2860 }
 0x20e   : > { %v2670_v52 = vadd.f32 %v2667_v61, %v2645_v53  ;;  %v2824_v45 = vrot.slane %v4777_v17, %v3689_v23  ;;  %v2691_v39 = vrot.slane %v4819_v46, %v3533_v55  ;;  %v2695_v15 = vrot.slane %v4809_v0, %v3533_v55 }
 0x20f   : > { %v2619_v49 = vadd.f32 %v2616_v26, %v2594_v16  ;;  %v2621_v37 = vadd.f32 %v2618_v24, %v2596_v32  ;;  %v2702_v29 = vmul.f32 %v2699_v4, %v4621_v28  ;;  %v2720_v13 = vrot.slane %v4809_v0, %v3543_v59 }
 0x210   : > { %v2701_v12 = vmul.f32 %v2695_v15, %v4621_v28  ;;  %v2716_v8 = vrot.slane %v4819_v46, %v3543_v59  ;;  %v2741_v22 = vrot.slane %v4819_v46, %v3564_v11  ;;  %v2745_v6 = vrot.slane %v4809_v0, %v3564_v11 }
 0x211   : > { %v2644_v19 = vadd.f32 %v2641_v20, %v2619_v49  ;;  %v2646_v34 = vadd.f32 %v4740_v35, %v2621_v37  ;;  %v2727_v21 = vmul.f32 %v2724_v5, %v4696_v51  ;;  %v2827_v58 = vmul.f32 %v2824_v45, %v4765_v25  ;;  %v2859_v32 = vpop.permute.xlu1 %2858 }
 0x212   : > { %v2700_v30 = vmul.f32 %v2691_v39, %v4621_v28  ;;  %v2704_v62 = vadd.f32 %v2701_v12, %v2670_v52  ;;  %v2726_v43 = vmul.f32 %v2720_v13, %v4696_v51  ;;  %v2766_v26 = vrot.slane %v4819_v46, %v3571_v18 }
 0x213   : > { %v2669_v56 = vadd.f32 %v2666_v44, %v2644_v19  ;;  %v2671_v24 = vadd.f32 %v2668_v7, %v2646_v34  ;;  %v2749_v20 = vrot.slane %v4777_v17, %v3564_v11  ;;  %v2770_v35 = vrot.slane %v4809_v0, %v3571_v18 }
 0x214   : > { %v2725_v42 = vmul.f32 %v2716_v8, %v4696_v51  ;;  %v2729_v38 = vadd.f32 %v2726_v43, %v2704_v62  ;;  %v2750_v28 = vmul.f32 %v2741_v22, %v4748_v10  ;;  %v2751_v50 = vmul.f32 %v2745_v6, %v4748_v10 }
 0x215   : > { %v2705_v41 = vadd.f32 %v2702_v29, %v2671_v24  ;;  %v2703_v47 = vadd.f32 %v2700_v30, %v2669_v56  ;;  %v2752_v2 = vmul.f32 %v2749_v20, %v4748_v10  ;;  %v2775_v63 = vmul.f32 %v2766_v26, %v4736_v9  ;;  %v2920_v26 = vpop.permute.xlu1 %2919  ;;  %v2945_v20 = vpop.permute.xlu0 %2944 }
 0x216   : > { %v2754_v60 = vadd.f32 %v2751_v50, %v2729_v38  ;;  %v2776_v44 = vmul.f32 %v2770_v35, %v4736_v9  ;;  %v2791_v27 = vrot.slane %v4819_v46, %v3634_v33  ;;  %v2795_v51 = vrot.slane %v4809_v0, %v3634_v33 }
 0x217   : > { %v2730_v61 = vadd.f32 %v2727_v21, %v2705_v41  ;;  %v2728_v4 = vadd.f32 %v2725_v42, %v2703_v47  ;;  %v2799_v53 = vrot.slane %v4777_v17, %v3634_v33  ;;  %v2816_v10 = vrot.slane %v4819_v46, %v3689_v23 }
 0x218   : > { %v2779_v7 = vadd.f32 %v2776_v44, %v2754_v60  ;;  %v2800_v5 = vmul.f32 %v2791_v27, %v4781_v1  ;;  %v2801_v9 = vmul.f32 %v2795_v51, %v4781_v1  ;;  %v2820_v16 = vrot.slane %v4809_v0, %v3689_v23 }
 0x219   : > { %v2753_v52 = vadd.f32 %v2750_v28, %v2728_v4  ;;  %v2755_v45 = vadd.f32 %v2752_v2, %v2730_v61  ;;  %v2802_v39 = vmul.f32 %v2799_v53, %v4781_v1  ;;  %v4874_v15 = vsel %vm1252_vm7, %v2861_v40, %v4837_v57  ;;  %v2970_v61 = vpop.permute.xlu1 %2969 }
 0x21a   : > { %v2804_v49 = vadd.f32 %v2801_v9, %v2779_v7  ;;  %v2826_v37 = vmul.f32 %v2820_v16, %v4765_v25  ;;  %v2841_v29 = vrot.slane %v4819_v46, %v3677_v14  ;;  %v2845_v13 = vrot.slane %v4809_v0, %v3677_v14 }
 0x21b   : > { %v2778_v12 = vadd.f32 %v2775_v63, %v2753_v52  ;;  %v2780_v8 = vadd.f32 %v2777_v54, %v2755_v45  ;;  %v2825_v22 = vmul.f32 %v2816_v10, %v4765_v25  ;;  %v2849_v1 = vrot.slane %v4777_v17, %v3677_v14  ;;  %v2995_v52 = vpop.permute.xlu0 %2994 }
 0x21c   : > { %v2829_v6 = vadd.f32 %v2826_v37, %v2804_v49  ;;  %v2850_v19 = vmul.f32 %v2841_v29, %v4811_v36  ;;  %v2851_v34 = vmul.f32 %v2845_v13, %v4811_v36  ;;  %v2883_v21 = vrot.slane %v4874_v15, %v3533_v55 }
 0x21d   : > { %v2803_v30 = vadd.f32 %v2800_v5, %v2778_v12  ;;  %v2805_v46 = vadd.f32 %v2802_v39, %v2780_v8  ;;  %v2852_v62 = vmul.f32 %v2849_v1, %v4811_v36  ;;  %v4891_v0 = vsel %vm1252_vm7, %v2859_v32, %v2861_v40 }
 0x21e   : > { %v2854_v25 = vadd.f32 %v2851_v34, %v2829_v6  ;;  %v2958_v17 = vrot.slane %v4874_v15, %v3571_v18  ;;  %v2908_v54 = vrot.slane %v4874_v15, %v3543_v59  ;;  %v3008_v43 = vrot.slane %v4874_v15, %v3689_v23 }
 0x21f   : > { %v2828_v56 = vadd.f32 %v2825_v22, %v2803_v30  ;;  %v2830_v24 = vadd.f32 %v2827_v58, %v2805_v46  ;;  %v2863_v36 = vsel %vm1252_vm7, %v4837_v57, %v2859_v32  ;;  %v2879_v35 = vrot.slane %v4891_v0, %v3533_v55 }
 0x220   : > { %v2886_v42 = vmul.f32 %v2883_v21, %v4797_v3  ;;  %v2875_v38 = vrot.slane %v2863_v36, %v3533_v55  ;;  %v2900_v28 = vrot.slane %v2863_v36, %v3543_v59  ;;  %v2904_v50 = vrot.slane %v4891_v0, %v3543_v59  ;;  %v3020_v21 = vpop.permute.xlu1 %3019 }
 0x221   : > { %v2853_v41 = vadd.f32 %v2850_v19, %v2828_v56  ;;  %v2855_v47 = vadd.f32 %v2852_v62, %v2830_v24  ;;  %v2885_v58 = vmul.f32 %v2879_v35, %v4797_v3  ;;  %v2929_v48 = vrot.slane %v4891_v0, %v3564_v11 }
 0x222   : > { %v2961_v57 = vmul.f32 %v2958_v17, %v2945_v20  ;;  %v2911_v2 = vmul.f32 %v2908_v54, %v4846_v31  ;;  %v2884_v63 = vmul.f32 %v2875_v38, %v4797_v3  ;;  %v2925_v60 = vrot.slane %v2863_v36, %v3564_v11 }
 0x223   : > { %v2889_v55 = vadd.f32 %v2886_v42, %v2855_v47  ;;  %v2888_v44 = vadd.f32 %v2885_v58, %v2854_v25  ;;  %v2910_v27 = vmul.f32 %v2904_v50, %v4846_v31  ;;  %v2933_v59 = vrot.slane %v4874_v15, %v3564_v11 }
 0x224   : > { %v2887_v51 = vadd.f32 %v2884_v63, %v2853_v41  ;;  %v2909_v40 = vmul.f32 %v2900_v28, %v4846_v31  ;;  %v2950_v4 = vrot.slane %v2863_v36, %v3571_v18  ;;  %v2954_v53 = vrot.slane %v4891_v0, %v3571_v18  ;;  %v5004_v63 = vld [vmem:[#allocation4_spill] sm:$0xff] }
 0x225   : > { %v2914_v10 = vadd.f32 %v2911_v2, %v2889_v55  ;;  %v2913_v3 = vadd.f32 %v2910_v27, %v2888_v44  ;;  %v2935_v7 = vmul.f32 %v2929_v48, %v2920_v26  ;;  %v2936_v5 = vmul.f32 %v2933_v59, %v2920_v26  ;;  %v5005_v55 = vld [vmem:[#allocation5_spill] sm:$0xff]  ;;  %v5006_v27 = vld [vmem:[#allocation3_spill] sm:$0xff] }
 0x226   : > { %v2912_v9 = vadd.f32 %v2909_v40, %v2887_v51  ;;  %v2934_v16 = vmul.f32 %v2925_v60, %v2920_v26  ;;  %v2975_v32 = vrot.slane %v2863_v36, %v3634_v33  ;;  %v2979_v11 = vrot.slane %v4891_v0, %v3634_v33  ;;  %v3255_v51 = vld [vmem:[%s3338_s12 + $0x8] sm:$0xf] }
 0x227   : > { %v2938_v45 = vadd.f32 %v2935_v7, %v2913_v3  ;;  %v2939_v31 = vadd.f32 %v2936_v5, %v2914_v10  ;;  %v2960_v39 = vmul.f32 %v2954_v53, %v2945_v20  ;;  %v2983_v49 = vrot.slane %v4874_v15, %v3634_v33  ;;  %v5007_v53 = vld [vmem:[#allocation2_spill] sm:$0xff] }
 0x228   : > { %v2937_v37 = vadd.f32 %v2934_v16, %v2912_v9  ;;  %v2959_v18 = vmul.f32 %v2950_v4, %v2945_v20  ;;  %v3000_v29 = vrot.slane %v2863_v36, %v3689_v23  ;;  %v3004_v13 = vrot.slane %v4891_v0, %v3689_v23 }
 0x229   : > { %v2963_v12 = vadd.f32 %v2960_v39, %v2938_v45  ;;  %v2964_v8 = vadd.f32 %v2961_v57, %v2939_v31  ;;  %v2985_v22 = vmul.f32 %v2979_v11, %v2970_v61  ;;  %v2986_v1 = vmul.f32 %v2983_v49, %v2970_v61 }
 0x22a   : > { %v3011_v6 = vmul.f32 %v3008_v43, %v2995_v52  ;;  %v2962_v19 = vadd.f32 %v2959_v18, %v2937_v37  ;;  %v2984_v34 = vmul.f32 %v2975_v32, %v2970_v61  ;;  %v3029_v30 = vrot.slane %v4891_v0, %v3677_v14  ;;  %v3044_v0 = vpop.permute.xlu0 %3043  ;;  %v3256_v61 = vld [vmem:[%s3338_s12] sm:$0xff] }
 0x22b   : > { %v2988_v46 = vadd.f32 %v2985_v22, %v2963_v12  ;;  %v2989_v33 = vadd.f32 %v2986_v1, %v2964_v8  ;;  %v3010_v62 = vmul.f32 %v3004_v13, %v2995_v52  ;;  %v3033_v25 = vrot.slane %v4874_v15, %v3677_v14  ;;  %v3053_v15 = vpop.permute.xlu1 %3052 }
 0x22c   : > { %v2987_v17 = vadd.f32 %v2984_v34, %v2962_v19  ;;  %v3009_v54 = vmul.f32 %v3000_v29, %v2995_v52  ;;  %v3025_v23 = vrot.slane %v2863_v36, %v3677_v14  ;;  %v3035_v24 = vmul.f32 %v3029_v30, %v3020_v21 }
 0x22d   : > { %v3013_v26 = vadd.f32 %v3010_v62, %v2988_v46  ;;  %v3014_v56 = vadd.f32 %v3011_v6, %v2989_v33  ;;  %v3036_v43 = vmul.f32 %v3033_v25, %v3020_v21 }
 0x22e   : > { %v3012_v20 = vadd.f32 %v3009_v54, %v2987_v17  ;;  %v3034_v35 = vmul.f32 %v3025_v23, %v3020_v21 }
 0x22f   : > { %v3038_v42 = vadd.f32 %v3035_v24, %v3013_v26  ;;  %v3039_v38 = vadd.f32 %v3036_v43, %v3014_v56 }
 0x230   : > { %v3037_v28 = vadd.f32 %v3034_v35, %v3012_v20 }
 0x231   : > { %v3047_v50 = vmul.f32 %v3044_v0, %v3038_v42  ;;  %v3048_v41 = vmul.f32 %v3044_v0, %v3039_v38 }
 0x232   : > { %v3046_v47 = vmul.f32 %v3044_v0, %v3037_v28 }
 0x233   : > { %v3056_v58 = vadd.f32 %v3053_v15, %v3047_v50  ;;  %v3057_v48 = vadd.f32 %v3053_v15, %v3048_v41 }
 0x234   : > { %v3055_v14 = vadd.f32 %v3053_v15, %v3046_v47 }
 0x235   : > { %v3059_v36 = vmax.f32 %v3056_v58, 0.0  ;;  %v3060_v57 = vmax.f32 %v3057_v48, 0.0 }
 0x236   : > { %v3058_v2 = vmax.f32 %v3055_v14, 0.0 }
 0x237   : > { %v3062_v60 = vmul.f32 %v3059_v36, %v5004_v63  ;;  %v3063_v44 = vmul.f32 %v3060_v57, %v5005_v55 }
 0x238   : > { %v3061_v59 = vmul.f32 %v3058_v2, %v5006_v27 }
 0x239   : > { %v3066_v40 = vadd.f32 %v3255_v51, %v3063_v44  ;;  %v3065_v10 = vadd.f32 %v3062_v60, %v5007_v53 }
 0x23a   : > { %v3064_v4 = vadd.f32 %v3256_v61, %v3061_v59 }
 0x23b   : > { %3072 = vst [vmem:[%s305_s25 + $0x8] sm:$0xf] %v3066_v40 }
 0x23c   : > { %v3069_v3 = vcombine.low %v3064_v4, %v3065_v10 }
 0x23e   : > { %3071 = vst [vmem:[%s305_s25] sm:$0xff] %v3069_v3 }
 0x23f PF: > { %s18_s27 = sadd.s32 1, %s3263_s27  }
 0x240   : > { %p15_p4 = scmp.ge.s32.totalorder %s18_s27, 4  }
 0x242   :  { %17 = sbr.rel (!%p15_p4) target bundleno = 1 (0x1), region = 179 }

// kernel: res_level_forward.4
= control target key start
LH: loop header
LB: loop body
LE: loop exit
PB: predicated region body
PF: predicated region fallthrough
CT: control target
= control target key end

     0   :  { %s3315_s24 = smov 0   ;;  %s4935_s0 = inlined_call_operand.vmem [shape: f32[2,4,384], index: 0, kind: input, shape index: {}]   ;;  %s4936_s1 = inlined_call_operand.vmem [shape: f32[1,384], index: 1, kind: input, shape index: {}]   ;;  %s4937_s2 = inlined_call_operand.vmem [shape: f32[9,4,7,1], index: 2, kind: input, shape index: {}]   ;;  %s4938_s3 = inlined_call_operand.vmem [shape: f32[9,7,4,1], index: 3, kind: input, shape index: {}]   ;;  %s4939_s4 = inlined_call_operand.vmem [shape: f32[7,1], index: 4, kind: input, shape index: {}]   ;;  %s4940_s5 = inlined_call_operand.vmem [shape: f32[7,1], index: 5, kind: input, shape index: {}]   ;;  %s4941_s6 = inlined_call_operand.vmem [shape: f32[2,4,1], index: 6, kind: output, shape index: {0}]   ;;  %s4942_s7 = inlined_call_operand.vmem [shape: f32[2,4,1], index: 7, kind: output, shape index: {1}]  }
   0x1 LB: > { %s3130_s25 = sadd.s32 4294967295, %s3264_s24   ;;  %p3134_p0 = scmp.ge.s32.totalorder %s3264_s24, 1  ;;  %s3264_s24 = sphi %s3315_s24, %s18_s24  }
   0x2   : > { %p240_p1 = scmp.lt.s32.totalorder %s3264_s24, 3 }
   0x4   : > { %p241_p2 = pnand %p3134_p0, %p240_p1 }
   0x6   : > { %244 = sbr.rel (%p241_p2) target bundleno = 715 (0x2cb), region = 44 }
   0xd   : > { %v309_v0 = vld [vmem:[%s4937_s2] sm:$0x7f]  ;;  %p275_p3 = scmp.lt.s32.totalorder %s3130_s25, 1  ;;  %v3266_v1 = vmov 0   ;;  %s3267_s9 = smov 19   ;;  %v303_v43 = vlaneseq  ;;  %vm3025_vm8 = vcmask 1043456  }
   0xe   : > { %3255 = vset.pattern.permute.xlu1 %v3266_v1  ;;  %3256 = vset.pattern.permute.xlu0 %v3266_v1  ;;  %v3139_v5 = vld [vmem:[%s4937_s2 + $0x10] sm:$0x7f]  ;;  %v3140_v6 = vld [vmem:[%s4937_s2 + $0x18] sm:$0x7f]  ;;  %v3138_v7 = vld [vmem:[%s4937_s2 + $0x8] sm:$0x7f] }
   0xf   : > { %312 = vperm.xlu1 %3255, %v309_v0   ;;  %s4991_s25 = smov (!%p275_p3, %s3130_s25), 1  ;;  %s3268_s16 = smov 18   ;;  %v3141_v8 = vld [vmem:[%s4937_s2 + $0x20] sm:$0x7f]  ;;  %v3143_v9 = vld [vmem:[%s4937_s2 + $0x30] sm:$0x7f] }
  0x10   : > { %s3237_s28 = smul.u32 12, %s4991_s25  ;;  %v3142_v10 = vld [vmem:[%s4937_s2 + $0x28] sm:$0x7f]  ;;  %v3144_v11 = vld [vmem:[%s4937_s2 + $0x38] sm:$0x7f]  ;;  %s3269_s27 = smov 17  }
  0x11   : > { %v3146_v12 = vld [vmem:[%s4937_s2 + $0x48] sm:$0x7f]  ;;  %v3145_v13 = vld [vmem:[%s4937_s2 + $0x40] sm:$0x7f]  ;;  %v3148_v14 = vld [vmem:[%s4937_s2 + $0x58] sm:$0x7f] }
  0x12   : > { %s279_s8 = scalar_lea.vmem %s4935_s0, %s3237_s28  ;;  %v3147_v15 = vld [vmem:[%s4937_s2 + $0x50] sm:$0x7f]  ;;  %s3270_s14 = smov 1   ;;  %v3149_v16 = vld [vmem:[%s4937_s2 + $0x60] sm:$0x7f]  ;;  %v3508_v48 = vand.u32 127, %v303_v43 }
  0x13   : > { %v3332_v2 = vld [vmem:[%s279_s8 + $0x8] sm:$0xf]  ;;  %v3334_v3 = vld [vmem:[%s279_s8] sm:$0xff]  ;;  %v3151_v17 = vld [vmem:[%s4937_s2 + $0x70] sm:$0x7f]  ;;  %s3271_s13 = smov 127  }
  0x14   : > { %301 = vrot.lane.b32.xlu1 %v3332_v2, %s3267_s9  ;;  %297 = vrot.lane.b32.xlu0 %v3334_v3, %s3267_s9  ;;  %v3342_v4 = vcombine.high %v3334_v3, %v3334_v3  ;;  %v3150_v18 = vld [vmem:[%s4937_s2 + $0x68] sm:$0x7f]  ;;  %v3153_v19 = vld [vmem:[%s4937_s2 + $0x80] sm:$0x7f]  ;;  %s3272_s26 = smov 111   ;;  %s3273_s17 = smov 110  }
  0x15   : > { %v3152_v20 = vld [vmem:[%s4937_s2 + $0x78] sm:$0x7f]  ;;  %v3155_v21 = vld [vmem:[%s4937_s2 + $0x90] sm:$0x7f]  ;;  %v3154_v22 = vld [vmem:[%s4937_s2 + $0x88] sm:$0x7f] }
  0x16   : > { %v3156_v23 = vld [vmem:[%s4937_s2 + $0x98] sm:$0x7f]  ;;  %v3158_v24 = vld [vmem:[%s4937_s2 + $0xa8] sm:$0x7f]  ;;  %v3157_v25 = vld [vmem:[%s4937_s2 + $0xa0] sm:$0x7f] }
  0x17   : > { %v3160_v26 = vld [vmem:[%s4937_s2 + $0xb8] sm:$0x7f]  ;;  %v3159_v27 = vld [vmem:[%s4937_s2 + $0xb0] sm:$0x7f]  ;;  %v3161_v28 = vld [vmem:[%s4937_s2 + $0xc0] sm:$0x7f] }
  0x18   : > { %362 = vperm.xlu1 %3255, %v3139_v5   ;;  %299 = vrot.lane.b32.xlu0 %v3342_v4, %s3267_s9  ;;  %v3163_v29 = vld [vmem:[%s4937_s2 + $0xd0] sm:$0x7f]  ;;  %v3162_v30 = vld [vmem:[%s4937_s2 + $0xc8] sm:$0x7f]  ;;  %v3164_v31 = vld [vmem:[%s4937_s2 + $0xd8] sm:$0x7f] }
  0x19   : > { %v3166_v32 = vld [vmem:[%s4937_s2 + $0xe8] sm:$0x7f]  ;;  %v3165_v33 = vld [vmem:[%s4937_s2 + $0xe0] sm:$0x7f]  ;;  %v3168_v34 = vld [vmem:[%s4937_s2 + $0xf8] sm:$0x7f] }
  0x1a   : > { %v3167_v35 = vld [vmem:[%s4937_s2 + $0xf0] sm:$0x7f]  ;;  %v3170_v36 = vld [vmem:[%s4937_s2 + $0x108] sm:$0x7f]  ;;  %v3169_v37 = vld [vmem:[%s4937_s2 + $0x100] sm:$0x7f] }
  0x1b   : > { %s3274_s12 = smov 109   ;;  %v3171_v38 = vld [vmem:[%s4937_s2 + $0x110] sm:$0x7f]  ;;  %v291_v39 = vld [vmem:[%s4939_s4] sm:$0x7f]  ;;  %v3513_v50 = vshrl.u32 %v303_v43, 7 }
  0x1c   : > { %387 = vperm.xlu1 %3255, %v3140_v6   ;;  %337 = vperm.xlu0 %3256, %v3138_v7   ;;  %v3172_v40 = vld [vmem:[%s4937_s2 + $0x118] sm:$0x7f]  ;;  %v3173_v41 = vld [vmem:[%s4938_s3 + $0x4] sm:$0xf]  ;;  %v3175_v45 = vld [vmem:[%s4938_s3 + $0xc] sm:$0xf] }
  0x1d   : > { %v292_v42 = vld [vmem:[%s4940_s5] sm:$0x7f]  ;;  %v3177_v49 = vld [vmem:[%s4938_s3 + $0x14] sm:$0xf]  ;;  %v3174_v51 = vld [vmem:[%s4938_s3 + $0x8] sm:$0xf] }
  0x1e   : > { %v1385_v47 = vld [vmem:[%s4938_s3] sm:$0xf]  ;;  %vm305_vm0 = vcmp.lt.s32.totalorder %v3508_v48, 19  ;;  %v3523_v55 = vsub.s32 0, %v3513_v50  ;;  %v3176_v58 = vld [vmem:[%s4938_s3 + $0x10] sm:$0xf] }
  0x1f   : > { %v3180_v54 = vld [vmem:[%s4938_s3 + $0x20] sm:$0xf]  ;;  %v3533_v59 = vsub.s32 1, %v3513_v50  ;;  %v3182_v0 = vld [vmem:[%s4938_s3 + $0x28] sm:$0xf]  ;;  %vm414_vm1 = vcmp.lt.s32.totalorder %v3508_v48, 18 }
  0x20   : > { %410 = vrot.lane.b32.xlu1 %v3342_v4, %s3268_s16  ;;  %408 = vrot.lane.b32.xlu0 %v3334_v3, %s3268_s16  ;;  %v3178_v5 = vld [vmem:[%s4938_s3 + $0x18] sm:$0xf]  ;;  %vm524_vm2 = vcmp.lt.s32.totalorder %v3508_v48, 17  ;;  %vm634_vm3 = vcmp.lt.s32.totalorder %v3508_v48, 1  ;;  %vm904_vm4 = vcmp.lt.s32.totalorder %v3508_v48, 127  ;;  %vm1014_vm5 = vcmp.lt.s32.totalorder %v3508_v48, 111 }
  0x21   : > { %vm1124_vm6 = vcmp.lt.s32.totalorder %v3508_v48, 110  ;;  %vm1234_vm7 = vcmp.lt.s32.totalorder %v3508_v48, 109  ;;  %s3136_s10 = sshll.u32 %s4991_s25, 2  ;;  %vm3033_vm9 = vcmask 3072  }
  0x22   : > { %s283_s15 = scalar_lea.vmem %s4941_s6, %s3136_s10  ;;  %s287_s19 = scalar_lea.vmem %s4942_s7, %s3136_s10 }
  0x24   : > { %422 = vperm.xlu1 %3255, %v3141_v8   ;;  %412 = vrot.lane.b32.xlu0 %v3332_v2, %s3268_s16 }
  0x28   : > { %472 = vperm.xlu1 %3255, %v3143_v9   ;;  %447 = vperm.xlu0 %3256, %v3142_v10   ;;  %v3554_v10 = vsub.s32 2, %v3513_v50 }
  0x2c   : > { %518 = vrot.lane.b32.xlu1 %v3334_v3, %s3269_s27  ;;  %497 = vperm.xlu0 %3256, %v3144_v11  }
  0x30   : > { %522 = vrot.lane.b32.xlu1 %v3332_v2, %s3269_s27  ;;  %520 = vrot.lane.b32.xlu0 %v3342_v4, %s3269_s27 }
  0x34   : > { %557 = vperm.xlu1 %3255, %v3146_v12   ;;  %532 = vperm.xlu0 %3256, %v3145_v13  }
  0x38   : > { %607 = vperm.xlu1 %3255, %v3148_v14   ;;  %582 = vperm.xlu0 %3256, %v3147_v15  }
  0x3c   : > { %630 = vrot.lane.b32.xlu1 %v3342_v4, %s3270_s14  ;;  %628 = vrot.lane.b32.xlu0 %v3334_v3, %s3270_s14 }
  0x40   : > { %642 = vperm.xlu1 %3255, %v3149_v16   ;;  %632 = vrot.lane.b32.xlu0 %v3332_v2, %s3270_s14  ;;  %v3184_v16 = vld [vmem:[%s4938_s3 + $0x30] sm:$0xf] }
  0x44   : > { %692 = vperm.xlu1 %3255, %v3151_v17   ;;  %667 = vperm.xlu0 %3256, %v3150_v18   ;;  %v3561_v17 = vsub.s32 3, %v3513_v50 }
  0x48   : > { %742 = vperm.xlu1 %3255, %v3153_v19   ;;  %717 = vperm.xlu0 %3256, %v3152_v20   ;;  %v3179_v19 = vld [vmem:[%s4938_s3 + $0x1c] sm:$0xf] }
  0x4c   : > { %822 = vperm.xlu1 %3255, %v3155_v21   ;;  %782 = vperm.xlu0 %3256, %v3154_v22  }
  0x50   : > { %898 = vrot.lane.b32.xlu1 %v3334_v3, %s3271_s13  ;;  %862 = vperm.xlu0 %3256, %v3156_v23  }
  0x54   : > { %902 = vrot.lane.b32.xlu1 %v3332_v2, %s3271_s13  ;;  %900 = vrot.lane.b32.xlu0 %v3342_v4, %s3271_s13 }
  0x58   : > { %937 = vperm.xlu1 %3255, %v3158_v24   ;;  %912 = vperm.xlu0 %3256, %v3157_v25  }
  0x5c   : > { %987 = vperm.xlu1 %3255, %v3160_v26   ;;  %962 = vperm.xlu0 %3256, %v3159_v27  }
  0x60   : > { %1010 = vrot.lane.b32.xlu1 %v3342_v4, %s3272_s26  ;;  %1008 = vrot.lane.b32.xlu0 %v3334_v3, %s3272_s26 }
  0x64   : > { %1022 = vperm.xlu1 %3255, %v3161_v28   ;;  %1012 = vrot.lane.b32.xlu0 %v3332_v2, %s3272_s26 }
  0x68   : > { %1072 = vperm.xlu1 %3255, %v3163_v29   ;;  %1047 = vperm.xlu0 %3256, %v3162_v30  }
  0x6c   : > { %1118 = vrot.lane.b32.xlu1 %v3334_v3, %s3273_s17  ;;  %1097 = vperm.xlu0 %3256, %v3164_v31  }
  0x70   : > { %1122 = vrot.lane.b32.xlu1 %v3332_v2, %s3273_s17  ;;  %1120 = vrot.lane.b32.xlu0 %v3342_v4, %s3273_s17 }
  0x74   : > { %1157 = vperm.xlu1 %3255, %v3166_v32   ;;  %1132 = vperm.xlu0 %3256, %v3165_v33   ;;  %v3186_v32 = vld [vmem:[%s4938_s3 + $0x38] sm:$0xf] }
  0x78   : > { %1207 = vperm.xlu1 %3255, %v3168_v34   ;;  %1182 = vperm.xlu0 %3256, %v3167_v35  }
  0x7c   : > { %1267 = vperm.xlu1 %3255, %v3170_v36   ;;  %1242 = vperm.xlu0 %3256, %v3169_v37   ;;  %v3181_v36 = vld [vmem:[%s4938_s3 + $0x24] sm:$0xf] }
  0x80   : > { %1230 = vrot.lane.b32.xlu1 %v3342_v4, %s3274_s12  ;;  %1228 = vrot.lane.b32.xlu0 %v3334_v3, %s3274_s12 }
  0x84   : > { %1292 = vperm.xlu1 %3255, %v3171_v38   ;;  %1232 = vrot.lane.b32.xlu0 %v3332_v2, %s3274_s12 }
  0x86   : > { %v298_v46 = vpop.permute.xlu0 %297 }
  0x88   : > { %1340 = vperm.xlu1 %3255, %v291_v39   ;;  %1317 = vperm.xlu0 %3256, %v3172_v40  }
  0x8a   : > { %v300_v53 = vpop.permute.xlu0 %299 }
  0x8b   : > { %v3537_v60 = vsel %vm305_vm0, %v298_v46, %v300_v53 }
  0x8c   : > { %1413 = vperm.xlu1 %3255, %v3173_v41   ;;  %1348 = vperm.xlu0 %3256, %v292_v42   ;;  %v322_v1 = vrot.slane %v3537_v60, %v3523_v55  ;;  %v347_v6 = vrot.slane %v3537_v60, %v3533_v59  ;;  %v372_v26 = vrot.slane %v3537_v60, %v3554_v10 }
  0x8d   : > { %v397_v37 = vrot.slane %v3537_v60, %v3561_v17 }
  0x8e   : > { %v313_v44 = vpop.permute.xlu1 %312 }
  0x8f   : > { %v328_v18 = vmul.f32 %v322_v1, %v313_v44 }
  0x90   : > { %1463 = vperm.xlu1 %3255, %v3175_v45   ;;  %1388 = vperm.xlu0 %3256, %v1385_v47  }
  0x92   : > { %v302_v52 = vpop.permute.xlu1 %301 }
  0x93   : > { %v306_v56 = vsel %vm305_vm0, %v300_v53, %v302_v52  ;;  %v308_v57 = vsel %vm305_vm0, %v302_v52, %v298_v46  ;;  %v3189_v53 = vld [vmem:[%s4938_s3 + $0x44] sm:$0xf] }
  0x94   : > { %1513 = vperm.xlu1 %3255, %v3177_v49   ;;  %1438 = vperm.xlu0 %3256, %v3174_v51   ;;  %v318_v62 = vrot.slane %v308_v57, %v3523_v55  ;;  %v326_v63 = vrot.slane %v306_v56, %v3523_v55  ;;  %v343_v4 = vrot.slane %v308_v57, %v3533_v59 }
  0x95   : > { %v351_v7 = vrot.slane %v306_v56, %v3533_v59  ;;  %v368_v20 = vrot.slane %v308_v57, %v3554_v10  ;;  %v376_v21 = vrot.slane %v306_v56, %v3554_v10  ;;  %v393_v29 = vrot.slane %v308_v57, %v3561_v17 }
  0x96   : > { %v327_v12 = vmul.f32 %v318_v62, %v313_v44  ;;  %v329_v13 = vmul.f32 %v326_v63, %v313_v44  ;;  %v401_v33 = vrot.slane %v306_v56, %v3561_v17 }
  0x97   : > { %v363_v61 = vpop.permute.xlu1 %362 }
  0x98   : > { %1597 = vperm.xlu1 %3255, %v3180_v54   ;;  %1488 = vperm.xlu0 %3256, %v3176_v58   ;;  %v377_v30 = vmul.f32 %v368_v20, %v363_v61  ;;  %v379_v31 = vmul.f32 %v376_v21, %v363_v61  ;;  %v378_v34 = vmul.f32 %v372_v26, %v363_v61  ;;  %v3183_v58 = vld [vmem:[%s4938_s3 + $0x2c] sm:$0xf]  ;;  %v3193_v26 = vld [vmem:[%s4938_s3 + $0x54] sm:$0xf] }
  0x9b   : > { %v388_v8 = vpop.permute.xlu1 %387  ;;  %v338_v9 = vpop.permute.xlu0 %337 }
  0x9c   : > { %v352_v11 = vmul.f32 %v343_v4, %v338_v9  ;;  %1647 = vperm.xlu1 %3255, %v3182_v0   ;;  %v353_v14 = vmul.f32 %v347_v6, %v338_v9  ;;  %v354_v15 = vmul.f32 %v351_v7, %v338_v9  ;;  %1538 = vperm.xlu0 %3256, %v3178_v5  }
  0x9d   : > { %v402_v38 = vmul.f32 %v393_v29, %v388_v8  ;;  %v404_v43 = vmul.f32 %v401_v33, %v388_v8  ;;  %v403_v54 = vmul.f32 %v397_v37, %v388_v8 }
  0x9e   : > { %v355_v22 = vadd.f32 %v352_v11, %v327_v12  ;;  %v357_v23 = vadd.f32 %v354_v15, %v329_v13  ;;  %v356_v27 = vadd.f32 %v353_v14, %v328_v18  ;;  %v3191_v12 = vld [vmem:[%s4938_s3 + $0x4c] sm:$0xf]  ;;  %v3185_v14 = vld [vmem:[%s4938_s3 + $0x34] sm:$0xf] }
  0x9f   : > { %v411_v24 = vpop.permute.xlu1 %410  ;;  %v409_v25 = vpop.permute.xlu0 %408 }
  0xa0   : > { %v3572_v28 = vsel %vm414_vm1, %v409_v25, %v411_v24  ;;  %1697 = vperm.xlu1 %3255, %v3184_v16   ;;  %1572 = vperm.xlu0 %3256, %v3179_v19   ;;  %v380_v39 = vadd.f32 %v377_v30, %v355_v22  ;;  %v382_v40 = vadd.f32 %v379_v31, %v357_v23  ;;  %v3187_v30 = vld [vmem:[%s4938_s3 + $0x3c] sm:$0xf] }
  0xa1   : > { %v432_v35 = vrot.slane %v3572_v28, %v3523_v55  ;;  %v381_v44 = vadd.f32 %v378_v34, %v356_v27  ;;  %v457_v56 = vrot.slane %v3572_v28, %v3533_v59  ;;  %v482_v20 = vrot.slane %v3572_v28, %v3554_v10 }
  0xa2   : > { %v405_v63 = vadd.f32 %v402_v38, %v380_v39  ;;  %v407_v0 = vadd.f32 %v404_v43, %v382_v40  ;;  %v507_v22 = vrot.slane %v3572_v28, %v3561_v17 }
  0xa3   : > { %v423_v41 = vpop.permute.xlu1 %422  ;;  %v413_v42 = vpop.permute.xlu0 %412  ;;  %v406_v4 = vadd.f32 %v403_v54, %v381_v44 }
  0xa4   : > { %v415_v45 = vsel %vm414_vm1, %v411_v24, %v413_v42  ;;  %v417_v46 = vsel %vm414_vm1, %v413_v42, %v409_v25  ;;  %1756 = vperm.xlu1 %3255, %v3186_v32   ;;  %1622 = vperm.xlu0 %3256, %v3181_v36   ;;  %v438_v57 = vmul.f32 %v432_v35, %v423_v41 }
  0xa5   : > { %v428_v47 = vrot.slane %v417_v46, %v3523_v55  ;;  %v436_v49 = vrot.slane %v415_v45, %v3523_v55  ;;  %v453_v51 = vrot.slane %v417_v46, %v3533_v59  ;;  %v461_v52 = vrot.slane %v415_v45, %v3533_v59 }
  0xa6   : > { %v478_v5 = vrot.slane %v417_v46, %v3554_v10  ;;  %v441_v13 = vadd.f32 %v438_v57, %v406_v4  ;;  %v486_v15 = vrot.slane %v415_v45, %v3554_v10  ;;  %v503_v23 = vrot.slane %v417_v46, %v3561_v17 }
  0xa7   : > { %v437_v60 = vmul.f32 %v428_v47, %v423_v41  ;;  %v439_v61 = vmul.f32 %v436_v49, %v423_v41  ;;  %v473_v62 = vpop.permute.xlu1 %472  ;;  %v448_v1 = vpop.permute.xlu0 %447  ;;  %v511_v27 = vrot.slane %v415_v45, %v3561_v17  ;;  %v3188_v45 = vld [vmem:[%s4938_s3 + $0x40] sm:$0xf]  ;;  %v3645_v46 = vsub.s32 4, %v3513_v50 }
  0xa8   : > { %v462_v6 = vmul.f32 %v453_v51, %v448_v1  ;;  %1831 = vperm.xlu1 %3255, %v3189_v53   ;;  %v463_v9 = vmul.f32 %v457_v56, %v448_v1  ;;  %v464_v11 = vmul.f32 %v461_v52, %v448_v1  ;;  %1672 = vperm.xlu0 %3256, %v3183_v58  }
  0xa9   : > { %v440_v7 = vadd.f32 %v437_v60, %v405_v63  ;;  %v442_v8 = vadd.f32 %v439_v61, %v407_v0  ;;  %v487_v24 = vmul.f32 %v478_v5, %v473_v62  ;;  %v488_v29 = vmul.f32 %v482_v20, %v473_v62  ;;  %v3190_v0 = vld [vmem:[%s4938_s3 + $0x48] sm:$0xf] }
  0xaa   : > { %v466_v21 = vadd.f32 %v463_v9, %v441_v13  ;;  %v489_v31 = vmul.f32 %v486_v15, %v473_v62  ;;  %v748_v52 = vrot.slane %v3334_v3, %v3523_v55  ;;  %v752_v1 = vrot.slane %v3334_v3, %v3645_v46 }
  0xab   : > { %v465_v16 = vadd.f32 %v462_v6, %v440_v7  ;;  %v519_v18 = vpop.permute.xlu1 %518  ;;  %v498_v19 = vpop.permute.xlu0 %497  ;;  %v467_v25 = vadd.f32 %v464_v11, %v442_v8  ;;  %v756_v8 = vrot.slane %v3332_v2, %v3523_v55  ;;  %v3664_v9 = vsub.s32 6, %v3513_v50 }
  0xac   : > { %1881 = vperm.xlu1 %3255, %v3191_v12   ;;  %1722 = vperm.xlu0 %3256, %v3185_v14   ;;  %v512_v33 = vmul.f32 %v503_v23, %v498_v19  ;;  %v513_v28 = vmul.f32 %v507_v22, %v498_v19  ;;  %v491_v36 = vadd.f32 %v488_v29, %v466_v21 }
  0xad   : > { %v490_v32 = vadd.f32 %v487_v24, %v465_v16  ;;  %v492_v40 = vadd.f32 %v489_v31, %v467_v25  ;;  %v514_v41 = vmul.f32 %v511_v27, %v498_v19  ;;  %v3676_v19 = vsub.s32 5, %v3513_v50  ;;  %v3192_v24 = vld [vmem:[%s4938_s3 + $0x50] sm:$0xf] }
  0xae   : > { %v516_v53 = vadd.f32 %v513_v28, %v491_v36  ;;  %v3685_v31 = vrot.slane %v756_v8, %v3523_v55  ;;  %v832_v28 = vrot.slane %v3334_v3, %v3664_v9 }
  0xaf   : > { %v523_v34 = vpop.permute.xlu1 %522  ;;  %v521_v35 = vpop.permute.xlu0 %520  ;;  %v515_v47 = vadd.f32 %v512_v33, %v490_v32  ;;  %v517_v58 = vadd.f32 %v514_v41, %v492_v40  ;;  %v828_v33 = vrot.slane %v3334_v3, %v3554_v10  ;;  %v788_v41 = vrot.slane %v3334_v3, %v3533_v59 }
  0xb0   : > { %v3625_v37 = vsel %vm524_vm2, %v523_v34, %v519_v18  ;;  %v3629_v38 = vsel %vm524_vm2, %v521_v35, %v523_v34  ;;  %v3633_v39 = vsel %vm524_vm2, %v519_v18, %v521_v35  ;;  %1940 = vperm.xlu1 %3255, %v3193_v26   ;;  %1781 = vperm.xlu0 %3256, %v3187_v30  }
  0xb1   : > { %v538_v42 = vrot.slane %v3625_v37, %v3523_v55  ;;  %v542_v43 = vrot.slane %v3633_v39, %v3523_v55  ;;  %v546_v44 = vrot.slane %v3629_v38, %v3523_v55  ;;  %v563_v54 = vrot.slane %v3625_v37, %v3533_v59 }
  0xb2   : > { %v567_v56 = vrot.slane %v3633_v39, %v3533_v59  ;;  %v571_v60 = vrot.slane %v3629_v38, %v3533_v59  ;;  %v588_v11 = vrot.slane %v3625_v37, %v3554_v10  ;;  %v592_v12 = vrot.slane %v3633_v39, %v3554_v10 }
  0xb3   : > { %v558_v49 = vpop.permute.xlu1 %557  ;;  %v533_v51 = vpop.permute.xlu0 %532  ;;  %v596_v15 = vrot.slane %v3629_v38, %v3554_v10  ;;  %v3673_v18 = vrot.slane %v748_v52, %v3523_v55  ;;  %v3682_v30 = vrot.slane %v752_v1, %v3523_v55  ;;  %v836_v34 = vrot.slane %v3332_v2, %v3554_v10 }
  0xb4   : > { %v547_v57 = vmul.f32 %v538_v42, %v533_v51  ;;  %v548_v61 = vmul.f32 %v542_v43, %v533_v51  ;;  %v549_v62 = vmul.f32 %v546_v44, %v533_v51  ;;  %1806 = vperm.xlu0 %3256, %v3188_v45   ;;  %v572_v13 = vmul.f32 %v563_v54, %v558_v49  ;;  %v3194_v45 = vld [vmem:[%s4938_s3 + $0x58] sm:$0xf] }
  0xb5   : > { %v573_v14 = vmul.f32 %v567_v56, %v558_v49  ;;  %v574_v16 = vmul.f32 %v571_v60, %v558_v49  ;;  %v613_v35 = vrot.slane %v3625_v37, %v3561_v17  ;;  %v617_v36 = vrot.slane %v3633_v39, %v3561_v17 }
  0xb6   : > { %v550_v63 = vadd.f32 %v547_v57, %v515_v47  ;;  %v551_v4 = vadd.f32 %v548_v61, %v516_v53  ;;  %v552_v5 = vadd.f32 %v549_v62, %v517_v58  ;;  %v621_v42 = vrot.slane %v3629_v38, %v3561_v17 }
  0xb7   : > { %v608_v6 = vpop.permute.xlu1 %607  ;;  %v583_v7 = vpop.permute.xlu0 %582  ;;  %v792_v37 = vrot.slane %v3334_v3, %v3676_v19  ;;  %v796_v53 = vrot.slane %v3332_v2, %v3533_v59 }
  0xb8   : > { %1856 = vperm.xlu0 %3256, %v3190_v0   ;;  %v575_v20 = vadd.f32 %v572_v13, %v550_v63  ;;  %v576_v21 = vadd.f32 %v573_v14, %v551_v4  ;;  %v597_v22 = vmul.f32 %v588_v11, %v583_v7  ;;  %v598_v23 = vmul.f32 %v592_v12, %v583_v7 }
  0xb9   : > { %v577_v25 = vadd.f32 %v574_v16, %v552_v5  ;;  %v599_v26 = vmul.f32 %v596_v15, %v583_v7  ;;  %v622_v39 = vmul.f32 %v613_v35, %v608_v6  ;;  %v623_v47 = vmul.f32 %v617_v36, %v608_v6 }
  0xba   : > { %v600_v43 = vadd.f32 %v597_v22, %v575_v20  ;;  %v601_v44 = vadd.f32 %v598_v23, %v576_v21  ;;  %v624_v54 = vmul.f32 %v621_v42, %v608_v6  ;;  %v871_v16 = vsub.s32 7, %v3513_v50 }
  0xbb   : > { %v631_v27 = vpop.permute.xlu1 %630  ;;  %v629_v29 = vpop.permute.xlu0 %628  ;;  %v602_v49 = vadd.f32 %v599_v26, %v577_v25 }
  0xbc   : > { %v3689_v32 = vsel %vm634_vm3, %v629_v29, %v631_v27  ;;  %1906 = vperm.xlu0 %3256, %v3192_v24   ;;  %v625_v63 = vadd.f32 %v622_v39, %v600_v43  ;;  %v626_v1 = vadd.f32 %v623_v47, %v601_v44  ;;  %v807_v39 = vrot.slane %v792_v37, %v3533_v59 }
  0xbd   : > { %v652_v40 = vrot.slane %v3689_v32, %v3523_v55  ;;  %v677_v0 = vrot.slane %v3689_v32, %v3533_v59  ;;  %v627_v5 = vadd.f32 %v624_v54, %v602_v49  ;;  %v702_v13 = vrot.slane %v3689_v32, %v3554_v10 }
  0xbe   : > { %v727_v24 = vrot.slane %v3689_v32, %v3561_v17  ;;  %v811_v54 = vrot.slane %v796_v53, %v3533_v59  ;;  %v843_v53 = vrot.slane %v828_v33, %v3554_v10 }
  0xbf   : > { %v643_v51 = vpop.permute.xlu1 %642  ;;  %v633_v52 = vpop.permute.xlu0 %632 }
  0xc0   : > { %v658_v56 = vmul.f32 %v652_v40, %v643_v51  ;;  %v635_v38 = vsel %vm634_vm3, %v631_v27, %v633_v52  ;;  %v637_v57 = vsel %vm634_vm3, %v633_v52, %v629_v29  ;;  %1965 = vperm.xlu0 %3256, %v3194_v45   ;;  %v803_v45 = vrot.slane %v788_v41, %v3533_v59 }
  0xc1   : > { %v648_v58 = vrot.slane %v637_v57, %v3523_v55  ;;  %v656_v60 = vrot.slane %v635_v38, %v3523_v55  ;;  %v673_v61 = vrot.slane %v637_v57, %v3533_v59  ;;  %v681_v62 = vrot.slane %v635_v38, %v3533_v59 }
  0xc2   : > { %v698_v4 = vrot.slane %v637_v57, %v3554_v10  ;;  %v706_v8 = vrot.slane %v635_v38, %v3554_v10  ;;  %v661_v14 = vadd.f32 %v658_v56, %v626_v1  ;;  %v723_v25 = vrot.slane %v637_v57, %v3561_v17 }
  0xc3   : > { %v657_v6 = vmul.f32 %v648_v58, %v643_v51  ;;  %v659_v7 = vmul.f32 %v656_v60, %v643_v51  ;;  %v693_v11 = vpop.permute.xlu1 %692  ;;  %v668_v12 = vpop.permute.xlu0 %667  ;;  %v731_v44 = vrot.slane %v635_v38, %v3561_v17  ;;  %v868_v56 = vrot.slane %v3334_v3, %v3561_v17 }
  0xc4   : > { %v682_v15 = vmul.f32 %v673_v61, %v668_v12  ;;  %v683_v22 = vmul.f32 %v677_v0, %v668_v12  ;;  %v684_v23 = vmul.f32 %v681_v62, %v668_v12  ;;  %v707_v26 = vmul.f32 %v698_v4, %v693_v11 }
  0xc5   : > { %v660_v20 = vadd.f32 %v657_v6, %v625_v63  ;;  %v662_v21 = vadd.f32 %v659_v7, %v627_v5  ;;  %v708_v27 = vmul.f32 %v702_v13, %v693_v11  ;;  %v709_v29 = vmul.f32 %v706_v8, %v693_v11 }
  0xc6   : > { %v686_v36 = vadd.f32 %v683_v22, %v661_v14  ;;  %v872_v57 = vrot.slane %v3334_v3, %v871_v16  ;;  %v851_v7 = vrot.slane %v836_v34, %v3554_v10  ;;  %v883_v11 = vrot.slane %v868_v56, %v3561_v17 }
  0xc7   : > { %v685_v35 = vadd.f32 %v682_v15, %v660_v20  ;;  %v687_v40 = vadd.f32 %v684_v23, %v662_v21  ;;  %v743_v42 = vpop.permute.xlu1 %742  ;;  %v718_v43 = vpop.permute.xlu0 %717 }
  0xc8   : > { %v732_v50 = vmul.f32 %v723_v25, %v718_v43  ;;  %v711_v49 = vadd.f32 %v708_v27, %v686_v36  ;;  %v733_v51 = vmul.f32 %v727_v24, %v718_v43  ;;  %v734_v52 = vmul.f32 %v731_v44, %v718_v43 }
  0xc9   : > { %v710_v47 = vadd.f32 %v707_v26, %v685_v35  ;;  %v712_v32 = vadd.f32 %v709_v29, %v687_v40  ;;  %v772_v58 = vmul.f32 %v3673_v18, %v743_v42  ;;  %v773_v38 = vmul.f32 %v3682_v30, %v743_v42 }
  0xca   : > { %v736_v41 = vadd.f32 %v733_v51, %v711_v49  ;;  %v774_v62 = vmul.f32 %v3685_v31, %v743_v42  ;;  %v847_v18 = vrot.slane %v832_v28, %v3554_v10  ;;  %v876_v31 = vrot.slane %v3332_v2, %v3561_v17 }
  0xcb   : > { %v735_v60 = vadd.f32 %v732_v50, %v710_v47  ;;  %v823_v61 = vpop.permute.xlu1 %822  ;;  %v783_v37 = vpop.permute.xlu0 %782  ;;  %v737_v63 = vadd.f32 %v734_v52, %v712_v32  ;;  %v887_v12 = vrot.slane %v872_v57, %v3561_v17 }
  0xcc   : > { %v776_v1 = vadd.f32 %v773_v38, %v736_v41  ;;  %v812_v4 = vmul.f32 %v803_v45, %v783_v37  ;;  %v813_v5 = vmul.f32 %v807_v39, %v783_v37  ;;  %v814_v6 = vmul.f32 %v811_v54, %v783_v37 }
  0xcd   : > { %v775_v0 = vadd.f32 %v772_v58, %v735_v60  ;;  %v777_v30 = vadd.f32 %v774_v62, %v737_v63  ;;  %v852_v3 = vmul.f32 %v843_v53, %v823_v61  ;;  %v853_v28 = vmul.f32 %v847_v18, %v823_v61 }
  0xce   : > { %v816_v14 = vadd.f32 %v813_v5, %v776_v1  ;;  %v891_v16 = vrot.slane %v876_v31, %v3561_v17  ;;  %v854_v20 = vmul.f32 %v851_v7, %v823_v61 }
  0xcf   : > { %v815_v33 = vadd.f32 %v812_v4, %v775_v0  ;;  %v899_v8 = vpop.permute.xlu1 %898  ;;  %v863_v13 = vpop.permute.xlu0 %862  ;;  %v817_v15 = vadd.f32 %v814_v6, %v777_v30 }
  0xd0   : > { %v892_v22 = vmul.f32 %v883_v11, %v863_v13  ;;  %v893_v2 = vmul.f32 %v887_v12, %v863_v13  ;;  %v856_v24 = vadd.f32 %v853_v28, %v816_v14  ;;  %v894_v36 = vmul.f32 %v891_v16, %v863_v13 }
  0xd1   : > { %v855_v21 = vadd.f32 %v852_v3, %v815_v33  ;;  %v857_v35 = vadd.f32 %v854_v20, %v817_v15 }
  0xd2   : > { %v896_v45 = vadd.f32 %v893_v2, %v856_v24 }
  0xd3   : > { %v903_v34 = vpop.permute.xlu1 %902  ;;  %v901_v23 = vpop.permute.xlu0 %900  ;;  %v895_v50 = vadd.f32 %v892_v22, %v855_v21  ;;  %v897_v52 = vadd.f32 %v894_v36, %v857_v35 }
  0xd4   : > { %v907_v25 = vsel %vm904_vm4, %v903_v34, %v899_v8  ;;  %v905_v26 = vsel %vm904_vm4, %v901_v23, %v903_v34  ;;  %v906_v27 = vsel %vm904_vm4, %v899_v8, %v901_v23 }
  0xd5   : > { %v926_v29 = vrot.slane %v907_v25, %v3523_v55  ;;  %v918_v40 = vrot.slane %v906_v27, %v3523_v55  ;;  %v922_v42 = vrot.slane %v905_v26, %v3523_v55  ;;  %v943_v47 = vrot.slane %v906_v27, %v3533_v59 }
  0xd6   : > { %v947_v49 = vrot.slane %v905_v26, %v3533_v59  ;;  %v951_v54 = vrot.slane %v907_v25, %v3533_v59  ;;  %v968_v41 = vrot.slane %v906_v27, %v3554_v10  ;;  %v972_v61 = vrot.slane %v905_v26, %v3554_v10 }
  0xd7   : > { %v938_v43 = vpop.permute.xlu1 %937  ;;  %v913_v44 = vpop.permute.xlu0 %912  ;;  %v976_v63 = vrot.slane %v907_v25, %v3554_v10  ;;  %v993_v33 = vrot.slane %v906_v27, %v3561_v17  ;;  %v997_v11 = vrot.slane %v905_v26, %v3561_v17  ;;  %v1001_v12 = vrot.slane %v907_v25, %v3561_v17 }
  0xd8   : > { %v927_v39 = vmul.f32 %v918_v40, %v913_v44  ;;  %v928_v32 = vmul.f32 %v922_v42, %v913_v44  ;;  %v929_v51 = vmul.f32 %v926_v29, %v913_v44  ;;  %v952_v37 = vmul.f32 %v943_v47, %v938_v43 }
  0xd9   : > { %v953_v62 = vmul.f32 %v947_v49, %v938_v43  ;;  %v954_v53 = vmul.f32 %v951_v54, %v938_v43 }
  0xda   : > { %v930_v56 = vadd.f32 %v927_v39, %v895_v50  ;;  %v931_v57 = vadd.f32 %v928_v32, %v896_v45  ;;  %v932_v60 = vadd.f32 %v929_v51, %v897_v52 }
  0xdb   : > { %v988_v58 = vpop.permute.xlu1 %987  ;;  %v963_v38 = vpop.permute.xlu0 %962 }
  0xdc   : > { %v955_v0 = vadd.f32 %v952_v37, %v930_v56  ;;  %v956_v1 = vadd.f32 %v953_v62, %v931_v57  ;;  %v977_v4 = vmul.f32 %v968_v41, %v963_v38  ;;  %v978_v5 = vmul.f32 %v972_v61, %v963_v38 }
  0xdd   : > { %v957_v6 = vadd.f32 %v954_v53, %v932_v60  ;;  %v979_v31 = vmul.f32 %v976_v63, %v963_v38  ;;  %v1002_v13 = vmul.f32 %v993_v33, %v988_v58  ;;  %v1003_v16 = vmul.f32 %v997_v11, %v988_v58 }
  0xde   : > { %v980_v14 = vadd.f32 %v977_v4, %v955_v0  ;;  %v981_v3 = vadd.f32 %v978_v5, %v956_v1  ;;  %v1004_v25 = vmul.f32 %v1001_v12, %v988_v58 }
  0xdf   : > { %v1011_v18 = vpop.permute.xlu1 %1010  ;;  %v1009_v30 = vpop.permute.xlu0 %1008  ;;  %v982_v20 = vadd.f32 %v979_v31, %v957_v6 }
  0xe0   : > { %v1016_v7 = vsel %vm1014_vm5, %v1009_v30, %v1011_v18  ;;  %v1006_v29 = vadd.f32 %v1003_v16, %v981_v3  ;;  %v1005_v35 = vadd.f32 %v1002_v13, %v980_v14 }
  0xe1   : > { %v1028_v8 = vrot.slane %v1016_v7, %v3523_v55  ;;  %v1053_v26 = vrot.slane %v1016_v7, %v3533_v59  ;;  %v1007_v44 = vadd.f32 %v1004_v25, %v982_v20  ;;  %v1078_v52 = vrot.slane %v1016_v7, %v3554_v10 }
  0xe2   : > { %v1103_v60 = vrot.slane %v1016_v7, %v3561_v17 }
  0xe3   : > { %v1023_v28 = vpop.permute.xlu1 %1022  ;;  %v1013_v15 = vpop.permute.xlu0 %1012 }
  0xe4   : > { %v1015_v21 = vsel %vm1014_vm5, %v1011_v18, %v1013_v15  ;;  %v1017_v22 = vsel %vm1014_vm5, %v1013_v15, %v1009_v30  ;;  %v1037_v2 = vmul.f32 %v1028_v8, %v1023_v28 }
  0xe5   : > { %v1032_v34 = vrot.slane %v1015_v21, %v3523_v55  ;;  %v1036_v23 = vrot.slane %v1017_v22, %v3523_v55  ;;  %v1057_v24 = vrot.slane %v1015_v21, %v3533_v59  ;;  %v1061_v27 = vrot.slane %v1017_v22, %v3533_v59 }
  0xe6   : > { %v1040_v45 = vadd.f32 %v1037_v2, %v1005_v35  ;;  %v1082_v49 = vrot.slane %v1015_v21, %v3554_v10  ;;  %v1086_v54 = vrot.slane %v1017_v22, %v3554_v10  ;;  %v1107_v41 = vrot.slane %v1015_v21, %v3561_v17 }
  0xe7   : > { %v1038_v36 = vmul.f32 %v1032_v34, %v1023_v28  ;;  %v1039_v40 = vmul.f32 %v1036_v23, %v1023_v28  ;;  %v1073_v42 = vpop.permute.xlu1 %1072  ;;  %v1048_v43 = vpop.permute.xlu0 %1047  ;;  %v1111_v37 = vrot.slane %v1017_v22, %v3561_v17 }
  0xe8   : > { %v1062_v50 = vmul.f32 %v1053_v26, %v1048_v43  ;;  %v1063_v47 = vmul.f32 %v1057_v24, %v1048_v43  ;;  %v1064_v51 = vmul.f32 %v1061_v27, %v1048_v43  ;;  %v1087_v61 = vmul.f32 %v1078_v52, %v1073_v42 }
  0xe9   : > { %v1041_v39 = vadd.f32 %v1038_v36, %v1006_v29  ;;  %v1042_v32 = vadd.f32 %v1039_v40, %v1007_v44  ;;  %v1088_v62 = vmul.f32 %v1082_v49, %v1073_v42  ;;  %v1089_v53 = vmul.f32 %v1086_v54, %v1073_v42 }
  0xea   : > { %v1065_v56 = vadd.f32 %v1062_v50, %v1040_v45 }
  0xeb   : > { %v1119_v57 = vpop.permute.xlu1 %1118  ;;  %v1098_v58 = vpop.permute.xlu0 %1097  ;;  %v1066_v38 = vadd.f32 %v1063_v47, %v1041_v39  ;;  %v1067_v63 = vadd.f32 %v1064_v51, %v1042_v32 }
  0xec   : > { %v1090_v0 = vadd.f32 %v1087_v61, %v1065_v56  ;;  %v1112_v1 = vmul.f32 %v1103_v60, %v1098_v58  ;;  %v1113_v4 = vmul.f32 %v1107_v41, %v1098_v58  ;;  %v1114_v11 = vmul.f32 %v1111_v37, %v1098_v58 }
  0xed   : > { %v1091_v30 = vadd.f32 %v1088_v62, %v1066_v38  ;;  %v1092_v8 = vadd.f32 %v1089_v53, %v1067_v63 }
  0xee   : > { %v1115_v28 = vadd.f32 %v1112_v1, %v1090_v0 }
  0xef   : > { %v1123_v5 = vpop.permute.xlu1 %1122  ;;  %v1121_v18 = vpop.permute.xlu0 %1120  ;;  %v1116_v15 = vadd.f32 %v1113_v4, %v1091_v30  ;;  %v1117_v34 = vadd.f32 %v1114_v11, %v1092_v8 }
  0xf0   : > { %v1127_v6 = vsel %vm1124_vm6, %v1123_v5, %v1119_v57  ;;  %v1125_v31 = vsel %vm1124_vm6, %v1121_v18, %v1123_v5  ;;  %v1126_v7 = vsel %vm1124_vm6, %v1119_v57, %v1121_v18 }
  0xf1   : > { %v1146_v33 = vrot.slane %v1127_v6, %v3523_v55  ;;  %v1138_v12 = vrot.slane %v1126_v7, %v3523_v55  ;;  %v1142_v13 = vrot.slane %v1125_v31, %v3523_v55  ;;  %v1163_v20 = vrot.slane %v1126_v7, %v3533_v59 }
  0xf2   : > { %v1167_v21 = vrot.slane %v1125_v31, %v3533_v59  ;;  %v1171_v23 = vrot.slane %v1127_v6, %v3533_v59  ;;  %v1188_v35 = vrot.slane %v1126_v7, %v3554_v10  ;;  %v1192_v36 = vrot.slane %v1125_v31, %v3554_v10 }
  0xf3   : > { %v1158_v14 = vpop.permute.xlu1 %1157  ;;  %v1133_v3 = vpop.permute.xlu0 %1132  ;;  %v1196_v43 = vrot.slane %v1127_v6, %v3554_v10  ;;  %v1213_v54 = vrot.slane %v1126_v7, %v3561_v17  ;;  %v1217_v56 = vrot.slane %v1125_v31, %v3561_v17  ;;  %v1221_v41 = vrot.slane %v1127_v6, %v3561_v17 }
  0xf4   : > { %v1147_v16 = vmul.f32 %v1138_v12, %v1133_v3  ;;  %v1148_v22 = vmul.f32 %v1142_v13, %v1133_v3  ;;  %v1149_v2 = vmul.f32 %v1146_v33, %v1133_v3  ;;  %v1172_v40 = vmul.f32 %v1163_v20, %v1158_v14 }
  0xf5   : > { %v1173_v42 = vmul.f32 %v1167_v21, %v1158_v14  ;;  %v1174_v44 = vmul.f32 %v1171_v23, %v1158_v14 }
  0xf6   : > { %v1150_v24 = vadd.f32 %v1147_v16, %v1115_v28  ;;  %v1151_v25 = vadd.f32 %v1148_v22, %v1116_v15  ;;  %v1152_v29 = vadd.f32 %v1149_v2, %v1117_v34 }
  0xf7   : > { %v1208_v26 = vpop.permute.xlu1 %1207  ;;  %v1183_v27 = vpop.permute.xlu0 %1182 }
  0xf8   : > { %v1175_v50 = vadd.f32 %v1172_v40, %v1150_v24  ;;  %v1176_v45 = vadd.f32 %v1173_v42, %v1151_v25  ;;  %v1197_v39 = vmul.f32 %v1188_v35, %v1183_v27  ;;  %v1198_v47 = vmul.f32 %v1192_v36, %v1183_v27 }
  0xf9   : > { %v1177_v51 = vadd.f32 %v1174_v44, %v1152_v29  ;;  %v1199_v52 = vmul.f32 %v1196_v43, %v1183_v27  ;;  %v1222_v62 = vmul.f32 %v1213_v54, %v1208_v26  ;;  %v1223_v63 = vmul.f32 %v1217_v56, %v1208_v26 }
  0xfa   : > { %v1200_v57 = vadd.f32 %v1197_v39, %v1175_v50  ;;  %v1201_v58 = vadd.f32 %v1198_v47, %v1176_v45  ;;  %v1224_v1 = vmul.f32 %v1221_v41, %v1208_v26 }
  0xfb   : > { %v1268_v49 = vpop.permute.xlu1 %1267  ;;  %v1243_v32 = vpop.permute.xlu0 %1242  ;;  %v1202_v61 = vadd.f32 %v1199_v52, %v1177_v51 }
  0xfc   : > { %v1225_v5 = vadd.f32 %v1222_v62, %v1200_v57  ;;  %v1226_v18 = vadd.f32 %v1223_v63, %v1201_v58 }
  0xfd   : > { %v1227_v33 = vadd.f32 %v1224_v1, %v1202_v61  ;;  %v3196_v1 = vld [vmem:[%s4938_s3 + $0x60] sm:$0xf] }
  0xff   : > { %v1231_v38 = vpop.permute.xlu1 %1230  ;;  %v1229_v60 = vpop.permute.xlu0 %1228 }
 0x100   : > { %v1236_v37 = vsel %vm1234_vm7, %v1229_v60, %v1231_v38 }
 0x101   : > { %v1248_v53 = vrot.slane %v1236_v37, %v3523_v55  ;;  %v1273_v0 = vrot.slane %v1236_v37, %v3533_v59  ;;  %v1298_v4 = vrot.slane %v1236_v37, %v3554_v10  ;;  %v1323_v20 = vrot.slane %v1236_v37, %v3561_v17 }
 0x103   : > { %v1257_v30 = vmul.f32 %v1248_v53, %v1243_v32  ;;  %v1293_v31 = vpop.permute.xlu1 %1292  ;;  %v1233_v7 = vpop.permute.xlu0 %1232  ;;  %v1282_v6 = vmul.f32 %v1273_v0, %v1268_v49 }
 0x104   : > { %v1235_v8 = vsel %vm1234_vm7, %v1231_v38, %v1233_v7  ;;  %v1237_v11 = vsel %vm1234_vm7, %v1233_v7, %v1229_v60  ;;  %v1307_v28 = vmul.f32 %v1298_v4, %v1293_v31 }
 0x105   : > { %v1260_v12 = vadd.f32 %v1257_v30, %v1225_v5  ;;  %v1252_v13 = vrot.slane %v1235_v8, %v3523_v55  ;;  %v1256_v14 = vrot.slane %v1237_v11, %v3523_v55  ;;  %v1277_v3 = vrot.slane %v1235_v8, %v3533_v59  ;;  %v3198_v30 = vld [vmem:[%s4938_s3 + $0x68] sm:$0xf] }
 0x106   : > { %v1281_v15 = vrot.slane %v1237_v11, %v3533_v59  ;;  %v1302_v16 = vrot.slane %v1235_v8, %v3554_v10  ;;  %v1306_v34 = vrot.slane %v1237_v11, %v3554_v10  ;;  %v1327_v26 = vrot.slane %v1235_v8, %v3561_v17  ;;  %v3199_v8 = vld [vmem:[%s4938_s3 + $0x6c] sm:$0xf] }
 0x107   : > { %v1285_v21 = vadd.f32 %v1282_v6, %v1260_v12  ;;  %v1258_v22 = vmul.f32 %v1252_v13, %v1243_v32  ;;  %v1259_v2 = vmul.f32 %v1256_v14, %v1243_v32  ;;  %v1318_v23 = vpop.permute.xlu0 %1317  ;;  %v1283_v24 = vmul.f32 %v1277_v3, %v1268_v49  ;;  %v1341_v39 = vpop.permute.xlu1 %1340  ;;  %v290_v32 = vld [vmem:[%s4936_s1] sm:$0x7]  ;;  %v3201_v12 = vld [vmem:[%s4938_s3 + $0x74] sm:$0xf]  ;;  %v3202_v13 = vld [vmem:[%s4938_s3 + $0x78] sm:$0xf] }
 0x108   : > { %v1284_v25 = vmul.f32 %v1281_v15, %v1268_v49  ;;  %v1331_v27 = vrot.slane %v1237_v11, %v3561_v17  ;;  %v1332_v40 = vmul.f32 %v1323_v20, %v1318_v23  ;;  %v1308_v42 = vmul.f32 %v1302_v16, %v1293_v31  ;;  %v3200_v11 = vld [vmem:[%s4938_s3 + $0x70] sm:$0xf]  ;;  %v3203_v14 = vld [vmem:[%s4938_s3 + $0x7c] sm:$0xf]  ;;  %v3205_v3 = vld [vmem:[%s4938_s3 + $0x84] sm:$0xf] }
 0x109   : > { %v1310_v29 = vadd.f32 %v1307_v28, %v1285_v21  ;;  %v1261_v35 = vadd.f32 %v1258_v22, %v1226_v18  ;;  %v1262_v36 = vadd.f32 %v1259_v2, %v1227_v33  ;;  %v1309_v43 = vmul.f32 %v1306_v34, %v1293_v31  ;;  %v3195_v18 = vld [vmem:[%s4938_s3 + $0x5c] sm:$0xf]  ;;  %v3197_v33 = vld [vmem:[%s4938_s3 + $0x64] sm:$0xf]  ;;  %v3207_v28 = vld [vmem:[%s4938_s3 + $0x8c] sm:$0xf] }
 0x10a   : > { %v1333_v47 = vmul.f32 %v1327_v26, %v1318_v23  ;;  %v1334_v52 = vmul.f32 %v1331_v27, %v1318_v23  ;;  %v3839_v38 = vrot.slane %v290_v32, %v3523_v55  ;;  %v3842_v62 = vrot.slane %v290_v32, %v3533_v59  ;;  %v3204_v16 = vld [vmem:[%s4938_s3 + $0x80] sm:$0xf]  ;;  %v3206_v21 = vld [vmem:[%s4938_s3 + $0x88] sm:$0xf]  ;;  %v3210_v22 = vld [vmem:[%s4938_s3 + $0x98] sm:$0xf] }
 0x10b   : > { %v1286_v44 = vadd.f32 %v1283_v24, %v1261_v35  ;;  %v1287_v50 = vadd.f32 %v1284_v25, %v1262_v36  ;;  %v1335_v45 = vadd.f32 %v1332_v40, %v1310_v29  ;;  %v1349_v56 = vpop.permute.xlu0 %1348  ;;  %v3864_v31 = vrot.slane %v290_v32, %v3554_v10  ;;  %v3208_v2 = vld [vmem:[%s4938_s3 + $0x90] sm:$0xf]  ;;  %v3212_v23 = vld [vmem:[%s4938_s3 + $0xa0] sm:$0xf]  ;;  %v3938_v24 = vpop.permute.xlu1 %1413  ;;  %v3214_v26 = vld [vmem:[%s4938_s3 + $0xa8] sm:$0xf] }
 0x10c   : > { %4947 = vst [vmem:[#allocation2_spill] sm:$0xff] %v3839_v38  ;;  %4948 = vst [vmem:[#allocation3_spill] sm:$0xff] %v3842_v62  ;;  %v3209_v27 = vld [vmem:[%s4938_s3 + $0x94] sm:$0xf]  ;;  %v3211_v29 = vld [vmem:[%s4938_s3 + $0x9c] sm:$0xf] }
 0x10d   : > { %v1311_v49 = vadd.f32 %v1308_v42, %v1286_v44  ;;  %v1312_v51 = vadd.f32 %v1309_v43, %v1287_v50  ;;  %v1343_v54 = vmul.f32 %v1341_v39, %v1335_v45  ;;  %4949 = vst [vmem:[#allocation4_spill] sm:$0xff] %v3864_v31  ;;  %v3213_v40 = vld [vmem:[%s4938_s3 + $0xa4] sm:$0xf]  ;;  %v3217_v44 = vld [vmem:[%s4938_s3 + $0xb4] sm:$0xf] }
 0x10e   : > { %v3215_v50 = vld [vmem:[%s4938_s3 + $0xac] sm:$0xf]  ;;  %v3219_v45 = vld [vmem:[%s4938_s3 + $0xbc] sm:$0xf]  ;;  %v3221_v32 = vld [vmem:[%s4938_s3 + $0xc4] sm:$0xf] }
 0x10f   : > { %v1336_v57 = vadd.f32 %v1333_v47, %v1311_v49  ;;  %v1337_v58 = vadd.f32 %v1334_v52, %v1312_v51  ;;  %v1351_v60 = vadd.f32 %v1349_v56, %v1343_v54  ;;  %v3911_v15 = vpop.permute.xlu0 %1388  ;;  %v3953_v35 = vpop.permute.xlu1 %1463  ;;  %v3216_v49 = vld [vmem:[%s4938_s3 + $0xb0] sm:$0xf]  ;;  %v3218_v54 = vld [vmem:[%s4938_s3 + $0xb8] sm:$0xf] }
 0x111   : > { %v1344_v41 = vmul.f32 %v1341_v39, %v1336_v57  ;;  %v1354_v61 = vmax.f32 %v1351_v60, 0.0  ;;  %v1345_v37 = vmul.f32 %v1341_v39, %v1337_v58  ;;  %v3224_v60 = vld [vmem:[%s4938_s3 + $0xd0] sm:$0xf] }
 0x113   : > { %v1352_v63 = vadd.f32 %v1349_v56, %v1344_v41  ;;  %v3845_v53 = vmul.f32 %v3839_v38, %v1354_v61  ;;  %v1353_v4 = vadd.f32 %v1349_v56, %v1345_v37  ;;  %v3918_v20 = vpop.permute.xlu0 %1438  ;;  %v3962_v42 = vpop.permute.xlu1 %1513  ;;  %v3220_v56 = vld [vmem:[%s4938_s3 + $0xc0] sm:$0xf]  ;;  %v3222_v41 = vld [vmem:[%s4938_s3 + $0xc8] sm:$0xf] }
 0x115   : > { %v1355_v0 = vmax.f32 %v1352_v63, 0.0  ;;  %1376 = vrot.lane.b32.xlu1 %v3845_v53, %s3267_s9  ;;  %v1356_v7 = vmax.f32 %v1353_v4, 0.0  ;;  %v3226_v63 = vld [vmem:[%s4938_s3 + $0xd8] sm:$0xf] }
 0x117   : > { %v3853_v5 = vmul.f32 %v3842_v62, %v1355_v0  ;;  %v3870_v6 = vmul.f32 %v3864_v31, %v1356_v7  ;;  %v3933_v34 = vpop.permute.xlu0 %1488  ;;  %v3977_v39 = vpop.permute.xlu1 %1597  ;;  %v3228_v0 = vld [vmem:[%s4938_s3 + $0xe0] sm:$0xf] }
 0x119   : > { %1378 = vrot.lane.b32.xlu0 %v3853_v5, %s3267_s9  ;;  %2015 = vperm.xlu1 %3255, %v3196_v1   ;;  %v3223_v1 = vld [vmem:[%s4938_s3 + $0xcc] sm:$0xf] }
 0x11b   : > { %v3940_v25 = vpop.permute.xlu0 %1538  ;;  %v3989_v51 = vpop.permute.xlu1 %1647 }
 0x11d   : > { %1990 = vperm.xlu0 %3256, %v3195_v18   ;;  %2065 = vperm.xlu1 %3255, %v3198_v30   ;;  %v3225_v30 = vld [vmem:[%s4938_s3 + $0xd4] sm:$0xf] }
 0x11f   : > { %v3955_v36 = vpop.permute.xlu0 %1572  ;;  %v4001_v57 = vpop.permute.xlu1 %1697 }
 0x121   : > { %2040 = vperm.xlu0 %3256, %v3197_v33   ;;  %1380 = vrot.lane.b32.xlu1 %v3870_v6, %s3267_s9 }
 0x123   : > { %v3964_v43 = vpop.permute.xlu0 %1622  ;;  %v4013_v61 = vpop.permute.xlu1 %1756 }
 0x125   : > { %1561 = vrot.lane.b32.xlu0 %v3853_v5, %s3268_s16  ;;  %1559 = vrot.lane.b32.xlu1 %v3845_v53, %s3268_s16 }
 0x127   : > { %v3979_v47 = vpop.permute.xlu0 %1672  ;;  %v4028_v4 = vpop.permute.xlu1 %1831 }
 0x129   : > { %2090 = vperm.xlu0 %3256, %v3199_v8   ;;  %2115 = vperm.xlu1 %3255, %v3200_v11   ;;  %v3227_v8 = vld [vmem:[%s4938_s3 + $0xdc] sm:$0xf]  ;;  %v3231_v11 = vld [vmem:[%s4938_s3 + $0xec] sm:$0xf] }
 0x12b   : > { %v3991_v52 = vpop.permute.xlu0 %1722  ;;  %v4035_v7 = vpop.permute.xlu1 %1881 }
 0x12d   : > { %2140 = vperm.xlu0 %3256, %v3201_v12   ;;  %1563 = vrot.lane.b32.xlu1 %v3870_v6, %s3268_s16  ;;  %v3229_v12 = vld [vmem:[%s4938_s3 + $0xe4] sm:$0xf] }
 0x12f   : > { %v4003_v58 = vpop.permute.xlu0 %1781 }
 0x131   : > { %1745 = vrot.lane.b32.xlu0 %v3853_v5, %s3269_s27  ;;  %2165 = vperm.xlu1 %3255, %v3202_v13   ;;  %v4052_v13 = vpop.permute.xlu1 %1940 }
 0x133   : > { %v4015_v37 = vpop.permute.xlu0 %1806 }
 0x135   : > { %1929 = vrot.lane.b32.xlu0 %v3853_v5, %s3270_s14  ;;  %1743 = vrot.lane.b32.xlu1 %v3845_v53, %s3269_s27 }
 0x137   : > { %v4030_v18 = vpop.permute.xlu0 %1856 }
 0x139   : > { %2190 = vperm.xlu0 %3256, %v3203_v14   ;;  %1747 = vrot.lane.b32.xlu1 %v3870_v6, %s3269_s27 }
 0x13b   : > { %v4037_v33 = vpop.permute.xlu0 %1906 }
 0x13d   : > { %2240 = vperm.xlu0 %3256, %v3205_v3   ;;  %1927 = vrot.lane.b32.xlu1 %v3845_v53, %s3270_s14  ;;  %v3233_v3 = vld [vmem:[%s4938_s3 + $0xf4] sm:$0xf] }
 0x13f   : > { %v4054_v14 = vpop.permute.xlu0 %1965 }
 0x141   : > { %2299 = vperm.xlu0 %3256, %v3207_v28   ;;  %1931 = vrot.lane.b32.xlu1 %v3870_v6, %s3270_s14 }
 0x145   : > { %2286 = vrot.lane.b32.xlu0 %v3845_v53, %s3271_s13  ;;  %2215 = vperm.xlu1 %3255, %v3204_v16  }
 0x149   : > { %2290 = vrot.lane.b32.xlu0 %v3870_v6, %s3271_s13  ;;  %2265 = vperm.xlu1 %3255, %v3206_v21  }
 0x14d   : > { %2374 = vperm.xlu0 %3256, %v3210_v22   ;;  %2324 = vperm.xlu1 %3255, %v3208_v2  }
 0x151   : > { %2424 = vperm.xlu0 %3256, %v3212_v23   ;;  %2288 = vrot.lane.b32.xlu1 %v3853_v5, %s3271_s13  ;;  %v3230_v23 = vld [vmem:[%s4938_s3 + $0xe8] sm:$0xf] }
 0x155   : > { %2483 = vperm.xlu0 %3256, %v3214_v26   ;;  %2349 = vperm.xlu1 %3255, %v3209_v27  }
 0x159   : > { %2470 = vrot.lane.b32.xlu0 %v3845_v53, %s3272_s26  ;;  %2399 = vperm.xlu1 %3255, %v3211_v29  }
 0x15d   : > { %2474 = vrot.lane.b32.xlu0 %v3870_v6, %s3272_s26  ;;  %2449 = vperm.xlu1 %3255, %v3213_v40   ;;  %v3232_v40 = vld [vmem:[%s4938_s3 + $0xf0] sm:$0xf] }
 0x161   : > { %2558 = vperm.xlu0 %3256, %v3217_v44   ;;  %2508 = vperm.xlu1 %3255, %v3215_v50  }
 0x165   : > { %2608 = vperm.xlu0 %3256, %v3219_v45   ;;  %2472 = vrot.lane.b32.xlu1 %v3853_v5, %s3272_s26 }
 0x169   : > { %2667 = vperm.xlu0 %3256, %v3221_v32   ;;  %2533 = vperm.xlu1 %3255, %v3216_v49   ;;  %v3234_v32 = vld [vmem:[%s4938_s3 + $0xf8] sm:$0xf] }
 0x16d   : > { %2654 = vrot.lane.b32.xlu0 %v3845_v53, %s3273_s17  ;;  %2583 = vperm.xlu1 %3255, %v3218_v54  }
 0x171   : > { %2658 = vrot.lane.b32.xlu0 %v3870_v6, %s3273_s17  ;;  %2633 = vperm.xlu1 %3255, %v3220_v56  }
 0x175   : > { %2742 = vperm.xlu0 %3256, %v3224_v60   ;;  %2692 = vperm.xlu1 %3255, %v3222_v41  }
 0x179   : > { %2792 = vperm.xlu0 %3256, %v3226_v63   ;;  %2656 = vrot.lane.b32.xlu1 %v3853_v5, %s3273_s17 }
 0x17d   : > { %2851 = vperm.xlu0 %3256, %v3228_v0   ;;  %2717 = vperm.xlu1 %3255, %v3223_v1  }
 0x181   : > { %2838 = vrot.lane.b32.xlu0 %v3845_v53, %s3274_s12  ;;  %2767 = vperm.xlu1 %3255, %v3225_v30  }
 0x185   : > { %2842 = vrot.lane.b32.xlu0 %v3870_v6, %s3274_s12  ;;  %2817 = vperm.xlu1 %3255, %v3227_v8  }
 0x187   : > { %v1377_v28 = vpop.permute.xlu1 %1376 }
 0x189   : > { %2926 = vperm.xlu0 %3256, %v3231_v11   ;;  %2876 = vperm.xlu1 %3255, %v3229_v12  }
 0x18b   : > { %v1379_v16 = vpop.permute.xlu0 %1378 }
 0x18c   : > { %v4061_v21 = vsel %vm305_vm0, %v1377_v28, %v1379_v16 }
 0x18d   : > { %v1398_v22 = vrot.slane %v4061_v21, %v3523_v55  ;;  %v1423_v2 = vrot.slane %v4061_v21, %v3533_v59  ;;  %2976 = vperm.xlu0 %3256, %v3233_v3   ;;  %2840 = vrot.lane.b32.xlu1 %v3853_v5, %s3274_s12  ;;  %v1448_v29 = vrot.slane %v4061_v21, %v3554_v10 }
 0x18e   : > { %v1473_v45 = vrot.slane %v4061_v21, %v3561_v17  ;;  %v1498_v63 = vrot.slane %v4061_v21, %v3645_v46 }
 0x18f   : > { %v1404_v26 = vmul.f32 %v1398_v22, %v3911_v15  ;;  %v1429_v27 = vmul.f32 %v1423_v2, %v3938_v24  ;;  %v1454_v50 = vmul.f32 %v1448_v29, %v3918_v20  ;;  %v1523_v22 = vrot.slane %v4061_v21, %v3676_v19 }
 0x190   : > { %v1479_v41 = vmul.f32 %v1473_v45, %v3953_v35  ;;  %v1504_v45 = vmul.f32 %v1498_v63, %v3933_v34 }
 0x191   : > { %2901 = vperm.xlu1 %3255, %v3230_v23   ;;  %v1432_v44 = vadd.f32 %v1429_v27, %v1404_v26  ;;  %v1529_v60 = vmul.f32 %v1523_v22, %v3962_v42 }
 0x193   : > { %v1457_v54 = vadd.f32 %v1454_v50, %v1432_v44 }
 0x195   : > { %2951 = vperm.xlu1 %3255, %v3232_v40   ;;  %v1482_v2 = vadd.f32 %v1479_v41, %v1457_v54  ;;  %v1548_v54 = vrot.slane %v4061_v21, %v3664_v9 }
 0x197   : > { %v1507_v44 = vadd.f32 %v1504_v45, %v1482_v2  ;;  %v1554_v23 = vmul.f32 %v1548_v54, %v3940_v25 }
 0x198   : > { %v4085_v49 = vpop.permute.xlu1 %2015 }
 0x199   : > { %3001 = vperm.xlu1 %3255, %v3234_v32  }
 0x19c   : > { %v4098_v30 = vpop.permute.xlu1 %2065  ;;  %v4100_v8 = vpop.permute.xlu0 %1990 }
 0x1a0   : > { %v1381_v3 = vpop.permute.xlu1 %1380  ;;  %v4133_v12 = vpop.permute.xlu0 %2040 }
 0x1a1   : > { %v1382_v41 = vsel %vm305_vm0, %v1379_v16, %v1381_v3  ;;  %v1384_v1 = vsel %vm305_vm0, %v1381_v3, %v1377_v28 }
 0x1a2   : > { %v1394_v40 = vrot.slane %v1384_v1, %v3523_v55  ;;  %v1402_v50 = vrot.slane %v1382_v41, %v3523_v55  ;;  %v1419_v29 = vrot.slane %v1384_v1, %v3533_v59  ;;  %v1427_v63 = vrot.slane %v1382_v41, %v3533_v59 }
 0x1a3   : > { %v1444_v32 = vrot.slane %v1384_v1, %v3554_v10  ;;  %v1452_v2 = vrot.slane %v1382_v41, %v3554_v10  ;;  %v1469_v21 = vrot.slane %v1384_v1, %v3561_v17  ;;  %v1477_v45 = vrot.slane %v1382_v41, %v3561_v17 }
 0x1a4   : > { %v1403_v16 = vmul.f32 %v1394_v40, %v3911_v15  ;;  %v1405_v28 = vmul.f32 %v1402_v50, %v3911_v15  ;;  %v1428_v3 = vmul.f32 %v1419_v29, %v3938_v24  ;;  %v1430_v0 = vmul.f32 %v1427_v63, %v3938_v24  ;;  %v1560_v27 = vpop.permute.xlu1 %1559  ;;  %v1562_v26 = vpop.permute.xlu0 %1561 }
 0x1a5   : > { %v1453_v11 = vmul.f32 %v1444_v32, %v3918_v20  ;;  %v1455_v56 = vmul.f32 %v1452_v2, %v3918_v20  ;;  %v1494_v40 = vrot.slane %v1384_v1, %v3645_v46  ;;  %v1502_v15 = vrot.slane %v1382_v41, %v3645_v46 }
 0x1a6   : > { %v1431_v62 = vadd.f32 %v1428_v3, %v1403_v16  ;;  %v1433_v38 = vadd.f32 %v1430_v0, %v1405_v28  ;;  %v1532_v50 = vadd.f32 %v1529_v60, %v1507_v44  ;;  %v1478_v29 = vmul.f32 %v1469_v21, %v3953_v35 }
 0x1a7   : > { %v1519_v24 = vrot.slane %v1384_v1, %v3676_v19  ;;  %v1527_v63 = vrot.slane %v1382_v41, %v3676_v19  ;;  %v1480_v54 = vmul.f32 %v1477_v45, %v3953_v35  ;;  %v1544_v32 = vrot.slane %v1384_v1, %v3664_v9 }
 0x1a8   : > { %v1456_v22 = vadd.f32 %v1453_v11, %v1431_v62  ;;  %v1458_v31 = vadd.f32 %v1455_v56, %v1433_v38  ;;  %v4170_v20 = vpop.permute.xlu1 %2115  ;;  %v4172_v0 = vpop.permute.xlu0 %2090  ;;  %v1503_v2 = vmul.f32 %v1494_v40, %v3933_v34  ;;  %v1505_v60 = vmul.f32 %v1502_v15, %v3933_v34 }
 0x1a9   : > { %v1528_v44 = vmul.f32 %v1519_v24, %v3962_v42  ;;  %v1552_v21 = vrot.slane %v1382_v41, %v3664_v9  ;;  %v1530_v38 = vmul.f32 %v1527_v63, %v3962_v42  ;;  %v4181_v62 = vsel %vm414_vm1, %v1560_v27, %v1562_v26 }
 0x1aa   : > { %v1481_v16 = vadd.f32 %v1478_v29, %v1456_v22  ;;  %v1483_v28 = vadd.f32 %v1480_v54, %v1458_v31  ;;  %v1582_v35 = vrot.slane %v4181_v62, %v3523_v55  ;;  %v1607_v56 = vrot.slane %v4181_v62, %v3533_v59 }
 0x1ab   : > { %v1632_v34 = vrot.slane %v4181_v62, %v3554_v10  ;;  %v1657_v1 = vrot.slane %v4181_v62, %v3561_v17  ;;  %v1682_v42 = vrot.slane %v4181_v62, %v3645_v46  ;;  %v1707_v41 = vrot.slane %v4181_v62, %v3676_v19 }
 0x1ac   : > { %v1506_v11 = vadd.f32 %v1503_v2, %v1481_v16  ;;  %v1508_v31 = vadd.f32 %v1505_v60, %v1483_v28  ;;  %v1564_v45 = vpop.permute.xlu1 %1563  ;;  %v4195_v3 = vpop.permute.xlu0 %2140  ;;  %v1557_v40 = vadd.f32 %v1554_v23, %v1532_v50  ;;  %v1553_v15 = vmul.f32 %v1544_v32, %v3940_v25 }
 0x1ad   : > { %v1555_v29 = vmul.f32 %v1552_v21, %v3940_v25  ;;  %v1588_v24 = vmul.f32 %v1582_v35, %v3955_v36  ;;  %v1613_v54 = vmul.f32 %v1607_v56, %v3977_v39  ;;  %v4950_v2 = vrot.slane %v3845_v53, %v3523_v55 }
 0x1ae   : > { %v1531_v63 = vadd.f32 %v1528_v44, %v1506_v11  ;;  %v1533_v22 = vadd.f32 %v1530_v38, %v1508_v31  ;;  %v1638_v28 = vmul.f32 %v1632_v34, %v3964_v43  ;;  %v1663_v23 = vmul.f32 %v1657_v1, %v3989_v51 }
 0x1af   : > { %v4205_v60 = vmul.f32 %v4950_v2, %v4170_v20  ;;  %v1591_v16 = vadd.f32 %v1588_v24, %v1557_v40  ;;  %v1688_v50 = vmul.f32 %v1682_v42, %v3979_v47  ;;  %v1713_v32 = vmul.f32 %v1707_v41, %v4001_v57 }
 0x1b0   : > { %v1556_v25 = vadd.f32 %v1553_v15, %v1531_v63  ;;  %v1565_v44 = vsel %vm414_vm1, %v1562_v26, %v1564_v45  ;;  %v1567_v21 = vsel %vm414_vm1, %v1564_v45, %v1560_v27  ;;  %v4215_v38 = vpop.permute.xlu1 %2165  ;;  %v4217_v35 = vpop.permute.xlu0 %1745  ;;  %v1558_v56 = vadd.f32 %v1555_v29, %v1533_v22 }
 0x1b1   : > { %4951 = vst [vmem:[#allocation5_spill] sm:$0xff] %v4205_v60  ;;  %v1616_v11 = vadd.f32 %v1613_v54, %v1591_v16  ;;  %v1578_v34 = vrot.slane %v1567_v21, %v3523_v55  ;;  %v1586_v1 = vrot.slane %v1565_v44, %v3523_v55  ;;  %v1603_v31 = vrot.slane %v1567_v21, %v3533_v59 }
 0x1b2   : > { %v1611_v42 = vrot.slane %v1565_v44, %v3533_v59  ;;  %v1628_v41 = vrot.slane %v1567_v21, %v3554_v10  ;;  %v1636_v26 = vrot.slane %v1565_v44, %v3554_v10  ;;  %v1732_v27 = vrot.slane %v4181_v62, %v3664_v9 }
 0x1b3   : > { %v1641_v40 = vadd.f32 %v1638_v28, %v1616_v11  ;;  %v1587_v45 = vmul.f32 %v1578_v34, %v3955_v36  ;;  %v1589_v15 = vmul.f32 %v1586_v1, %v3955_v36  ;;  %v4952_v29 = vrot.slane %v3853_v5, %v3523_v55 }
 0x1b4   : > { %v1612_v63 = vmul.f32 %v1603_v31, %v3977_v39  ;;  %v1614_v22 = vmul.f32 %v1611_v42, %v3977_v39  ;;  %v1653_v54 = vrot.slane %v1567_v21, %v3561_v17  ;;  %v4238_v2 = vpop.permute.xlu1 %1743  ;;  %v4240_v16 = vpop.permute.xlu0 %1929  ;;  %v1661_v36 = vrot.slane %v1565_v44, %v3561_v17 }
 0x1b5   : > { %v4233_v24 = vmul.f32 %v4952_v29, %v4170_v20  ;;  %v1666_v62 = vadd.f32 %v1663_v23, %v1641_v40  ;;  %v1590_v28 = vadd.f32 %v1587_v45, %v1556_v25  ;;  %v1592_v11 = vadd.f32 %v1589_v15, %v1558_v56 }
 0x1b6   : > { %v1637_v34 = vmul.f32 %v1628_v41, %v3964_v43  ;;  %v1639_v1 = vmul.f32 %v1636_v26, %v3964_v43  ;;  %v1678_v29 = vrot.slane %v1567_v21, %v3645_v46  ;;  %v1686_v31 = vrot.slane %v1565_v44, %v3645_v46 }
 0x1b7   : > { %4953 = vst [vmem:[#allocation6_spill] sm:$0xff] %v4233_v24  ;;  %v1691_v39 = vadd.f32 %v1688_v50, %v1666_v62  ;;  %v1615_v42 = vadd.f32 %v1612_v63, %v1590_v28  ;;  %v1617_v60 = vadd.f32 %v1614_v22, %v1592_v11  ;;  %v1703_v24 = vrot.slane %v1567_v21, %v3676_v19 }
 0x1b8   : > { %v4954_v23 = vrot.slane %v3870_v6, %v3523_v55  ;;  %v1662_v56 = vmul.f32 %v1653_v54, %v3989_v51  ;;  %v1664_v41 = vmul.f32 %v1661_v36, %v3989_v51  ;;  %v1711_v43 = vrot.slane %v1565_v44, %v3676_v19  ;;  %v1748_v26 = vpop.permute.xlu1 %1747  ;;  %v4257_v40 = vpop.permute.xlu0 %2190 }
 0x1b9   : > { %v1716_v50 = vadd.f32 %v1713_v32, %v1691_v39  ;;  %v1640_v45 = vadd.f32 %v1637_v34, %v1615_v42  ;;  %v1642_v15 = vadd.f32 %v1639_v1, %v1617_v60  ;;  %v1728_v63 = vrot.slane %v1567_v21, %v3664_v9 }
 0x1ba   : > { %v4252_v25 = vmul.f32 %v4954_v23, %v4170_v20  ;;  %v1738_v22 = vmul.f32 %v1732_v27, %v3991_v52  ;;  %v1687_v62 = vmul.f32 %v1678_v29, %v3979_v47  ;;  %v1689_v20 = vmul.f32 %v1686_v31, %v3979_v47 }
 0x1bb   : > { %v1736_v54 = vrot.slane %v1565_v44, %v3664_v9  ;;  %v1665_v28 = vadd.f32 %v1662_v56, %v1640_v45  ;;  %v1667_v51 = vadd.f32 %v1664_v41, %v1642_v15  ;;  %v1712_v11 = vmul.f32 %v1703_v24, %v4001_v57 }
 0x1bc   : > { %4955 = vst [vmem:[#allocation7_spill] sm:$0xff] %v4252_v25  ;;  %v1714_v36 = vmul.f32 %v1711_v43, %v4001_v57  ;;  %v1741_v23 = vadd.f32 %v1738_v22, %v1716_v50  ;;  %v1737_v32 = vmul.f32 %v1728_v63, %v3991_v52  ;;  %v4956_v60 = vrot.slane %v3845_v53, %v3533_v59  ;;  %v4279_v27 = vpop.permute.xlu1 %1927  ;;  %v4281_v24 = vpop.permute.xlu0 %2240 }
 0x1bd   : > { %v4958_v47 = vrot.slane %v3853_v5, %v3533_v59  ;;  %v1690_v57 = vadd.f32 %v1687_v62, %v1665_v28  ;;  %v1692_v34 = vadd.f32 %v1689_v20, %v1667_v51  ;;  %v1739_v1 = vmul.f32 %v1736_v54, %v3991_v52 }
 0x1be   : > { %v4271_v21 = vmul.f32 %v4956_v60, %v4195_v3  ;;  %v1750_v29 = vsel %vm524_vm2, %v4238_v2, %v4217_v35  ;;  %v4959_v31 = vrot.slane %v3870_v6, %v3533_v59  ;;  %v4961_v52 = vrot.slane %v3845_v53, %v3554_v10 }
 0x1bf   : > { %v4277_v44 = vmul.f32 %v4958_v47, %v4195_v3  ;;  %v1766_v42 = vrot.slane %v1750_v29, %v3523_v55  ;;  %v1791_v56 = vrot.slane %v1750_v29, %v3533_v59  ;;  %v1816_v41 = vrot.slane %v1750_v29, %v3554_v10 }
 0x1c0   : > { %4957 = vst [vmem:[#allocation8_spill] sm:$0xff] %v4271_v21  ;;  %v4292_v39 = vmul.f32 %v4959_v31, %v4195_v3  ;;  %v1715_v43 = vadd.f32 %v1712_v11, %v1690_v57  ;;  %v1717_v50 = vadd.f32 %v1714_v36, %v1692_v34  ;;  %v4301_v45 = vmul.f32 %v4961_v52, %v4215_v38  ;;  %v4318_v28 = vpop.permute.xlu1 %1931  ;;  %v4320_v51 = vpop.permute.xlu0 %2299 }
 0x1c1   : > { %v4963_v15 = vrot.slane %v3853_v5, %v3554_v10  ;;  %v4964_v63 = vrot.slane %v3870_v6, %v3554_v10  ;;  %v1772_v62 = vmul.f32 %v1766_v42, %v4013_v61  ;;  %v1841_v20 = vrot.slane %v1750_v29, %v3561_v17 }
 0x1c2   : > { %4960 = vst [vmem:[#allocation9_spill] sm:$0xff] %v4292_v39  ;;  %4962 = vst [vmem:[#allocation10_spill] sm:$0xff] %v4301_v45  ;;  %v1866_v54 = vrot.slane %v1750_v29, %v3645_v46  ;;  %v1740_v11 = vadd.f32 %v1737_v32, %v1715_v43  ;;  %v1797_v36 = vmul.f32 %v1791_v56, %v4003_v58 }
 0x1c3   : > { %v4307_v3 = vmul.f32 %v4963_v15, %v4215_v38  ;;  %v4313_v22 = vmul.f32 %v4964_v63, %v4215_v38  ;;  %v1822_v60 = vmul.f32 %v1816_v41, %v4015_v37  ;;  %v1891_v47 = vrot.slane %v1750_v29, %v3676_v19 }
 0x1c4   : > { %v1742_v57 = vadd.f32 %v1739_v1, %v1717_v50  ;;  %v1775_v38 = vadd.f32 %v1772_v62, %v1741_v23  ;;  %v4328_v34 = vsel %vm524_vm2, %v4217_v35, %v1748_v26  ;;  %v4333_v31 = vsel %vm524_vm2, %v1748_v26, %v4238_v2  ;;  %v4346_v26 = vpop.permute.xlu1 %2215  ;;  %v4348_v43 = vpop.permute.xlu0 %2286 }
 0x1c5   : > { %4965 = vst [vmem:[#allocation11_spill] sm:$0xff] %v4313_v22  ;;  %v1762_v32 = vrot.slane %v4333_v31, %v3523_v55  ;;  %v1770_v42 = vrot.slane %v4328_v34, %v3523_v55  ;;  %v1787_v1 = vrot.slane %v4333_v31, %v3533_v59  ;;  %v1795_v23 = vrot.slane %v4328_v34, %v3533_v59 }
 0x1c6   : > { %v1800_v56 = vadd.f32 %v1797_v36, %v1775_v38  ;;  %v1847_v35 = vmul.f32 %v1841_v20, %v4028_v4  ;;  %v1872_v41 = vmul.f32 %v1866_v54, %v4030_v18  ;;  %v1916_v2 = vrot.slane %v1750_v29, %v3664_v9 }
 0x1c7   : > { %v1771_v50 = vmul.f32 %v1762_v32, %v4013_v61  ;;  %v1773_v52 = vmul.f32 %v1770_v42, %v4013_v61  ;;  %v1812_v15 = vrot.slane %v4333_v31, %v3554_v10  ;;  %v1820_v63 = vrot.slane %v4328_v34, %v3554_v10 }
 0x1c8   : > { %v1825_v62 = vadd.f32 %v1822_v60, %v1800_v56  ;;  %v1796_v20 = vmul.f32 %v1787_v1, %v4003_v58  ;;  %v1798_v54 = vmul.f32 %v1795_v23, %v4003_v58  ;;  %v1837_v29 = vrot.slane %v4333_v31, %v3561_v17  ;;  %v4369_v1 = vpop.permute.xlu1 %2265  ;;  %v4371_v23 = vpop.permute.xlu0 %2290 }
 0x1c9   : > { %v1774_v36 = vadd.f32 %v1771_v50, %v1740_v11  ;;  %v1776_v38 = vadd.f32 %v1773_v52, %v1742_v57  ;;  %v1845_v32 = vrot.slane %v4328_v34, %v3561_v17  ;;  %v1862_v61 = vrot.slane %v4333_v31, %v3645_v46 }
 0x1ca   : > { %v1850_v42 = vadd.f32 %v1847_v35, %v1825_v62  ;;  %v1897_v22 = vmul.f32 %v1891_v47, %v4035_v7  ;;  %v1870_v60 = vrot.slane %v4328_v34, %v3645_v46  ;;  %v1887_v58 = vrot.slane %v4333_v31, %v3676_v19 }
 0x1cb   : > { %v1799_v11 = vadd.f32 %v1796_v20, %v1774_v36  ;;  %v1801_v57 = vadd.f32 %v1798_v54, %v1776_v38  ;;  %v1821_v56 = vmul.f32 %v1812_v15, %v4015_v37  ;;  %v1823_v50 = vmul.f32 %v1820_v63, %v4015_v37 }
 0x1cc   : > { %v1875_v52 = vadd.f32 %v1872_v41, %v1850_v42  ;;  %v1922_v35 = vmul.f32 %v1916_v2, %v4037_v33  ;;  %v1846_v47 = vmul.f32 %v1837_v29, %v4028_v4  ;;  %v1895_v62 = vrot.slane %v4328_v34, %v3676_v19  ;;  %v4385_v41 = vpop.permute.xlu1 %2324  ;;  %v4387_v2 = vpop.permute.xlu0 %2374 }
 0x1cd   : > { %v1824_v45 = vadd.f32 %v1821_v56, %v1799_v11  ;;  %v1826_v39 = vadd.f32 %v1823_v50, %v1801_v57  ;;  %v1848_v21 = vmul.f32 %v1845_v32, %v4028_v4  ;;  %v1871_v25 = vmul.f32 %v1862_v61, %v4030_v18 }
 0x1ce   : > { %v1900_v20 = vadd.f32 %v1897_v22, %v1875_v52  ;;  %v1873_v54 = vmul.f32 %v1870_v60, %v4030_v18  ;;  %v1896_v15 = vmul.f32 %v1887_v58, %v4035_v7  ;;  %v1912_v37 = vrot.slane %v4333_v31, %v3664_v9 }
 0x1cf   : > { %v1849_v63 = vadd.f32 %v1846_v47, %v1824_v45  ;;  %v1851_v29 = vadd.f32 %v1848_v21, %v1826_v39  ;;  %v1898_v36 = vmul.f32 %v1895_v62, %v4035_v7  ;;  %v1920_v4 = vrot.slane %v4328_v34, %v3664_v9 }
 0x1d0   : > { %v1925_v38 = vadd.f32 %v1922_v35, %v1900_v20  ;;  %v4966_v18 = vrot.slane %v3845_v53, %v3561_v17  ;;  %v4967_v31 = vrot.slane %v3853_v5, %v3561_v17  ;;  %v4408_v7 = vsel %vm634_vm3, %v4279_v27, %v4240_v16  ;;  %v4424_v11 = vpop.permute.xlu0 %2424 }
 0x1d1   : > { %v1874_v21 = vadd.f32 %v1871_v25, %v1849_v63  ;;  %v1876_v39 = vadd.f32 %v1873_v54, %v1851_v29  ;;  %v1950_v45 = vrot.slane %v4408_v7, %v3523_v55  ;;  %v1975_v34 = vrot.slane %v4408_v7, %v3533_v59  ;;  %v4422_v25 = vpop.permute.xlu1 %2288 }
 0x1d2   : > { %v4396_v22 = vmul.f32 %v4966_v18, %v4257_v40  ;;  %v4402_v32 = vmul.f32 %v4967_v31, %v4257_v40  ;;  %v2000_v61 = vrot.slane %v4408_v7, %v3554_v10  ;;  %v2025_v42 = vrot.slane %v4408_v7, %v3561_v17 }
 0x1d3   : > { %v2050_v60 = vrot.slane %v4408_v7, %v3645_v46  ;;  %v2075_v58 = vrot.slane %v4408_v7, %v3676_v19  ;;  %v1899_v57 = vadd.f32 %v1896_v15, %v1874_v21  ;;  %v1901_v56 = vadd.f32 %v1898_v36, %v1876_v39 }
 0x1d4   : > { %v1921_v50 = vmul.f32 %v1912_v37, %v4037_v33  ;;  %v1956_v52 = vmul.f32 %v1950_v45, %v4052_v13  ;;  %v1923_v35 = vmul.f32 %v1920_v4, %v4037_v33  ;;  %v4968_v47 = vrot.slane %v3870_v6, %v3561_v17  ;;  %v4456_v31 = vpop.permute.xlu0 %2483 }
 0x1d5   : > { %v1981_v20 = vmul.f32 %v1975_v34, %v4054_v14  ;;  %v4969_v54 = vrot.slane %v3845_v53, %v3676_v19  ;;  %v2006_v37 = vmul.f32 %v2000_v61, %v4100_v8  ;;  %v2031_v29 = vmul.f32 %v2025_v42, %v4085_v49  ;;  %4970 = vst [vmem:[#allocation12_spill] sm:$0xff] %v4456_v31 }
 0x1d6   : > { %v4433_v62 = vmul.f32 %v4968_v47, %v4257_v40  ;;  %v1959_v63 = vadd.f32 %v1956_v52, %v1925_v38  ;;  %v2056_v33 = vmul.f32 %v2050_v60, %v4133_v12  ;;  %v1924_v36 = vadd.f32 %v1921_v50, %v1899_v57  ;;  %v4454_v38 = vpop.permute.xlu1 %2349 }
 0x1d7   : > { %v4440_v15 = vmul.f32 %v4969_v54, %v4281_v24  ;;  %v2081_v4 = vmul.f32 %v2075_v58, %v4098_v30  ;;  %v1933_v40 = vsel %vm634_vm3, %v4240_v16, %v4318_v28  ;;  %v1935_v18 = vsel %vm634_vm3, %v4318_v28, %v4279_v27 }
 0x1d8   : > { %v1926_v21 = vadd.f32 %v1923_v35, %v1901_v56  ;;  %v1984_v39 = vadd.f32 %v1981_v20, %v1959_v63  ;;  %v1946_v45 = vrot.slane %v1935_v18, %v3523_v55  ;;  %v1954_v34 = vrot.slane %v1933_v40, %v3523_v55  ;;  %v4479_v54 = vpop.permute.xlu0 %2470 }
 0x1d9   : > { %v1971_v61 = vrot.slane %v1935_v18, %v3533_v59  ;;  %v1979_v42 = vrot.slane %v1933_v40, %v3533_v59  ;;  %v1996_v16 = vrot.slane %v1935_v18, %v3554_v10  ;;  %v2004_v60 = vrot.slane %v1933_v40, %v3554_v10 }
 0x1da   : > { %v2009_v58 = vadd.f32 %v2006_v37, %v1984_v39  ;;  %v2100_v27 = vrot.slane %v4408_v7, %v3664_v9  ;;  %v1955_v28 = vmul.f32 %v1946_v45, %v4052_v13  ;;  %v1957_v57 = vmul.f32 %v1954_v34, %v4052_v13  ;;  %v4477_v20 = vpop.permute.xlu1 %2399 }
 0x1db   : > { %v4971_v56 = vrot.slane %v3853_v5, %v3676_v19  ;;  %v1980_v52 = vmul.f32 %v1971_v61, %v4054_v14  ;;  %v1982_v35 = vmul.f32 %v1979_v42, %v4054_v14  ;;  %v2021_v47 = vrot.slane %v1935_v18, %v3561_v17 }
 0x1dc   : > { %v2034_v7 = vadd.f32 %v2031_v29, %v2009_v58  ;;  %v1958_v63 = vadd.f32 %v1955_v28, %v1924_v36  ;;  %v1960_v37 = vadd.f32 %v1957_v57, %v1926_v21  ;;  %v2029_v13 = vrot.slane %v1933_v40, %v3561_v17  ;;  %v4498_v58 = vpop.permute.xlu0 %2474 }
 0x1dd   : > { %v4472_v50 = vmul.f32 %v4971_v56, %v4281_v24  ;;  %v2005_v39 = vmul.f32 %v1996_v16, %v4100_v8  ;;  %v2007_v45 = vmul.f32 %v2004_v60, %v4100_v8  ;;  %v2046_v34 = vrot.slane %v1935_v18, %v3645_v46 }
 0x1de   : > { %v2054_v61 = vrot.slane %v1933_v40, %v3645_v46  ;;  %v2059_v14 = vadd.f32 %v2056_v33, %v2034_v7  ;;  %v1983_v42 = vadd.f32 %v1980_v52, %v1958_v63  ;;  %v1985_v56 = vadd.f32 %v1982_v35, %v1960_v37  ;;  %v4496_v60 = vpop.permute.xlu1 %2449 }
 0x1df   : > { %v2071_v31 = vrot.slane %v1935_v18, %v3676_v19  ;;  %v4972_v29 = vrot.slane %v3870_v6, %v3676_v19  ;;  %v2030_v21 = vmul.f32 %v2021_v47, %v4085_v49  ;;  %v2032_v16 = vmul.f32 %v2029_v13, %v4085_v49 }
 0x1e0   : > { %v2079_v8 = vrot.slane %v1933_v40, %v3676_v19  ;;  %v2008_v33 = vadd.f32 %v2005_v39, %v1983_v42  ;;  %v2010_v28 = vadd.f32 %v2007_v45, %v1985_v56  ;;  %v2096_v57 = vrot.slane %v1935_v18, %v3664_v9  ;;  %v4975_v42 = vld [vmem:[#allocation6_spill] sm:$0xff] }
 0x1e1   : > { %v4491_v36 = vmul.f32 %v4972_v29, %v4281_v24  ;;  %v2104_v52 = vrot.slane %v1933_v40, %v3664_v9  ;;  %v2106_v35 = vmul.f32 %v2100_v27, %v4172_v0  ;;  %v2055_v24 = vmul.f32 %v2046_v34, %v4133_v12  ;;  %v4520_v34 = vpop.permute.xlu0 %2558 }
 0x1e2   : > { %v2057_v47 = vmul.f32 %v2054_v61, %v4133_v12  ;;  %v2084_v7 = vadd.f32 %v2081_v4, %v2059_v14  ;;  %v2033_v49 = vadd.f32 %v2030_v21, %v2008_v33  ;;  %v2035_v63 = vadd.f32 %v2032_v16, %v2010_v28  ;;  %v4518_v27 = vpop.permute.xlu1 %2508 }
 0x1e3   : > { %v2080_v37 = vmul.f32 %v2071_v31, %v4098_v30  ;;  %v2082_v13 = vmul.f32 %v2079_v8, %v4098_v30  ;;  %v2105_v39 = vmul.f32 %v2096_v57, %v4172_v0  ;;  %v4973_v40 = vrot.slane %v3845_v53, %v3645_v46 }
 0x1e4   : > { %v2109_v45 = vadd.f32 %v2106_v35, %v2084_v7  ;;  %v4974_v12 = vrot.slane %v3853_v5, %v3645_v46  ;;  %v2058_v31 = vadd.f32 %v2055_v24, %v2033_v49  ;;  %v2060_v30 = vadd.f32 %v2057_v47, %v2035_v63 }
 0x1e5   : > { %v4512_v18 = vmul.f32 %v4973_v40, %v4346_v26  ;;  %v2107_v61 = vmul.f32 %v2104_v52, %v4172_v0  ;;  %v4527_v14 = vsel %vm904_vm4, %v4371_v23, %v4348_v43  ;;  %v4540_v0 = vsel %vm904_vm4, %v4422_v25, %v4371_v23 }
 0x1e6   : > { %v2231_v4 = vmul.f32 %v4974_v12, %v4346_v26  ;;  %v2134_v56 = vadd.f32 %v4975_v42, %v2109_v45  ;;  %v2313_v29 = vrot.slane %v4527_v14, %v3523_v55  ;;  %v2338_v21 = vrot.slane %v4527_v14, %v3533_v59  ;;  %v4981_v12 = vld [vmem:[#allocation7_spill] sm:$0xff] }
 0x1e7   : > { %v2388_v16 = vrot.slane %v4527_v14, %v3561_v17  ;;  %v2083_v8 = vadd.f32 %v2080_v37, %v2058_v31  ;;  %v2085_v33 = vadd.f32 %v2082_v13, %v2060_v30  ;;  %v4546_v28 = vsel %vm904_vm4, %v4348_v43, %v4422_v25  ;;  %v4563_v43 = vpop.permute.xlu1 %2472  ;;  %v4565_v25 = vpop.permute.xlu0 %2608 }
 0x1e8   : > { %v2159_v57 = vadd.f32 %v4277_v44, %v2134_v56  ;;  %v4976_v52 = vrot.slane %v3870_v6, %v3645_v46  ;;  %v4977_v24 = vrot.slane %v3845_v53, %v3664_v9  ;;  %v4978_v23 = vrot.slane %v3853_v5, %v3664_v9 }
 0x1e9   : > { %v2108_v44 = vadd.f32 %v2105_v39, %v2083_v8  ;;  %v2110_v49 = vadd.f32 %v2107_v61, %v2085_v33  ;;  %v2434_v63 = vrot.slane %v4540_v0, %v3676_v19  ;;  %v4979_v37 = vrot.slane %v3870_v6, %v3664_v9  ;;  %v4980_v39 = vld [vmem:[#allocation5_spill] sm:$0xff] }
 0x1ea   : > { %v2232_v35 = vmul.f32 %v4976_v52, %v4346_v26  ;;  %v4557_v47 = vmul.f32 %v4977_v24, %v4369_v1  ;;  %v2281_v7 = vmul.f32 %v4978_v23, %v4369_v1  ;;  %v2430_v26 = vrot.slane %v4546_v28, %v3676_v19 }
 0x1eb   : > { %v2184_v53 = vadd.f32 %v4307_v3, %v2159_v57  ;;  %v2282_v5 = vmul.f32 %v4979_v37, %v4369_v1  ;;  %v4577_v13 = vmul.f32 %v2313_v29, %v4320_v51  ;;  %v4580_v45 = vmul.f32 %v2338_v21, %v4385_v41  ;;  %v4597_v56 = vpop.permute.xlu1 %2533  ;;  %v4982_v29 = vld [vmem:[#allocation8_spill] sm:$0xff]  ;;  %v4606_v57 = vpop.permute.xlu0 %2667 }
 0x1ec   : > { %v2133_v40 = vadd.f32 %v4980_v39, %v2108_v44  ;;  %v2135_v31 = vadd.f32 %v4981_v12, %v2110_v49  ;;  %v4585_v30 = vmul.f32 %v2388_v16, %v4387_v2  ;;  %v2305_v3 = vrot.slane %v4546_v28, %v3523_v55  ;;  %v4983_v16 = vld [vmem:[#allocation9_spill] sm:$0xff]  ;;  %v4984_v49 = vld [vmem:[#allocation10_spill] sm:$0xff] }
 0x1ed   : > { %v2209_v61 = vadd.f32 %v4402_v32, %v2184_v53  ;;  %v2438_v6 = vrot.slane %v4527_v14, %v3676_v19  ;;  %v4593_v1 = vmul.f32 %v2430_v26, %v4424_v11  ;;  %v2309_v42 = vrot.slane %v4540_v0, %v3523_v55  ;;  %v4985_v53 = vld [vmem:[#allocation11_spill] sm:$0xff] }
 0x1ee   : > { %v2158_v21 = vadd.f32 %v4982_v29, %v2133_v40  ;;  %v2160_v8 = vadd.f32 %v4983_v16, %v2135_v31  ;;  %v4602_v33 = vmul.f32 %v2434_v63, %v4424_v11  ;;  %v2330_v32 = vrot.slane %v4546_v28, %v3533_v59 }
 0x1ef   : > { %v2234_v52 = vadd.f32 %v2231_v4, %v2209_v61  ;;  %v2334_v24 = vrot.slane %v4540_v0, %v3533_v59  ;;  %v2355_v23 = vrot.slane %v4546_v28, %v3554_v10  ;;  %v2359_v44 = vrot.slane %v4540_v0, %v3554_v10  ;;  %v4625_v61 = vpop.permute.xlu1 %2583 }
 0x1f0   : > { %v2183_v26 = vadd.f32 %v4984_v49, %v2158_v21  ;;  %v2185_v63 = vadd.f32 %v4985_v53, %v2160_v8  ;;  %v4617_v37 = vmul.f32 %v2438_v6, %v4424_v11  ;;  %v2314_v39 = vmul.f32 %v2305_v3, %v4320_v51 }
 0x1f1   : > { %v2259_v4 = vadd.f32 %v4472_v50, %v2234_v52  ;;  %v2315_v40 = vmul.f32 %v2309_v42, %v4320_v51  ;;  %v2339_v12 = vmul.f32 %v2330_v32, %v4385_v41  ;;  %v2363_v31 = vrot.slane %v4527_v14, %v3554_v10  ;;  %v4640_v32 = vpop.permute.xlu0 %2654 }
 0x1f2   : > { %v2208_v29 = vadd.f32 %v4396_v22, %v2183_v26  ;;  %v2210_v21 = vadd.f32 %v4433_v62, %v2185_v63  ;;  %v2380_v11 = vrot.slane %v4546_v28, %v3561_v17  ;;  %v2384_v3 = vrot.slane %v4540_v0, %v3561_v17 }
 0x1f3   : > { %v2284_v50 = vadd.f32 %v2281_v7, %v2259_v4  ;;  %v2340_v51 = vmul.f32 %v2334_v24, %v4385_v41  ;;  %v2364_v6 = vmul.f32 %v2355_v23, %v4454_v38  ;;  %v2365_v42 = vmul.f32 %v2359_v44, %v4454_v38  ;;  %v4647_v24 = vpop.permute.xlu1 %2633 }
 0x1f4   : > { %v2233_v16 = vadd.f32 %v4512_v18, %v2208_v29  ;;  %v2235_v8 = vadd.f32 %v2232_v35, %v2210_v21  ;;  %v2366_v22 = vmul.f32 %v2363_v31, %v4454_v38  ;;  %v2405_v62 = vrot.slane %v4546_v28, %v3645_v46 }
 0x1f5   : > { %v2318_v52 = vadd.f32 %v2315_v40, %v2284_v50  ;;  %v2389_v49 = vmul.f32 %v2380_v11, %v4387_v2  ;;  %v2409_v41 = vrot.slane %v4540_v0, %v3645_v46  ;;  %v2413_v7 = vrot.slane %v4527_v14, %v3645_v46 }
 0x1f6   : > { %v2258_v18 = vadd.f32 %v4440_v15, %v2233_v16  ;;  %v2260_v38 = vadd.f32 %v4491_v36, %v2235_v8  ;;  %v2390_v35 = vmul.f32 %v2384_v3, %v4387_v2  ;;  %v2414_v23 = vmul.f32 %v2405_v62, %v4477_v20  ;;  %v4986_v8 = vld [vmem:[#allocation12_spill] sm:$0xff] }
 0x1f7   : > { %v2343_v44 = vadd.f32 %v2340_v51, %v2318_v52  ;;  %v2415_v26 = vmul.f32 %v2409_v41, %v4477_v20  ;;  %v2416_v53 = vmul.f32 %v2413_v7, %v4477_v20  ;;  %v4659_v63 = vsel %vm1014_vm5, %v4498_v58, %v4479_v54  ;;  %v4672_v21 = vpop.permute.xlu1 %2692 }
 0x1f8   : > { %v2283_v4 = vadd.f32 %v4557_v47, %v2258_v18  ;;  %v2285_v15 = vadd.f32 %v2282_v5, %v2260_v38  ;;  %v2455_v36 = vrot.slane %v4546_v28, %v3664_v9  ;;  %v2459_v2 = vrot.slane %v4540_v0, %v3664_v9 }
 0x1f9   : > { %v2368_v40 = vadd.f32 %v2365_v42, %v2343_v44  ;;  %v2463_v31 = vrot.slane %v4527_v14, %v3664_v9  ;;  %v2497_v20 = vrot.slane %v4659_v63, %v3523_v55  ;;  %v2522_v29 = vrot.slane %v4659_v63, %v3533_v59  ;;  %v4683_v14 = vpop.permute.xlu0 %2658 }
 0x1fa   : > { %v2319_v47 = vadd.f32 %v4577_v13, %v2285_v15  ;;  %v2317_v5 = vadd.f32 %v2314_v39, %v2283_v4  ;;  %v2572_v28 = vrot.slane %v4659_v63, %v3561_v17  ;;  %v4681_v0 = vsel %vm1014_vm5, %v4479_v54, %v4563_v43 }
 0x1fb   : > { %v2393_v11 = vadd.f32 %v2390_v35, %v2368_v40  ;;  %v2464_v3 = vmul.f32 %v2455_v36, %v4496_v60  ;;  %v4690_v13 = vsel %vm1014_vm5, %v4563_v43, %v4498_v58  ;;  %v2614_v39 = vrot.slane %v4681_v0, %v3676_v19  ;;  %v4702_v58 = vpop.permute.xlu1 %2656 }
 0x1fc   : > { %v2344_v50 = vadd.f32 %v4580_v45, %v2319_v47  ;;  %v2342_v51 = vadd.f32 %v2339_v12, %v2317_v5  ;;  %v2465_v54 = vmul.f32 %v2459_v2, %v4496_v60  ;;  %v2466_v42 = vmul.f32 %v2463_v31, %v4496_v60 }
 0x1fd   : > { %v2418_v16 = vadd.f32 %v2415_v26, %v2393_v11  ;;  %v2500_v62 = vmul.f32 %v2497_v20, %v4986_v8  ;;  %v2525_v52 = vmul.f32 %v2522_v29, %v4518_v27  ;;  %v4700_v41 = vmul.f32 %v2572_v28, %v4520_v34  ;;  %v4721_v4 = vpop.permute.xlu0 %2742 }
 0x1fe   : > { %v2367_v43 = vadd.f32 %v2364_v6, %v2342_v51  ;;  %v2369_v7 = vadd.f32 %v2366_v22, %v2344_v50  ;;  %v2618_v45 = vrot.slane %v4690_v13, %v3676_v19  ;;  %v2493_v12 = vrot.slane %v4690_v13, %v3523_v55 }
 0x1ff   : > { %v2443_v60 = vadd.f32 %v4602_v33, %v2418_v16  ;;  %v2622_v18 = vrot.slane %v4659_v63, %v3676_v19  ;;  %v4712_v38 = vmul.f32 %v2614_v39, %v4565_v25  ;;  %v2489_v35 = vrot.slane %v4681_v0, %v3523_v55 }
 0x200   : > { %v2392_v44 = vadd.f32 %v2389_v49, %v2367_v43  ;;  %v2394_v6 = vadd.f32 %v4585_v30, %v2369_v7  ;;  %v2514_v22 = vrot.slane %v4681_v0, %v3533_v59  ;;  %v2518_v26 = vrot.slane %v4690_v13, %v3533_v59  ;;  %v4728_v49 = vpop.permute.xlu1 %2717 }
 0x201   : > { %v2468_v33 = vadd.f32 %v2465_v54, %v2443_v60  ;;  %v2499_v15 = vmul.f32 %v2493_v12, %v4986_v8  ;;  %v2539_v36 = vrot.slane %v4681_v0, %v3554_v10  ;;  %v2543_v2 = vrot.slane %v4690_v13, %v3554_v10 }
 0x202   : > { %v2417_v30 = vadd.f32 %v2414_v23, %v2392_v44  ;;  %v2419_v40 = vadd.f32 %v2416_v53, %v2394_v6  ;;  %v2624_v31 = vmul.f32 %v2618_v45, %v4565_v25  ;;  %v4732_v20 = vmul.f32 %v2622_v18, %v4565_v25 }
 0x203   : > { %v2498_v29 = vmul.f32 %v2489_v35, %v4986_v8  ;;  %v2502_v47 = vadd.f32 %v2499_v15, %v2468_v33  ;;  %v2524_v5 = vmul.f32 %v2518_v26, %v4518_v27  ;;  %v2564_v28 = vrot.slane %v4681_v0, %v3561_v17 }
 0x204   : > { %v2442_v11 = vadd.f32 %v4593_v1, %v2417_v30  ;;  %v2444_v39 = vadd.f32 %v4617_v37, %v2419_v40  ;;  %v2547_v23 = vrot.slane %v4659_v63, %v3554_v10  ;;  %v2568_v53 = vrot.slane %v4690_v13, %v3561_v17  ;;  %v4750_v37 = vpop.permute.xlu0 %2792  ;;  %v4756_v60 = vpop.permute.xlu1 %2767 }
 0x205   : > { %v2523_v25 = vmul.f32 %v2514_v22, %v4518_v27  ;;  %v2527_v50 = vadd.f32 %v2524_v5, %v2502_v47  ;;  %v2548_v51 = vmul.f32 %v2539_v36, %v4597_v56  ;;  %v2549_v54 = vmul.f32 %v2543_v2, %v4597_v56 }
 0x206   : > { %v2467_v16 = vadd.f32 %v2464_v3, %v2442_v11  ;;  %v2469_v8 = vadd.f32 %v2466_v42, %v2444_v39  ;;  %v2550_v43 = vmul.f32 %v2547_v23, %v4597_v56  ;;  %v2589_v1 = vrot.slane %v4681_v0, %v3645_v46 }
 0x207   : > { %v2552_v7 = vadd.f32 %v2549_v54, %v2527_v50  ;;  %v2573_v45 = vmul.f32 %v2564_v28, %v4520_v34  ;;  %v2574_v12 = vmul.f32 %v2568_v53, %v4520_v34  ;;  %v2593_v27 = vrot.slane %v4690_v13, %v3645_v46 }
 0x208   : > { %v2503_v18 = vadd.f32 %v2500_v62, %v2469_v8  ;;  %v2501_v3 = vadd.f32 %v2498_v29, %v2467_v16  ;;  %v2597_v56 = vrot.slane %v4659_v63, %v3645_v46  ;;  %v2598_v42 = vmul.f32 %v2589_v1, %v4625_v61  ;;  %v4797_v28 = vpop.permute.xlu1 %2817 }
 0x209   : > { %v2577_v35 = vadd.f32 %v2574_v12, %v2552_v7  ;;  %v2599_v44 = vmul.f32 %v2593_v27, %v4625_v61  ;;  %v2639_v6 = vrot.slane %v4681_v0, %v3664_v9  ;;  %v4768_v34 = vsel %vm1124_vm6, %v4683_v14, %v4640_v32 }
 0x20a   : > { %v2528_v22 = vadd.f32 %v2525_v52, %v2503_v18  ;;  %v2526_v62 = vadd.f32 %v2523_v25, %v2501_v3  ;;  %v2600_v26 = vmul.f32 %v2597_v56, %v4625_v61  ;;  %v2643_v33 = vrot.slane %v4690_v13, %v3664_v9  ;;  %v4786_v13 = vpop.permute.xlu0 %2851 }
 0x20b   : > { %v2602_v15 = vadd.f32 %v2599_v44, %v2577_v35  ;;  %v2647_v36 = vrot.slane %v4659_v63, %v3664_v9  ;;  %v2648_v2 = vmul.f32 %v2639_v6, %v4647_v24  ;;  %v2681_v0 = vrot.slane %v4768_v34, %v3523_v55 }
 0x20c   : > { %v2551_v30 = vadd.f32 %v2548_v51, %v2526_v62  ;;  %v2553_v40 = vadd.f32 %v2550_v43, %v2528_v22  ;;  %v2706_v52 = vrot.slane %v4768_v34, %v3533_v59  ;;  %v4784_v61 = vsel %vm1124_vm6, %v4702_v58, %v4683_v14 }
 0x20d   : > { %v2627_v29 = vadd.f32 %v2624_v31, %v2602_v15  ;;  %v2649_v63 = vmul.f32 %v2643_v33, %v4647_v24  ;;  %v2756_v47 = vrot.slane %v4768_v34, %v3561_v17  ;;  %v4795_v5 = vsel %vm1124_vm6, %v4640_v32, %v4702_v58 }
 0x20e   : > { %v2576_v11 = vadd.f32 %v2573_v45, %v2551_v30  ;;  %v2578_v14 = vadd.f32 %v4700_v41, %v2553_v40  ;;  %v2650_v39 = vmul.f32 %v2647_v36, %v4647_v24  ;;  %v2798_v31 = vrot.slane %v4795_v5, %v3676_v19  ;;  %v2839_v12 = vpop.permute.xlu0 %2838 }
 0x20f   : > { %v2652_v23 = vadd.f32 %v2649_v63, %v2627_v29  ;;  %v2684_v53 = vmul.f32 %v2681_v0, %v4606_v57  ;;  %v2802_v25 = vrot.slane %v4784_v61, %v3676_v19  ;;  %v2677_v32 = vrot.slane %v4784_v61, %v3523_v55 }
 0x210   : > { %v2601_v58 = vadd.f32 %v2598_v42, %v2576_v11  ;;  %v2603_v50 = vadd.f32 %v2600_v26, %v2578_v14  ;;  %v2709_v51 = vmul.f32 %v2706_v52, %v4672_v21  ;;  %v2673_v41 = vrot.slane %v4795_v5, %v3523_v55  ;;  %v4827_v42 = vpop.permute.xlu1 %2876 }
 0x211   : > { %v2759_v24 = vmul.f32 %v2756_v47, %v4721_v4  ;;  %v2806_v54 = vrot.slane %v4768_v34, %v3676_v19  ;;  %v2683_v16 = vmul.f32 %v2677_v32, %v4606_v57  ;;  %v2698_v8 = vrot.slane %v4795_v5, %v3533_v59 }
 0x212   : > { %v2626_v43 = vadd.f32 %v4712_v38, %v2601_v58  ;;  %v2628_v1 = vadd.f32 %v4732_v20, %v2603_v50  ;;  %v2807_v7 = vmul.f32 %v2798_v31, %v4750_v37  ;;  %v2702_v45 = vrot.slane %v4784_v61, %v3533_v59  ;;  %v2843_v47 = vpop.permute.xlu0 %2842 }
 0x213   : > { %v2808_v27 = vmul.f32 %v2802_v25, %v4750_v37  ;;  %v2686_v18 = vadd.f32 %v2683_v16, %v2652_v23  ;;  %v2723_v3 = vrot.slane %v4795_v5, %v3554_v10  ;;  %v2727_v56 = vrot.slane %v4784_v61, %v3554_v10 }
 0x214   : > { %v2651_v38 = vadd.f32 %v2648_v2, %v2626_v43  ;;  %v2653_v35 = vadd.f32 %v2650_v39, %v2628_v1  ;;  %v2682_v20 = vmul.f32 %v2673_v41, %v4606_v57  ;;  %v2708_v44 = vmul.f32 %v2702_v45, %v4672_v21  ;;  %v2841_v31 = vpop.permute.xlu1 %2840 }
 0x215   : > { %v2707_v6 = vmul.f32 %v2698_v8, %v4672_v21  ;;  %v2731_v22 = vrot.slane %v4768_v34, %v3554_v10  ;;  %v2748_v62 = vrot.slane %v4795_v5, %v3561_v17  ;;  %v2752_v26 = vrot.slane %v4784_v61, %v3561_v17 }
 0x216   : > { %v2687_v33 = vadd.f32 %v2684_v53, %v2653_v35  ;;  %v2685_v15 = vadd.f32 %v2682_v20, %v2651_v38  ;;  %v2711_v36 = vadd.f32 %v2708_v44, %v2686_v18  ;;  %v2733_v2 = vmul.f32 %v2727_v56, %v4728_v49  ;;  %v2927_v45 = vpop.permute.xlu0 %2926 }
 0x217   : > { %v2732_v57 = vmul.f32 %v2723_v3, %v4728_v49  ;;  %v2734_v0 = vmul.f32 %v2731_v22, %v4728_v49  ;;  %v2758_v21 = vmul.f32 %v2752_v26, %v4721_v4  ;;  %v2773_v30 = vrot.slane %v4795_v5, %v3645_v46 }
 0x218   : > { %v2712_v40 = vadd.f32 %v2709_v51, %v2687_v33  ;;  %v2710_v52 = vadd.f32 %v2707_v6, %v2685_v15  ;;  %v2736_v29 = vadd.f32 %v2733_v2, %v2711_v36  ;;  %v2777_v63 = vrot.slane %v4784_v61, %v3645_v46  ;;  %v2902_v38 = vpop.permute.xlu1 %2901 }
 0x219   : > { %v2809_v11 = vmul.f32 %v2806_v54, %v4750_v37  ;;  %v2757_v14 = vmul.f32 %v2748_v62, %v4721_v4  ;;  %v2781_v39 = vrot.slane %v4768_v34, %v3645_v46  ;;  %v2782_v49 = vmul.f32 %v2773_v30, %v4756_v60 }
 0x21a   : > { %v2735_v23 = vadd.f32 %v2732_v57, %v2710_v52  ;;  %v2737_v53 = vadd.f32 %v2734_v0, %v2712_v40  ;;  %v2761_v25 = vadd.f32 %v2758_v21, %v2736_v29  ;;  %v2783_v32 = vmul.f32 %v2777_v63, %v4756_v60 }
 0x21b   : > { %v2784_v58 = vmul.f32 %v2781_v39, %v4756_v60  ;;  %v2823_v50 = vrot.slane %v4795_v5, %v3664_v9  ;;  %v2827_v37 = vrot.slane %v4784_v61, %v3664_v9  ;;  %v4859_v4 = vsel %vm1234_vm7, %v2843_v47, %v2839_v12 }
 0x21c   : > { %v2760_v51 = vadd.f32 %v2757_v14, %v2735_v23  ;;  %v2762_v41 = vadd.f32 %v2759_v24, %v2737_v53  ;;  %v2786_v54 = vadd.f32 %v2783_v32, %v2761_v25  ;;  %v2831_v16 = vrot.slane %v4768_v34, %v3664_v9  ;;  %v2977_v25 = vpop.permute.xlu0 %2976 }
 0x21d   : > { %v2865_v8 = vrot.slane %v4859_v4, %v3523_v55  ;;  %v2890_v60 = vrot.slane %v4859_v4, %v3533_v59  ;;  %v2940_v5 = vrot.slane %v4859_v4, %v3561_v17  ;;  %v4871_v61 = vsel %vm1234_vm7, %v2839_v12, %v2841_v31 }
 0x21e   : > { %v2785_v43 = vadd.f32 %v2782_v49, %v2760_v51  ;;  %v2787_v1 = vadd.f32 %v2784_v58, %v2762_v41  ;;  %v2811_v24 = vadd.f32 %v2808_v27, %v2786_v54  ;;  %v4875_v34 = vsel %vm1234_vm7, %v2841_v31, %v2843_v47 }
 0x21f   : > { %v2832_v18 = vmul.f32 %v2823_v50, %v4797_v28  ;;  %v2833_v3 = vmul.f32 %v2827_v37, %v4797_v28  ;;  %v2834_v56 = vmul.f32 %v2831_v16, %v4797_v28  ;;  %v2868_v12 = vmul.f32 %v2865_v8, %v4786_v13 }
 0x220   : > { %v2810_v35 = vadd.f32 %v2807_v7, %v2785_v43  ;;  %v2812_v20 = vadd.f32 %v2809_v11, %v2787_v1  ;;  %v2982_v44 = vrot.slane %v4871_v61, %v3676_v19  ;;  %v2893_v27 = vmul.f32 %v2890_v60, %v4827_v42 }
 0x221   : > { %v2943_v6 = vmul.f32 %v2940_v5, %v2927_v45  ;;  %v2857_v48 = vrot.slane %v4871_v61, %v3523_v55  ;;  %v2861_v22 = vrot.slane %v4875_v34, %v3523_v55  ;;  %v2836_v26 = vadd.f32 %v2833_v3, %v2811_v24 }
 0x222   : > { %v2835_v62 = vadd.f32 %v2832_v18, %v2810_v35  ;;  %v2837_v28 = vadd.f32 %v2834_v56, %v2812_v20  ;;  %v2882_v7 = vrot.slane %v4871_v61, %v3533_v59  ;;  %v2886_v36 = vrot.slane %v4875_v34, %v3533_v59  ;;  %v2952_v59 = vpop.permute.xlu1 %2951 }
 0x223   : > { %v2866_v33 = vmul.f32 %v2857_v48, %v4786_v13  ;;  %v2867_v15 = vmul.f32 %v2861_v22, %v4786_v13  ;;  %v2907_v2 = vrot.slane %v4871_v61, %v3554_v10  ;;  %v2986_v55 = vrot.slane %v4875_v34, %v3676_v19 }
 0x224   : > { %v2871_v57 = vadd.f32 %v2868_v12, %v2837_v28  ;;  %v2911_v0 = vrot.slane %v4875_v34, %v3554_v10  ;;  %v2915_v21 = vrot.slane %v4859_v4, %v3554_v10  ;;  %v2891_v13 = vmul.f32 %v2882_v7, %v4827_v42  ;;  %v4989_v7 = vld [vmem:[#allocation3_spill] sm:$0xff] }
 0x225   : > { %v2869_v30 = vadd.f32 %v2866_v33, %v2835_v62  ;;  %v2870_v40 = vadd.f32 %v2867_v15, %v2836_v26  ;;  %v2892_v52 = vmul.f32 %v2886_v36, %v4827_v42  ;;  %v2916_v63 = vmul.f32 %v2907_v2, %v2902_v38  ;;  %v4987_v62 = vld [vmem:[#allocation4_spill] sm:$0xff] }
 0x226   : > { %v2896_v29 = vadd.f32 %v2893_v27, %v2871_v57  ;;  %v2918_v47 = vmul.f32 %v2915_v21, %v2902_v38  ;;  %v2932_v11 = vrot.slane %v4871_v61, %v3561_v17  ;;  %v2917_v49 = vmul.f32 %v2911_v0, %v2902_v38  ;;  %v3002_v43 = vpop.permute.xlu1 %3001 }
 0x227   : > { %v2894_v14 = vadd.f32 %v2891_v13, %v2869_v30  ;;  %v2895_v39 = vadd.f32 %v2892_v52, %v2870_v40  ;;  %v2936_v31 = vrot.slane %v4875_v34, %v3561_v17  ;;  %v2957_v53 = vrot.slane %v4871_v61, %v3645_v46 }
 0x228   : > { %v2921_v10 = vadd.f32 %v2918_v47, %v2896_v29  ;;  %v2941_v23 = vmul.f32 %v2932_v11, %v2927_v45  ;;  %v2965_v42 = vrot.slane %v4859_v4, %v3645_v46  ;;  %v2961_v37 = vrot.slane %v4875_v34, %v3645_v46 }
 0x229   : > { %v2919_v32 = vadd.f32 %v2916_v63, %v2894_v14  ;;  %v2920_v58 = vadd.f32 %v2917_v49, %v2895_v39  ;;  %v2942_v50 = vmul.f32 %v2936_v31, %v2927_v45  ;;  %v2990_v51 = vrot.slane %v4859_v4, %v3676_v19 }
 0x22a   : > { %v2991_v41 = vmul.f32 %v2982_v44, %v2977_v25  ;;  %v2946_v17 = vadd.f32 %v2943_v6, %v2921_v10  ;;  %v2968_v54 = vmul.f32 %v2965_v42, %v2952_v59  ;;  %v2966_v60 = vmul.f32 %v2957_v53, %v2952_v59 }
 0x22b   : > { %v2944_v16 = vadd.f32 %v2941_v23, %v2919_v32  ;;  %v2945_v8 = vadd.f32 %v2942_v50, %v2920_v58  ;;  %v2967_v5 = vmul.f32 %v2961_v37, %v2952_v59  ;;  %v2992_v1 = vmul.f32 %v2986_v55, %v2977_v25 }
 0x22c   : > { %v2993_v24 = vmul.f32 %v2990_v51, %v2977_v25  ;;  %v2971_v18 = vadd.f32 %v2968_v54, %v2946_v17  ;;  %v3015_v45 = vrot.slane %v4859_v4, %v3664_v9  ;;  %v3007_v46 = vrot.slane %v4871_v61, %v3664_v9  ;;  %v4988_v4 = vld [vmem:[#allocation2_spill] sm:$0xff] }
 0x22d   : > { %v2969_v3 = vadd.f32 %v2966_v60, %v2944_v16  ;;  %v2970_v56 = vadd.f32 %v2967_v5, %v2945_v8  ;;  %v3011_v19 = vrot.slane %v4875_v34, %v3664_v9 }
 0x22e   : > { %v2996_v38 = vadd.f32 %v2993_v24, %v2971_v18  ;;  %v3018_v35 = vmul.f32 %v3015_v45, %v3002_v43  ;;  %v3016_v44 = vmul.f32 %v3007_v46, %v3002_v43 }
 0x22f   : > { %v2994_v20 = vadd.f32 %v2991_v41, %v2969_v3  ;;  %v2995_v12 = vadd.f32 %v2992_v1, %v2970_v56  ;;  %v3017_v27 = vmul.f32 %v3011_v19, %v3002_v43 }
 0x230   : > { %v3021_v6 = vadd.f32 %v3018_v35, %v2996_v38 }
 0x231   : > { %v3019_v48 = vadd.f32 %v3016_v44, %v2994_v20  ;;  %v3020_v22 = vadd.f32 %v3017_v27, %v2995_v12 }
 0x232   : > { %v3024_v26 = vmul.f32 %v3021_v6, %v4987_v62 }
 0x233   : > { %v3022_v28 = vmul.f32 %v3019_v48, %v4988_v4  ;;  %v3023_v33 = vmul.f32 %v3020_v22, %v4989_v7 }
 0x234   : > { %v3037_v61 = vmul.f32 %v3024_v26, %v3021_v6  ;;  %v3029_v57 = vsel %vm3025_vm8, %v3024_v26, 0.0 }
 0x235   : > { %v3035_v15 = vmul.f32 %v3022_v28, %v3019_v48  ;;  %v3036_v9 = vmul.f32 %v3023_v33, %v3020_v22  ;;  %v3026_v34 = vsel %vm3025_vm8, %v3022_v28, 0.0  ;;  %v3027_v36 = vsel %vm3025_vm8, %v3023_v33, 0.0 }
 0x236   : > { %v3028_v2 = vadd.f32 %v3027_v36, %v3026_v34  ;;  %v3041_v40 = vsel %vm3025_vm8, %v3037_v61, 0.0 }
 0x237   : > { %v3038_v55 = vsel %vm3025_vm8, %v3035_v15, 0.0  ;;  %v3039_v0 = vsel %vm3025_vm8, %v3036_v9, 0.0 }
 0x238   : > { %v3030_v21 = vadd.f32 %v3029_v57, %v3028_v2  ;;  %v3040_v30 = vadd.f32 %v3039_v0, %v3038_v55 }
 0x23a   : > { %3031 = vadd.xlane.f32.xlu0 %v3030_v21  ;;  %v3042_v13 = vadd.f32 %v3041_v40, %v3040_v30 }
 0x23c   : > { %3043 = vadd.xlane.f32.xlu1 %v3042_v13 }
 0x2c7   : > { %v3032_v52 = vpop.xlane.xlu0 %3031 }
 0x2c8   : > { %3034 = vst.msk [vmem:[%s283_s15] sm:$0xf] %vm3033_vm9, %v3032_v52 }
 0x2c9   : > { %v3044_v59 = vpop.xlane.xlu1 %3043 }
 0x2ca   : > { %3045 = vst.msk [vmem:[%s287_s19] sm:$0xf] %vm3033_vm9, %v3044_v59 }
 0x2cb PF: > { %s18_s24 = sadd.s32 1, %s3264_s24  }
 0x2cc   : > { %p15_p4 = scmp.ge.s32.totalorder %s18_s24, 4  }
 0x2ce   :  { %17 = sbr.rel (!%p15_p4) target bundleno = 1 (0x1), region = 183 }

</bundles_post_ra>
